<compile_context>
chip_gen: v5e
topology: v5e:2x2
jax: 0.10.0
libtpu: 0.0.40
codegen_flags: <defaults>
</compile_context>

<pallas_src>
import math
import functools

import numpy as np
import jax
import jax.numpy as jnp
from jax.experimental import pallas as pl
from jax.experimental.pallas import tpu as pltpu


_MXU_MIN_K = 16  # contraction size at which projections move from VPU FMAs to the MXU


def _sigmoid(x):
    # One EUP transcendental (tanh), no vector divide.
    return 0.5 * jnp.tanh(0.5 * x) + 0.5


def _silu(x):
    return x * _sigmoid(x)


def _softplus(x):
    return jnp.maximum(x, 0.0) + jnp.log(1.0 + jnp.exp(-jnp.abs(x)))


def _proj_vpu(w, v):
    """(R, K) @ (K, T) as K broadcast-FMAs on the VPU (exact f32, tiny K)."""
    acc = w[:, 0:1] * v[0:1, :]
    for k in range(1, w.shape[1]):
        acc = acc + w[:, k:k + 1] * v[k:k + 1, :]
    return acc


def _proj(w, v):
    """Small projection: VPU FMA loop for tiny K, MXU matmul once K is big enough."""
    if w.shape[1] >= _MXU_MIN_K:
        return jnp.dot(w, v, preferred_element_type=jnp.float32)
    return _proj_vpu(w, v)


# ----------------------------------------------------------------------------
# Mamba kernel: one (batch, spatial-tile) block per grid step.
#   x_ref / o_ref : (L*dm, T)  -- token t == rows [t*dm, (t+1)*dm), spatial tile T in lanes.
# ----------------------------------------------------------------------------
def _mamba_kernel(x_ref, w_in_ref, conv_w_ref, conv_b_ref, wx_ref, w_dt_ref, b_dt_ref,
                  a_ref, d_ref, w_out_ref, o_ref, *,
                  L, d_state, d_conv, dt_rank, state_chunk, default_A_init, out_group):
    LDM, T = x_ref.shape
    dm = LDM // L
    d_inner = w_in_ref.shape[0] // 2
    SC = state_chunk
    n_chunks = d_state // SC

    w_in = w_in_ref[...]      # (2*d_inner, dm)
    conv_w = conv_w_ref[...]  # (d_inner, d_conv)
    conv_b = conv_b_ref[...]  # (d_inner, 1)
    wx = wx_ref[...]          # (2*d_state + dt_rank, d_inner), rows = [B | C | dt]
    w_dt = w_dt_ref[...]      # (d_inner, dt_rank)
    b_dt = b_dt_ref[...]      # (d_inner, 1)
    A_T = a_ref[...]          # (d_state, d_inner), only used on the general (trained-A) path
    Dvec = d_ref[...]         # (d_inner, 1)
    w_out = w_out_ref[...]    # (out_group*dm, out_group*d_inner) block-diag out_proj

    # scan state, chunked along d_state to bound live temporaries
    h = [jnp.zeros((SC, d_inner, T), jnp.float32) for _ in range(n_chunks)]
    # rolling window of the previous d_conv-1 conv-branch activations (zeros == causal pad)
    win = [jnp.zeros((d_inner, T), jnp.float32) for _ in range(d_conv - 1)]
    ys = []

    for t in range(L):
        x_t = x_ref[pl.ds(t * dm, dm), :].astype(jnp.float32)       # (dm, T)
        xz = _proj(w_in, x_t)                                       # (2*d_inner, T)  in_proj
        xi_t = xz[:d_inner, :]
        z_t = xz[d_inner:, :]

        # causal depthwise conv1d over the token axis + SiLU
        u = conv_b + conv_w[:, d_conv - 1:d_conv] * xi_t
        for k in range(d_conv - 1):
            u = u + conv_w[:, k:k + 1] * win[k]
        u = _silu(u)                                                # (d_inner, T)
        win = win[1:] + [xi_t]                                      # slide conv window

        dbc = _proj(wx, u)                                          # (2*d_state+dt_rank, T)
        B_t = dbc[:d_state, :]                                      # 8-aligned slices
        C_t = dbc[d_state:2 * d_state, :]
        dt_raw = dbc[2 * d_state:, :]
        delta = _softplus(_proj(w_dt, dt_raw) + b_dt)               # (d_inner, T)
        du = delta * u

        y = Dvec * u
        if default_A_init:
            # Default Mamba init A[:, s] = -(s+1)  =>  dA_s = exp(-delta)^(s+1).
            # One EUP exp per token instead of d_state of them.
            e1 = jnp.exp(-delta)
            pw = e1
            rows = [pw]
            for _ in range(SC - 1):
                pw = pw * e1
                rows.append(pw)
            dA_c = jnp.stack(rows, axis=0)                          # e1^(1..SC)
            e_step = pw                                             # e1^SC
        for c in range(n_chunks):
            s0 = c * SC
            if default_A_init:
                if c > 0:
                    dA_c = dA_c * e_step[None]                      # advance to next chunk
            else:
                dA_c = jnp.exp(delta[None] * A_T[s0:s0 + SC, :, None])
            h[c] = dA_c * h[c] + du[None] * B_t[s0:s0 + SC, None, :]
            y = y + jnp.sum(h[c] * C_t[s0:s0 + SC, None, :], axis=0)   # leading-axis VPU sum

        ys.append(y * _silu(z_t))                                   # gated (d_inner, T)

    if out_group == 2:
        # out_proj on token pairs against a block-diag weight: all concatenates are
        # 8-sublane aligned and the (L*dm, T) result leaves as ONE dense store.
        outs = []
        for p in range(L // 2):
            y_pair = jnp.concatenate([ys[2 * p], ys[2 * p + 1]], axis=0)   # (2*d_inner, T)
            outs.append(_proj_vpu(w_out, y_pair))                          # (2*dm, T)
        o_ref[...] = jnp.concatenate(outs, axis=0).astype(o_ref.dtype)
    else:
        for t in range(L):
            o_ref[pl.ds(t * dm, dm), :] = _proj_vpu(w_out, ys[t]).astype(o_ref.dtype)


# ----------------------------------------------------------------------------
# GroupNorm + SiLU (+ optional residual), one (batch, group) block per grid step.
#   xm_ref / o_ref : (cpg, HW) -- spatial in lanes, vectorized group statistics.
# ----------------------------------------------------------------------------
def _gn_silu_kernel(*refs, groups_in_block, eps, use_residual):
    if use_residual:
        xm_ref, xin_ref, gamma_ref, beta_ref, o_ref = refs
    else:
        xm_ref, gamma_ref, beta_ref, o_ref = refs
    C, HW = xm_ref.shape
    cpg = C // groups_in_block

    x = xm_ref[...].astype(jnp.float32)
    xg = x.reshape(groups_in_block, cpg, HW)                 # layout-preserving split
    mean = jnp.mean(xg, axis=(1, 2), keepdims=True)
    var = jnp.mean((xg - mean) ** 2, axis=(1, 2), keepdims=True)
    xn = ((xg - mean) * jax.lax.rsqrt(var + eps)).reshape(C, HW)
    y = xn * gamma_ref[...] + beta_ref[...]
    y = y * _sigmoid(y)                                      # SiLU
    if use_residual:
        y = y + xin_ref[...].astype(jnp.float32)
    o_ref[...] = y.astype(o_ref.dtype)                       # single lane-dense store
    # TODO(synk): for very large HW a tiled two-pass (sum/sumsq) reduction is needed so the
    # per-(batch,group) block always fits VMEM.


# ----------------------------------------------------------------------------
# Module wrapper (parameter setup + free reshapes in plain JAX).
# ----------------------------------------------------------------------------
class SpeMambaPallas:

    def __init__(self, channels, token_num=8, use_residual=True, group_num=4,
                 key=jax.random.PRNGKey(0)):
        self.token_num = token_num
        self.use_residual = use_residual
        self.group_num = group_num
        self.group_channel_num = math.ceil(channels / token_num)
        self.channel_num = token_num * self.group_channel_num

        d_model = self.group_channel_num
        d_state, d_conv, expand = 16, 4, 2
        d_inner = expand * d_model
        dt_rank = max(1, math.ceil(d_model / 16))
        self.d_state, self.d_conv, self.d_inner, self.dt_rank = d_state, d_conv, d_inner, dt_rank
        # d_state chunk for the scan update (bounds live vregs); must divide d_state.
        self.state_chunk = 4 if d_state % 4 == 0 else (2 if d_state % 2 == 0 else 1)

        ks = jax.random.split(key, 7)
        s = 0.2
        # Synthetic weights, "W @ x" style with output channels in rows (channels-in-sublanes,
        # spatial-in-lanes kernel layout).
        self.w_in = (s * jax.random.normal(ks[0], (2 * d_inner, d_model))).astype(jnp.float32)
        self.conv_w = (s * jax.random.normal(ks[1], (d_inner, d_conv))).astype(jnp.float32)
        self.conv_b = (s * jax.random.normal(ks[2], (d_inner, 1))).astype(jnp.float32)
        # Fused x_proj; row order [B (d_state) | C (d_state) | dt (dt_rank)] so every slice of
        # its in-kernel result sits at an 8-aligned sublane offset.
        self.wx = (s * jax.random.normal(ks[3], (2 * d_state + dt_rank, d_inner))).astype(jnp.float32)
        self.w_dt = (s * jax.random.normal(ks[4], (d_inner, dt_rank))).astype(jnp.float32)
        self.b_dt = (0.1 * jax.random.normal(ks[5], (d_inner, 1))).astype(jnp.float32)
        # Default Mamba A init: A[:, s] = -(s+1) (== -exp(A_log)).  A_T is only read by the
        # general exp path; the kernel uses the exp(-delta)-powers shortcut when default_A_init.
        self.A_T = -jnp.tile(jnp.arange(1, d_state + 1, dtype=jnp.float32)[:, None], (1, d_inner))
        self.default_A_init = True   # set False when loading a trained A_log
        self.D = jnp.ones((d_inner, 1), jnp.float32)
        self.w_out = (s * jax.random.normal(ks[6], (d_model, d_inner))).astype(jnp.float32)
        # Pair tokens in the out_proj whenever 2*d_model rows fill whole (8,128) tiles.
        self.out_group = 2 if (d_model % 4 == 0 and token_num % 2 == 0) else 1
        if self.out_group == 2:
            self.w_out_k = jnp.kron(jnp.eye(2, dtype=jnp.float32), self.w_out)
        else:
            self.w_out_k = self.w_out
        # GroupNorm affine params (PyTorch default init: weight=1, bias=0)
        self.gamma = jnp.ones((self.channel_num, 1), jnp.float32)
        self.beta = jnp.zeros((self.channel_num, 1), jnp.float32)

    # ---- forward (Pallas) ----
    def __call__(self, x):
        B, C, H, W = x.shape
        C_pad = self.channel_num
        L, dm, d_inner = self.token_num, self.group_channel_num, self.d_inner
        HW = H * W
        LDM = L * dm                         # == C_pad

        x_pad = x if C >= C_pad else jnp.pad(x, ((0, 0), (0, C_pad - C), (0, 0), (0, 0)))
        # Free reshape: NCHW -> (B, L*dm, HW).  Token t == rows [t*dm, (t+1)*dm).
        x3 = x_pad.reshape(B, LDM, HW).astype(jnp.float32)

        # 128-lane spatial tile; pad HW up so real image sizes never collapse to one giant
        # block (VMEM blow-up) and the grid stays wide for megacore sharding.
        T = 128
        HW_pad = ((HW + T - 1) // T) * T
        if HW_pad != HW:
            x3 = jnp.pad(x3, ((0, 0), (0, 0), (0, HW_pad - HW)))
        grid = (B, HW_pad // T)              # (2, 2) at the test size -> >= 2 parallel steps

        weights = [self.w_in, self.conv_w, self.conv_b, self.wx, self.w_dt, self.b_dt,
                   self.A_T, self.D, self.w_out_k]
        x_spec = pl.BlockSpec((None, LDM, T), lambda b, s: (b, 0, s))
        w_specs = [pl.BlockSpec(w.shape, lambda b, s: (0, 0)) for w in weights]

        kern = functools.partial(
            _mamba_kernel, L=L, d_state=self.d_state, d_conv=self.d_conv,
            dt_rank=self.dt_rank, state_chunk=self.state_chunk,
            default_A_init=self.default_A_init, out_group=self.out_group)

        steps = B * (HW_pad // T)
        per_tok_flops = T * (2 * (2 * d_inner) * dm + 2 * self.d_conv * d_inner
                             + 2 * (2 * self.d_state + self.dt_rank) * d_inner
                             + 2 * d_inner * self.dt_rank + 7 * self.d_state * d_inner
                             + 14 * d_inner + 2 * dm * d_inner)
        cost = pl.CostEstimate(
            flops=int(steps * L * per_tok_flops),
            transcendentals=int(steps * L * 6 * d_inner * T),
            bytes_accessed=int(2 * B * LDM * HW_pad * 4
                               + steps * sum(int(np.prod(w.shape)) for w in weights) * 4))

        y3 = pl.pallas_call(
            kern,
            out_shape=jax.ShapeDtypeStruct((B, LDM, HW_pad), jnp.float32),
            grid=grid,
            in_specs=[x_spec] + w_specs,
            out_specs=x_spec,
            compiler_params=pltpu.CompilerParams(
                dimension_semantics=("parallel", "parallel")),
            cost_estimate=cost,
        )(x3, *weights)

        y_m = y3 if HW_pad == HW else y3[:, :, :HW]      # crop spatial padding

        # ---- GroupNorm + SiLU (+ residual), tiled over (batch, group) ----
        g = self.group_num
        cpg = C_pad // g
        if cpg % 8 == 0:
            grid_gn = (B, g)
            blk = pl.BlockSpec((None, cpg, HW), lambda b, gi: (b, gi, 0))
            aff = pl.BlockSpec((cpg, 1), lambda b, gi: (gi, 0))
            gib = 1
            dims = ("parallel", "parallel")
        else:  # fallback: one full sample per block (block == full dims, no (8,128) constraint)
            grid_gn = (B,)
            blk = pl.BlockSpec((None, C_pad, HW), lambda b: (b, 0, 0))
            aff = pl.BlockSpec((C_pad, 1), lambda b: (0, 0))
            gib = g
            dims = ("parallel",)

        if self.use_residual:
            assert C == C_pad, "residual add requires channels % token_num == 0 (as in PyTorch)"
            xin = x.reshape(B, C_pad, HW).astype(jnp.float32)
            operands, in_specs = (y_m, xin, self.gamma, self.beta), [blk, blk, aff, aff]
        else:
            operands, in_specs = (y_m, self.gamma, self.beta), [blk, aff, aff]

        out = pl.pallas_call(
            functools.partial(_gn_silu_kernel, groups_in_block=gib, eps=1e-5,
                              use_residual=self.use_residual),
            out_shape=jax.ShapeDtypeStruct((B, C_pad, HW), jnp.float32),
            grid=grid_gn,
            in_specs=in_specs,
            out_specs=blk,
            compiler_params=pltpu.CompilerParams(dimension_semantics=dims),
        )(*operands)

        return out.reshape(B, C_pad, H, W)

    # ---- pure-JAX reference (same math, no Pallas, exact f32 elementwise) ----
    def reference(self, x):
        B, C, H, W = x.shape
        C_pad = self.channel_num
        L, dm = self.token_num, self.group_channel_num
        HW = H * W
        d_inner, d_state, d_conv = self.d_inner, self.d_state, self.d_conv

        def sig(v):
            return 1.0 / (1.0 + jnp.exp(-v))

        def mv(w, v):
            acc = w[:, 0:1] * v[0:1, :]
            for k in range(1, w.shape[1]):
                acc = acc + w[:, k:k + 1] * v[k:k + 1, :]
            return acc

        x_pad = x if C >= C_pad else jnp.pad(x, ((0, 0), (0, C_pad - C), (0, 0), (0, 0)))
        xt = jnp.transpose(x_pad.reshape(B, L, dm, HW), (1, 2, 0, 3)).reshape(L, dm, B * HW)
        xt = xt.astype(jnp.float32)
        N = B * HW

        wx_b = self.wx[:d_state]
        wx_c = self.wx[d_state:2 * d_state]
        wx_dt = self.wx[2 * d_state:]

        h = jnp.zeros((d_state, d_inner, N), jnp.float32)
        win = [jnp.zeros((d_inner, N), jnp.float32) for _ in range(d_conv - 1)]
        outs = []
        for t in range(L):
            xz = mv(self.w_in, xt[t])
            xi_t, z_t = xz[:d_inner], xz[d_inner:]
            u = self.conv_b + self.conv_w[:, d_conv - 1:d_conv] * xi_t
            for k in range(d_conv - 1):
                u = u + self.conv_w[:, k:k + 1] * win[k]
            u = u * sig(u)
            win = win[1:] + [xi_t]
            B_t = mv(wx_b, u)
            C_t = mv(wx_c, u)
            dt_raw = mv(wx_dt, u)
            delta = _softplus(mv(self.w_dt, dt_raw) + self.b_dt)
            h = jnp.exp(delta[None] * self.A_T[:, :, None]) * h \
                + (delta * u)[None] * B_t[:, None, :]
            y = jnp.sum(h * C_t[:, None, :], axis=0) + self.D * u
            y = y * (z_t * sig(z_t))
            outs.append(mv(self.w_out, y))
        y_tok = jnp.stack(outs, axis=0)                                   # (L, dm, N)
        y_m = jnp.transpose(y_tok.reshape(L, dm, B, HW), (2, 0, 1, 3)).reshape(B, C_pad, HW)

        g = self.group_num
        xg = y_m.reshape(B, g, -1)
        mean = xg.mean(-1, keepdims=True)
        var = ((xg - mean) ** 2).mean(-1, keepdims=True)
        xn = ((xg - mean) * jax.lax.rsqrt(var + 1e-5)).reshape(B, C_pad, HW)
        y = xn * self.gamma + self.beta
        y = y * sig(y)
        if self.use_residual:
            y = y + x.reshape(B, C_pad, HW).astype(jnp.float32)
        return y.reshape(B, C_pad, H, W)


if __name__ == "__main__":
    key = jax.random.PRNGKey(0)
    B, C, H, W = 2, 32, 16, 16   # channels divisible by token_num=8 (required by the residual)
    x = jax.random.normal(jax.random.fold_in(key, 0), (B, C, H, W), dtype=jnp.float32)

    mod = SpeMambaPallas(channels=C, token_num=8, use_residual=True, group_num=4,
                         key=jax.random.fold_in(key, 1))

    out = jax.block_until_ready(mod(x))
    ref = jax.block_until_ready(mod.reference(x))

    assert out.shape == (B, C, H, W) and out.dtype == jnp.float32
    np.testing.assert_allclose(np.asarray(out), np.asarray(ref), rtol=1e-3, atol=1e-3)
    print("KERNEL_OK")
</pallas_src>

<mosaic_0001>
module attributes {stable_mosaic.version = 11 : i64} {
  func.func @_mamba_kernel(%arg0: i32, %arg1: i32, %arg2: memref<1x32x128xf32, #tpu.memory_space<vmem>>, %arg3: memref<16x4xf32, #tpu.memory_space<vmem>>, %arg4: memref<8x4xf32, #tpu.memory_space<vmem>>, %arg5: memref<8x1xf32, #tpu.memory_space<vmem>>, %arg6: memref<33x8xf32, #tpu.memory_space<vmem>>, %arg7: memref<8x1xf32, #tpu.memory_space<vmem>>, %arg8: memref<8x1xf32, #tpu.memory_space<vmem>>, %arg9: memref<16x8xf32, #tpu.memory_space<vmem>>, %arg10: memref<8x1xf32, #tpu.memory_space<vmem>>, %arg11: memref<8x16xf32, #tpu.memory_space<vmem>>, %arg12: memref<1x32x128xf32, #tpu.memory_space<vmem>>) attributes {dimension_semantics = [#tpu.dimension_semantics<parallel>, #tpu.dimension_semantics<parallel>], iteration_bounds = array<i64: 2, 2>, scalar_prefetch = 0 : i64, scratch_operands = 0 : i64, tpu.core_type = #tpu.core_type<tc>, window_params = [{transform_indices = @transform_0, window_bounds = array<i64: 1, 32, 128>}, {pipeline_mode = #tpu.pipeline_mode<synchronous>, transform_indices = @transform_1, window_bounds = array<i64: 16, 4>}, {pipeline_mode = #tpu.pipeline_mode<synchronous>, transform_indices = @transform_2, window_bounds = array<i64: 8, 4>}, {pipeline_mode = #tpu.pipeline_mode<synchronous>, transform_indices = @transform_3, window_bounds = array<i64: 8, 1>}, {pipeline_mode = #tpu.pipeline_mode<synchronous>, transform_indices = @transform_4, window_bounds = array<i64: 33, 8>}, {pipeline_mode = #tpu.pipeline_mode<synchronous>, transform_indices = @transform_5, window_bounds = array<i64: 8, 1>}, {pipeline_mode = #tpu.pipeline_mode<synchronous>, transform_indices = @transform_6, window_bounds = array<i64: 8, 1>}, {pipeline_mode = #tpu.pipeline_mode<synchronous>, transform_indices = @transform_7, window_bounds = array<i64: 16, 8>}, {pipeline_mode = #tpu.pipeline_mode<synchronous>, transform_indices = @transform_8, window_bounds = array<i64: 8, 1>}, {pipeline_mode = #tpu.pipeline_mode<synchronous>, transform_indices = @transform_9, window_bounds = array<i64: 8, 16>}, {transform_indices = @transform_10, window_bounds = array<i64: 1, 32, 128>}]} {
    %c0 = arith.constant 0 : index
    %c0_0 = arith.constant 0 : index
    %0 = vector.load %arg3[%c0, %c0_0] : memref<16x4xf32, #tpu.memory_space<vmem>>, vector<16x4xf32>
    %c0_1 = arith.constant 0 : index
    %c0_2 = arith.constant 0 : index
    %1 = vector.load %arg4[%c0_1, %c0_2] : memref<8x4xf32, #tpu.memory_space<vmem>>, vector<8x4xf32>
    %c0_3 = arith.constant 0 : index
    %c0_4 = arith.constant 0 : index
    %2 = vector.load %arg5[%c0_3, %c0_4] : memref<8x1xf32, #tpu.memory_space<vmem>>, vector<8x1xf32>
    %c0_5 = arith.constant 0 : index
    %c0_6 = arith.constant 0 : index
    %3 = vector.load %arg6[%c0_5, %c0_6] : memref<33x8xf32, #tpu.memory_space<vmem>>, vector<33x8xf32>
    %c0_7 = arith.constant 0 : index
    %c0_8 = arith.constant 0 : index
    %4 = vector.load %arg7[%c0_7, %c0_8] : memref<8x1xf32, #tpu.memory_space<vmem>>, vector<8x1xf32>
    %c0_9 = arith.constant 0 : index
    %c0_10 = arith.constant 0 : index
    %5 = vector.load %arg8[%c0_9, %c0_10] : memref<8x1xf32, #tpu.memory_space<vmem>>, vector<8x1xf32>
    %c0_11 = arith.constant 0 : index
    %c0_12 = arith.constant 0 : index
    %6 = vector.load %arg10[%c0_11, %c0_12] : memref<8x1xf32, #tpu.memory_space<vmem>>, vector<8x1xf32>
    %c0_13 = arith.constant 0 : index
    %c0_14 = arith.constant 0 : index
    %7 = vector.load %arg11[%c0_13, %c0_14] : memref<8x16xf32, #tpu.memory_space<vmem>>, vector<8x16xf32>
    %cst = arith.constant 0.000000e+00 : f32
    %8 = vector.broadcast %cst : f32 to vector<4x8x128xf32>
    %cst_15 = arith.constant 0.000000e+00 : f32
    %9 = vector.broadcast %cst_15 : f32 to vector<4x8x128xf32>
    %cst_16 = arith.constant 0.000000e+00 : f32
    %10 = vector.broadcast %cst_16 : f32 to vector<4x8x128xf32>
    %cst_17 = arith.constant 0.000000e+00 : f32
    %11 = vector.broadcast %cst_17 : f32 to vector<4x8x128xf32>
    %cst_18 = arith.constant 0.000000e+00 : f32
    %12 = vector.broadcast %cst_18 : f32 to vector<8x128xf32>
    %cst_19 = arith.constant 0.000000e+00 : f32
    %13 = vector.broadcast %cst_19 : f32 to vector<8x128xf32>
    %cst_20 = arith.constant 0.000000e+00 : f32
    %14 = vector.broadcast %cst_20 : f32 to vector<8x128xf32>
    %c0_21 = arith.constant 0 : index
    %c0_22 = arith.constant 0 : index
    %c0_23 = arith.constant 0 : index
    %15 = vector.load %arg2[%c0_21, %c0_22, %c0_23] : memref<1x32x128xf32, #tpu.memory_space<vmem>>, vector<1x4x128xf32>
    %16 = vector.shape_cast %15 : vector<1x4x128xf32> to vector<4x128xf32>
    %17 = vector.extract_strided_slice %0 {offsets = [0, 0], sizes = [16, 1], strides = [1, 1]} : vector<16x4xf32> to vector<16x1xf32>
    %18 = vector.extract_strided_slice %16 {offsets = [0, 0], sizes = [1, 128], strides = [1, 1]} : vector<4x128xf32> to vector<1x128xf32>
    %19 = vector.broadcast %17 : vector<16x1xf32> to vector<16x128xf32>
    %20 = vector.broadcast %18 : vector<1x128xf32> to vector<16x128xf32>
    %21 = arith.mulf %19, %20 : vector<16x128xf32>
    %22 = vector.extract_strided_slice %0 {offsets = [0, 1], sizes = [16, 1], strides = [1, 1]} : vector<16x4xf32> to vector<16x1xf32>
    %23 = vector.extract_strided_slice %16 {offsets = [1, 0], sizes = [1, 128], strides = [1, 1]} : vector<4x128xf32> to vector<1x128xf32>
    %24 = vector.broadcast %22 : vector<16x1xf32> to vector<16x128xf32>
    %25 = vector.broadcast %23 : vector<1x128xf32> to vector<16x128xf32>
    %26 = arith.mulf %24, %25 : vector<16x128xf32>
    %27 = arith.addf %21, %26 : vector<16x128xf32>
    %28 = vector.extract_strided_slice %0 {offsets = [0, 2], sizes = [16, 1], strides = [1, 1]} : vector<16x4xf32> to vector<16x1xf32>
    %29 = vector.extract_strided_slice %16 {offsets = [2, 0], sizes = [1, 128], strides = [1, 1]} : vector<4x128xf32> to vector<1x128xf32>
    %30 = vector.broadcast %28 : vector<16x1xf32> to vector<16x128xf32>
    %31 = vector.broadcast %29 : vector<1x128xf32> to vector<16x128xf32>
    %32 = arith.mulf %30, %31 : vector<16x128xf32>
    %33 = arith.addf %27, %32 : vector<16x128xf32>
    %34 = vector.extract_strided_slice %0 {offsets = [0, 3], sizes = [16, 1], strides = [1, 1]} : vector<16x4xf32> to vector<16x1xf32>
    %35 = vector.extract_strided_slice %16 {offsets = [3, 0], sizes = [1, 128], strides = [1, 1]} : vector<4x128xf32> to vector<1x128xf32>
    %36 = vector.broadcast %34 : vector<16x1xf32> to vector<16x128xf32>
    %37 = vector.broadcast %35 : vector<1x128xf32> to vector<16x128xf32>
    %38 = arith.mulf %36, %37 : vector<16x128xf32>
    %39 = arith.addf %33, %38 : vector<16x128xf32>
    %40 = vector.extract_strided_slice %39 {offsets = [0, 0], sizes = [8, 128], strides = [1, 1]} : vector<16x128xf32> to vector<8x128xf32>
    %41 = vector.extract_strided_slice %39 {offsets = [8, 0], sizes = [8, 128], strides = [1, 1]} : vector<16x128xf32> to vector<8x128xf32>
    %42 = vector.extract_strided_slice %1 {offsets = [0, 3], sizes = [8, 1], strides = [1, 1]} : vector<8x4xf32> to vector<8x1xf32>
    %43 = vector.broadcast %42 : vector<8x1xf32> to vector<8x128xf32>
    %44 = arith.mulf %43, %40 : vector<8x128xf32>
    %45 = vector.broadcast %2 : vector<8x1xf32> to vector<8x128xf32>
    %46 = arith.addf %45, %44 : vector<8x128xf32>
    %47 = vector.extract_strided_slice %1 {offsets = [0, 0], sizes = [8, 1], strides = [1, 1]} : vector<8x4xf32> to vector<8x1xf32>
    %48 = vector.broadcast %47 : vector<8x1xf32> to vector<8x128xf32>
    %49 = arith.mulf %48, %12 : vector<8x128xf32>
    %50 = arith.addf %46, %49 : vector<8x128xf32>
    %51 = vector.extract_strided_slice %1 {offsets = [0, 1], sizes = [8, 1], strides = [1, 1]} : vector<8x4xf32> to vector<8x1xf32>
    %52 = vector.broadcast %51 : vector<8x1xf32> to vector<8x128xf32>
    %53 = arith.mulf %52, %13 : vector<8x128xf32>
    %54 = arith.addf %50, %53 : vector<8x128xf32>
    %55 = vector.extract_strided_slice %1 {offsets = [0, 2], sizes = [8, 1], strides = [1, 1]} : vector<8x4xf32> to vector<8x1xf32>
    %56 = vector.broadcast %55 : vector<8x1xf32> to vector<8x128xf32>
    %57 = arith.mulf %56, %14 : vector<8x128xf32>
    %58 = arith.addf %54, %57 : vector<8x128xf32>
    %cst_24 = arith.constant 5.000000e-01 : f32
    %59 = vector.broadcast %cst_24 : f32 to vector<8x128xf32>
    %60 = arith.mulf %59, %58 : vector<8x128xf32>
    %61 = math.tanh %60 : vector<8x128xf32>
    %cst_25 = arith.constant 5.000000e-01 : f32
    %62 = vector.broadcast %cst_25 : f32 to vector<8x128xf32>
    %63 = arith.mulf %62, %61 : vector<8x128xf32>
    %cst_26 = arith.constant 5.000000e-01 : f32
    %64 = vector.broadcast %cst_26 : f32 to vector<8x128xf32>
    %65 = arith.addf %63, %64 : vector<8x128xf32>
    %66 = arith.mulf %58, %65 : vector<8x128xf32>
    %67 = vector.extract_strided_slice %3 {offsets = [0, 0], sizes = [33, 1], strides = [1, 1]} : vector<33x8xf32> to vector<33x1xf32>
    %68 = vector.extract_strided_slice %66 {offsets = [0, 0], sizes = [1, 128], strides = [1, 1]} : vector<8x128xf32> to vector<1x128xf32>
    %69 = vector.broadcast %67 : vector<33x1xf32> to vector<33x128xf32>
    %70 = vector.broadcast %68 : vector<1x128xf32> to vector<33x128xf32>
    %71 = arith.mulf %69, %70 : vector<33x128xf32>
    %72 = vector.extract_strided_slice %3 {offsets = [0, 1], sizes = [33, 1], strides = [1, 1]} : vector<33x8xf32> to vector<33x1xf32>
    %73 = vector.extract_strided_slice %66 {offsets = [1, 0], sizes = [1, 128], strides = [1, 1]} : vector<8x128xf32> to vector<1x128xf32>
    %74 = vector.broadcast %72 : vector<33x1xf32> to vector<33x128xf32>
    %75 = vector.broadcast %73 : vector<1x128xf32> to vector<33x128xf32>
    %76 = arith.mulf %74, %75 : vector<33x128xf32>
    %77 = arith.addf %71, %76 : vector<33x128xf32>
    %78 = vector.extract_strided_slice %3 {offsets = [0, 2], sizes = [33, 1], strides = [1, 1]} : vector<33x8xf32> to vector<33x1xf32>
    %79 = vector.extract_strided_slice %66 {offsets = [2, 0], sizes = [1, 128], strides = [1, 1]} : vector<8x128xf32> to vector<1x128xf32>
    %80 = vector.broadcast %78 : vector<33x1xf32> to vector<33x128xf32>
    %81 = vector.broadcast %79 : vector<1x128xf32> to vector<33x128xf32>
    %82 = arith.mulf %80, %81 : vector<33x128xf32>
    %83 = arith.addf %77, %82 : vector<33x128xf32>
    %84 = vector.extract_strided_slice %3 {offsets = [0, 3], sizes = [33, 1], strides = [1, 1]} : vector<33x8xf32> to vector<33x1xf32>
    %85 = vector.extract_strided_slice %66 {offsets = [3, 0], sizes = [1, 128], strides = [1, 1]} : vector<8x128xf32> to vector<1x128xf32>
    %86 = vector.broadcast %84 : vector<33x1xf32> to vector<33x128xf32>
    %87 = vector.broadcast %85 : vector<1x128xf32> to vector<33x128xf32>
    %88 = arith.mulf %86, %87 : vector<33x128xf32>
    %89 = arith.addf %83, %88 : vector<33x128xf32>
    %90 = vector.extract_strided_slice %3 {offsets = [0, 4], sizes = [33, 1], strides = [1, 1]} : vector<33x8xf32> to vector<33x1xf32>
    %91 = vector.extract_strided_slice %66 {offsets = [4, 0], sizes = [1, 128], strides = [1, 1]} : vector<8x128xf32> to vector<1x128xf32>
    %92 = vector.broadcast %90 : vector<33x1xf32> to vector<33x128xf32>
    %93 = vector.broadcast %91 : vector<1x128xf32> to vector<33x128xf32>
    %94 = arith.mulf %92, %93 : vector<33x128xf32>
    %95 = arith.addf %89, %94 : vector<33x128xf32>
    %96 = vector.extract_strided_slice %3 {offsets = [0, 5], sizes = [33, 1], strides = [1, 1]} : vector<33x8xf32> to vector<33x1xf32>
    %97 = vector.extract_strided_slice %66 {offsets = [5, 0], sizes = [1, 128], strides = [1, 1]} : vector<8x128xf32> to vector<1x128xf32>
    %98 = vector.broadcast %96 : vector<33x1xf32> to vector<33x128xf32>
    %99 = vector.broadcast %97 : vector<1x128xf32> to vector<33x128xf32>
    %100 = arith.mulf %98, %99 : vector<33x128xf32>
    %101 = arith.addf %95, %100 : vector<33x128xf32>
    %102 = vector.extract_strided_slice %3 {offsets = [0, 6], sizes = [33, 1], strides = [1, 1]} : vector<33x8xf32> to vector<33x1xf32>
    %103 = vector.extract_strided_slice %66 {offsets = [6, 0], sizes = [1, 128], strides = [1, 1]} : vector<8x128xf32> to vector<1x128xf32>
    %104 = vector.broadcast %102 : vector<33x1xf32> to vector<33x128xf32>
    %105 = vector.broadcast %103 : vector<1x128xf32> to vector<33x128xf32>
    %106 = arith.mulf %104, %105 : vector<33x128xf32>
    %107 = arith.addf %101, %106 : vector<33x128xf32>
    %108 = vector.extract_strided_slice %3 {offsets = [0, 7], sizes = [33, 1], strides = [1, 1]} : vector<33x8xf32> to vector<33x1xf32>
    %109 = vector.extract_strided_slice %66 {offsets = [7, 0], sizes = [1, 128], strides = [1, 1]} : vector<8x128xf32> to vector<1x128xf32>
    %110 = vector.broadcast %108 : vector<33x1xf32> to vector<33x128xf32>
    %111 = vector.broadcast %109 : vector<1x128xf32> to vector<33x128xf32>
    %112 = arith.mulf %110, %111 : vector<33x128xf32>
    %113 = arith.addf %107, %112 : vector<33x128xf32>
    %114 = vector.extract_strided_slice %113 {offsets = [0, 0], sizes = [16, 128], strides = [1, 1]} : vector<33x128xf32> to vector<16x128xf32>
    %115 = vector.extract_strided_slice %113 {offsets = [16, 0], sizes = [16, 128], strides = [1, 1]} : vector<33x128xf32> to vector<16x128xf32>
    %116 = vector.extract_strided_slice %113 {offsets = [32, 0], sizes = [1, 128], strides = [1, 1]} : vector<33x128xf32> to vector<1x128xf32>
    %117 = vector.broadcast %4 : vector<8x1xf32> to vector<8x128xf32>
    %118 = vector.broadcast %116 : vector<1x128xf32> to vector<8x128xf32>
    %119 = arith.mulf %117, %118 : vector<8x128xf32>
    %120 = vector.broadcast %5 : vector<8x1xf32> to vector<8x128xf32>
    %121 = arith.addf %119, %120 : vector<8x128xf32>
    %cst_27 = arith.constant 0.000000e+00 : f32
    %122 = vector.broadcast %cst_27 : f32 to vector<8x128xf32>
    %123 = arith.maximumf %121, %122 : vector<8x128xf32>
    %124 = math.absf %121 : vector<8x128xf32>
    %cst_28 = arith.constant 0.000000e+00 : f32
    %125 = vector.broadcast %cst_28 : f32 to vector<8x128xf32>
    %126 = arith.subf %125, %124 : vector<8x128xf32>
    %127 = math.exp %126 : vector<8x128xf32>
    %cst_29 = arith.constant 1.000000e+00 : f32
    %128 = vector.broadcast %cst_29 : f32 to vector<8x128xf32>
    %129 = arith.addf %128, %127 : vector<8x128xf32>
    %130 = math.log %129 : vector<8x128xf32>
    %131 = arith.addf %123, %130 : vector<8x128xf32>
    %132 = arith.mulf %131, %66 : vector<8x128xf32>
    %133 = vector.broadcast %6 : vector<8x1xf32> to vector<8x128xf32>
    %134 = arith.mulf %133, %66 : vector<8x128xf32>
    %cst_30 = arith.constant 0.000000e+00 : f32
    %135 = vector.broadcast %cst_30 : f32 to vector<8x128xf32>
    %136 = arith.subf %135, %131 : vector<8x128xf32>
    %137 = math.exp %136 : vector<8x128xf32>
    %138 = arith.mulf %137, %137 : vector<8x128xf32>
    %139 = arith.mulf %138, %137 : vector<8x128xf32>
    %140 = arith.mulf %139, %137 : vector<8x128xf32>
    %141 = vector.shape_cast %137 : vector<8x128xf32> to vector<1x8x128xf32>
    %142 = vector.shape_cast %138 : vector<8x128xf32> to vector<1x8x128xf32>
    %143 = vector.shape_cast %139 : vector<8x128xf32> to vector<1x8x128xf32>
    %144 = vector.shape_cast %140 : vector<8x128xf32> to vector<1x8x128xf32>
    %145 = tpu.concatenate %141, %142, %143, %144 in 0 : vector<1x8x128xf32>, vector<1x8x128xf32>, vector<1x8x128xf32>, vector<1x8x128xf32> -> vector<4x8x128xf32>
    %146 = arith.mulf %145, %8 : vector<4x8x128xf32>
    %147 = vector.shape_cast %132 : vector<8x128xf32> to vector<1x8x128xf32>
    %148 = vector.extract_strided_slice %114 {offsets = [0, 0], sizes = [4, 128], strides = [1, 1]} : vector<16x128xf32> to vector<4x128xf32>
    %149 = vector.shape_cast %148 : vector<4x128xf32> to vector<4x1x128xf32>
    %150 = vector.broadcast %147 : vector<1x8x128xf32> to vector<4x8x128xf32>
    %151 = vector.broadcast %149 : vector<4x1x128xf32> to vector<4x8x128xf32>
    %152 = arith.mulf %150, %151 : vector<4x8x128xf32>
    %153 = arith.addf %146, %152 : vector<4x8x128xf32>
    %154 = vector.extract_strided_slice %115 {offsets = [0, 0], sizes = [4, 128], strides = [1, 1]} : vector<16x128xf32> to vector<4x128xf32>
    %155 = vector.shape_cast %154 : vector<4x128xf32> to vector<4x1x128xf32>
    %156 = vector.broadcast %155 : vector<4x1x128xf32> to vector<4x8x128xf32>
    %157 = arith.mulf %153, %156 : vector<4x8x128xf32>
    %cst_31 = arith.constant dense<0.000000e+00> : vector<8x128xf32>
    %158 = vector.multi_reduction <add>, %157, %cst_31 [0] : vector<4x8x128xf32> to vector<8x128xf32>
    %159 = arith.addf %134, %158 : vector<8x128xf32>
    %160 = vector.shape_cast %140 : vector<8x128xf32> to vector<1x8x128xf32>
    %161 = vector.broadcast %160 : vector<1x8x128xf32> to vector<4x8x128xf32>
    %162 = arith.mulf %145, %161 : vector<4x8x128xf32>
    %163 = arith.mulf %162, %9 : vector<4x8x128xf32>
    %164 = vector.shape_cast %132 : vector<8x128xf32> to vector<1x8x128xf32>
    %165 = vector.extract_strided_slice %114 {offsets = [4, 0], sizes = [4, 128], strides = [1, 1]} : vector<16x128xf32> to vector<4x128xf32>
    %166 = vector.shape_cast %165 : vector<4x128xf32> to vector<4x1x128xf32>
    %167 = vector.broadcast %164 : vector<1x8x128xf32> to vector<4x8x128xf32>
    %168 = vector.broadcast %166 : vector<4x1x128xf32> to vector<4x8x128xf32>
    %169 = arith.mulf %167, %168 : vector<4x8x128xf32>
    %170 = arith.addf %163, %169 : vector<4x8x128xf32>
    %171 = vector.extract_strided_slice %115 {offsets = [4, 0], sizes = [4, 128], strides = [1, 1]} : vector<16x128xf32> to vector<4x128xf32>
    %172 = vector.shape_cast %171 : vector<4x128xf32> to vector<4x1x128xf32>
    %173 = vector.broadcast %172 : vector<4x1x128xf32> to vector<4x8x128xf32>
    %174 = arith.mulf %170, %173 : vector<4x8x128xf32>
    %cst_32 = arith.constant dense<0.000000e+00> : vector<8x128xf32>
    %175 = vector.multi_reduction <add>, %174, %cst_32 [0] : vector<4x8x128xf32> to vector<8x128xf32>
    %176 = arith.addf %159, %175 : vector<8x128xf32>
    %177 = vector.shape_cast %140 : vector<8x128xf32> to vector<1x8x128xf32>
    %178 = vector.broadcast %177 : vector<1x8x128xf32> to vector<4x8x128xf32>
    %179 = arith.mulf %162, %178 : vector<4x8x128xf32>
    %180 = arith.mulf %179, %10 : vector<4x8x128xf32>
    %181 = vector.shape_cast %132 : vector<8x128xf32> to vector<1x8x128xf32>
    %182 = vector.extract_strided_slice %114 {offsets = [8, 0], sizes = [4, 128], strides = [1, 1]} : vector<16x128xf32> to vector<4x128xf32>
    %183 = vector.shape_cast %182 : vector<4x128xf32> to vector<4x1x128xf32>
    %184 = vector.broadcast %181 : vector<1x8x128xf32> to vector<4x8x128xf32>
    %185 = vector.broadcast %183 : vector<4x1x128xf32> to vector<4x8x128xf32>
    %186 = arith.mulf %184, %185 : vector<4x8x128xf32>
    %187 = arith.addf %180, %186 : vector<4x8x128xf32>
    %188 = vector.extract_strided_slice %115 {offsets = [8, 0], sizes = [4, 128], strides = [1, 1]} : vector<16x128xf32> to vector<4x128xf32>
    %189 = vector.shape_cast %188 : vector<4x128xf32> to vector<4x1x128xf32>
    %190 = vector.broadcast %189 : vector<4x1x128xf32> to vector<4x8x128xf32>
    %191 = arith.mulf %187, %190 : vector<4x8x128xf32>
    %cst_33 = arith.constant dense<0.000000e+00> : vector<8x128xf32>
    %192 = vector.multi_reduction <add>, %191, %cst_33 [0] : vector<4x8x128xf32> to vector<8x128xf32>
    %193 = arith.addf %176, %192 : vector<8x128xf32>
    %194 = vector.shape_cast %140 : vector<8x128xf32> to vector<1x8x128xf32>
    %195 = vector.broadcast %194 : vector<1x8x128xf32> to vector<4x8x128xf32>
    %196 = arith.mulf %179, %195 : vector<4x8x128xf32>
    %197 = arith.mulf %196, %11 : vector<4x8x128xf32>
    %198 = vector.shape_cast %132 : vector<8x128xf32> to vector<1x8x128xf32>
    %199 = vector.extract_strided_slice %114 {offsets = [12, 0], sizes = [4, 128], strides = [1, 1]} : vector<16x128xf32> to vector<4x128xf32>
    %200 = vector.shape_cast %199 : vector<4x128xf32> to vector<4x1x128xf32>
    %201 = vector.broadcast %198 : vector<1x8x128xf32> to vector<4x8x128xf32>
    %202 = vector.broadcast %200 : vector<4x1x128xf32> to vector<4x8x128xf32>
    %203 = arith.mulf %201, %202 : vector<4x8x128xf32>
    %204 = arith.addf %197, %203 : vector<4x8x128xf32>
    %205 = vector.extract_strided_slice %115 {offsets = [12, 0], sizes = [4, 128], strides = [1, 1]} : vector<16x128xf32> to vector<4x128xf32>
    %206 = vector.shape_cast %205 : vector<4x128xf32> to vector<4x1x128xf32>
    %207 = vector.broadcast %206 : vector<4x1x128xf32> to vector<4x8x128xf32>
    %208 = arith.mulf %204, %207 : vector<4x8x128xf32>
    %cst_34 = arith.constant dense<0.000000e+00> : vector<8x128xf32>
    %209 = vector.multi_reduction <add>, %208, %cst_34 [0] : vector<4x8x128xf32> to vector<8x128xf32>
    %210 = arith.addf %193, %209 : vector<8x128xf32>
    %cst_35 = arith.constant 5.000000e-01 : f32
    %211 = vector.broadcast %cst_35 : f32 to vector<8x128xf32>
    %212 = arith.mulf %211, %41 : vector<8x128xf32>
    %213 = math.tanh %212 : vector<8x128xf32>
    %cst_36 = arith.constant 5.000000e-01 : f32
    %214 = vector.broadcast %cst_36 : f32 to vector<8x128xf32>
    %215 = arith.mulf %214, %213 : vector<8x128xf32>
    %cst_37 = arith.constant 5.000000e-01 : f32
    %216 = vector.broadcast %cst_37 : f32 to vector<8x128xf32>
    %217 = arith.addf %215, %216 : vector<8x128xf32>
    %218 = arith.mulf %41, %217 : vector<8x128xf32>
    %219 = arith.mulf %210, %218 : vector<8x128xf32>
    %c0_38 = arith.constant 0 : index
    %c4 = arith.constant 4 : index
    %c0_39 = arith.constant 0 : index
    %220 = vector.load %arg2[%c0_38, %c4, %c0_39] : memref<1x32x128xf32, #tpu.memory_space<vmem>>, vector<1x4x128xf32>
    %221 = vector.shape_cast %220 : vector<1x4x128xf32> to vector<4x128xf32>
    %222 = vector.extract_strided_slice %0 {offsets = [0, 0], sizes = [16, 1], strides = [1, 1]} : vector<16x4xf32> to vector<16x1xf32>
    %223 = vector.extract_strided_slice %221 {offsets = [0, 0], sizes = [1, 128], strides = [1, 1]} : vector<4x128xf32> to vector<1x128xf32>
    %224 = vector.broadcast %222 : vector<16x1xf32> to vector<16x128xf32>
    %225 = vector.broadcast %223 : vector<1x128xf32> to vector<16x128xf32>
    %226 = arith.mulf %224, %225 : vector<16x128xf32>
    %227 = vector.extract_strided_slice %0 {offsets = [0, 1], sizes = [16, 1], strides = [1, 1]} : vector<16x4xf32> to vector<16x1xf32>
    %228 = vector.extract_strided_slice %221 {offsets = [1, 0], sizes = [1, 128], strides = [1, 1]} : vector<4x128xf32> to vector<1x128xf32>
    %229 = vector.broadcast %227 : vector<16x1xf32> to vector<16x128xf32>
    %230 = vector.broadcast %228 : vector<1x128xf32> to vector<16x128xf32>
    %231 = arith.mulf %229, %230 : vector<16x128xf32>
    %232 = arith.addf %226, %231 : vector<16x128xf32>
    %233 = vector.extract_strided_slice %0 {offsets = [0, 2], sizes = [16, 1], strides = [1, 1]} : vector<16x4xf32> to vector<16x1xf32>
    %234 = vector.extract_strided_slice %221 {offsets = [2, 0], sizes = [1, 128], strides = [1, 1]} : vector<4x128xf32> to vector<1x128xf32>
    %235 = vector.broadcast %233 : vector<16x1xf32> to vector<16x128xf32>
    %236 = vector.broadcast %234 : vector<1x128xf32> to vector<16x128xf32>
    %237 = arith.mulf %235, %236 : vector<16x128xf32>
    %238 = arith.addf %232, %237 : vector<16x128xf32>
    %239 = vector.extract_strided_slice %0 {offsets = [0, 3], sizes = [16, 1], strides = [1, 1]} : vector<16x4xf32> to vector<16x1xf32>
    %240 = vector.extract_strided_slice %221 {offsets = [3, 0], sizes = [1, 128], strides = [1, 1]} : vector<4x128xf32> to vector<1x128xf32>
    %241 = vector.broadcast %239 : vector<16x1xf32> to vector<16x128xf32>
    %242 = vector.broadcast %240 : vector<1x128xf32> to vector<16x128xf32>
    %243 = arith.mulf %241, %242 : vector<16x128xf32>
    %244 = arith.addf %238, %243 : vector<16x128xf32>
    %245 = vector.extract_strided_slice %244 {offsets = [0, 0], sizes = [8, 128], strides = [1, 1]} : vector<16x128xf32> to vector<8x128xf32>
    %246 = vector.extract_strided_slice %244 {offsets = [8, 0], sizes = [8, 128], strides = [1, 1]} : vector<16x128xf32> to vector<8x128xf32>
    %247 = vector.extract_strided_slice %1 {offsets = [0, 3], sizes = [8, 1], strides = [1, 1]} : vector<8x4xf32> to vector<8x1xf32>
    %248 = vector.broadcast %247 : vector<8x1xf32> to vector<8x128xf32>
    %249 = arith.mulf %248, %245 : vector<8x128xf32>
    %250 = vector.broadcast %2 : vector<8x1xf32> to vector<8x128xf32>
    %251 = arith.addf %250, %249 : vector<8x128xf32>
    %252 = vector.extract_strided_slice %1 {offsets = [0, 0], sizes = [8, 1], strides = [1, 1]} : vector<8x4xf32> to vector<8x1xf32>
    %253 = vector.broadcast %252 : vector<8x1xf32> to vector<8x128xf32>
    %254 = arith.mulf %253, %13 : vector<8x128xf32>
    %255 = arith.addf %251, %254 : vector<8x128xf32>
    %256 = vector.extract_strided_slice %1 {offsets = [0, 1], sizes = [8, 1], strides = [1, 1]} : vector<8x4xf32> to vector<8x1xf32>
    %257 = vector.broadcast %256 : vector<8x1xf32> to vector<8x128xf32>
    %258 = arith.mulf %257, %14 : vector<8x128xf32>
    %259 = arith.addf %255, %258 : vector<8x128xf32>
    %260 = vector.extract_strided_slice %1 {offsets = [0, 2], sizes = [8, 1], strides = [1, 1]} : vector<8x4xf32> to vector<8x1xf32>
    %261 = vector.broadcast %260 : vector<8x1xf32> to vector<8x128xf32>
    %262 = arith.mulf %261, %40 : vector<8x128xf32>
    %263 = arith.addf %259, %262 : vector<8x128xf32>
    %cst_40 = arith.constant 5.000000e-01 : f32
    %264 = vector.broadcast %cst_40 : f32 to vector<8x128xf32>
    %265 = arith.mulf %264, %263 : vector<8x128xf32>
    %266 = math.tanh %265 : vector<8x128xf32>
    %cst_41 = arith.constant 5.000000e-01 : f32
    %267 = vector.broadcast %cst_41 : f32 to vector<8x128xf32>
    %268 = arith.mulf %267, %266 : vector<8x128xf32>
    %cst_42 = arith.constant 5.000000e-01 : f32
    %269 = vector.broadcast %cst_42 : f32 to vector<8x128xf32>
    %270 = arith.addf %268, %269 : vector<8x128xf32>
    %271 = arith.mulf %263, %270 : vector<8x128xf32>
    %272 = vector.extract_strided_slice %3 {offsets = [0, 0], sizes = [33, 1], strides = [1, 1]} : vector<33x8xf32> to vector<33x1xf32>
    %273 = vector.extract_strided_slice %271 {offsets = [0, 0], sizes = [1, 128], strides = [1, 1]} : vector<8x128xf32> to vector<1x128xf32>
    %274 = vector.broadcast %272 : vector<33x1xf32> to vector<33x128xf32>
    %275 = vector.broadcast %273 : vector<1x128xf32> to vector<33x128xf32>
    %276 = arith.mulf %274, %275 : vector<33x128xf32>
    %277 = vector.extract_strided_slice %3 {offsets = [0, 1], sizes = [33, 1], strides = [1, 1]} : vector<33x8xf32> to vector<33x1xf32>
    %278 = vector.extract_strided_slice %271 {offsets = [1, 0], sizes = [1, 128], strides = [1, 1]} : vector<8x128xf32> to vector<1x128xf32>
    %279 = vector.broadcast %277 : vector<33x1xf32> to vector<33x128xf32>
    %280 = vector.broadcast %278 : vector<1x128xf32> to vector<33x128xf32>
    %281 = arith.mulf %279, %280 : vector<33x128xf32>
    %282 = arith.addf %276, %281 : vector<33x128xf32>
    %283 = vector.extract_strided_slice %3 {offsets = [0, 2], sizes = [33, 1], strides = [1, 1]} : vector<33x8xf32> to vector<33x1xf32>
    %284 = vector.extract_strided_slice %271 {offsets = [2, 0], sizes = [1, 128], strides = [1, 1]} : vector<8x128xf32> to vector<1x128xf32>
    %285 = vector.broadcast %283 : vector<33x1xf32> to vector<33x128xf32>
    %286 = vector.broadcast %284 : vector<1x128xf32> to vector<33x128xf32>
    %287 = arith.mulf %285, %286 : vector<33x128xf32>
    %288 = arith.addf %282, %287 : vector<33x128xf32>
    %289 = vector.extract_strided_slice %3 {offsets = [0, 3], sizes = [33, 1], strides = [1, 1]} : vector<33x8xf32> to vector<33x1xf32>
    %290 = vector.extract_strided_slice %271 {offsets = [3, 0], sizes = [1, 128], strides = [1, 1]} : vector<8x128xf32> to vector<1x128xf32>
    %291 = vector.broadcast %289 : vector<33x1xf32> to vector<33x128xf32>
    %292 = vector.broadcast %290 : vector<1x128xf32> to vector<33x128xf32>
    %293 = arith.mulf %291, %292 : vector<33x128xf32>
    %294 = arith.addf %288, %293 : vector<33x128xf32>
    %295 = vector.extract_strided_slice %3 {offsets = [0, 4], sizes = [33, 1], strides = [1, 1]} : vector<33x8xf32> to vector<33x1xf32>
    %296 = vector.extract_strided_slice %271 {offsets = [4, 0], sizes = [1, 128], strides = [1, 1]} : vector<8x128xf32> to vector<1x128xf32>
    %297 = vector.broadcast %295 : vector<33x1xf32> to vector<33x128xf32>
    %298 = vector.broadcast %296 : vector<1x128xf32> to vector<33x128xf32>
    %299 = arith.mulf %297, %298 : vector<33x128xf32>
    %300 = arith.addf %294, %299 : vector<33x128xf32>
    %301 = vector.extract_strided_slice %3 {offsets = [0, 5], sizes = [33, 1], strides = [1, 1]} : vector<33x8xf32> to vector<33x1xf32>
    %302 = vector.extract_strided_slice %271 {offsets = [5, 0], sizes = [1, 128], strides = [1, 1]} : vector<8x128xf32> to vector<1x128xf32>
    %303 = vector.broadcast %301 : vector<33x1xf32> to vector<33x128xf32>
    %304 = vector.broadcast %302 : vector<1x128xf32> to vector<33x128xf32>
    %305 = arith.mulf %303, %304 : vector<33x128xf32>
    %306 = arith.addf %300, %305 : vector<33x128xf32>
    %307 = vector.extract_strided_slice %3 {offsets = [0, 6], sizes = [33, 1], strides = [1, 1]} : vector<33x8xf32> to vector<33x1xf32>
    %308 = vector.extract_strided_slice %271 {offsets = [6, 0], sizes = [1, 128], strides = [1, 1]} : vector<8x128xf32> to vector<1x128xf32>
    %309 = vector.broadcast %307 : vector<33x1xf32> to vector<33x128xf32>
    %310 = vector.broadcast %308 : vector<1x128xf32> to vector<33x128xf32>
    %311 = arith.mulf %309, %310 : vector<33x128xf32>
    %312 = arith.addf %306, %311 : vector<33x128xf32>
    %313 = vector.extract_strided_slice %3 {offsets = [0, 7], sizes = [33, 1], strides = [1, 1]} : vector<33x8xf32> to vector<33x1xf32>
    %314 = vector.extract_strided_slice %271 {offsets = [7, 0], sizes = [1, 128], strides = [1, 1]} : vector<8x128xf32> to vector<1x128xf32>
    %315 = vector.broadcast %313 : vector<33x1xf32> to vector<33x128xf32>
    %316 = vector.broadcast %314 : vector<1x128xf32> to vector<33x128xf32>
    %317 = arith.mulf %315, %316 : vector<33x128xf32>
    %318 = arith.addf %312, %317 : vector<33x128xf32>
    %319 = vector.extract_strided_slice %318 {offsets = [0, 0], sizes = [16, 128], strides = [1, 1]} : vector<33x128xf32> to vector<16x128xf32>
    %320 = vector.extract_strided_slice %318 {offsets = [16, 0], sizes = [16, 128], strides = [1, 1]} : vector<33x128xf32> to vector<16x128xf32>
    %321 = vector.extract_strided_slice %318 {offsets = [32, 0], sizes = [1, 128], strides = [1, 1]} : vector<33x128xf32> to vector<1x128xf32>
    %322 = vector.broadcast %4 : vector<8x1xf32> to vector<8x128xf32>
    %323 = vector.broadcast %321 : vector<1x128xf32> to vector<8x128xf32>
    %324 = arith.mulf %322, %323 : vector<8x128xf32>
    %325 = vector.broadcast %5 : vector<8x1xf32> to vector<8x128xf32>
    %326 = arith.addf %324, %325 : vector<8x128xf32>
    %cst_43 = arith.constant 0.000000e+00 : f32
    %327 = vector.broadcast %cst_43 : f32 to vector<8x128xf32>
    %328 = arith.maximumf %326, %327 : vector<8x128xf32>
    %329 = math.absf %326 : vector<8x128xf32>
    %cst_44 = arith.constant 0.000000e+00 : f32
    %330 = vector.broadcast %cst_44 : f32 to vector<8x128xf32>
    %331 = arith.subf %330, %329 : vector<8x128xf32>
    %332 = math.exp %331 : vector<8x128xf32>
    %cst_45 = arith.constant 1.000000e+00 : f32
    %333 = vector.broadcast %cst_45 : f32 to vector<8x128xf32>
    %334 = arith.addf %333, %332 : vector<8x128xf32>
    %335 = math.log %334 : vector<8x128xf32>
    %336 = arith.addf %328, %335 : vector<8x128xf32>
    %337 = arith.mulf %336, %271 : vector<8x128xf32>
    %338 = vector.broadcast %6 : vector<8x1xf32> to vector<8x128xf32>
    %339 = arith.mulf %338, %271 : vector<8x128xf32>
    %cst_46 = arith.constant 0.000000e+00 : f32
    %340 = vector.broadcast %cst_46 : f32 to vector<8x128xf32>
    %341 = arith.subf %340, %336 : vector<8x128xf32>
    %342 = math.exp %341 : vector<8x128xf32>
    %343 = arith.mulf %342, %342 : vector<8x128xf32>
    %344 = arith.mulf %343, %342 : vector<8x128xf32>
    %345 = arith.mulf %344, %342 : vector<8x128xf32>
    %346 = vector.shape_cast %342 : vector<8x128xf32> to vector<1x8x128xf32>
    %347 = vector.shape_cast %343 : vector<8x128xf32> to vector<1x8x128xf32>
    %348 = vector.shape_cast %344 : vector<8x128xf32> to vector<1x8x128xf32>
    %349 = vector.shape_cast %345 : vector<8x128xf32> to vector<1x8x128xf32>
    %350 = tpu.concatenate %346, %347, %348, %349 in 0 : vector<1x8x128xf32>, vector<1x8x128xf32>, vector<1x8x128xf32>, vector<1x8x128xf32> -> vector<4x8x128xf32>
    %351 = arith.mulf %350, %153 : vector<4x8x128xf32>
    %352 = vector.shape_cast %337 : vector<8x128xf32> to vector<1x8x128xf32>
    %353 = vector.extract_strided_slice %319 {offsets = [0, 0], sizes = [4, 128], strides = [1, 1]} : vector<16x128xf32> to vector<4x128xf32>
    %354 = vector.shape_cast %353 : vector<4x128xf32> to vector<4x1x128xf32>
    %355 = vector.broadcast %352 : vector<1x8x128xf32> to vector<4x8x128xf32>
    %356 = vector.broadcast %354 : vector<4x1x128xf32> to vector<4x8x128xf32>
    %357 = arith.mulf %355, %356 : vector<4x8x128xf32>
    %358 = arith.addf %351, %357 : vector<4x8x128xf32>
    %359 = vector.extract_strided_slice %320 {offsets = [0, 0], sizes = [4, 128], strides = [1, 1]} : vector<16x128xf32> to vector<4x128xf32>
    %360 = vector.shape_cast %359 : vector<4x128xf32> to vector<4x1x128xf32>
    %361 = vector.broadcast %360 : vector<4x1x128xf32> to vector<4x8x128xf32>
    %362 = arith.mulf %358, %361 : vector<4x8x128xf32>
    %cst_47 = arith.constant dense<0.000000e+00> : vector<8x128xf32>
    %363 = vector.multi_reduction <add>, %362, %cst_47 [0] : vector<4x8x128xf32> to vector<8x128xf32>
    %364 = arith.addf %339, %363 : vector<8x128xf32>
    %365 = vector.shape_cast %345 : vector<8x128xf32> to vector<1x8x128xf32>
    %366 = vector.broadcast %365 : vector<1x8x128xf32> to vector<4x8x128xf32>
    %367 = arith.mulf %350, %366 : vector<4x8x128xf32>
    %368 = arith.mulf %367, %170 : vector<4x8x128xf32>
    %369 = vector.shape_cast %337 : vector<8x128xf32> to vector<1x8x128xf32>
    %370 = vector.extract_strided_slice %319 {offsets = [4, 0], sizes = [4, 128], strides = [1, 1]} : vector<16x128xf32> to vector<4x128xf32>
    %371 = vector.shape_cast %370 : vector<4x128xf32> to vector<4x1x128xf32>
    %372 = vector.broadcast %369 : vector<1x8x128xf32> to vector<4x8x128xf32>
    %373 = vector.broadcast %371 : vector<4x1x128xf32> to vector<4x8x128xf32>
    %374 = arith.mulf %372, %373 : vector<4x8x128xf32>
    %375 = arith.addf %368, %374 : vector<4x8x128xf32>
    %376 = vector.extract_strided_slice %320 {offsets = [4, 0], sizes = [4, 128], strides = [1, 1]} : vector<16x128xf32> to vector<4x128xf32>
    %377 = vector.shape_cast %376 : vector<4x128xf32> to vector<4x1x128xf32>
    %378 = vector.broadcast %377 : vector<4x1x128xf32> to vector<4x8x128xf32>
    %379 = arith.mulf %375, %378 : vector<4x8x128xf32>
    %cst_48 = arith.constant dense<0.000000e+00> : vector<8x128xf32>
    %380 = vector.multi_reduction <add>, %379, %cst_48 [0] : vector<4x8x128xf32> to vector<8x128xf32>
    %381 = arith.addf %364, %380 : vector<8x128xf32>
    %382 = vector.shape_cast %345 : vector<8x128xf32> to vector<1x8x128xf32>
    %383 = vector.broadcast %382 : vector<1x8x128xf32> to vector<4x8x128xf32>
    %384 = arith.mulf %367, %383 : vector<4x8x128xf32>
    %385 = arith.mulf %384, %187 : vector<4x8x128xf32>
    %386 = vector.shape_cast %337 : vector<8x128xf32> to vector<1x8x128xf32>
    %387 = vector.extract_strided_slice %319 {offsets = [8, 0], sizes = [4, 128], strides = [1, 1]} : vector<16x128xf32> to vector<4x128xf32>
    %388 = vector.shape_cast %387 : vector<4x128xf32> to vector<4x1x128xf32>
    %389 = vector.broadcast %386 : vector<1x8x128xf32> to vector<4x8x128xf32>
    %390 = vector.broadcast %388 : vector<4x1x128xf32> to vector<4x8x128xf32>
    %391 = arith.mulf %389, %390 : vector<4x8x128xf32>
    %392 = arith.addf %385, %391 : vector<4x8x128xf32>
    %393 = vector.extract_strided_slice %320 {offsets = [8, 0], sizes = [4, 128], strides = [1, 1]} : vector<16x128xf32> to vector<4x128xf32>
    %394 = vector.shape_cast %393 : vector<4x128xf32> to vector<4x1x128xf32>
    %395 = vector.broadcast %394 : vector<4x1x128xf32> to vector<4x8x128xf32>
    %396 = arith.mulf %392, %395 : vector<4x8x128xf32>
    %cst_49 = arith.constant dense<0.000000e+00> : vector<8x128xf32>
    %397 = vector.multi_reduction <add>, %396, %cst_49 [0] : vector<4x8x128xf32> to vector<8x128xf32>
    %398 = arith.addf %381, %397 : vector<8x128xf32>
    %399 = vector.shape_cast %345 : vector<8x128xf32> to vector<1x8x128xf32>
    %400 = vector.broadcast %399 : vector<1x8x128xf32> to vector<4x8x128xf32>
    %401 = arith.mulf %384, %400 : vector<4x8x128xf32>
    %402 = arith.mulf %401, %204 : vector<4x8x128xf32>
    %403 = vector.shape_cast %337 : vector<8x128xf32> to vector<1x8x128xf32>
    %404 = vector.extract_strided_slice %319 {offsets = [12, 0], sizes = [4, 128], strides = [1, 1]} : vector<16x128xf32> to vector<4x128xf32>
    %405 = vector.shape_cast %404 : vector<4x128xf32> to vector<4x1x128xf32>
    %406 = vector.broadcast %403 : vector<1x8x128xf32> to vector<4x8x128xf32>
    %407 = vector.broadcast %405 : vector<4x1x128xf32> to vector<4x8x128xf32>
    %408 = arith.mulf %406, %407 : vector<4x8x128xf32>
    %409 = arith.addf %402, %408 : vector<4x8x128xf32>
    %410 = vector.extract_strided_slice %320 {offsets = [12, 0], sizes = [4, 128], strides = [1, 1]} : vector<16x128xf32> to vector<4x128xf32>
    %411 = vector.shape_cast %410 : vector<4x128xf32> to vector<4x1x128xf32>
    %412 = vector.broadcast %411 : vector<4x1x128xf32> to vector<4x8x128xf32>
    %413 = arith.mulf %409, %412 : vector<4x8x128xf32>
    %cst_50 = arith.constant dense<0.000000e+00> : vector<8x128xf32>
    %414 = vector.multi_reduction <add>, %413, %cst_50 [0] : vector<4x8x128xf32> to vector<8x128xf32>
    %415 = arith.addf %398, %414 : vector<8x128xf32>
    %cst_51 = arith.constant 5.000000e-01 : f32
    %416 = vector.broadcast %cst_51 : f32 to vector<8x128xf32>
    %417 = arith.mulf %416, %246 : vector<8x128xf32>
    %418 = math.tanh %417 : vector<8x128xf32>
    %cst_52 = arith.constant 5.000000e-01 : f32
    %419 = vector.broadcast %cst_52 : f32 to vector<8x128xf32>
    %420 = arith.mulf %419, %418 : vector<8x128xf32>
    %cst_53 = arith.constant 5.000000e-01 : f32
    %421 = vector.broadcast %cst_53 : f32 to vector<8x128xf32>
    %422 = arith.addf %420, %421 : vector<8x128xf32>
    %423 = arith.mulf %246, %422 : vector<8x128xf32>
    %424 = arith.mulf %415, %423 : vector<8x128xf32>
    %c0_54 = arith.constant 0 : index
    %c8 = arith.constant 8 : index
    %c0_55 = arith.constant 0 : index
    %425 = vector.load %arg2[%c0_54, %c8, %c0_55] : memref<1x32x128xf32, #tpu.memory_space<vmem>>, vector<1x4x128xf32>
    %426 = vector.shape_cast %425 : vector<1x4x128xf32> to vector<4x128xf32>
    %427 = vector.extract_strided_slice %0 {offsets = [0, 0], sizes = [16, 1], strides = [1, 1]} : vector<16x4xf32> to vector<16x1xf32>
    %428 = vector.extract_strided_slice %426 {offsets = [0, 0], sizes = [1, 128], strides = [1, 1]} : vector<4x128xf32> to vector<1x128xf32>
    %429 = vector.broadcast %427 : vector<16x1xf32> to vector<16x128xf32>
    %430 = vector.broadcast %428 : vector<1x128xf32> to vector<16x128xf32>
    %431 = arith.mulf %429, %430 : vector<16x128xf32>
    %432 = vector.extract_strided_slice %0 {offsets = [0, 1], sizes = [16, 1], strides = [1, 1]} : vector<16x4xf32> to vector<16x1xf32>
    %433 = vector.extract_strided_slice %426 {offsets = [1, 0], sizes = [1, 128], strides = [1, 1]} : vector<4x128xf32> to vector<1x128xf32>
    %434 = vector.broadcast %432 : vector<16x1xf32> to vector<16x128xf32>
    %435 = vector.broadcast %433 : vector<1x128xf32> to vector<16x128xf32>
    %436 = arith.mulf %434, %435 : vector<16x128xf32>
    %437 = arith.addf %431, %436 : vector<16x128xf32>
    %438 = vector.extract_strided_slice %0 {offsets = [0, 2], sizes = [16, 1], strides = [1, 1]} : vector<16x4xf32> to vector<16x1xf32>
    %439 = vector.extract_strided_slice %426 {offsets = [2, 0], sizes = [1, 128], strides = [1, 1]} : vector<4x128xf32> to vector<1x128xf32>
    %440 = vector.broadcast %438 : vector<16x1xf32> to vector<16x128xf32>
    %441 = vector.broadcast %439 : vector<1x128xf32> to vector<16x128xf32>
    %442 = arith.mulf %440, %441 : vector<16x128xf32>
    %443 = arith.addf %437, %442 : vector<16x128xf32>
    %444 = vector.extract_strided_slice %0 {offsets = [0, 3], sizes = [16, 1], strides = [1, 1]} : vector<16x4xf32> to vector<16x1xf32>
    %445 = vector.extract_strided_slice %426 {offsets = [3, 0], sizes = [1, 128], strides = [1, 1]} : vector<4x128xf32> to vector<1x128xf32>
    %446 = vector.broadcast %444 : vector<16x1xf32> to vector<16x128xf32>
    %447 = vector.broadcast %445 : vector<1x128xf32> to vector<16x128xf32>
    %448 = arith.mulf %446, %447 : vector<16x128xf32>
    %449 = arith.addf %443, %448 : vector<16x128xf32>
    %450 = vector.extract_strided_slice %449 {offsets = [0, 0], sizes = [8, 128], strides = [1, 1]} : vector<16x128xf32> to vector<8x128xf32>
    %451 = vector.extract_strided_slice %449 {offsets = [8, 0], sizes = [8, 128], strides = [1, 1]} : vector<16x128xf32> to vector<8x128xf32>
    %452 = vector.extract_strided_slice %1 {offsets = [0, 3], sizes = [8, 1], strides = [1, 1]} : vector<8x4xf32> to vector<8x1xf32>
    %453 = vector.broadcast %452 : vector<8x1xf32> to vector<8x128xf32>
    %454 = arith.mulf %453, %450 : vector<8x128xf32>
    %455 = vector.broadcast %2 : vector<8x1xf32> to vector<8x128xf32>
    %456 = arith.addf %455, %454 : vector<8x128xf32>
    %457 = vector.extract_strided_slice %1 {offsets = [0, 0], sizes = [8, 1], strides = [1, 1]} : vector<8x4xf32> to vector<8x1xf32>
    %458 = vector.broadcast %457 : vector<8x1xf32> to vector<8x128xf32>
    %459 = arith.mulf %458, %14 : vector<8x128xf32>
    %460 = arith.addf %456, %459 : vector<8x128xf32>
    %461 = vector.extract_strided_slice %1 {offsets = [0, 1], sizes = [8, 1], strides = [1, 1]} : vector<8x4xf32> to vector<8x1xf32>
    %462 = vector.broadcast %461 : vector<8x1xf32> to vector<8x128xf32>
    %463 = arith.mulf %462, %40 : vector<8x128xf32>
    %464 = arith.addf %460, %463 : vector<8x128xf32>
    %465 = vector.extract_strided_slice %1 {offsets = [0, 2], sizes = [8, 1], strides = [1, 1]} : vector<8x4xf32> to vector<8x1xf32>
    %466 = vector.broadcast %465 : vector<8x1xf32> to vector<8x128xf32>
    %467 = arith.mulf %466, %245 : vector<8x128xf32>
    %468 = arith.addf %464, %467 : vector<8x128xf32>
    %cst_56 = arith.constant 5.000000e-01 : f32
    %469 = vector.broadcast %cst_56 : f32 to vector<8x128xf32>
    %470 = arith.mulf %469, %468 : vector<8x128xf32>
    %471 = math.tanh %470 : vector<8x128xf32>
    %cst_57 = arith.constant 5.000000e-01 : f32
    %472 = vector.broadcast %cst_57 : f32 to vector<8x128xf32>
    %473 = arith.mulf %472, %471 : vector<8x128xf32>
    %cst_58 = arith.constant 5.000000e-01 : f32
    %474 = vector.broadcast %cst_58 : f32 to vector<8x128xf32>
    %475 = arith.addf %473, %474 : vector<8x128xf32>
    %476 = arith.mulf %468, %475 : vector<8x128xf32>
    %477 = vector.extract_strided_slice %3 {offsets = [0, 0], sizes = [33, 1], strides = [1, 1]} : vector<33x8xf32> to vector<33x1xf32>
    %478 = vector.extract_strided_slice %476 {offsets = [0, 0], sizes = [1, 128], strides = [1, 1]} : vector<8x128xf32> to vector<1x128xf32>
    %479 = vector.broadcast %477 : vector<33x1xf32> to vector<33x128xf32>
    %480 = vector.broadcast %478 : vector<1x128xf32> to vector<33x128xf32>
    %481 = arith.mulf %479, %480 : vector<33x128xf32>
    %482 = vector.extract_strided_slice %3 {offsets = [0, 1], sizes = [33, 1], strides = [1, 1]} : vector<33x8xf32> to vector<33x1xf32>
    %483 = vector.extract_strided_slice %476 {offsets = [1, 0], sizes = [1, 128], strides = [1, 1]} : vector<8x128xf32> to vector<1x128xf32>
    %484 = vector.broadcast %482 : vector<33x1xf32> to vector<33x128xf32>
    %485 = vector.broadcast %483 : vector<1x128xf32> to vector<33x128xf32>
    %486 = arith.mulf %484, %485 : vector<33x128xf32>
    %487 = arith.addf %481, %486 : vector<33x128xf32>
    %488 = vector.extract_strided_slice %3 {offsets = [0, 2], sizes = [33, 1], strides = [1, 1]} : vector<33x8xf32> to vector<33x1xf32>
    %489 = vector.extract_strided_slice %476 {offsets = [2, 0], sizes = [1, 128], strides = [1, 1]} : vector<8x128xf32> to vector<1x128xf32>
    %490 = vector.broadcast %488 : vector<33x1xf32> to vector<33x128xf32>
    %491 = vector.broadcast %489 : vector<1x128xf32> to vector<33x128xf32>
    %492 = arith.mulf %490, %491 : vector<33x128xf32>
    %493 = arith.addf %487, %492 : vector<33x128xf32>
    %494 = vector.extract_strided_slice %3 {offsets = [0, 3], sizes = [33, 1], strides = [1, 1]} : vector<33x8xf32> to vector<33x1xf32>
    %495 = vector.extract_strided_slice %476 {offsets = [3, 0], sizes = [1, 128], strides = [1, 1]} : vector<8x128xf32> to vector<1x128xf32>
    %496 = vector.broadcast %494 : vector<33x1xf32> to vector<33x128xf32>
    %497 = vector.broadcast %495 : vector<1x128xf32> to vector<33x128xf32>
    %498 = arith.mulf %496, %497 : vector<33x128xf32>
    %499 = arith.addf %493, %498 : vector<33x128xf32>
    %500 = vector.extract_strided_slice %3 {offsets = [0, 4], sizes = [33, 1], strides = [1, 1]} : vector<33x8xf32> to vector<33x1xf32>
    %501 = vector.extract_strided_slice %476 {offsets = [4, 0], sizes = [1, 128], strides = [1, 1]} : vector<8x128xf32> to vector<1x128xf32>
    %502 = vector.broadcast %500 : vector<33x1xf32> to vector<33x128xf32>
    %503 = vector.broadcast %501 : vector<1x128xf32> to vector<33x128xf32>
    %504 = arith.mulf %502, %503 : vector<33x128xf32>
    %505 = arith.addf %499, %504 : vector<33x128xf32>
    %506 = vector.extract_strided_slice %3 {offsets = [0, 5], sizes = [33, 1], strides = [1, 1]} : vector<33x8xf32> to vector<33x1xf32>
    %507 = vector.extract_strided_slice %476 {offsets = [5, 0], sizes = [1, 128], strides = [1, 1]} : vector<8x128xf32> to vector<1x128xf32>
    %508 = vector.broadcast %506 : vector<33x1xf32> to vector<33x128xf32>
    %509 = vector.broadcast %507 : vector<1x128xf32> to vector<33x128xf32>
    %510 = arith.mulf %508, %509 : vector<33x128xf32>
    %511 = arith.addf %505, %510 : vector<33x128xf32>
    %512 = vector.extract_strided_slice %3 {offsets = [0, 6], sizes = [33, 1], strides = [1, 1]} : vector<33x8xf32> to vector<33x1xf32>
    %513 = vector.extract_strided_slice %476 {offsets = [6, 0], sizes = [1, 128], strides = [1, 1]} : vector<8x128xf32> to vector<1x128xf32>
    %514 = vector.broadcast %512 : vector<33x1xf32> to vector<33x128xf32>
    %515 = vector.broadcast %513 : vector<1x128xf32> to vector<33x128xf32>
    %516 = arith.mulf %514, %515 : vector<33x128xf32>
    %517 = arith.addf %511, %516 : vector<33x128xf32>
    %518 = vector.extract_strided_slice %3 {offsets = [0, 7], sizes = [33, 1], strides = [1, 1]} : vector<33x8xf32> to vector<33x1xf32>
    %519 = vector.extract_strided_slice %476 {offsets = [7, 0], sizes = [1, 128], strides = [1, 1]} : vector<8x128xf32> to vector<1x128xf32>
    %520 = vector.broadcast %518 : vector<33x1xf32> to vector<33x128xf32>
    %521 = vector.broadcast %519 : vector<1x128xf32> to vector<33x128xf32>
    %522 = arith.mulf %520, %521 : vector<33x128xf32>
    %523 = arith.addf %517, %522 : vector<33x128xf32>
    %524 = vector.extract_strided_slice %523 {offsets = [0, 0], sizes = [16, 128], strides = [1, 1]} : vector<33x128xf32> to vector<16x128xf32>
    %525 = vector.extract_strided_slice %523 {offsets = [16, 0], sizes = [16, 128], strides = [1, 1]} : vector<33x128xf32> to vector<16x128xf32>
    %526 = vector.extract_strided_slice %523 {offsets = [32, 0], sizes = [1, 128], strides = [1, 1]} : vector<33x128xf32> to vector<1x128xf32>
    %527 = vector.broadcast %4 : vector<8x1xf32> to vector<8x128xf32>
    %528 = vector.broadcast %526 : vector<1x128xf32> to vector<8x128xf32>
    %529 = arith.mulf %527, %528 : vector<8x128xf32>
    %530 = vector.broadcast %5 : vector<8x1xf32> to vector<8x128xf32>
    %531 = arith.addf %529, %530 : vector<8x128xf32>
    %cst_59 = arith.constant 0.000000e+00 : f32
    %532 = vector.broadcast %cst_59 : f32 to vector<8x128xf32>
    %533 = arith.maximumf %531, %532 : vector<8x128xf32>
    %534 = math.absf %531 : vector<8x128xf32>
    %cst_60 = arith.constant 0.000000e+00 : f32
    %535 = vector.broadcast %cst_60 : f32 to vector<8x128xf32>
    %536 = arith.subf %535, %534 : vector<8x128xf32>
    %537 = math.exp %536 : vector<8x128xf32>
    %cst_61 = arith.constant 1.000000e+00 : f32
    %538 = vector.broadcast %cst_61 : f32 to vector<8x128xf32>
    %539 = arith.addf %538, %537 : vector<8x128xf32>
    %540 = math.log %539 : vector<8x128xf32>
    %541 = arith.addf %533, %540 : vector<8x128xf32>
    %542 = arith.mulf %541, %476 : vector<8x128xf32>
    %543 = vector.broadcast %6 : vector<8x1xf32> to vector<8x128xf32>
    %544 = arith.mulf %543, %476 : vector<8x128xf32>
    %cst_62 = arith.constant 0.000000e+00 : f32
    %545 = vector.broadcast %cst_62 : f32 to vector<8x128xf32>
    %546 = arith.subf %545, %541 : vector<8x128xf32>
    %547 = math.exp %546 : vector<8x128xf32>
    %548 = arith.mulf %547, %547 : vector<8x128xf32>
    %549 = arith.mulf %548, %547 : vector<8x128xf32>
    %550 = arith.mulf %549, %547 : vector<8x128xf32>
    %551 = vector.shape_cast %547 : vector<8x128xf32> to vector<1x8x128xf32>
    %552 = vector.shape_cast %548 : vector<8x128xf32> to vector<1x8x128xf32>
    %553 = vector.shape_cast %549 : vector<8x128xf32> to vector<1x8x128xf32>
    %554 = vector.shape_cast %550 : vector<8x128xf32> to vector<1x8x128xf32>
    %555 = tpu.concatenate %551, %552, %553, %554 in 0 : vector<1x8x128xf32>, vector<1x8x128xf32>, vector<1x8x128xf32>, vector<1x8x128xf32> -> vector<4x8x128xf32>
    %556 = arith.mulf %555, %358 : vector<4x8x128xf32>
    %557 = vector.shape_cast %542 : vector<8x128xf32> to vector<1x8x128xf32>
    %558 = vector.extract_strided_slice %524 {offsets = [0, 0], sizes = [4, 128], strides = [1, 1]} : vector<16x128xf32> to vector<4x128xf32>
    %559 = vector.shape_cast %558 : vector<4x128xf32> to vector<4x1x128xf32>
    %560 = vector.broadcast %557 : vector<1x8x128xf32> to vector<4x8x128xf32>
    %561 = vector.broadcast %559 : vector<4x1x128xf32> to vector<4x8x128xf32>
    %562 = arith.mulf %560, %561 : vector<4x8x128xf32>
    %563 = arith.addf %556, %562 : vector<4x8x128xf32>
    %564 = vector.extract_strided_slice %525 {offsets = [0, 0], sizes = [4, 128], strides = [1, 1]} : vector<16x128xf32> to vector<4x128xf32>
    %565 = vector.shape_cast %564 : vector<4x128xf32> to vector<4x1x128xf32>
    %566 = vector.broadcast %565 : vector<4x1x128xf32> to vector<4x8x128xf32>
    %567 = arith.mulf %563, %566 : vector<4x8x128xf32>
    %cst_63 = arith.constant dense<0.000000e+00> : vector<8x128xf32>
    %568 = vector.multi_reduction <add>, %567, %cst_63 [0] : vector<4x8x128xf32> to vector<8x128xf32>
    %569 = arith.addf %544, %568 : vector<8x128xf32>
    %570 = vector.shape_cast %550 : vector<8x128xf32> to vector<1x8x128xf32>
    %571 = vector.broadcast %570 : vector<1x8x128xf32> to vector<4x8x128xf32>
    %572 = arith.mulf %555, %571 : vector<4x8x128xf32>
    %573 = arith.mulf %572, %375 : vector<4x8x128xf32>
    %574 = vector.shape_cast %542 : vector<8x128xf32> to vector<1x8x128xf32>
    %575 = vector.extract_strided_slice %524 {offsets = [4, 0], sizes = [4, 128], strides = [1, 1]} : vector<16x128xf32> to vector<4x128xf32>
    %576 = vector.shape_cast %575 : vector<4x128xf32> to vector<4x1x128xf32>
    %577 = vector.broadcast %574 : vector<1x8x128xf32> to vector<4x8x128xf32>
    %578 = vector.broadcast %576 : vector<4x1x128xf32> to vector<4x8x128xf32>
    %579 = arith.mulf %577, %578 : vector<4x8x128xf32>
    %580 = arith.addf %573, %579 : vector<4x8x128xf32>
    %581 = vector.extract_strided_slice %525 {offsets = [4, 0], sizes = [4, 128], strides = [1, 1]} : vector<16x128xf32> to vector<4x128xf32>
    %582 = vector.shape_cast %581 : vector<4x128xf32> to vector<4x1x128xf32>
    %583 = vector.broadcast %582 : vector<4x1x128xf32> to vector<4x8x128xf32>
    %584 = arith.mulf %580, %583 : vector<4x8x128xf32>
    %cst_64 = arith.constant dense<0.000000e+00> : vector<8x128xf32>
    %585 = vector.multi_reduction <add>, %584, %cst_64 [0] : vector<4x8x128xf32> to vector<8x128xf32>
    %586 = arith.addf %569, %585 : vector<8x128xf32>
    %587 = vector.shape_cast %550 : vector<8x128xf32> to vector<1x8x128xf32>
    %588 = vector.broadcast %587 : vector<1x8x128xf32> to vector<4x8x128xf32>
    %589 = arith.mulf %572, %588 : vector<4x8x128xf32>
    %590 = arith.mulf %589, %392 : vector<4x8x128xf32>
    %591 = vector.shape_cast %542 : vector<8x128xf32> to vector<1x8x128xf32>
    %592 = vector.extract_strided_slice %524 {offsets = [8, 0], sizes = [4, 128], strides = [1, 1]} : vector<16x128xf32> to vector<4x128xf32>
    %593 = vector.shape_cast %592 : vector<4x128xf32> to vector<4x1x128xf32>
    %594 = vector.broadcast %591 : vector<1x8x128xf32> to vector<4x8x128xf32>
    %595 = vector.broadcast %593 : vector<4x1x128xf32> to vector<4x8x128xf32>
    %596 = arith.mulf %594, %595 : vector<4x8x128xf32>
    %597 = arith.addf %590, %596 : vector<4x8x128xf32>
    %598 = vector.extract_strided_slice %525 {offsets = [8, 0], sizes = [4, 128], strides = [1, 1]} : vector<16x128xf32> to vector<4x128xf32>
    %599 = vector.shape_cast %598 : vector<4x128xf32> to vector<4x1x128xf32>
    %600 = vector.broadcast %599 : vector<4x1x128xf32> to vector<4x8x128xf32>
    %601 = arith.mulf %597, %600 : vector<4x8x128xf32>
    %cst_65 = arith.constant dense<0.000000e+00> : vector<8x128xf32>
    %602 = vector.multi_reduction <add>, %601, %cst_65 [0] : vector<4x8x128xf32> to vector<8x128xf32>
    %603 = arith.addf %586, %602 : vector<8x128xf32>
    %604 = vector.shape_cast %550 : vector<8x128xf32> to vector<1x8x128xf32>
    %605 = vector.broadcast %604 : vector<1x8x128xf32> to vector<4x8x128xf32>
    %606 = arith.mulf %589, %605 : vector<4x8x128xf32>
    %607 = arith.mulf %606, %409 : vector<4x8x128xf32>
    %608 = vector.shape_cast %542 : vector<8x128xf32> to vector<1x8x128xf32>
    %609 = vector.extract_strided_slice %524 {offsets = [12, 0], sizes = [4, 128], strides = [1, 1]} : vector<16x128xf32> to vector<4x128xf32>
    %610 = vector.shape_cast %609 : vector<4x128xf32> to vector<4x1x128xf32>
    %611 = vector.broadcast %608 : vector<1x8x128xf32> to vector<4x8x128xf32>
    %612 = vector.broadcast %610 : vector<4x1x128xf32> to vector<4x8x128xf32>
    %613 = arith.mulf %611, %612 : vector<4x8x128xf32>
    %614 = arith.addf %607, %613 : vector<4x8x128xf32>
    %615 = vector.extract_strided_slice %525 {offsets = [12, 0], sizes = [4, 128], strides = [1, 1]} : vector<16x128xf32> to vector<4x128xf32>
    %616 = vector.shape_cast %615 : vector<4x128xf32> to vector<4x1x128xf32>
    %617 = vector.broadcast %616 : vector<4x1x128xf32> to vector<4x8x128xf32>
    %618 = arith.mulf %614, %617 : vector<4x8x128xf32>
    %cst_66 = arith.constant dense<0.000000e+00> : vector<8x128xf32>
    %619 = vector.multi_reduction <add>, %618, %cst_66 [0] : vector<4x8x128xf32> to vector<8x128xf32>
    %620 = arith.addf %603, %619 : vector<8x128xf32>
    %cst_67 = arith.constant 5.000000e-01 : f32
    %621 = vector.broadcast %cst_67 : f32 to vector<8x128xf32>
    %622 = arith.mulf %621, %451 : vector<8x128xf32>
    %623 = math.tanh %622 : vector<8x128xf32>
    %cst_68 = arith.constant 5.000000e-01 : f32
    %624 = vector.broadcast %cst_68 : f32 to vector<8x128xf32>
    %625 = arith.mulf %624, %623 : vector<8x128xf32>
    %cst_69 = arith.constant 5.000000e-01 : f32
    %626 = vector.broadcast %cst_69 : f32 to vector<8x128xf32>
    %627 = arith.addf %625, %626 : vector<8x128xf32>
    %628 = arith.mulf %451, %627 : vector<8x128xf32>
    %629 = arith.mulf %620, %628 : vector<8x128xf32>
    %c0_70 = arith.constant 0 : index
    %c12 = arith.constant 12 : index
    %c0_71 = arith.constant 0 : index
    %630 = vector.load %arg2[%c0_70, %c12, %c0_71] : memref<1x32x128xf32, #tpu.memory_space<vmem>>, vector<1x4x128xf32>
    %631 = vector.shape_cast %630 : vector<1x4x128xf32> to vector<4x128xf32>
    %632 = vector.extract_strided_slice %0 {offsets = [0, 0], sizes = [16, 1], strides = [1, 1]} : vector<16x4xf32> to vector<16x1xf32>
    %633 = vector.extract_strided_slice %631 {offsets = [0, 0], sizes = [1, 128], strides = [1, 1]} : vector<4x128xf32> to vector<1x128xf32>
    %634 = vector.broadcast %632 : vector<16x1xf32> to vector<16x128xf32>
    %635 = vector.broadcast %633 : vector<1x128xf32> to vector<16x128xf32>
    %636 = arith.mulf %634, %635 : vector<16x128xf32>
    %637 = vector.extract_strided_slice %0 {offsets = [0, 1], sizes = [16, 1], strides = [1, 1]} : vector<16x4xf32> to vector<16x1xf32>
    %638 = vector.extract_strided_slice %631 {offsets = [1, 0], sizes = [1, 128], strides = [1, 1]} : vector<4x128xf32> to vector<1x128xf32>
    %639 = vector.broadcast %637 : vector<16x1xf32> to vector<16x128xf32>
    %640 = vector.broadcast %638 : vector<1x128xf32> to vector<16x128xf32>
    %641 = arith.mulf %639, %640 : vector<16x128xf32>
    %642 = arith.addf %636, %641 : vector<16x128xf32>
    %643 = vector.extract_strided_slice %0 {offsets = [0, 2], sizes = [16, 1], strides = [1, 1]} : vector<16x4xf32> to vector<16x1xf32>
    %644 = vector.extract_strided_slice %631 {offsets = [2, 0], sizes = [1, 128], strides = [1, 1]} : vector<4x128xf32> to vector<1x128xf32>
    %645 = vector.broadcast %643 : vector<16x1xf32> to vector<16x128xf32>
    %646 = vector.broadcast %644 : vector<1x128xf32> to vector<16x128xf32>
    %647 = arith.mulf %645, %646 : vector<16x128xf32>
    %648 = arith.addf %642, %647 : vector<16x128xf32>
    %649 = vector.extract_strided_slice %0 {offsets = [0, 3], sizes = [16, 1], strides = [1, 1]} : vector<16x4xf32> to vector<16x1xf32>
    %650 = vector.extract_strided_slice %631 {offsets = [3, 0], sizes = [1, 128], strides = [1, 1]} : vector<4x128xf32> to vector<1x128xf32>
    %651 = vector.broadcast %649 : vector<16x1xf32> to vector<16x128xf32>
    %652 = vector.broadcast %650 : vector<1x128xf32> to vector<16x128xf32>
    %653 = arith.mulf %651, %652 : vector<16x128xf32>
    %654 = arith.addf %648, %653 : vector<16x128xf32>
    %655 = vector.extract_strided_slice %654 {offsets = [0, 0], sizes = [8, 128], strides = [1, 1]} : vector<16x128xf32> to vector<8x128xf32>
    %656 = vector.extract_strided_slice %654 {offsets = [8, 0], sizes = [8, 128], strides = [1, 1]} : vector<16x128xf32> to vector<8x128xf32>
    %657 = vector.extract_strided_slice %1 {offsets = [0, 3], sizes = [8, 1], strides = [1, 1]} : vector<8x4xf32> to vector<8x1xf32>
    %658 = vector.broadcast %657 : vector<8x1xf32> to vector<8x128xf32>
    %659 = arith.mulf %658, %655 : vector<8x128xf32>
    %660 = vector.broadcast %2 : vector<8x1xf32> to vector<8x128xf32>
    %661 = arith.addf %660, %659 : vector<8x128xf32>
    %662 = vector.extract_strided_slice %1 {offsets = [0, 0], sizes = [8, 1], strides = [1, 1]} : vector<8x4xf32> to vector<8x1xf32>
    %663 = vector.broadcast %662 : vector<8x1xf32> to vector<8x128xf32>
    %664 = arith.mulf %663, %40 : vector<8x128xf32>
    %665 = arith.addf %661, %664 : vector<8x128xf32>
    %666 = vector.extract_strided_slice %1 {offsets = [0, 1], sizes = [8, 1], strides = [1, 1]} : vector<8x4xf32> to vector<8x1xf32>
    %667 = vector.broadcast %666 : vector<8x1xf32> to vector<8x128xf32>
    %668 = arith.mulf %667, %245 : vector<8x128xf32>
    %669 = arith.addf %665, %668 : vector<8x128xf32>
    %670 = vector.extract_strided_slice %1 {offsets = [0, 2], sizes = [8, 1], strides = [1, 1]} : vector<8x4xf32> to vector<8x1xf32>
    %671 = vector.broadcast %670 : vector<8x1xf32> to vector<8x128xf32>
    %672 = arith.mulf %671, %450 : vector<8x128xf32>
    %673 = arith.addf %669, %672 : vector<8x128xf32>
    %cst_72 = arith.constant 5.000000e-01 : f32
    %674 = vector.broadcast %cst_72 : f32 to vector<8x128xf32>
    %675 = arith.mulf %674, %673 : vector<8x128xf32>
    %676 = math.tanh %675 : vector<8x128xf32>
    %cst_73 = arith.constant 5.000000e-01 : f32
    %677 = vector.broadcast %cst_73 : f32 to vector<8x128xf32>
    %678 = arith.mulf %677, %676 : vector<8x128xf32>
    %cst_74 = arith.constant 5.000000e-01 : f32
    %679 = vector.broadcast %cst_74 : f32 to vector<8x128xf32>
    %680 = arith.addf %678, %679 : vector<8x128xf32>
    %681 = arith.mulf %673, %680 : vector<8x128xf32>
    %682 = vector.extract_strided_slice %3 {offsets = [0, 0], sizes = [33, 1], strides = [1, 1]} : vector<33x8xf32> to vector<33x1xf32>
    %683 = vector.extract_strided_slice %681 {offsets = [0, 0], sizes = [1, 128], strides = [1, 1]} : vector<8x128xf32> to vector<1x128xf32>
    %684 = vector.broadcast %682 : vector<33x1xf32> to vector<33x128xf32>
    %685 = vector.broadcast %683 : vector<1x128xf32> to vector<33x128xf32>
    %686 = arith.mulf %684, %685 : vector<33x128xf32>
    %687 = vector.extract_strided_slice %3 {offsets = [0, 1], sizes = [33, 1], strides = [1, 1]} : vector<33x8xf32> to vector<33x1xf32>
    %688 = vector.extract_strided_slice %681 {offsets = [1, 0], sizes = [1, 128], strides = [1, 1]} : vector<8x128xf32> to vector<1x128xf32>
    %689 = vector.broadcast %687 : vector<33x1xf32> to vector<33x128xf32>
    %690 = vector.broadcast %688 : vector<1x128xf32> to vector<33x128xf32>
    %691 = arith.mulf %689, %690 : vector<33x128xf32>
    %692 = arith.addf %686, %691 : vector<33x128xf32>
    %693 = vector.extract_strided_slice %3 {offsets = [0, 2], sizes = [33, 1], strides = [1, 1]} : vector<33x8xf32> to vector<33x1xf32>
    %694 = vector.extract_strided_slice %681 {offsets = [2, 0], sizes = [1, 128], strides = [1, 1]} : vector<8x128xf32> to vector<1x128xf32>
    %695 = vector.broadcast %693 : vector<33x1xf32> to vector<33x128xf32>
    %696 = vector.broadcast %694 : vector<1x128xf32> to vector<33x128xf32>
    %697 = arith.mulf %695, %696 : vector<33x128xf32>
    %698 = arith.addf %692, %697 : vector<33x128xf32>
    %699 = vector.extract_strided_slice %3 {offsets = [0, 3], sizes = [33, 1], strides = [1, 1]} : vector<33x8xf32> to vector<33x1xf32>
    %700 = vector.extract_strided_slice %681 {offsets = [3, 0], sizes = [1, 128], strides = [1, 1]} : vector<8x128xf32> to vector<1x128xf32>
    %701 = vector.broadcast %699 : vector<33x1xf32> to vector<33x128xf32>
    %702 = vector.broadcast %700 : vector<1x128xf32> to vector<33x128xf32>
    %703 = arith.mulf %701, %702 : vector<33x128xf32>
    %704 = arith.addf %698, %703 : vector<33x128xf32>
    %705 = vector.extract_strided_slice %3 {offsets = [0, 4], sizes = [33, 1], strides = [1, 1]} : vector<33x8xf32> to vector<33x1xf32>
    %706 = vector.extract_strided_slice %681 {offsets = [4, 0], sizes = [1, 128], strides = [1, 1]} : vector<8x128xf32> to vector<1x128xf32>
    %707 = vector.broadcast %705 : vector<33x1xf32> to vector<33x128xf32>
    %708 = vector.broadcast %706 : vector<1x128xf32> to vector<33x128xf32>
    %709 = arith.mulf %707, %708 : vector<33x128xf32>
    %710 = arith.addf %704, %709 : vector<33x128xf32>
    %711 = vector.extract_strided_slice %3 {offsets = [0, 5], sizes = [33, 1], strides = [1, 1]} : vector<33x8xf32> to vector<33x1xf32>
    %712 = vector.extract_strided_slice %681 {offsets = [5, 0], sizes = [1, 128], strides = [1, 1]} : vector<8x128xf32> to vector<1x128xf32>
    %713 = vector.broadcast %711 : vector<33x1xf32> to vector<33x128xf32>
    %714 = vector.broadcast %712 : vector<1x128xf32> to vector<33x128xf32>
    %715 = arith.mulf %713, %714 : vector<33x128xf32>
    %716 = arith.addf %710, %715 : vector<33x128xf32>
    %717 = vector.extract_strided_slice %3 {offsets = [0, 6], sizes = [33, 1], strides = [1, 1]} : vector<33x8xf32> to vector<33x1xf32>
    %718 = vector.extract_strided_slice %681 {offsets = [6, 0], sizes = [1, 128], strides = [1, 1]} : vector<8x128xf32> to vector<1x128xf32>
    %719 = vector.broadcast %717 : vector<33x1xf32> to vector<33x128xf32>
    %720 = vector.broadcast %718 : vector<1x128xf32> to vector<33x128xf32>
    %721 = arith.mulf %719, %720 : vector<33x128xf32>
    %722 = arith.addf %716, %721 : vector<33x128xf32>
    %723 = vector.extract_strided_slice %3 {offsets = [0, 7], sizes = [33, 1], strides = [1, 1]} : vector<33x8xf32> to vector<33x1xf32>
    %724 = vector.extract_strided_slice %681 {offsets = [7, 0], sizes = [1, 128], strides = [1, 1]} : vector<8x128xf32> to vector<1x128xf32>
    %725 = vector.broadcast %723 : vector<33x1xf32> to vector<33x128xf32>
    %726 = vector.broadcast %724 : vector<1x128xf32> to vector<33x128xf32>
    %727 = arith.mulf %725, %726 : vector<33x128xf32>
    %728 = arith.addf %722, %727 : vector<33x128xf32>
    %729 = vector.extract_strided_slice %728 {offsets = [0, 0], sizes = [16, 128], strides = [1, 1]} : vector<33x128xf32> to vector<16x128xf32>
    %730 = vector.extract_strided_slice %728 {offsets = [16, 0], sizes = [16, 128], strides = [1, 1]} : vector<33x128xf32> to vector<16x128xf32>
    %731 = vector.extract_strided_slice %728 {offsets = [32, 0], sizes = [1, 128], strides = [1, 1]} : vector<33x128xf32> to vector<1x128xf32>
    %732 = vector.broadcast %4 : vector<8x1xf32> to vector<8x128xf32>
    %733 = vector.broadcast %731 : vector<1x128xf32> to vector<8x128xf32>
    %734 = arith.mulf %732, %733 : vector<8x128xf32>
    %735 = vector.broadcast %5 : vector<8x1xf32> to vector<8x128xf32>
    %736 = arith.addf %734, %735 : vector<8x128xf32>
    %cst_75 = arith.constant 0.000000e+00 : f32
    %737 = vector.broadcast %cst_75 : f32 to vector<8x128xf32>
    %738 = arith.maximumf %736, %737 : vector<8x128xf32>
    %739 = math.absf %736 : vector<8x128xf32>
    %cst_76 = arith.constant 0.000000e+00 : f32
    %740 = vector.broadcast %cst_76 : f32 to vector<8x128xf32>
    %741 = arith.subf %740, %739 : vector<8x128xf32>
    %742 = math.exp %741 : vector<8x128xf32>
    %cst_77 = arith.constant 1.000000e+00 : f32
    %743 = vector.broadcast %cst_77 : f32 to vector<8x128xf32>
    %744 = arith.addf %743, %742 : vector<8x128xf32>
    %745 = math.log %744 : vector<8x128xf32>
    %746 = arith.addf %738, %745 : vector<8x128xf32>
    %747 = arith.mulf %746, %681 : vector<8x128xf32>
    %748 = vector.broadcast %6 : vector<8x1xf32> to vector<8x128xf32>
    %749 = arith.mulf %748, %681 : vector<8x128xf32>
    %cst_78 = arith.constant 0.000000e+00 : f32
    %750 = vector.broadcast %cst_78 : f32 to vector<8x128xf32>
    %751 = arith.subf %750, %746 : vector<8x128xf32>
    %752 = math.exp %751 : vector<8x128xf32>
    %753 = arith.mulf %752, %752 : vector<8x128xf32>
    %754 = arith.mulf %753, %752 : vector<8x128xf32>
    %755 = arith.mulf %754, %752 : vector<8x128xf32>
    %756 = vector.shape_cast %752 : vector<8x128xf32> to vector<1x8x128xf32>
    %757 = vector.shape_cast %753 : vector<8x128xf32> to vector<1x8x128xf32>
    %758 = vector.shape_cast %754 : vector<8x128xf32> to vector<1x8x128xf32>
    %759 = vector.shape_cast %755 : vector<8x128xf32> to vector<1x8x128xf32>
    %760 = tpu.concatenate %756, %757, %758, %759 in 0 : vector<1x8x128xf32>, vector<1x8x128xf32>, vector<1x8x128xf32>, vector<1x8x128xf32> -> vector<4x8x128xf32>
    %761 = arith.mulf %760, %563 : vector<4x8x128xf32>
    %762 = vector.shape_cast %747 : vector<8x128xf32> to vector<1x8x128xf32>
    %763 = vector.extract_strided_slice %729 {offsets = [0, 0], sizes = [4, 128], strides = [1, 1]} : vector<16x128xf32> to vector<4x128xf32>
    %764 = vector.shape_cast %763 : vector<4x128xf32> to vector<4x1x128xf32>
    %765 = vector.broadcast %762 : vector<1x8x128xf32> to vector<4x8x128xf32>
    %766 = vector.broadcast %764 : vector<4x1x128xf32> to vector<4x8x128xf32>
    %767 = arith.mulf %765, %766 : vector<4x8x128xf32>
    %768 = arith.addf %761, %767 : vector<4x8x128xf32>
    %769 = vector.extract_strided_slice %730 {offsets = [0, 0], sizes = [4, 128], strides = [1, 1]} : vector<16x128xf32> to vector<4x128xf32>
    %770 = vector.shape_cast %769 : vector<4x128xf32> to vector<4x1x128xf32>
    %771 = vector.broadcast %770 : vector<4x1x128xf32> to vector<4x8x128xf32>
    %772 = arith.mulf %768, %771 : vector<4x8x128xf32>
    %cst_79 = arith.constant dense<0.000000e+00> : vector<8x128xf32>
    %773 = vector.multi_reduction <add>, %772, %cst_79 [0] : vector<4x8x128xf32> to vector<8x128xf32>
    %774 = arith.addf %749, %773 : vector<8x128xf32>
    %775 = vector.shape_cast %755 : vector<8x128xf32> to vector<1x8x128xf32>
    %776 = vector.broadcast %775 : vector<1x8x128xf32> to vector<4x8x128xf32>
    %777 = arith.mulf %760, %776 : vector<4x8x128xf32>
    %778 = arith.mulf %777, %580 : vector<4x8x128xf32>
    %779 = vector.shape_cast %747 : vector<8x128xf32> to vector<1x8x128xf32>
    %780 = vector.extract_strided_slice %729 {offsets = [4, 0], sizes = [4, 128], strides = [1, 1]} : vector<16x128xf32> to vector<4x128xf32>
    %781 = vector.shape_cast %780 : vector<4x128xf32> to vector<4x1x128xf32>
    %782 = vector.broadcast %779 : vector<1x8x128xf32> to vector<4x8x128xf32>
    %783 = vector.broadcast %781 : vector<4x1x128xf32> to vector<4x8x128xf32>
    %784 = arith.mulf %782, %783 : vector<4x8x128xf32>
    %785 = arith.addf %778, %784 : vector<4x8x128xf32>
    %786 = vector.extract_strided_slice %730 {offsets = [4, 0], sizes = [4, 128], strides = [1, 1]} : vector<16x128xf32> to vector<4x128xf32>
    %787 = vector.shape_cast %786 : vector<4x128xf32> to vector<4x1x128xf32>
    %788 = vector.broadcast %787 : vector<4x1x128xf32> to vector<4x8x128xf32>
    %789 = arith.mulf %785, %788 : vector<4x8x128xf32>
    %cst_80 = arith.constant dense<0.000000e+00> : vector<8x128xf32>
    %790 = vector.multi_reduction <add>, %789, %cst_80 [0] : vector<4x8x128xf32> to vector<8x128xf32>
    %791 = arith.addf %774, %790 : vector<8x128xf32>
    %792 = vector.shape_cast %755 : vector<8x128xf32> to vector<1x8x128xf32>
    %793 = vector.broadcast %792 : vector<1x8x128xf32> to vector<4x8x128xf32>
    %794 = arith.mulf %777, %793 : vector<4x8x128xf32>
    %795 = arith.mulf %794, %597 : vector<4x8x128xf32>
    %796 = vector.shape_cast %747 : vector<8x128xf32> to vector<1x8x128xf32>
    %797 = vector.extract_strided_slice %729 {offsets = [8, 0], sizes = [4, 128], strides = [1, 1]} : vector<16x128xf32> to vector<4x128xf32>
    %798 = vector.shape_cast %797 : vector<4x128xf32> to vector<4x1x128xf32>
    %799 = vector.broadcast %796 : vector<1x8x128xf32> to vector<4x8x128xf32>
    %800 = vector.broadcast %798 : vector<4x1x128xf32> to vector<4x8x128xf32>
    %801 = arith.mulf %799, %800 : vector<4x8x128xf32>
    %802 = arith.addf %795, %801 : vector<4x8x128xf32>
    %803 = vector.extract_strided_slice %730 {offsets = [8, 0], sizes = [4, 128], strides = [1, 1]} : vector<16x128xf32> to vector<4x128xf32>
    %804 = vector.shape_cast %803 : vector<4x128xf32> to vector<4x1x128xf32>
    %805 = vector.broadcast %804 : vector<4x1x128xf32> to vector<4x8x128xf32>
    %806 = arith.mulf %802, %805 : vector<4x8x128xf32>
    %cst_81 = arith.constant dense<0.000000e+00> : vector<8x128xf32>
    %807 = vector.multi_reduction <add>, %806, %cst_81 [0] : vector<4x8x128xf32> to vector<8x128xf32>
    %808 = arith.addf %791, %807 : vector<8x128xf32>
    %809 = vector.shape_cast %755 : vector<8x128xf32> to vector<1x8x128xf32>
    %810 = vector.broadcast %809 : vector<1x8x128xf32> to vector<4x8x128xf32>
    %811 = arith.mulf %794, %810 : vector<4x8x128xf32>
    %812 = arith.mulf %811, %614 : vector<4x8x128xf32>
    %813 = vector.shape_cast %747 : vector<8x128xf32> to vector<1x8x128xf32>
    %814 = vector.extract_strided_slice %729 {offsets = [12, 0], sizes = [4, 128], strides = [1, 1]} : vector<16x128xf32> to vector<4x128xf32>
    %815 = vector.shape_cast %814 : vector<4x128xf32> to vector<4x1x128xf32>
    %816 = vector.broadcast %813 : vector<1x8x128xf32> to vector<4x8x128xf32>
    %817 = vector.broadcast %815 : vector<4x1x128xf32> to vector<4x8x128xf32>
    %818 = arith.mulf %816, %817 : vector<4x8x128xf32>
    %819 = arith.addf %812, %818 : vector<4x8x128xf32>
    %820 = vector.extract_strided_slice %730 {offsets = [12, 0], sizes = [4, 128], strides = [1, 1]} : vector<16x128xf32> to vector<4x128xf32>
    %821 = vector.shape_cast %820 : vector<4x128xf32> to vector<4x1x128xf32>
    %822 = vector.broadcast %821 : vector<4x1x128xf32> to vector<4x8x128xf32>
    %823 = arith.mulf %819, %822 : vector<4x8x128xf32>
    %cst_82 = arith.constant dense<0.000000e+00> : vector<8x128xf32>
    %824 = vector.multi_reduction <add>, %823, %cst_82 [0] : vector<4x8x128xf32> to vector<8x128xf32>
    %825 = arith.addf %808, %824 : vector<8x128xf32>
    %cst_83 = arith.constant 5.000000e-01 : f32
    %826 = vector.broadcast %cst_83 : f32 to vector<8x128xf32>
    %827 = arith.mulf %826, %656 : vector<8x128xf32>
    %828 = math.tanh %827 : vector<8x128xf32>
    %cst_84 = arith.constant 5.000000e-01 : f32
    %829 = vector.broadcast %cst_84 : f32 to vector<8x128xf32>
    %830 = arith.mulf %829, %828 : vector<8x128xf32>
    %cst_85 = arith.constant 5.000000e-01 : f32
    %831 = vector.broadcast %cst_85 : f32 to vector<8x128xf32>
    %832 = arith.addf %830, %831 : vector<8x128xf32>
    %833 = arith.mulf %656, %832 : vector<8x128xf32>
    %834 = arith.mulf %825, %833 : vector<8x128xf32>
    %c0_86 = arith.constant 0 : index
    %c16 = arith.constant 16 : index
    %c0_87 = arith.constant 0 : index
    %835 = vector.load %arg2[%c0_86, %c16, %c0_87] : memref<1x32x128xf32, #tpu.memory_space<vmem>>, vector<1x4x128xf32>
    %836 = vector.shape_cast %835 : vector<1x4x128xf32> to vector<4x128xf32>
    %837 = vector.extract_strided_slice %0 {offsets = [0, 0], sizes = [16, 1], strides = [1, 1]} : vector<16x4xf32> to vector<16x1xf32>
    %838 = vector.extract_strided_slice %836 {offsets = [0, 0], sizes = [1, 128], strides = [1, 1]} : vector<4x128xf32> to vector<1x128xf32>
    %839 = vector.broadcast %837 : vector<16x1xf32> to vector<16x128xf32>
    %840 = vector.broadcast %838 : vector<1x128xf32> to vector<16x128xf32>
    %841 = arith.mulf %839, %840 : vector<16x128xf32>
    %842 = vector.extract_strided_slice %0 {offsets = [0, 1], sizes = [16, 1], strides = [1, 1]} : vector<16x4xf32> to vector<16x1xf32>
    %843 = vector.extract_strided_slice %836 {offsets = [1, 0], sizes = [1, 128], strides = [1, 1]} : vector<4x128xf32> to vector<1x128xf32>
    %844 = vector.broadcast %842 : vector<16x1xf32> to vector<16x128xf32>
    %845 = vector.broadcast %843 : vector<1x128xf32> to vector<16x128xf32>
    %846 = arith.mulf %844, %845 : vector<16x128xf32>
    %847 = arith.addf %841, %846 : vector<16x128xf32>
    %848 = vector.extract_strided_slice %0 {offsets = [0, 2], sizes = [16, 1], strides = [1, 1]} : vector<16x4xf32> to vector<16x1xf32>
    %849 = vector.extract_strided_slice %836 {offsets = [2, 0], sizes = [1, 128], strides = [1, 1]} : vector<4x128xf32> to vector<1x128xf32>
    %850 = vector.broadcast %848 : vector<16x1xf32> to vector<16x128xf32>
    %851 = vector.broadcast %849 : vector<1x128xf32> to vector<16x128xf32>
    %852 = arith.mulf %850, %851 : vector<16x128xf32>
    %853 = arith.addf %847, %852 : vector<16x128xf32>
    %854 = vector.extract_strided_slice %0 {offsets = [0, 3], sizes = [16, 1], strides = [1, 1]} : vector<16x4xf32> to vector<16x1xf32>
    %855 = vector.extract_strided_slice %836 {offsets = [3, 0], sizes = [1, 128], strides = [1, 1]} : vector<4x128xf32> to vector<1x128xf32>
    %856 = vector.broadcast %854 : vector<16x1xf32> to vector<16x128xf32>
    %857 = vector.broadcast %855 : vector<1x128xf32> to vector<16x128xf32>
    %858 = arith.mulf %856, %857 : vector<16x128xf32>
    %859 = arith.addf %853, %858 : vector<16x128xf32>
    %860 = vector.extract_strided_slice %859 {offsets = [0, 0], sizes = [8, 128], strides = [1, 1]} : vector<16x128xf32> to vector<8x128xf32>
    %861 = vector.extract_strided_slice %859 {offsets = [8, 0], sizes = [8, 128], strides = [1, 1]} : vector<16x128xf32> to vector<8x128xf32>
    %862 = vector.extract_strided_slice %1 {offsets = [0, 3], sizes = [8, 1], strides = [1, 1]} : vector<8x4xf32> to vector<8x1xf32>
    %863 = vector.broadcast %862 : vector<8x1xf32> to vector<8x128xf32>
    %864 = arith.mulf %863, %860 : vector<8x128xf32>
    %865 = vector.broadcast %2 : vector<8x1xf32> to vector<8x128xf32>
    %866 = arith.addf %865, %864 : vector<8x128xf32>
    %867 = vector.extract_strided_slice %1 {offsets = [0, 0], sizes = [8, 1], strides = [1, 1]} : vector<8x4xf32> to vector<8x1xf32>
    %868 = vector.broadcast %867 : vector<8x1xf32> to vector<8x128xf32>
    %869 = arith.mulf %868, %245 : vector<8x128xf32>
    %870 = arith.addf %866, %869 : vector<8x128xf32>
    %871 = vector.extract_strided_slice %1 {offsets = [0, 1], sizes = [8, 1], strides = [1, 1]} : vector<8x4xf32> to vector<8x1xf32>
    %872 = vector.broadcast %871 : vector<8x1xf32> to vector<8x128xf32>
    %873 = arith.mulf %872, %450 : vector<8x128xf32>
    %874 = arith.addf %870, %873 : vector<8x128xf32>
    %875 = vector.extract_strided_slice %1 {offsets = [0, 2], sizes = [8, 1], strides = [1, 1]} : vector<8x4xf32> to vector<8x1xf32>
    %876 = vector.broadcast %875 : vector<8x1xf32> to vector<8x128xf32>
    %877 = arith.mulf %876, %655 : vector<8x128xf32>
    %878 = arith.addf %874, %877 : vector<8x128xf32>
    %cst_88 = arith.constant 5.000000e-01 : f32
    %879 = vector.broadcast %cst_88 : f32 to vector<8x128xf32>
    %880 = arith.mulf %879, %878 : vector<8x128xf32>
    %881 = math.tanh %880 : vector<8x128xf32>
    %cst_89 = arith.constant 5.000000e-01 : f32
    %882 = vector.broadcast %cst_89 : f32 to vector<8x128xf32>
    %883 = arith.mulf %882, %881 : vector<8x128xf32>
    %cst_90 = arith.constant 5.000000e-01 : f32
    %884 = vector.broadcast %cst_90 : f32 to vector<8x128xf32>
    %885 = arith.addf %883, %884 : vector<8x128xf32>
    %886 = arith.mulf %878, %885 : vector<8x128xf32>
    %887 = vector.extract_strided_slice %3 {offsets = [0, 0], sizes = [33, 1], strides = [1, 1]} : vector<33x8xf32> to vector<33x1xf32>
    %888 = vector.extract_strided_slice %886 {offsets = [0, 0], sizes = [1, 128], strides = [1, 1]} : vector<8x128xf32> to vector<1x128xf32>
    %889 = vector.broadcast %887 : vector<33x1xf32> to vector<33x128xf32>
    %890 = vector.broadcast %888 : vector<1x128xf32> to vector<33x128xf32>
    %891 = arith.mulf %889, %890 : vector<33x128xf32>
    %892 = vector.extract_strided_slice %3 {offsets = [0, 1], sizes = [33, 1], strides = [1, 1]} : vector<33x8xf32> to vector<33x1xf32>
    %893 = vector.extract_strided_slice %886 {offsets = [1, 0], sizes = [1, 128], strides = [1, 1]} : vector<8x128xf32> to vector<1x128xf32>
    %894 = vector.broadcast %892 : vector<33x1xf32> to vector<33x128xf32>
    %895 = vector.broadcast %893 : vector<1x128xf32> to vector<33x128xf32>
    %896 = arith.mulf %894, %895 : vector<33x128xf32>
    %897 = arith.addf %891, %896 : vector<33x128xf32>
    %898 = vector.extract_strided_slice %3 {offsets = [0, 2], sizes = [33, 1], strides = [1, 1]} : vector<33x8xf32> to vector<33x1xf32>
    %899 = vector.extract_strided_slice %886 {offsets = [2, 0], sizes = [1, 128], strides = [1, 1]} : vector<8x128xf32> to vector<1x128xf32>
    %900 = vector.broadcast %898 : vector<33x1xf32> to vector<33x128xf32>
    %901 = vector.broadcast %899 : vector<1x128xf32> to vector<33x128xf32>
    %902 = arith.mulf %900, %901 : vector<33x128xf32>
    %903 = arith.addf %897, %902 : vector<33x128xf32>
    %904 = vector.extract_strided_slice %3 {offsets = [0, 3], sizes = [33, 1], strides = [1, 1]} : vector<33x8xf32> to vector<33x1xf32>
    %905 = vector.extract_strided_slice %886 {offsets = [3, 0], sizes = [1, 128], strides = [1, 1]} : vector<8x128xf32> to vector<1x128xf32>
    %906 = vector.broadcast %904 : vector<33x1xf32> to vector<33x128xf32>
    %907 = vector.broadcast %905 : vector<1x128xf32> to vector<33x128xf32>
    %908 = arith.mulf %906, %907 : vector<33x128xf32>
    %909 = arith.addf %903, %908 : vector<33x128xf32>
    %910 = vector.extract_strided_slice %3 {offsets = [0, 4], sizes = [33, 1], strides = [1, 1]} : vector<33x8xf32> to vector<33x1xf32>
    %911 = vector.extract_strided_slice %886 {offsets = [4, 0], sizes = [1, 128], strides = [1, 1]} : vector<8x128xf32> to vector<1x128xf32>
    %912 = vector.broadcast %910 : vector<33x1xf32> to vector<33x128xf32>
    %913 = vector.broadcast %911 : vector<1x128xf32> to vector<33x128xf32>
    %914 = arith.mulf %912, %913 : vector<33x128xf32>
    %915 = arith.addf %909, %914 : vector<33x128xf32>
    %916 = vector.extract_strided_slice %3 {offsets = [0, 5], sizes = [33, 1], strides = [1, 1]} : vector<33x8xf32> to vector<33x1xf32>
    %917 = vector.extract_strided_slice %886 {offsets = [5, 0], sizes = [1, 128], strides = [1, 1]} : vector<8x128xf32> to vector<1x128xf32>
    %918 = vector.broadcast %916 : vector<33x1xf32> to vector<33x128xf32>
    %919 = vector.broadcast %917 : vector<1x128xf32> to vector<33x128xf32>
    %920 = arith.mulf %918, %919 : vector<33x128xf32>
    %921 = arith.addf %915, %920 : vector<33x128xf32>
    %922 = vector.extract_strided_slice %3 {offsets = [0, 6], sizes = [33, 1], strides = [1, 1]} : vector<33x8xf32> to vector<33x1xf32>
    %923 = vector.extract_strided_slice %886 {offsets = [6, 0], sizes = [1, 128], strides = [1, 1]} : vector<8x128xf32> to vector<1x128xf32>
    %924 = vector.broadcast %922 : vector<33x1xf32> to vector<33x128xf32>
    %925 = vector.broadcast %923 : vector<1x128xf32> to vector<33x128xf32>
    %926 = arith.mulf %924, %925 : vector<33x128xf32>
    %927 = arith.addf %921, %926 : vector<33x128xf32>
    %928 = vector.extract_strided_slice %3 {offsets = [0, 7], sizes = [33, 1], strides = [1, 1]} : vector<33x8xf32> to vector<33x1xf32>
    %929 = vector.extract_strided_slice %886 {offsets = [7, 0], sizes = [1, 128], strides = [1, 1]} : vector<8x128xf32> to vector<1x128xf32>
    %930 = vector.broadcast %928 : vector<33x1xf32> to vector<33x128xf32>
    %931 = vector.broadcast %929 : vector<1x128xf32> to vector<33x128xf32>
    %932 = arith.mulf %930, %931 : vector<33x128xf32>
    %933 = arith.addf %927, %932 : vector<33x128xf32>
    %934 = vector.extract_strided_slice %933 {offsets = [0, 0], sizes = [16, 128], strides = [1, 1]} : vector<33x128xf32> to vector<16x128xf32>
    %935 = vector.extract_strided_slice %933 {offsets = [16, 0], sizes = [16, 128], strides = [1, 1]} : vector<33x128xf32> to vector<16x128xf32>
    %936 = vector.extract_strided_slice %933 {offsets = [32, 0], sizes = [1, 128], strides = [1, 1]} : vector<33x128xf32> to vector<1x128xf32>
    %937 = vector.broadcast %4 : vector<8x1xf32> to vector<8x128xf32>
    %938 = vector.broadcast %936 : vector<1x128xf32> to vector<8x128xf32>
    %939 = arith.mulf %937, %938 : vector<8x128xf32>
    %940 = vector.broadcast %5 : vector<8x1xf32> to vector<8x128xf32>
    %941 = arith.addf %939, %940 : vector<8x128xf32>
    %cst_91 = arith.constant 0.000000e+00 : f32
    %942 = vector.broadcast %cst_91 : f32 to vector<8x128xf32>
    %943 = arith.maximumf %941, %942 : vector<8x128xf32>
    %944 = math.absf %941 : vector<8x128xf32>
    %cst_92 = arith.constant 0.000000e+00 : f32
    %945 = vector.broadcast %cst_92 : f32 to vector<8x128xf32>
    %946 = arith.subf %945, %944 : vector<8x128xf32>
    %947 = math.exp %946 : vector<8x128xf32>
    %cst_93 = arith.constant 1.000000e+00 : f32
    %948 = vector.broadcast %cst_93 : f32 to vector<8x128xf32>
    %949 = arith.addf %948, %947 : vector<8x128xf32>
    %950 = math.log %949 : vector<8x128xf32>
    %951 = arith.addf %943, %950 : vector<8x128xf32>
    %952 = arith.mulf %951, %886 : vector<8x128xf32>
    %953 = vector.broadcast %6 : vector<8x1xf32> to vector<8x128xf32>
    %954 = arith.mulf %953, %886 : vector<8x128xf32>
    %cst_94 = arith.constant 0.000000e+00 : f32
    %955 = vector.broadcast %cst_94 : f32 to vector<8x128xf32>
    %956 = arith.subf %955, %951 : vector<8x128xf32>
    %957 = math.exp %956 : vector<8x128xf32>
    %958 = arith.mulf %957, %957 : vector<8x128xf32>
    %959 = arith.mulf %958, %957 : vector<8x128xf32>
    %960 = arith.mulf %959, %957 : vector<8x128xf32>
    %961 = vector.shape_cast %957 : vector<8x128xf32> to vector<1x8x128xf32>
    %962 = vector.shape_cast %958 : vector<8x128xf32> to vector<1x8x128xf32>
    %963 = vector.shape_cast %959 : vector<8x128xf32> to vector<1x8x128xf32>
    %964 = vector.shape_cast %960 : vector<8x128xf32> to vector<1x8x128xf32>
    %965 = tpu.concatenate %961, %962, %963, %964 in 0 : vector<1x8x128xf32>, vector<1x8x128xf32>, vector<1x8x128xf32>, vector<1x8x128xf32> -> vector<4x8x128xf32>
    %966 = arith.mulf %965, %768 : vector<4x8x128xf32>
    %967 = vector.shape_cast %952 : vector<8x128xf32> to vector<1x8x128xf32>
    %968 = vector.extract_strided_slice %934 {offsets = [0, 0], sizes = [4, 128], strides = [1, 1]} : vector<16x128xf32> to vector<4x128xf32>
    %969 = vector.shape_cast %968 : vector<4x128xf32> to vector<4x1x128xf32>
    %970 = vector.broadcast %967 : vector<1x8x128xf32> to vector<4x8x128xf32>
    %971 = vector.broadcast %969 : vector<4x1x128xf32> to vector<4x8x128xf32>
    %972 = arith.mulf %970, %971 : vector<4x8x128xf32>
    %973 = arith.addf %966, %972 : vector<4x8x128xf32>
    %974 = vector.extract_strided_slice %935 {offsets = [0, 0], sizes = [4, 128], strides = [1, 1]} : vector<16x128xf32> to vector<4x128xf32>
    %975 = vector.shape_cast %974 : vector<4x128xf32> to vector<4x1x128xf32>
    %976 = vector.broadcast %975 : vector<4x1x128xf32> to vector<4x8x128xf32>
    %977 = arith.mulf %973, %976 : vector<4x8x128xf32>
    %cst_95 = arith.constant dense<0.000000e+00> : vector<8x128xf32>
    %978 = vector.multi_reduction <add>, %977, %cst_95 [0] : vector<4x8x128xf32> to vector<8x128xf32>
    %979 = arith.addf %954, %978 : vector<8x128xf32>
    %980 = vector.shape_cast %960 : vector<8x128xf32> to vector<1x8x128xf32>
    %981 = vector.broadcast %980 : vector<1x8x128xf32> to vector<4x8x128xf32>
    %982 = arith.mulf %965, %981 : vector<4x8x128xf32>
    %983 = arith.mulf %982, %785 : vector<4x8x128xf32>
    %984 = vector.shape_cast %952 : vector<8x128xf32> to vector<1x8x128xf32>
    %985 = vector.extract_strided_slice %934 {offsets = [4, 0], sizes = [4, 128], strides = [1, 1]} : vector<16x128xf32> to vector<4x128xf32>
    %986 = vector.shape_cast %985 : vector<4x128xf32> to vector<4x1x128xf32>
    %987 = vector.broadcast %984 : vector<1x8x128xf32> to vector<4x8x128xf32>
    %988 = vector.broadcast %986 : vector<4x1x128xf32> to vector<4x8x128xf32>
    %989 = arith.mulf %987, %988 : vector<4x8x128xf32>
    %990 = arith.addf %983, %989 : vector<4x8x128xf32>
    %991 = vector.extract_strided_slice %935 {offsets = [4, 0], sizes = [4, 128], strides = [1, 1]} : vector<16x128xf32> to vector<4x128xf32>
    %992 = vector.shape_cast %991 : vector<4x128xf32> to vector<4x1x128xf32>
    %993 = vector.broadcast %992 : vector<4x1x128xf32> to vector<4x8x128xf32>
    %994 = arith.mulf %990, %993 : vector<4x8x128xf32>
    %cst_96 = arith.constant dense<0.000000e+00> : vector<8x128xf32>
    %995 = vector.multi_reduction <add>, %994, %cst_96 [0] : vector<4x8x128xf32> to vector<8x128xf32>
    %996 = arith.addf %979, %995 : vector<8x128xf32>
    %997 = vector.shape_cast %960 : vector<8x128xf32> to vector<1x8x128xf32>
    %998 = vector.broadcast %997 : vector<1x8x128xf32> to vector<4x8x128xf32>
    %999 = arith.mulf %982, %998 : vector<4x8x128xf32>
    %1000 = arith.mulf %999, %802 : vector<4x8x128xf32>
    %1001 = vector.shape_cast %952 : vector<8x128xf32> to vector<1x8x128xf32>
    %1002 = vector.extract_strided_slice %934 {offsets = [8, 0], sizes = [4, 128], strides = [1, 1]} : vector<16x128xf32> to vector<4x128xf32>
    %1003 = vector.shape_cast %1002 : vector<4x128xf32> to vector<4x1x128xf32>
    %1004 = vector.broadcast %1001 : vector<1x8x128xf32> to vector<4x8x128xf32>
    %1005 = vector.broadcast %1003 : vector<4x1x128xf32> to vector<4x8x128xf32>
    %1006 = arith.mulf %1004, %1005 : vector<4x8x128xf32>
    %1007 = arith.addf %1000, %1006 : vector<4x8x128xf32>
    %1008 = vector.extract_strided_slice %935 {offsets = [8, 0], sizes = [4, 128], strides = [1, 1]} : vector<16x128xf32> to vector<4x128xf32>
    %1009 = vector.shape_cast %1008 : vector<4x128xf32> to vector<4x1x128xf32>
    %1010 = vector.broadcast %1009 : vector<4x1x128xf32> to vector<4x8x128xf32>
    %1011 = arith.mulf %1007, %1010 : vector<4x8x128xf32>
    %cst_97 = arith.constant dense<0.000000e+00> : vector<8x128xf32>
    %1012 = vector.multi_reduction <add>, %1011, %cst_97 [0] : vector<4x8x128xf32> to vector<8x128xf32>
    %1013 = arith.addf %996, %1012 : vector<8x128xf32>
    %1014 = vector.shape_cast %960 : vector<8x128xf32> to vector<1x8x128xf32>
    %1015 = vector.broadcast %1014 : vector<1x8x128xf32> to vector<4x8x128xf32>
    %1016 = arith.mulf %999, %1015 : vector<4x8x128xf32>
    %1017 = arith.mulf %1016, %819 : vector<4x8x128xf32>
    %1018 = vector.shape_cast %952 : vector<8x128xf32> to vector<1x8x128xf32>
    %1019 = vector.extract_strided_slice %934 {offsets = [12, 0], sizes = [4, 128], strides = [1, 1]} : vector<16x128xf32> to vector<4x128xf32>
    %1020 = vector.shape_cast %1019 : vector<4x128xf32> to vector<4x1x128xf32>
    %1021 = vector.broadcast %1018 : vector<1x8x128xf32> to vector<4x8x128xf32>
    %1022 = vector.broadcast %1020 : vector<4x1x128xf32> to vector<4x8x128xf32>
    %1023 = arith.mulf %1021, %1022 : vector<4x8x128xf32>
    %1024 = arith.addf %1017, %1023 : vector<4x8x128xf32>
    %1025 = vector.extract_strided_slice %935 {offsets = [12, 0], sizes = [4, 128], strides = [1, 1]} : vector<16x128xf32> to vector<4x128xf32>
    %1026 = vector.shape_cast %1025 : vector<4x128xf32> to vector<4x1x128xf32>
    %1027 = vector.broadcast %1026 : vector<4x1x128xf32> to vector<4x8x128xf32>
    %1028 = arith.mulf %1024, %1027 : vector<4x8x128xf32>
    %cst_98 = arith.constant dense<0.000000e+00> : vector<8x128xf32>
    %1029 = vector.multi_reduction <add>, %1028, %cst_98 [0] : vector<4x8x128xf32> to vector<8x128xf32>
    %1030 = arith.addf %1013, %1029 : vector<8x128xf32>
    %cst_99 = arith.constant 5.000000e-01 : f32
    %1031 = vector.broadcast %cst_99 : f32 to vector<8x128xf32>
    %1032 = arith.mulf %1031, %861 : vector<8x128xf32>
    %1033 = math.tanh %1032 : vector<8x128xf32>
    %cst_100 = arith.constant 5.000000e-01 : f32
    %1034 = vector.broadcast %cst_100 : f32 to vector<8x128xf32>
    %1035 = arith.mulf %1034, %1033 : vector<8x128xf32>
    %cst_101 = arith.constant 5.000000e-01 : f32
    %1036 = vector.broadcast %cst_101 : f32 to vector<8x128xf32>
    %1037 = arith.addf %1035, %1036 : vector<8x128xf32>
    %1038 = arith.mulf %861, %1037 : vector<8x128xf32>
    %1039 = arith.mulf %1030, %1038 : vector<8x128xf32>
    %c0_102 = arith.constant 0 : index
    %c20 = arith.constant 20 : index
    %c0_103 = arith.constant 0 : index
    %1040 = vector.load %arg2[%c0_102, %c20, %c0_103] : memref<1x32x128xf32, #tpu.memory_space<vmem>>, vector<1x4x128xf32>
    %1041 = vector.shape_cast %1040 : vector<1x4x128xf32> to vector<4x128xf32>
    %1042 = vector.extract_strided_slice %0 {offsets = [0, 0], sizes = [16, 1], strides = [1, 1]} : vector<16x4xf32> to vector<16x1xf32>
    %1043 = vector.extract_strided_slice %1041 {offsets = [0, 0], sizes = [1, 128], strides = [1, 1]} : vector<4x128xf32> to vector<1x128xf32>
    %1044 = vector.broadcast %1042 : vector<16x1xf32> to vector<16x128xf32>
    %1045 = vector.broadcast %1043 : vector<1x128xf32> to vector<16x128xf32>
    %1046 = arith.mulf %1044, %1045 : vector<16x128xf32>
    %1047 = vector.extract_strided_slice %0 {offsets = [0, 1], sizes = [16, 1], strides = [1, 1]} : vector<16x4xf32> to vector<16x1xf32>
    %1048 = vector.extract_strided_slice %1041 {offsets = [1, 0], sizes = [1, 128], strides = [1, 1]} : vector<4x128xf32> to vector<1x128xf32>
    %1049 = vector.broadcast %1047 : vector<16x1xf32> to vector<16x128xf32>
    %1050 = vector.broadcast %1048 : vector<1x128xf32> to vector<16x128xf32>
    %1051 = arith.mulf %1049, %1050 : vector<16x128xf32>
    %1052 = arith.addf %1046, %1051 : vector<16x128xf32>
    %1053 = vector.extract_strided_slice %0 {offsets = [0, 2], sizes = [16, 1], strides = [1, 1]} : vector<16x4xf32> to vector<16x1xf32>
    %1054 = vector.extract_strided_slice %1041 {offsets = [2, 0], sizes = [1, 128], strides = [1, 1]} : vector<4x128xf32> to vector<1x128xf32>
    %1055 = vector.broadcast %1053 : vector<16x1xf32> to vector<16x128xf32>
    %1056 = vector.broadcast %1054 : vector<1x128xf32> to vector<16x128xf32>
    %1057 = arith.mulf %1055, %1056 : vector<16x128xf32>
    %1058 = arith.addf %1052, %1057 : vector<16x128xf32>
    %1059 = vector.extract_strided_slice %0 {offsets = [0, 3], sizes = [16, 1], strides = [1, 1]} : vector<16x4xf32> to vector<16x1xf32>
    %1060 = vector.extract_strided_slice %1041 {offsets = [3, 0], sizes = [1, 128], strides = [1, 1]} : vector<4x128xf32> to vector<1x128xf32>
    %1061 = vector.broadcast %1059 : vector<16x1xf32> to vector<16x128xf32>
    %1062 = vector.broadcast %1060 : vector<1x128xf32> to vector<16x128xf32>
    %1063 = arith.mulf %1061, %1062 : vector<16x128xf32>
    %1064 = arith.addf %1058, %1063 : vector<16x128xf32>
    %1065 = vector.extract_strided_slice %1064 {offsets = [0, 0], sizes = [8, 128], strides = [1, 1]} : vector<16x128xf32> to vector<8x128xf32>
    %1066 = vector.extract_strided_slice %1064 {offsets = [8, 0], sizes = [8, 128], strides = [1, 1]} : vector<16x128xf32> to vector<8x128xf32>
    %1067 = vector.extract_strided_slice %1 {offsets = [0, 3], sizes = [8, 1], strides = [1, 1]} : vector<8x4xf32> to vector<8x1xf32>
    %1068 = vector.broadcast %1067 : vector<8x1xf32> to vector<8x128xf32>
    %1069 = arith.mulf %1068, %1065 : vector<8x128xf32>
    %1070 = vector.broadcast %2 : vector<8x1xf32> to vector<8x128xf32>
    %1071 = arith.addf %1070, %1069 : vector<8x128xf32>
    %1072 = vector.extract_strided_slice %1 {offsets = [0, 0], sizes = [8, 1], strides = [1, 1]} : vector<8x4xf32> to vector<8x1xf32>
    %1073 = vector.broadcast %1072 : vector<8x1xf32> to vector<8x128xf32>
    %1074 = arith.mulf %1073, %450 : vector<8x128xf32>
    %1075 = arith.addf %1071, %1074 : vector<8x128xf32>
    %1076 = vector.extract_strided_slice %1 {offsets = [0, 1], sizes = [8, 1], strides = [1, 1]} : vector<8x4xf32> to vector<8x1xf32>
    %1077 = vector.broadcast %1076 : vector<8x1xf32> to vector<8x128xf32>
    %1078 = arith.mulf %1077, %655 : vector<8x128xf32>
    %1079 = arith.addf %1075, %1078 : vector<8x128xf32>
    %1080 = vector.extract_strided_slice %1 {offsets = [0, 2], sizes = [8, 1], strides = [1, 1]} : vector<8x4xf32> to vector<8x1xf32>
    %1081 = vector.broadcast %1080 : vector<8x1xf32> to vector<8x128xf32>
    %1082 = arith.mulf %1081, %860 : vector<8x128xf32>
    %1083 = arith.addf %1079, %1082 : vector<8x128xf32>
    %cst_104 = arith.constant 5.000000e-01 : f32
    %1084 = vector.broadcast %cst_104 : f32 to vector<8x128xf32>
    %1085 = arith.mulf %1084, %1083 : vector<8x128xf32>
    %1086 = math.tanh %1085 : vector<8x128xf32>
    %cst_105 = arith.constant 5.000000e-01 : f32
    %1087 = vector.broadcast %cst_105 : f32 to vector<8x128xf32>
    %1088 = arith.mulf %1087, %1086 : vector<8x128xf32>
    %cst_106 = arith.constant 5.000000e-01 : f32
    %1089 = vector.broadcast %cst_106 : f32 to vector<8x128xf32>
    %1090 = arith.addf %1088, %1089 : vector<8x128xf32>
    %1091 = arith.mulf %1083, %1090 : vector<8x128xf32>
    %1092 = vector.extract_strided_slice %3 {offsets = [0, 0], sizes = [33, 1], strides = [1, 1]} : vector<33x8xf32> to vector<33x1xf32>
    %1093 = vector.extract_strided_slice %1091 {offsets = [0, 0], sizes = [1, 128], strides = [1, 1]} : vector<8x128xf32> to vector<1x128xf32>
    %1094 = vector.broadcast %1092 : vector<33x1xf32> to vector<33x128xf32>
    %1095 = vector.broadcast %1093 : vector<1x128xf32> to vector<33x128xf32>
    %1096 = arith.mulf %1094, %1095 : vector<33x128xf32>
    %1097 = vector.extract_strided_slice %3 {offsets = [0, 1], sizes = [33, 1], strides = [1, 1]} : vector<33x8xf32> to vector<33x1xf32>
    %1098 = vector.extract_strided_slice %1091 {offsets = [1, 0], sizes = [1, 128], strides = [1, 1]} : vector<8x128xf32> to vector<1x128xf32>
    %1099 = vector.broadcast %1097 : vector<33x1xf32> to vector<33x128xf32>
    %1100 = vector.broadcast %1098 : vector<1x128xf32> to vector<33x128xf32>
    %1101 = arith.mulf %1099, %1100 : vector<33x128xf32>
    %1102 = arith.addf %1096, %1101 : vector<33x128xf32>
    %1103 = vector.extract_strided_slice %3 {offsets = [0, 2], sizes = [33, 1], strides = [1, 1]} : vector<33x8xf32> to vector<33x1xf32>
    %1104 = vector.extract_strided_slice %1091 {offsets = [2, 0], sizes = [1, 128], strides = [1, 1]} : vector<8x128xf32> to vector<1x128xf32>
    %1105 = vector.broadcast %1103 : vector<33x1xf32> to vector<33x128xf32>
    %1106 = vector.broadcast %1104 : vector<1x128xf32> to vector<33x128xf32>
    %1107 = arith.mulf %1105, %1106 : vector<33x128xf32>
    %1108 = arith.addf %1102, %1107 : vector<33x128xf32>
    %1109 = vector.extract_strided_slice %3 {offsets = [0, 3], sizes = [33, 1], strides = [1, 1]} : vector<33x8xf32> to vector<33x1xf32>
    %1110 = vector.extract_strided_slice %1091 {offsets = [3, 0], sizes = [1, 128], strides = [1, 1]} : vector<8x128xf32> to vector<1x128xf32>
    %1111 = vector.broadcast %1109 : vector<33x1xf32> to vector<33x128xf32>
    %1112 = vector.broadcast %1110 : vector<1x128xf32> to vector<33x128xf32>
    %1113 = arith.mulf %1111, %1112 : vector<33x128xf32>
    %1114 = arith.addf %1108, %1113 : vector<33x128xf32>
    %1115 = vector.extract_strided_slice %3 {offsets = [0, 4], sizes = [33, 1], strides = [1, 1]} : vector<33x8xf32> to vector<33x1xf32>
    %1116 = vector.extract_strided_slice %1091 {offsets = [4, 0], sizes = [1, 128], strides = [1, 1]} : vector<8x128xf32> to vector<1x128xf32>
    %1117 = vector.broadcast %1115 : vector<33x1xf32> to vector<33x128xf32>
    %1118 = vector.broadcast %1116 : vector<1x128xf32> to vector<33x128xf32>
    %1119 = arith.mulf %1117, %1118 : vector<33x128xf32>
    %1120 = arith.addf %1114, %1119 : vector<33x128xf32>
    %1121 = vector.extract_strided_slice %3 {offsets = [0, 5], sizes = [33, 1], strides = [1, 1]} : vector<33x8xf32> to vector<33x1xf32>
    %1122 = vector.extract_strided_slice %1091 {offsets = [5, 0], sizes = [1, 128], strides = [1, 1]} : vector<8x128xf32> to vector<1x128xf32>
    %1123 = vector.broadcast %1121 : vector<33x1xf32> to vector<33x128xf32>
    %1124 = vector.broadcast %1122 : vector<1x128xf32> to vector<33x128xf32>
    %1125 = arith.mulf %1123, %1124 : vector<33x128xf32>
    %1126 = arith.addf %1120, %1125 : vector<33x128xf32>
    %1127 = vector.extract_strided_slice %3 {offsets = [0, 6], sizes = [33, 1], strides = [1, 1]} : vector<33x8xf32> to vector<33x1xf32>
    %1128 = vector.extract_strided_slice %1091 {offsets = [6, 0], sizes = [1, 128], strides = [1, 1]} : vector<8x128xf32> to vector<1x128xf32>
    %1129 = vector.broadcast %1127 : vector<33x1xf32> to vector<33x128xf32>
    %1130 = vector.broadcast %1128 : vector<1x128xf32> to vector<33x128xf32>
    %1131 = arith.mulf %1129, %1130 : vector<33x128xf32>
    %1132 = arith.addf %1126, %1131 : vector<33x128xf32>
    %1133 = vector.extract_strided_slice %3 {offsets = [0, 7], sizes = [33, 1], strides = [1, 1]} : vector<33x8xf32> to vector<33x1xf32>
    %1134 = vector.extract_strided_slice %1091 {offsets = [7, 0], sizes = [1, 128], strides = [1, 1]} : vector<8x128xf32> to vector<1x128xf32>
    %1135 = vector.broadcast %1133 : vector<33x1xf32> to vector<33x128xf32>
    %1136 = vector.broadcast %1134 : vector<1x128xf32> to vector<33x128xf32>
    %1137 = arith.mulf %1135, %1136 : vector<33x128xf32>
    %1138 = arith.addf %1132, %1137 : vector<33x128xf32>
    %1139 = vector.extract_strided_slice %1138 {offsets = [0, 0], sizes = [16, 128], strides = [1, 1]} : vector<33x128xf32> to vector<16x128xf32>
    %1140 = vector.extract_strided_slice %1138 {offsets = [16, 0], sizes = [16, 128], strides = [1, 1]} : vector<33x128xf32> to vector<16x128xf32>
    %1141 = vector.extract_strided_slice %1138 {offsets = [32, 0], sizes = [1, 128], strides = [1, 1]} : vector<33x128xf32> to vector<1x128xf32>
    %1142 = vector.broadcast %4 : vector<8x1xf32> to vector<8x128xf32>
    %1143 = vector.broadcast %1141 : vector<1x128xf32> to vector<8x128xf32>
    %1144 = arith.mulf %1142, %1143 : vector<8x128xf32>
    %1145 = vector.broadcast %5 : vector<8x1xf32> to vector<8x128xf32>
    %1146 = arith.addf %1144, %1145 : vector<8x128xf32>
    %cst_107 = arith.constant 0.000000e+00 : f32
    %1147 = vector.broadcast %cst_107 : f32 to vector<8x128xf32>
    %1148 = arith.maximumf %1146, %1147 : vector<8x128xf32>
    %1149 = math.absf %1146 : vector<8x128xf32>
    %cst_108 = arith.constant 0.000000e+00 : f32
    %1150 = vector.broadcast %cst_108 : f32 to vector<8x128xf32>
    %1151 = arith.subf %1150, %1149 : vector<8x128xf32>
    %1152 = math.exp %1151 : vector<8x128xf32>
    %cst_109 = arith.constant 1.000000e+00 : f32
    %1153 = vector.broadcast %cst_109 : f32 to vector<8x128xf32>
    %1154 = arith.addf %1153, %1152 : vector<8x128xf32>
    %1155 = math.log %1154 : vector<8x128xf32>
    %1156 = arith.addf %1148, %1155 : vector<8x128xf32>
    %1157 = arith.mulf %1156, %1091 : vector<8x128xf32>
    %1158 = vector.broadcast %6 : vector<8x1xf32> to vector<8x128xf32>
    %1159 = arith.mulf %1158, %1091 : vector<8x128xf32>
    %cst_110 = arith.constant 0.000000e+00 : f32
    %1160 = vector.broadcast %cst_110 : f32 to vector<8x128xf32>
    %1161 = arith.subf %1160, %1156 : vector<8x128xf32>
    %1162 = math.exp %1161 : vector<8x128xf32>
    %1163 = arith.mulf %1162, %1162 : vector<8x128xf32>
    %1164 = arith.mulf %1163, %1162 : vector<8x128xf32>
    %1165 = arith.mulf %1164, %1162 : vector<8x128xf32>
    %1166 = vector.shape_cast %1162 : vector<8x128xf32> to vector<1x8x128xf32>
    %1167 = vector.shape_cast %1163 : vector<8x128xf32> to vector<1x8x128xf32>
    %1168 = vector.shape_cast %1164 : vector<8x128xf32> to vector<1x8x128xf32>
    %1169 = vector.shape_cast %1165 : vector<8x128xf32> to vector<1x8x128xf32>
    %1170 = tpu.concatenate %1166, %1167, %1168, %1169 in 0 : vector<1x8x128xf32>, vector<1x8x128xf32>, vector<1x8x128xf32>, vector<1x8x128xf32> -> vector<4x8x128xf32>
    %1171 = arith.mulf %1170, %973 : vector<4x8x128xf32>
    %1172 = vector.shape_cast %1157 : vector<8x128xf32> to vector<1x8x128xf32>
    %1173 = vector.extract_strided_slice %1139 {offsets = [0, 0], sizes = [4, 128], strides = [1, 1]} : vector<16x128xf32> to vector<4x128xf32>
    %1174 = vector.shape_cast %1173 : vector<4x128xf32> to vector<4x1x128xf32>
    %1175 = vector.broadcast %1172 : vector<1x8x128xf32> to vector<4x8x128xf32>
    %1176 = vector.broadcast %1174 : vector<4x1x128xf32> to vector<4x8x128xf32>
    %1177 = arith.mulf %1175, %1176 : vector<4x8x128xf32>
    %1178 = arith.addf %1171, %1177 : vector<4x8x128xf32>
    %1179 = vector.extract_strided_slice %1140 {offsets = [0, 0], sizes = [4, 128], strides = [1, 1]} : vector<16x128xf32> to vector<4x128xf32>
    %1180 = vector.shape_cast %1179 : vector<4x128xf32> to vector<4x1x128xf32>
    %1181 = vector.broadcast %1180 : vector<4x1x128xf32> to vector<4x8x128xf32>
    %1182 = arith.mulf %1178, %1181 : vector<4x8x128xf32>
    %cst_111 = arith.constant dense<0.000000e+00> : vector<8x128xf32>
    %1183 = vector.multi_reduction <add>, %1182, %cst_111 [0] : vector<4x8x128xf32> to vector<8x128xf32>
    %1184 = arith.addf %1159, %1183 : vector<8x128xf32>
    %1185 = vector.shape_cast %1165 : vector<8x128xf32> to vector<1x8x128xf32>
    %1186 = vector.broadcast %1185 : vector<1x8x128xf32> to vector<4x8x128xf32>
    %1187 = arith.mulf %1170, %1186 : vector<4x8x128xf32>
    %1188 = arith.mulf %1187, %990 : vector<4x8x128xf32>
    %1189 = vector.shape_cast %1157 : vector<8x128xf32> to vector<1x8x128xf32>
    %1190 = vector.extract_strided_slice %1139 {offsets = [4, 0], sizes = [4, 128], strides = [1, 1]} : vector<16x128xf32> to vector<4x128xf32>
    %1191 = vector.shape_cast %1190 : vector<4x128xf32> to vector<4x1x128xf32>
    %1192 = vector.broadcast %1189 : vector<1x8x128xf32> to vector<4x8x128xf32>
    %1193 = vector.broadcast %1191 : vector<4x1x128xf32> to vector<4x8x128xf32>
    %1194 = arith.mulf %1192, %1193 : vector<4x8x128xf32>
    %1195 = arith.addf %1188, %1194 : vector<4x8x128xf32>
    %1196 = vector.extract_strided_slice %1140 {offsets = [4, 0], sizes = [4, 128], strides = [1, 1]} : vector<16x128xf32> to vector<4x128xf32>
    %1197 = vector.shape_cast %1196 : vector<4x128xf32> to vector<4x1x128xf32>
    %1198 = vector.broadcast %1197 : vector<4x1x128xf32> to vector<4x8x128xf32>
    %1199 = arith.mulf %1195, %1198 : vector<4x8x128xf32>
    %cst_112 = arith.constant dense<0.000000e+00> : vector<8x128xf32>
    %1200 = vector.multi_reduction <add>, %1199, %cst_112 [0] : vector<4x8x128xf32> to vector<8x128xf32>
    %1201 = arith.addf %1184, %1200 : vector<8x128xf32>
    %1202 = vector.shape_cast %1165 : vector<8x128xf32> to vector<1x8x128xf32>
    %1203 = vector.broadcast %1202 : vector<1x8x128xf32> to vector<4x8x128xf32>
    %1204 = arith.mulf %1187, %1203 : vector<4x8x128xf32>
    %1205 = arith.mulf %1204, %1007 : vector<4x8x128xf32>
    %1206 = vector.shape_cast %1157 : vector<8x128xf32> to vector<1x8x128xf32>
    %1207 = vector.extract_strided_slice %1139 {offsets = [8, 0], sizes = [4, 128], strides = [1, 1]} : vector<16x128xf32> to vector<4x128xf32>
    %1208 = vector.shape_cast %1207 : vector<4x128xf32> to vector<4x1x128xf32>
    %1209 = vector.broadcast %1206 : vector<1x8x128xf32> to vector<4x8x128xf32>
    %1210 = vector.broadcast %1208 : vector<4x1x128xf32> to vector<4x8x128xf32>
    %1211 = arith.mulf %1209, %1210 : vector<4x8x128xf32>
    %1212 = arith.addf %1205, %1211 : vector<4x8x128xf32>
    %1213 = vector.extract_strided_slice %1140 {offsets = [8, 0], sizes = [4, 128], strides = [1, 1]} : vector<16x128xf32> to vector<4x128xf32>
    %1214 = vector.shape_cast %1213 : vector<4x128xf32> to vector<4x1x128xf32>
    %1215 = vector.broadcast %1214 : vector<4x1x128xf32> to vector<4x8x128xf32>
    %1216 = arith.mulf %1212, %1215 : vector<4x8x128xf32>
    %cst_113 = arith.constant dense<0.000000e+00> : vector<8x128xf32>
    %1217 = vector.multi_reduction <add>, %1216, %cst_113 [0] : vector<4x8x128xf32> to vector<8x128xf32>
    %1218 = arith.addf %1201, %1217 : vector<8x128xf32>
    %1219 = vector.shape_cast %1165 : vector<8x128xf32> to vector<1x8x128xf32>
    %1220 = vector.broadcast %1219 : vector<1x8x128xf32> to vector<4x8x128xf32>
    %1221 = arith.mulf %1204, %1220 : vector<4x8x128xf32>
    %1222 = arith.mulf %1221, %1024 : vector<4x8x128xf32>
    %1223 = vector.shape_cast %1157 : vector<8x128xf32> to vector<1x8x128xf32>
    %1224 = vector.extract_strided_slice %1139 {offsets = [12, 0], sizes = [4, 128], strides = [1, 1]} : vector<16x128xf32> to vector<4x128xf32>
    %1225 = vector.shape_cast %1224 : vector<4x128xf32> to vector<4x1x128xf32>
    %1226 = vector.broadcast %1223 : vector<1x8x128xf32> to vector<4x8x128xf32>
    %1227 = vector.broadcast %1225 : vector<4x1x128xf32> to vector<4x8x128xf32>
    %1228 = arith.mulf %1226, %1227 : vector<4x8x128xf32>
    %1229 = arith.addf %1222, %1228 : vector<4x8x128xf32>
    %1230 = vector.extract_strided_slice %1140 {offsets = [12, 0], sizes = [4, 128], strides = [1, 1]} : vector<16x128xf32> to vector<4x128xf32>
    %1231 = vector.shape_cast %1230 : vector<4x128xf32> to vector<4x1x128xf32>
    %1232 = vector.broadcast %1231 : vector<4x1x128xf32> to vector<4x8x128xf32>
    %1233 = arith.mulf %1229, %1232 : vector<4x8x128xf32>
    %cst_114 = arith.constant dense<0.000000e+00> : vector<8x128xf32>
    %1234 = vector.multi_reduction <add>, %1233, %cst_114 [0] : vector<4x8x128xf32> to vector<8x128xf32>
    %1235 = arith.addf %1218, %1234 : vector<8x128xf32>
    %cst_115 = arith.constant 5.000000e-01 : f32
    %1236 = vector.broadcast %cst_115 : f32 to vector<8x128xf32>
    %1237 = arith.mulf %1236, %1066 : vector<8x128xf32>
    %1238 = math.tanh %1237 : vector<8x128xf32>
    %cst_116 = arith.constant 5.000000e-01 : f32
    %1239 = vector.broadcast %cst_116 : f32 to vector<8x128xf32>
    %1240 = arith.mulf %1239, %1238 : vector<8x128xf32>
    %cst_117 = arith.constant 5.000000e-01 : f32
    %1241 = vector.broadcast %cst_117 : f32 to vector<8x128xf32>
    %1242 = arith.addf %1240, %1241 : vector<8x128xf32>
    %1243 = arith.mulf %1066, %1242 : vector<8x128xf32>
    %1244 = arith.mulf %1235, %1243 : vector<8x128xf32>
    %c0_118 = arith.constant 0 : index
    %c24 = arith.constant 24 : index
    %c0_119 = arith.constant 0 : index
    %1245 = vector.load %arg2[%c0_118, %c24, %c0_119] : memref<1x32x128xf32, #tpu.memory_space<vmem>>, vector<1x4x128xf32>
    %1246 = vector.shape_cast %1245 : vector<1x4x128xf32> to vector<4x128xf32>
    %1247 = vector.extract_strided_slice %0 {offsets = [0, 0], sizes = [16, 1], strides = [1, 1]} : vector<16x4xf32> to vector<16x1xf32>
    %1248 = vector.extract_strided_slice %1246 {offsets = [0, 0], sizes = [1, 128], strides = [1, 1]} : vector<4x128xf32> to vector<1x128xf32>
    %1249 = vector.broadcast %1247 : vector<16x1xf32> to vector<16x128xf32>
    %1250 = vector.broadcast %1248 : vector<1x128xf32> to vector<16x128xf32>
    %1251 = arith.mulf %1249, %1250 : vector<16x128xf32>
    %1252 = vector.extract_strided_slice %0 {offsets = [0, 1], sizes = [16, 1], strides = [1, 1]} : vector<16x4xf32> to vector<16x1xf32>
    %1253 = vector.extract_strided_slice %1246 {offsets = [1, 0], sizes = [1, 128], strides = [1, 1]} : vector<4x128xf32> to vector<1x128xf32>
    %1254 = vector.broadcast %1252 : vector<16x1xf32> to vector<16x128xf32>
    %1255 = vector.broadcast %1253 : vector<1x128xf32> to vector<16x128xf32>
    %1256 = arith.mulf %1254, %1255 : vector<16x128xf32>
    %1257 = arith.addf %1251, %1256 : vector<16x128xf32>
    %1258 = vector.extract_strided_slice %0 {offsets = [0, 2], sizes = [16, 1], strides = [1, 1]} : vector<16x4xf32> to vector<16x1xf32>
    %1259 = vector.extract_strided_slice %1246 {offsets = [2, 0], sizes = [1, 128], strides = [1, 1]} : vector<4x128xf32> to vector<1x128xf32>
    %1260 = vector.broadcast %1258 : vector<16x1xf32> to vector<16x128xf32>
    %1261 = vector.broadcast %1259 : vector<1x128xf32> to vector<16x128xf32>
    %1262 = arith.mulf %1260, %1261 : vector<16x128xf32>
    %1263 = arith.addf %1257, %1262 : vector<16x128xf32>
    %1264 = vector.extract_strided_slice %0 {offsets = [0, 3], sizes = [16, 1], strides = [1, 1]} : vector<16x4xf32> to vector<16x1xf32>
    %1265 = vector.extract_strided_slice %1246 {offsets = [3, 0], sizes = [1, 128], strides = [1, 1]} : vector<4x128xf32> to vector<1x128xf32>
    %1266 = vector.broadcast %1264 : vector<16x1xf32> to vector<16x128xf32>
    %1267 = vector.broadcast %1265 : vector<1x128xf32> to vector<16x128xf32>
    %1268 = arith.mulf %1266, %1267 : vector<16x128xf32>
    %1269 = arith.addf %1263, %1268 : vector<16x128xf32>
    %1270 = vector.extract_strided_slice %1269 {offsets = [0, 0], sizes = [8, 128], strides = [1, 1]} : vector<16x128xf32> to vector<8x128xf32>
    %1271 = vector.extract_strided_slice %1269 {offsets = [8, 0], sizes = [8, 128], strides = [1, 1]} : vector<16x128xf32> to vector<8x128xf32>
    %1272 = vector.extract_strided_slice %1 {offsets = [0, 3], sizes = [8, 1], strides = [1, 1]} : vector<8x4xf32> to vector<8x1xf32>
    %1273 = vector.broadcast %1272 : vector<8x1xf32> to vector<8x128xf32>
    %1274 = arith.mulf %1273, %1270 : vector<8x128xf32>
    %1275 = vector.broadcast %2 : vector<8x1xf32> to vector<8x128xf32>
    %1276 = arith.addf %1275, %1274 : vector<8x128xf32>
    %1277 = vector.extract_strided_slice %1 {offsets = [0, 0], sizes = [8, 1], strides = [1, 1]} : vector<8x4xf32> to vector<8x1xf32>
    %1278 = vector.broadcast %1277 : vector<8x1xf32> to vector<8x128xf32>
    %1279 = arith.mulf %1278, %655 : vector<8x128xf32>
    %1280 = arith.addf %1276, %1279 : vector<8x128xf32>
    %1281 = vector.extract_strided_slice %1 {offsets = [0, 1], sizes = [8, 1], strides = [1, 1]} : vector<8x4xf32> to vector<8x1xf32>
    %1282 = vector.broadcast %1281 : vector<8x1xf32> to vector<8x128xf32>
    %1283 = arith.mulf %1282, %860 : vector<8x128xf32>
    %1284 = arith.addf %1280, %1283 : vector<8x128xf32>
    %1285 = vector.extract_strided_slice %1 {offsets = [0, 2], sizes = [8, 1], strides = [1, 1]} : vector<8x4xf32> to vector<8x1xf32>
    %1286 = vector.broadcast %1285 : vector<8x1xf32> to vector<8x128xf32>
    %1287 = arith.mulf %1286, %1065 : vector<8x128xf32>
    %1288 = arith.addf %1284, %1287 : vector<8x128xf32>
    %cst_120 = arith.constant 5.000000e-01 : f32
    %1289 = vector.broadcast %cst_120 : f32 to vector<8x128xf32>
    %1290 = arith.mulf %1289, %1288 : vector<8x128xf32>
    %1291 = math.tanh %1290 : vector<8x128xf32>
    %cst_121 = arith.constant 5.000000e-01 : f32
    %1292 = vector.broadcast %cst_121 : f32 to vector<8x128xf32>
    %1293 = arith.mulf %1292, %1291 : vector<8x128xf32>
    %cst_122 = arith.constant 5.000000e-01 : f32
    %1294 = vector.broadcast %cst_122 : f32 to vector<8x128xf32>
    %1295 = arith.addf %1293, %1294 : vector<8x128xf32>
    %1296 = arith.mulf %1288, %1295 : vector<8x128xf32>
    %1297 = vector.extract_strided_slice %3 {offsets = [0, 0], sizes = [33, 1], strides = [1, 1]} : vector<33x8xf32> to vector<33x1xf32>
    %1298 = vector.extract_strided_slice %1296 {offsets = [0, 0], sizes = [1, 128], strides = [1, 1]} : vector<8x128xf32> to vector<1x128xf32>
    %1299 = vector.broadcast %1297 : vector<33x1xf32> to vector<33x128xf32>
    %1300 = vector.broadcast %1298 : vector<1x128xf32> to vector<33x128xf32>
    %1301 = arith.mulf %1299, %1300 : vector<33x128xf32>
    %1302 = vector.extract_strided_slice %3 {offsets = [0, 1], sizes = [33, 1], strides = [1, 1]} : vector<33x8xf32> to vector<33x1xf32>
    %1303 = vector.extract_strided_slice %1296 {offsets = [1, 0], sizes = [1, 128], strides = [1, 1]} : vector<8x128xf32> to vector<1x128xf32>
    %1304 = vector.broadcast %1302 : vector<33x1xf32> to vector<33x128xf32>
    %1305 = vector.broadcast %1303 : vector<1x128xf32> to vector<33x128xf32>
    %1306 = arith.mulf %1304, %1305 : vector<33x128xf32>
    %1307 = arith.addf %1301, %1306 : vector<33x128xf32>
    %1308 = vector.extract_strided_slice %3 {offsets = [0, 2], sizes = [33, 1], strides = [1, 1]} : vector<33x8xf32> to vector<33x1xf32>
    %1309 = vector.extract_strided_slice %1296 {offsets = [2, 0], sizes = [1, 128], strides = [1, 1]} : vector<8x128xf32> to vector<1x128xf32>
    %1310 = vector.broadcast %1308 : vector<33x1xf32> to vector<33x128xf32>
    %1311 = vector.broadcast %1309 : vector<1x128xf32> to vector<33x128xf32>
    %1312 = arith.mulf %1310, %1311 : vector<33x128xf32>
    %1313 = arith.addf %1307, %1312 : vector<33x128xf32>
    %1314 = vector.extract_strided_slice %3 {offsets = [0, 3], sizes = [33, 1], strides = [1, 1]} : vector<33x8xf32> to vector<33x1xf32>
    %1315 = vector.extract_strided_slice %1296 {offsets = [3, 0], sizes = [1, 128], strides = [1, 1]} : vector<8x128xf32> to vector<1x128xf32>
    %1316 = vector.broadcast %1314 : vector<33x1xf32> to vector<33x128xf32>
    %1317 = vector.broadcast %1315 : vector<1x128xf32> to vector<33x128xf32>
    %1318 = arith.mulf %1316, %1317 : vector<33x128xf32>
    %1319 = arith.addf %1313, %1318 : vector<33x128xf32>
    %1320 = vector.extract_strided_slice %3 {offsets = [0, 4], sizes = [33, 1], strides = [1, 1]} : vector<33x8xf32> to vector<33x1xf32>
    %1321 = vector.extract_strided_slice %1296 {offsets = [4, 0], sizes = [1, 128], strides = [1, 1]} : vector<8x128xf32> to vector<1x128xf32>
    %1322 = vector.broadcast %1320 : vector<33x1xf32> to vector<33x128xf32>
    %1323 = vector.broadcast %1321 : vector<1x128xf32> to vector<33x128xf32>
    %1324 = arith.mulf %1322, %1323 : vector<33x128xf32>
    %1325 = arith.addf %1319, %1324 : vector<33x128xf32>
    %1326 = vector.extract_strided_slice %3 {offsets = [0, 5], sizes = [33, 1], strides = [1, 1]} : vector<33x8xf32> to vector<33x1xf32>
    %1327 = vector.extract_strided_slice %1296 {offsets = [5, 0], sizes = [1, 128], strides = [1, 1]} : vector<8x128xf32> to vector<1x128xf32>
    %1328 = vector.broadcast %1326 : vector<33x1xf32> to vector<33x128xf32>
    %1329 = vector.broadcast %1327 : vector<1x128xf32> to vector<33x128xf32>
    %1330 = arith.mulf %1328, %1329 : vector<33x128xf32>
    %1331 = arith.addf %1325, %1330 : vector<33x128xf32>
    %1332 = vector.extract_strided_slice %3 {offsets = [0, 6], sizes = [33, 1], strides = [1, 1]} : vector<33x8xf32> to vector<33x1xf32>
    %1333 = vector.extract_strided_slice %1296 {offsets = [6, 0], sizes = [1, 128], strides = [1, 1]} : vector<8x128xf32> to vector<1x128xf32>
    %1334 = vector.broadcast %1332 : vector<33x1xf32> to vector<33x128xf32>
    %1335 = vector.broadcast %1333 : vector<1x128xf32> to vector<33x128xf32>
    %1336 = arith.mulf %1334, %1335 : vector<33x128xf32>
    %1337 = arith.addf %1331, %1336 : vector<33x128xf32>
    %1338 = vector.extract_strided_slice %3 {offsets = [0, 7], sizes = [33, 1], strides = [1, 1]} : vector<33x8xf32> to vector<33x1xf32>
    %1339 = vector.extract_strided_slice %1296 {offsets = [7, 0], sizes = [1, 128], strides = [1, 1]} : vector<8x128xf32> to vector<1x128xf32>
    %1340 = vector.broadcast %1338 : vector<33x1xf32> to vector<33x128xf32>
    %1341 = vector.broadcast %1339 : vector<1x128xf32> to vector<33x128xf32>
    %1342 = arith.mulf %1340, %1341 : vector<33x128xf32>
    %1343 = arith.addf %1337, %1342 : vector<33x128xf32>
    %1344 = vector.extract_strided_slice %1343 {offsets = [0, 0], sizes = [16, 128], strides = [1, 1]} : vector<33x128xf32> to vector<16x128xf32>
    %1345 = vector.extract_strided_slice %1343 {offsets = [16, 0], sizes = [16, 128], strides = [1, 1]} : vector<33x128xf32> to vector<16x128xf32>
    %1346 = vector.extract_strided_slice %1343 {offsets = [32, 0], sizes = [1, 128], strides = [1, 1]} : vector<33x128xf32> to vector<1x128xf32>
    %1347 = vector.broadcast %4 : vector<8x1xf32> to vector<8x128xf32>
    %1348 = vector.broadcast %1346 : vector<1x128xf32> to vector<8x128xf32>
    %1349 = arith.mulf %1347, %1348 : vector<8x128xf32>
    %1350 = vector.broadcast %5 : vector<8x1xf32> to vector<8x128xf32>
    %1351 = arith.addf %1349, %1350 : vector<8x128xf32>
    %cst_123 = arith.constant 0.000000e+00 : f32
    %1352 = vector.broadcast %cst_123 : f32 to vector<8x128xf32>
    %1353 = arith.maximumf %1351, %1352 : vector<8x128xf32>
    %1354 = math.absf %1351 : vector<8x128xf32>
    %cst_124 = arith.constant 0.000000e+00 : f32
    %1355 = vector.broadcast %cst_124 : f32 to vector<8x128xf32>
    %1356 = arith.subf %1355, %1354 : vector<8x128xf32>
    %1357 = math.exp %1356 : vector<8x128xf32>
    %cst_125 = arith.constant 1.000000e+00 : f32
    %1358 = vector.broadcast %cst_125 : f32 to vector<8x128xf32>
    %1359 = arith.addf %1358, %1357 : vector<8x128xf32>
    %1360 = math.log %1359 : vector<8x128xf32>
    %1361 = arith.addf %1353, %1360 : vector<8x128xf32>
    %1362 = arith.mulf %1361, %1296 : vector<8x128xf32>
    %1363 = vector.broadcast %6 : vector<8x1xf32> to vector<8x128xf32>
    %1364 = arith.mulf %1363, %1296 : vector<8x128xf32>
    %cst_126 = arith.constant 0.000000e+00 : f32
    %1365 = vector.broadcast %cst_126 : f32 to vector<8x128xf32>
    %1366 = arith.subf %1365, %1361 : vector<8x128xf32>
    %1367 = math.exp %1366 : vector<8x128xf32>
    %1368 = arith.mulf %1367, %1367 : vector<8x128xf32>
    %1369 = arith.mulf %1368, %1367 : vector<8x128xf32>
    %1370 = arith.mulf %1369, %1367 : vector<8x128xf32>
    %1371 = vector.shape_cast %1367 : vector<8x128xf32> to vector<1x8x128xf32>
    %1372 = vector.shape_cast %1368 : vector<8x128xf32> to vector<1x8x128xf32>
    %1373 = vector.shape_cast %1369 : vector<8x128xf32> to vector<1x8x128xf32>
    %1374 = vector.shape_cast %1370 : vector<8x128xf32> to vector<1x8x128xf32>
    %1375 = tpu.concatenate %1371, %1372, %1373, %1374 in 0 : vector<1x8x128xf32>, vector<1x8x128xf32>, vector<1x8x128xf32>, vector<1x8x128xf32> -> vector<4x8x128xf32>
    %1376 = arith.mulf %1375, %1178 : vector<4x8x128xf32>
    %1377 = vector.shape_cast %1362 : vector<8x128xf32> to vector<1x8x128xf32>
    %1378 = vector.extract_strided_slice %1344 {offsets = [0, 0], sizes = [4, 128], strides = [1, 1]} : vector<16x128xf32> to vector<4x128xf32>
    %1379 = vector.shape_cast %1378 : vector<4x128xf32> to vector<4x1x128xf32>
    %1380 = vector.broadcast %1377 : vector<1x8x128xf32> to vector<4x8x128xf32>
    %1381 = vector.broadcast %1379 : vector<4x1x128xf32> to vector<4x8x128xf32>
    %1382 = arith.mulf %1380, %1381 : vector<4x8x128xf32>
    %1383 = arith.addf %1376, %1382 : vector<4x8x128xf32>
    %1384 = vector.extract_strided_slice %1345 {offsets = [0, 0], sizes = [4, 128], strides = [1, 1]} : vector<16x128xf32> to vector<4x128xf32>
    %1385 = vector.shape_cast %1384 : vector<4x128xf32> to vector<4x1x128xf32>
    %1386 = vector.broadcast %1385 : vector<4x1x128xf32> to vector<4x8x128xf32>
    %1387 = arith.mulf %1383, %1386 : vector<4x8x128xf32>
    %cst_127 = arith.constant dense<0.000000e+00> : vector<8x128xf32>
    %1388 = vector.multi_reduction <add>, %1387, %cst_127 [0] : vector<4x8x128xf32> to vector<8x128xf32>
    %1389 = arith.addf %1364, %1388 : vector<8x128xf32>
    %1390 = vector.shape_cast %1370 : vector<8x128xf32> to vector<1x8x128xf32>
    %1391 = vector.broadcast %1390 : vector<1x8x128xf32> to vector<4x8x128xf32>
    %1392 = arith.mulf %1375, %1391 : vector<4x8x128xf32>
    %1393 = arith.mulf %1392, %1195 : vector<4x8x128xf32>
    %1394 = vector.shape_cast %1362 : vector<8x128xf32> to vector<1x8x128xf32>
    %1395 = vector.extract_strided_slice %1344 {offsets = [4, 0], sizes = [4, 128], strides = [1, 1]} : vector<16x128xf32> to vector<4x128xf32>
    %1396 = vector.shape_cast %1395 : vector<4x128xf32> to vector<4x1x128xf32>
    %1397 = vector.broadcast %1394 : vector<1x8x128xf32> to vector<4x8x128xf32>
    %1398 = vector.broadcast %1396 : vector<4x1x128xf32> to vector<4x8x128xf32>
    %1399 = arith.mulf %1397, %1398 : vector<4x8x128xf32>
    %1400 = arith.addf %1393, %1399 : vector<4x8x128xf32>
    %1401 = vector.extract_strided_slice %1345 {offsets = [4, 0], sizes = [4, 128], strides = [1, 1]} : vector<16x128xf32> to vector<4x128xf32>
    %1402 = vector.shape_cast %1401 : vector<4x128xf32> to vector<4x1x128xf32>
    %1403 = vector.broadcast %1402 : vector<4x1x128xf32> to vector<4x8x128xf32>
    %1404 = arith.mulf %1400, %1403 : vector<4x8x128xf32>
    %cst_128 = arith.constant dense<0.000000e+00> : vector<8x128xf32>
    %1405 = vector.multi_reduction <add>, %1404, %cst_128 [0] : vector<4x8x128xf32> to vector<8x128xf32>
    %1406 = arith.addf %1389, %1405 : vector<8x128xf32>
    %1407 = vector.shape_cast %1370 : vector<8x128xf32> to vector<1x8x128xf32>
    %1408 = vector.broadcast %1407 : vector<1x8x128xf32> to vector<4x8x128xf32>
    %1409 = arith.mulf %1392, %1408 : vector<4x8x128xf32>
    %1410 = arith.mulf %1409, %1212 : vector<4x8x128xf32>
    %1411 = vector.shape_cast %1362 : vector<8x128xf32> to vector<1x8x128xf32>
    %1412 = vector.extract_strided_slice %1344 {offsets = [8, 0], sizes = [4, 128], strides = [1, 1]} : vector<16x128xf32> to vector<4x128xf32>
    %1413 = vector.shape_cast %1412 : vector<4x128xf32> to vector<4x1x128xf32>
    %1414 = vector.broadcast %1411 : vector<1x8x128xf32> to vector<4x8x128xf32>
    %1415 = vector.broadcast %1413 : vector<4x1x128xf32> to vector<4x8x128xf32>
    %1416 = arith.mulf %1414, %1415 : vector<4x8x128xf32>
    %1417 = arith.addf %1410, %1416 : vector<4x8x128xf32>
    %1418 = vector.extract_strided_slice %1345 {offsets = [8, 0], sizes = [4, 128], strides = [1, 1]} : vector<16x128xf32> to vector<4x128xf32>
    %1419 = vector.shape_cast %1418 : vector<4x128xf32> to vector<4x1x128xf32>
    %1420 = vector.broadcast %1419 : vector<4x1x128xf32> to vector<4x8x128xf32>
    %1421 = arith.mulf %1417, %1420 : vector<4x8x128xf32>
    %cst_129 = arith.constant dense<0.000000e+00> : vector<8x128xf32>
    %1422 = vector.multi_reduction <add>, %1421, %cst_129 [0] : vector<4x8x128xf32> to vector<8x128xf32>
    %1423 = arith.addf %1406, %1422 : vector<8x128xf32>
    %1424 = vector.shape_cast %1370 : vector<8x128xf32> to vector<1x8x128xf32>
    %1425 = vector.broadcast %1424 : vector<1x8x128xf32> to vector<4x8x128xf32>
    %1426 = arith.mulf %1409, %1425 : vector<4x8x128xf32>
    %1427 = arith.mulf %1426, %1229 : vector<4x8x128xf32>
    %1428 = vector.shape_cast %1362 : vector<8x128xf32> to vector<1x8x128xf32>
    %1429 = vector.extract_strided_slice %1344 {offsets = [12, 0], sizes = [4, 128], strides = [1, 1]} : vector<16x128xf32> to vector<4x128xf32>
    %1430 = vector.shape_cast %1429 : vector<4x128xf32> to vector<4x1x128xf32>
    %1431 = vector.broadcast %1428 : vector<1x8x128xf32> to vector<4x8x128xf32>
    %1432 = vector.broadcast %1430 : vector<4x1x128xf32> to vector<4x8x128xf32>
    %1433 = arith.mulf %1431, %1432 : vector<4x8x128xf32>
    %1434 = arith.addf %1427, %1433 : vector<4x8x128xf32>
    %1435 = vector.extract_strided_slice %1345 {offsets = [12, 0], sizes = [4, 128], strides = [1, 1]} : vector<16x128xf32> to vector<4x128xf32>
    %1436 = vector.shape_cast %1435 : vector<4x128xf32> to vector<4x1x128xf32>
    %1437 = vector.broadcast %1436 : vector<4x1x128xf32> to vector<4x8x128xf32>
    %1438 = arith.mulf %1434, %1437 : vector<4x8x128xf32>
    %cst_130 = arith.constant dense<0.000000e+00> : vector<8x128xf32>
    %1439 = vector.multi_reduction <add>, %1438, %cst_130 [0] : vector<4x8x128xf32> to vector<8x128xf32>
    %1440 = arith.addf %1423, %1439 : vector<8x128xf32>
    %cst_131 = arith.constant 5.000000e-01 : f32
    %1441 = vector.broadcast %cst_131 : f32 to vector<8x128xf32>
    %1442 = arith.mulf %1441, %1271 : vector<8x128xf32>
    %1443 = math.tanh %1442 : vector<8x128xf32>
    %cst_132 = arith.constant 5.000000e-01 : f32
    %1444 = vector.broadcast %cst_132 : f32 to vector<8x128xf32>
    %1445 = arith.mulf %1444, %1443 : vector<8x128xf32>
    %cst_133 = arith.constant 5.000000e-01 : f32
    %1446 = vector.broadcast %cst_133 : f32 to vector<8x128xf32>
    %1447 = arith.addf %1445, %1446 : vector<8x128xf32>
    %1448 = arith.mulf %1271, %1447 : vector<8x128xf32>
    %1449 = arith.mulf %1440, %1448 : vector<8x128xf32>
    %c0_134 = arith.constant 0 : index
    %c28 = arith.constant 28 : index
    %c0_135 = arith.constant 0 : index
    %1450 = vector.load %arg2[%c0_134, %c28, %c0_135] : memref<1x32x128xf32, #tpu.memory_space<vmem>>, vector<1x4x128xf32>
    %1451 = vector.shape_cast %1450 : vector<1x4x128xf32> to vector<4x128xf32>
    %1452 = vector.extract_strided_slice %0 {offsets = [0, 0], sizes = [16, 1], strides = [1, 1]} : vector<16x4xf32> to vector<16x1xf32>
    %1453 = vector.extract_strided_slice %1451 {offsets = [0, 0], sizes = [1, 128], strides = [1, 1]} : vector<4x128xf32> to vector<1x128xf32>
    %1454 = vector.broadcast %1452 : vector<16x1xf32> to vector<16x128xf32>
    %1455 = vector.broadcast %1453 : vector<1x128xf32> to vector<16x128xf32>
    %1456 = arith.mulf %1454, %1455 : vector<16x128xf32>
    %1457 = vector.extract_strided_slice %0 {offsets = [0, 1], sizes = [16, 1], strides = [1, 1]} : vector<16x4xf32> to vector<16x1xf32>
    %1458 = vector.extract_strided_slice %1451 {offsets = [1, 0], sizes = [1, 128], strides = [1, 1]} : vector<4x128xf32> to vector<1x128xf32>
    %1459 = vector.broadcast %1457 : vector<16x1xf32> to vector<16x128xf32>
    %1460 = vector.broadcast %1458 : vector<1x128xf32> to vector<16x128xf32>
    %1461 = arith.mulf %1459, %1460 : vector<16x128xf32>
    %1462 = arith.addf %1456, %1461 : vector<16x128xf32>
    %1463 = vector.extract_strided_slice %0 {offsets = [0, 2], sizes = [16, 1], strides = [1, 1]} : vector<16x4xf32> to vector<16x1xf32>
    %1464 = vector.extract_strided_slice %1451 {offsets = [2, 0], sizes = [1, 128], strides = [1, 1]} : vector<4x128xf32> to vector<1x128xf32>
    %1465 = vector.broadcast %1463 : vector<16x1xf32> to vector<16x128xf32>
    %1466 = vector.broadcast %1464 : vector<1x128xf32> to vector<16x128xf32>
    %1467 = arith.mulf %1465, %1466 : vector<16x128xf32>
    %1468 = arith.addf %1462, %1467 : vector<16x128xf32>
    %1469 = vector.extract_strided_slice %0 {offsets = [0, 3], sizes = [16, 1], strides = [1, 1]} : vector<16x4xf32> to vector<16x1xf32>
    %1470 = vector.extract_strided_slice %1451 {offsets = [3, 0], sizes = [1, 128], strides = [1, 1]} : vector<4x128xf32> to vector<1x128xf32>
    %1471 = vector.broadcast %1469 : vector<16x1xf32> to vector<16x128xf32>
    %1472 = vector.broadcast %1470 : vector<1x128xf32> to vector<16x128xf32>
    %1473 = arith.mulf %1471, %1472 : vector<16x128xf32>
    %1474 = arith.addf %1468, %1473 : vector<16x128xf32>
    %1475 = vector.extract_strided_slice %1474 {offsets = [0, 0], sizes = [8, 128], strides = [1, 1]} : vector<16x128xf32> to vector<8x128xf32>
    %1476 = vector.extract_strided_slice %1474 {offsets = [8, 0], sizes = [8, 128], strides = [1, 1]} : vector<16x128xf32> to vector<8x128xf32>
    %1477 = vector.extract_strided_slice %1 {offsets = [0, 3], sizes = [8, 1], strides = [1, 1]} : vector<8x4xf32> to vector<8x1xf32>
    %1478 = vector.broadcast %1477 : vector<8x1xf32> to vector<8x128xf32>
    %1479 = arith.mulf %1478, %1475 : vector<8x128xf32>
    %1480 = vector.broadcast %2 : vector<8x1xf32> to vector<8x128xf32>
    %1481 = arith.addf %1480, %1479 : vector<8x128xf32>
    %1482 = vector.extract_strided_slice %1 {offsets = [0, 0], sizes = [8, 1], strides = [1, 1]} : vector<8x4xf32> to vector<8x1xf32>
    %1483 = vector.broadcast %1482 : vector<8x1xf32> to vector<8x128xf32>
    %1484 = arith.mulf %1483, %860 : vector<8x128xf32>
    %1485 = arith.addf %1481, %1484 : vector<8x128xf32>
    %1486 = vector.extract_strided_slice %1 {offsets = [0, 1], sizes = [8, 1], strides = [1, 1]} : vector<8x4xf32> to vector<8x1xf32>
    %1487 = vector.broadcast %1486 : vector<8x1xf32> to vector<8x128xf32>
    %1488 = arith.mulf %1487, %1065 : vector<8x128xf32>
    %1489 = arith.addf %1485, %1488 : vector<8x128xf32>
    %1490 = vector.extract_strided_slice %1 {offsets = [0, 2], sizes = [8, 1], strides = [1, 1]} : vector<8x4xf32> to vector<8x1xf32>
    %1491 = vector.broadcast %1490 : vector<8x1xf32> to vector<8x128xf32>
    %1492 = arith.mulf %1491, %1270 : vector<8x128xf32>
    %1493 = arith.addf %1489, %1492 : vector<8x128xf32>
    %cst_136 = arith.constant 5.000000e-01 : f32
    %1494 = vector.broadcast %cst_136 : f32 to vector<8x128xf32>
    %1495 = arith.mulf %1494, %1493 : vector<8x128xf32>
    %1496 = math.tanh %1495 : vector<8x128xf32>
    %cst_137 = arith.constant 5.000000e-01 : f32
    %1497 = vector.broadcast %cst_137 : f32 to vector<8x128xf32>
    %1498 = arith.mulf %1497, %1496 : vector<8x128xf32>
    %cst_138 = arith.constant 5.000000e-01 : f32
    %1499 = vector.broadcast %cst_138 : f32 to vector<8x128xf32>
    %1500 = arith.addf %1498, %1499 : vector<8x128xf32>
    %1501 = arith.mulf %1493, %1500 : vector<8x128xf32>
    %1502 = vector.extract_strided_slice %3 {offsets = [0, 0], sizes = [33, 1], strides = [1, 1]} : vector<33x8xf32> to vector<33x1xf32>
    %1503 = vector.extract_strided_slice %1501 {offsets = [0, 0], sizes = [1, 128], strides = [1, 1]} : vector<8x128xf32> to vector<1x128xf32>
    %1504 = vector.broadcast %1502 : vector<33x1xf32> to vector<33x128xf32>
    %1505 = vector.broadcast %1503 : vector<1x128xf32> to vector<33x128xf32>
    %1506 = arith.mulf %1504, %1505 : vector<33x128xf32>
    %1507 = vector.extract_strided_slice %3 {offsets = [0, 1], sizes = [33, 1], strides = [1, 1]} : vector<33x8xf32> to vector<33x1xf32>
    %1508 = vector.extract_strided_slice %1501 {offsets = [1, 0], sizes = [1, 128], strides = [1, 1]} : vector<8x128xf32> to vector<1x128xf32>
    %1509 = vector.broadcast %1507 : vector<33x1xf32> to vector<33x128xf32>
    %1510 = vector.broadcast %1508 : vector<1x128xf32> to vector<33x128xf32>
    %1511 = arith.mulf %1509, %1510 : vector<33x128xf32>
    %1512 = arith.addf %1506, %1511 : vector<33x128xf32>
    %1513 = vector.extract_strided_slice %3 {offsets = [0, 2], sizes = [33, 1], strides = [1, 1]} : vector<33x8xf32> to vector<33x1xf32>
    %1514 = vector.extract_strided_slice %1501 {offsets = [2, 0], sizes = [1, 128], strides = [1, 1]} : vector<8x128xf32> to vector<1x128xf32>
    %1515 = vector.broadcast %1513 : vector<33x1xf32> to vector<33x128xf32>
    %1516 = vector.broadcast %1514 : vector<1x128xf32> to vector<33x128xf32>
    %1517 = arith.mulf %1515, %1516 : vector<33x128xf32>
    %1518 = arith.addf %1512, %1517 : vector<33x128xf32>
    %1519 = vector.extract_strided_slice %3 {offsets = [0, 3], sizes = [33, 1], strides = [1, 1]} : vector<33x8xf32> to vector<33x1xf32>
    %1520 = vector.extract_strided_slice %1501 {offsets = [3, 0], sizes = [1, 128], strides = [1, 1]} : vector<8x128xf32> to vector<1x128xf32>
    %1521 = vector.broadcast %1519 : vector<33x1xf32> to vector<33x128xf32>
    %1522 = vector.broadcast %1520 : vector<1x128xf32> to vector<33x128xf32>
    %1523 = arith.mulf %1521, %1522 : vector<33x128xf32>
    %1524 = arith.addf %1518, %1523 : vector<33x128xf32>
    %1525 = vector.extract_strided_slice %3 {offsets = [0, 4], sizes = [33, 1], strides = [1, 1]} : vector<33x8xf32> to vector<33x1xf32>
    %1526 = vector.extract_strided_slice %1501 {offsets = [4, 0], sizes = [1, 128], strides = [1, 1]} : vector<8x128xf32> to vector<1x128xf32>
    %1527 = vector.broadcast %1525 : vector<33x1xf32> to vector<33x128xf32>
    %1528 = vector.broadcast %1526 : vector<1x128xf32> to vector<33x128xf32>
    %1529 = arith.mulf %1527, %1528 : vector<33x128xf32>
    %1530 = arith.addf %1524, %1529 : vector<33x128xf32>
    %1531 = vector.extract_strided_slice %3 {offsets = [0, 5], sizes = [33, 1], strides = [1, 1]} : vector<33x8xf32> to vector<33x1xf32>
    %1532 = vector.extract_strided_slice %1501 {offsets = [5, 0], sizes = [1, 128], strides = [1, 1]} : vector<8x128xf32> to vector<1x128xf32>
    %1533 = vector.broadcast %1531 : vector<33x1xf32> to vector<33x128xf32>
    %1534 = vector.broadcast %1532 : vector<1x128xf32> to vector<33x128xf32>
    %1535 = arith.mulf %1533, %1534 : vector<33x128xf32>
    %1536 = arith.addf %1530, %1535 : vector<33x128xf32>
    %1537 = vector.extract_strided_slice %3 {offsets = [0, 6], sizes = [33, 1], strides = [1, 1]} : vector<33x8xf32> to vector<33x1xf32>
    %1538 = vector.extract_strided_slice %1501 {offsets = [6, 0], sizes = [1, 128], strides = [1, 1]} : vector<8x128xf32> to vector<1x128xf32>
    %1539 = vector.broadcast %1537 : vector<33x1xf32> to vector<33x128xf32>
    %1540 = vector.broadcast %1538 : vector<1x128xf32> to vector<33x128xf32>
    %1541 = arith.mulf %1539, %1540 : vector<33x128xf32>
    %1542 = arith.addf %1536, %1541 : vector<33x128xf32>
    %1543 = vector.extract_strided_slice %3 {offsets = [0, 7], sizes = [33, 1], strides = [1, 1]} : vector<33x8xf32> to vector<33x1xf32>
    %1544 = vector.extract_strided_slice %1501 {offsets = [7, 0], sizes = [1, 128], strides = [1, 1]} : vector<8x128xf32> to vector<1x128xf32>
    %1545 = vector.broadcast %1543 : vector<33x1xf32> to vector<33x128xf32>
    %1546 = vector.broadcast %1544 : vector<1x128xf32> to vector<33x128xf32>
    %1547 = arith.mulf %1545, %1546 : vector<33x128xf32>
    %1548 = arith.addf %1542, %1547 : vector<33x128xf32>
    %1549 = vector.extract_strided_slice %1548 {offsets = [0, 0], sizes = [16, 128], strides = [1, 1]} : vector<33x128xf32> to vector<16x128xf32>
    %1550 = vector.extract_strided_slice %1548 {offsets = [16, 0], sizes = [16, 128], strides = [1, 1]} : vector<33x128xf32> to vector<16x128xf32>
    %1551 = vector.extract_strided_slice %1548 {offsets = [32, 0], sizes = [1, 128], strides = [1, 1]} : vector<33x128xf32> to vector<1x128xf32>
    %1552 = vector.broadcast %4 : vector<8x1xf32> to vector<8x128xf32>
    %1553 = vector.broadcast %1551 : vector<1x128xf32> to vector<8x128xf32>
    %1554 = arith.mulf %1552, %1553 : vector<8x128xf32>
    %1555 = vector.broadcast %5 : vector<8x1xf32> to vector<8x128xf32>
    %1556 = arith.addf %1554, %1555 : vector<8x128xf32>
    %cst_139 = arith.constant 0.000000e+00 : f32
    %1557 = vector.broadcast %cst_139 : f32 to vector<8x128xf32>
    %1558 = arith.maximumf %1556, %1557 : vector<8x128xf32>
    %1559 = math.absf %1556 : vector<8x128xf32>
    %cst_140 = arith.constant 0.000000e+00 : f32
    %1560 = vector.broadcast %cst_140 : f32 to vector<8x128xf32>
    %1561 = arith.subf %1560, %1559 : vector<8x128xf32>
    %1562 = math.exp %1561 : vector<8x128xf32>
    %cst_141 = arith.constant 1.000000e+00 : f32
    %1563 = vector.broadcast %cst_141 : f32 to vector<8x128xf32>
    %1564 = arith.addf %1563, %1562 : vector<8x128xf32>
    %1565 = math.log %1564 : vector<8x128xf32>
    %1566 = arith.addf %1558, %1565 : vector<8x128xf32>
    %1567 = arith.mulf %1566, %1501 : vector<8x128xf32>
    %1568 = vector.broadcast %6 : vector<8x1xf32> to vector<8x128xf32>
    %1569 = arith.mulf %1568, %1501 : vector<8x128xf32>
    %cst_142 = arith.constant 0.000000e+00 : f32
    %1570 = vector.broadcast %cst_142 : f32 to vector<8x128xf32>
    %1571 = arith.subf %1570, %1566 : vector<8x128xf32>
    %1572 = math.exp %1571 : vector<8x128xf32>
    %1573 = arith.mulf %1572, %1572 : vector<8x128xf32>
    %1574 = arith.mulf %1573, %1572 : vector<8x128xf32>
    %1575 = arith.mulf %1574, %1572 : vector<8x128xf32>
    %1576 = vector.shape_cast %1572 : vector<8x128xf32> to vector<1x8x128xf32>
    %1577 = vector.shape_cast %1573 : vector<8x128xf32> to vector<1x8x128xf32>
    %1578 = vector.shape_cast %1574 : vector<8x128xf32> to vector<1x8x128xf32>
    %1579 = vector.shape_cast %1575 : vector<8x128xf32> to vector<1x8x128xf32>
    %1580 = tpu.concatenate %1576, %1577, %1578, %1579 in 0 : vector<1x8x128xf32>, vector<1x8x128xf32>, vector<1x8x128xf32>, vector<1x8x128xf32> -> vector<4x8x128xf32>
    %1581 = arith.mulf %1580, %1383 : vector<4x8x128xf32>
    %1582 = vector.shape_cast %1567 : vector<8x128xf32> to vector<1x8x128xf32>
    %1583 = vector.extract_strided_slice %1549 {offsets = [0, 0], sizes = [4, 128], strides = [1, 1]} : vector<16x128xf32> to vector<4x128xf32>
    %1584 = vector.shape_cast %1583 : vector<4x128xf32> to vector<4x1x128xf32>
    %1585 = vector.broadcast %1582 : vector<1x8x128xf32> to vector<4x8x128xf32>
    %1586 = vector.broadcast %1584 : vector<4x1x128xf32> to vector<4x8x128xf32>
    %1587 = arith.mulf %1585, %1586 : vector<4x8x128xf32>
    %1588 = arith.addf %1581, %1587 : vector<4x8x128xf32>
    %1589 = vector.extract_strided_slice %1550 {offsets = [0, 0], sizes = [4, 128], strides = [1, 1]} : vector<16x128xf32> to vector<4x128xf32>
    %1590 = vector.shape_cast %1589 : vector<4x128xf32> to vector<4x1x128xf32>
    %1591 = vector.broadcast %1590 : vector<4x1x128xf32> to vector<4x8x128xf32>
    %1592 = arith.mulf %1588, %1591 : vector<4x8x128xf32>
    %cst_143 = arith.constant dense<0.000000e+00> : vector<8x128xf32>
    %1593 = vector.multi_reduction <add>, %1592, %cst_143 [0] : vector<4x8x128xf32> to vector<8x128xf32>
    %1594 = arith.addf %1569, %1593 : vector<8x128xf32>
    %1595 = vector.shape_cast %1575 : vector<8x128xf32> to vector<1x8x128xf32>
    %1596 = vector.broadcast %1595 : vector<1x8x128xf32> to vector<4x8x128xf32>
    %1597 = arith.mulf %1580, %1596 : vector<4x8x128xf32>
    %1598 = arith.mulf %1597, %1400 : vector<4x8x128xf32>
    %1599 = vector.shape_cast %1567 : vector<8x128xf32> to vector<1x8x128xf32>
    %1600 = vector.extract_strided_slice %1549 {offsets = [4, 0], sizes = [4, 128], strides = [1, 1]} : vector<16x128xf32> to vector<4x128xf32>
    %1601 = vector.shape_cast %1600 : vector<4x128xf32> to vector<4x1x128xf32>
    %1602 = vector.broadcast %1599 : vector<1x8x128xf32> to vector<4x8x128xf32>
    %1603 = vector.broadcast %1601 : vector<4x1x128xf32> to vector<4x8x128xf32>
    %1604 = arith.mulf %1602, %1603 : vector<4x8x128xf32>
    %1605 = arith.addf %1598, %1604 : vector<4x8x128xf32>
    %1606 = vector.extract_strided_slice %1550 {offsets = [4, 0], sizes = [4, 128], strides = [1, 1]} : vector<16x128xf32> to vector<4x128xf32>
    %1607 = vector.shape_cast %1606 : vector<4x128xf32> to vector<4x1x128xf32>
    %1608 = vector.broadcast %1607 : vector<4x1x128xf32> to vector<4x8x128xf32>
    %1609 = arith.mulf %1605, %1608 : vector<4x8x128xf32>
    %cst_144 = arith.constant dense<0.000000e+00> : vector<8x128xf32>
    %1610 = vector.multi_reduction <add>, %1609, %cst_144 [0] : vector<4x8x128xf32> to vector<8x128xf32>
    %1611 = arith.addf %1594, %1610 : vector<8x128xf32>
    %1612 = vector.shape_cast %1575 : vector<8x128xf32> to vector<1x8x128xf32>
    %1613 = vector.broadcast %1612 : vector<1x8x128xf32> to vector<4x8x128xf32>
    %1614 = arith.mulf %1597, %1613 : vector<4x8x128xf32>
    %1615 = arith.mulf %1614, %1417 : vector<4x8x128xf32>
    %1616 = vector.shape_cast %1567 : vector<8x128xf32> to vector<1x8x128xf32>
    %1617 = vector.extract_strided_slice %1549 {offsets = [8, 0], sizes = [4, 128], strides = [1, 1]} : vector<16x128xf32> to vector<4x128xf32>
    %1618 = vector.shape_cast %1617 : vector<4x128xf32> to vector<4x1x128xf32>
    %1619 = vector.broadcast %1616 : vector<1x8x128xf32> to vector<4x8x128xf32>
    %1620 = vector.broadcast %1618 : vector<4x1x128xf32> to vector<4x8x128xf32>
    %1621 = arith.mulf %1619, %1620 : vector<4x8x128xf32>
    %1622 = arith.addf %1615, %1621 : vector<4x8x128xf32>
    %1623 = vector.extract_strided_slice %1550 {offsets = [8, 0], sizes = [4, 128], strides = [1, 1]} : vector<16x128xf32> to vector<4x128xf32>
    %1624 = vector.shape_cast %1623 : vector<4x128xf32> to vector<4x1x128xf32>
    %1625 = vector.broadcast %1624 : vector<4x1x128xf32> to vector<4x8x128xf32>
    %1626 = arith.mulf %1622, %1625 : vector<4x8x128xf32>
    %cst_145 = arith.constant dense<0.000000e+00> : vector<8x128xf32>
    %1627 = vector.multi_reduction <add>, %1626, %cst_145 [0] : vector<4x8x128xf32> to vector<8x128xf32>
    %1628 = arith.addf %1611, %1627 : vector<8x128xf32>
    %1629 = vector.shape_cast %1575 : vector<8x128xf32> to vector<1x8x128xf32>
    %1630 = vector.broadcast %1629 : vector<1x8x128xf32> to vector<4x8x128xf32>
    %1631 = arith.mulf %1614, %1630 : vector<4x8x128xf32>
    %1632 = arith.mulf %1631, %1434 : vector<4x8x128xf32>
    %1633 = vector.shape_cast %1567 : vector<8x128xf32> to vector<1x8x128xf32>
    %1634 = vector.extract_strided_slice %1549 {offsets = [12, 0], sizes = [4, 128], strides = [1, 1]} : vector<16x128xf32> to vector<4x128xf32>
    %1635 = vector.shape_cast %1634 : vector<4x128xf32> to vector<4x1x128xf32>
    %1636 = vector.broadcast %1633 : vector<1x8x128xf32> to vector<4x8x128xf32>
    %1637 = vector.broadcast %1635 : vector<4x1x128xf32> to vector<4x8x128xf32>
    %1638 = arith.mulf %1636, %1637 : vector<4x8x128xf32>
    %1639 = arith.addf %1632, %1638 : vector<4x8x128xf32>
    %1640 = vector.extract_strided_slice %1550 {offsets = [12, 0], sizes = [4, 128], strides = [1, 1]} : vector<16x128xf32> to vector<4x128xf32>
    %1641 = vector.shape_cast %1640 : vector<4x128xf32> to vector<4x1x128xf32>
    %1642 = vector.broadcast %1641 : vector<4x1x128xf32> to vector<4x8x128xf32>
    %1643 = arith.mulf %1639, %1642 : vector<4x8x128xf32>
    %cst_146 = arith.constant dense<0.000000e+00> : vector<8x128xf32>
    %1644 = vector.multi_reduction <add>, %1643, %cst_146 [0] : vector<4x8x128xf32> to vector<8x128xf32>
    %1645 = arith.addf %1628, %1644 : vector<8x128xf32>
    %cst_147 = arith.constant 5.000000e-01 : f32
    %1646 = vector.broadcast %cst_147 : f32 to vector<8x128xf32>
    %1647 = arith.mulf %1646, %1476 : vector<8x128xf32>
    %1648 = math.tanh %1647 : vector<8x128xf32>
    %cst_148 = arith.constant 5.000000e-01 : f32
    %1649 = vector.broadcast %cst_148 : f32 to vector<8x128xf32>
    %1650 = arith.mulf %1649, %1648 : vector<8x128xf32>
    %cst_149 = arith.constant 5.000000e-01 : f32
    %1651 = vector.broadcast %cst_149 : f32 to vector<8x128xf32>
    %1652 = arith.addf %1650, %1651 : vector<8x128xf32>
    %1653 = arith.mulf %1476, %1652 : vector<8x128xf32>
    %1654 = arith.mulf %1645, %1653 : vector<8x128xf32>
    %1655 = tpu.concatenate %219, %424 in 0 : vector<8x128xf32>, vector<8x128xf32> -> vector<16x128xf32>
    %1656 = vector.extract_strided_slice %7 {offsets = [0, 0], sizes = [8, 1], strides = [1, 1]} : vector<8x16xf32> to vector<8x1xf32>
    %1657 = vector.extract_strided_slice %1655 {offsets = [0, 0], sizes = [1, 128], strides = [1, 1]} : vector<16x128xf32> to vector<1x128xf32>
    %1658 = vector.broadcast %1656 : vector<8x1xf32> to vector<8x128xf32>
    %1659 = vector.broadcast %1657 : vector<1x128xf32> to vector<8x128xf32>
    %1660 = arith.mulf %1658, %1659 : vector<8x128xf32>
    %1661 = vector.extract_strided_slice %7 {offsets = [0, 1], sizes = [8, 1], strides = [1, 1]} : vector<8x16xf32> to vector<8x1xf32>
    %1662 = vector.extract_strided_slice %1655 {offsets = [1, 0], sizes = [1, 128], strides = [1, 1]} : vector<16x128xf32> to vector<1x128xf32>
    %1663 = vector.broadcast %1661 : vector<8x1xf32> to vector<8x128xf32>
    %1664 = vector.broadcast %1662 : vector<1x128xf32> to vector<8x128xf32>
    %1665 = arith.mulf %1663, %1664 : vector<8x128xf32>
    %1666 = arith.addf %1660, %1665 : vector<8x128xf32>
    %1667 = vector.extract_strided_slice %7 {offsets = [0, 2], sizes = [8, 1], strides = [1, 1]} : vector<8x16xf32> to vector<8x1xf32>
    %1668 = vector.extract_strided_slice %1655 {offsets = [2, 0], sizes = [1, 128], strides = [1, 1]} : vector<16x128xf32> to vector<1x128xf32>
    %1669 = vector.broadcast %1667 : vector<8x1xf32> to vector<8x128xf32>
    %1670 = vector.broadcast %1668 : vector<1x128xf32> to vector<8x128xf32>
    %1671 = arith.mulf %1669, %1670 : vector<8x128xf32>
    %1672 = arith.addf %1666, %1671 : vector<8x128xf32>
    %1673 = vector.extract_strided_slice %7 {offsets = [0, 3], sizes = [8, 1], strides = [1, 1]} : vector<8x16xf32> to vector<8x1xf32>
    %1674 = vector.extract_strided_slice %1655 {offsets = [3, 0], sizes = [1, 128], strides = [1, 1]} : vector<16x128xf32> to vector<1x128xf32>
    %1675 = vector.broadcast %1673 : vector<8x1xf32> to vector<8x128xf32>
    %1676 = vector.broadcast %1674 : vector<1x128xf32> to vector<8x128xf32>
    %1677 = arith.mulf %1675, %1676 : vector<8x128xf32>
    %1678 = arith.addf %1672, %1677 : vector<8x128xf32>
    %1679 = vector.extract_strided_slice %7 {offsets = [0, 4], sizes = [8, 1], strides = [1, 1]} : vector<8x16xf32> to vector<8x1xf32>
    %1680 = vector.extract_strided_slice %1655 {offsets = [4, 0], sizes = [1, 128], strides = [1, 1]} : vector<16x128xf32> to vector<1x128xf32>
    %1681 = vector.broadcast %1679 : vector<8x1xf32> to vector<8x128xf32>
    %1682 = vector.broadcast %1680 : vector<1x128xf32> to vector<8x128xf32>
    %1683 = arith.mulf %1681, %1682 : vector<8x128xf32>
    %1684 = arith.addf %1678, %1683 : vector<8x128xf32>
    %1685 = vector.extract_strided_slice %7 {offsets = [0, 5], sizes = [8, 1], strides = [1, 1]} : vector<8x16xf32> to vector<8x1xf32>
    %1686 = vector.extract_strided_slice %1655 {offsets = [5, 0], sizes = [1, 128], strides = [1, 1]} : vector<16x128xf32> to vector<1x128xf32>
    %1687 = vector.broadcast %1685 : vector<8x1xf32> to vector<8x128xf32>
    %1688 = vector.broadcast %1686 : vector<1x128xf32> to vector<8x128xf32>
    %1689 = arith.mulf %1687, %1688 : vector<8x128xf32>
    %1690 = arith.addf %1684, %1689 : vector<8x128xf32>
    %1691 = vector.extract_strided_slice %7 {offsets = [0, 6], sizes = [8, 1], strides = [1, 1]} : vector<8x16xf32> to vector<8x1xf32>
    %1692 = vector.extract_strided_slice %1655 {offsets = [6, 0], sizes = [1, 128], strides = [1, 1]} : vector<16x128xf32> to vector<1x128xf32>
    %1693 = vector.broadcast %1691 : vector<8x1xf32> to vector<8x128xf32>
    %1694 = vector.broadcast %1692 : vector<1x128xf32> to vector<8x128xf32>
    %1695 = arith.mulf %1693, %1694 : vector<8x128xf32>
    %1696 = arith.addf %1690, %1695 : vector<8x128xf32>
    %1697 = vector.extract_strided_slice %7 {offsets = [0, 7], sizes = [8, 1], strides = [1, 1]} : vector<8x16xf32> to vector<8x1xf32>
    %1698 = vector.extract_strided_slice %1655 {offsets = [7, 0], sizes = [1, 128], strides = [1, 1]} : vector<16x128xf32> to vector<1x128xf32>
    %1699 = vector.broadcast %1697 : vector<8x1xf32> to vector<8x128xf32>
    %1700 = vector.broadcast %1698 : vector<1x128xf32> to vector<8x128xf32>
    %1701 = arith.mulf %1699, %1700 : vector<8x128xf32>
    %1702 = arith.addf %1696, %1701 : vector<8x128xf32>
    %1703 = vector.extract_strided_slice %7 {offsets = [0, 8], sizes = [8, 1], strides = [1, 1]} : vector<8x16xf32> to vector<8x1xf32>
    %1704 = vector.extract_strided_slice %1655 {offsets = [8, 0], sizes = [1, 128], strides = [1, 1]} : vector<16x128xf32> to vector<1x128xf32>
    %1705 = vector.broadcast %1703 : vector<8x1xf32> to vector<8x128xf32>
    %1706 = vector.broadcast %1704 : vector<1x128xf32> to vector<8x128xf32>
    %1707 = arith.mulf %1705, %1706 : vector<8x128xf32>
    %1708 = arith.addf %1702, %1707 : vector<8x128xf32>
    %1709 = vector.extract_strided_slice %7 {offsets = [0, 9], sizes = [8, 1], strides = [1, 1]} : vector<8x16xf32> to vector<8x1xf32>
    %1710 = vector.extract_strided_slice %1655 {offsets = [9, 0], sizes = [1, 128], strides = [1, 1]} : vector<16x128xf32> to vector<1x128xf32>
    %1711 = vector.broadcast %1709 : vector<8x1xf32> to vector<8x128xf32>
    %1712 = vector.broadcast %1710 : vector<1x128xf32> to vector<8x128xf32>
    %1713 = arith.mulf %1711, %1712 : vector<8x128xf32>
    %1714 = arith.addf %1708, %1713 : vector<8x128xf32>
    %1715 = vector.extract_strided_slice %7 {offsets = [0, 10], sizes = [8, 1], strides = [1, 1]} : vector<8x16xf32> to vector<8x1xf32>
    %1716 = vector.extract_strided_slice %1655 {offsets = [10, 0], sizes = [1, 128], strides = [1, 1]} : vector<16x128xf32> to vector<1x128xf32>
    %1717 = vector.broadcast %1715 : vector<8x1xf32> to vector<8x128xf32>
    %1718 = vector.broadcast %1716 : vector<1x128xf32> to vector<8x128xf32>
    %1719 = arith.mulf %1717, %1718 : vector<8x128xf32>
    %1720 = arith.addf %1714, %1719 : vector<8x128xf32>
    %1721 = vector.extract_strided_slice %7 {offsets = [0, 11], sizes = [8, 1], strides = [1, 1]} : vector<8x16xf32> to vector<8x1xf32>
    %1722 = vector.extract_strided_slice %1655 {offsets = [11, 0], sizes = [1, 128], strides = [1, 1]} : vector<16x128xf32> to vector<1x128xf32>
    %1723 = vector.broadcast %1721 : vector<8x1xf32> to vector<8x128xf32>
    %1724 = vector.broadcast %1722 : vector<1x128xf32> to vector<8x128xf32>
    %1725 = arith.mulf %1723, %1724 : vector<8x128xf32>
    %1726 = arith.addf %1720, %1725 : vector<8x128xf32>
    %1727 = vector.extract_strided_slice %7 {offsets = [0, 12], sizes = [8, 1], strides = [1, 1]} : vector<8x16xf32> to vector<8x1xf32>
    %1728 = vector.extract_strided_slice %1655 {offsets = [12, 0], sizes = [1, 128], strides = [1, 1]} : vector<16x128xf32> to vector<1x128xf32>
    %1729 = vector.broadcast %1727 : vector<8x1xf32> to vector<8x128xf32>
    %1730 = vector.broadcast %1728 : vector<1x128xf32> to vector<8x128xf32>
    %1731 = arith.mulf %1729, %1730 : vector<8x128xf32>
    %1732 = arith.addf %1726, %1731 : vector<8x128xf32>
    %1733 = vector.extract_strided_slice %7 {offsets = [0, 13], sizes = [8, 1], strides = [1, 1]} : vector<8x16xf32> to vector<8x1xf32>
    %1734 = vector.extract_strided_slice %1655 {offsets = [13, 0], sizes = [1, 128], strides = [1, 1]} : vector<16x128xf32> to vector<1x128xf32>
    %1735 = vector.broadcast %1733 : vector<8x1xf32> to vector<8x128xf32>
    %1736 = vector.broadcast %1734 : vector<1x128xf32> to vector<8x128xf32>
    %1737 = arith.mulf %1735, %1736 : vector<8x128xf32>
    %1738 = arith.addf %1732, %1737 : vector<8x128xf32>
    %1739 = vector.extract_strided_slice %7 {offsets = [0, 14], sizes = [8, 1], strides = [1, 1]} : vector<8x16xf32> to vector<8x1xf32>
    %1740 = vector.extract_strided_slice %1655 {offsets = [14, 0], sizes = [1, 128], strides = [1, 1]} : vector<16x128xf32> to vector<1x128xf32>
    %1741 = vector.broadcast %1739 : vector<8x1xf32> to vector<8x128xf32>
    %1742 = vector.broadcast %1740 : vector<1x128xf32> to vector<8x128xf32>
    %1743 = arith.mulf %1741, %1742 : vector<8x128xf32>
    %1744 = arith.addf %1738, %1743 : vector<8x128xf32>
    %1745 = vector.extract_strided_slice %7 {offsets = [0, 15], sizes = [8, 1], strides = [1, 1]} : vector<8x16xf32> to vector<8x1xf32>
    %1746 = vector.extract_strided_slice %1655 {offsets = [15, 0], sizes = [1, 128], strides = [1, 1]} : vector<16x128xf32> to vector<1x128xf32>
    %1747 = vector.broadcast %1745 : vector<8x1xf32> to vector<8x128xf32>
    %1748 = vector.broadcast %1746 : vector<1x128xf32> to vector<8x128xf32>
    %1749 = arith.mulf %1747, %1748 : vector<8x128xf32>
    %1750 = arith.addf %1744, %1749 : vector<8x128xf32>
    %1751 = tpu.concatenate %629, %834 in 0 : vector<8x128xf32>, vector<8x128xf32> -> vector<16x128xf32>
    %1752 = vector.extract_strided_slice %7 {offsets = [0, 0], sizes = [8, 1], strides = [1, 1]} : vector<8x16xf32> to vector<8x1xf32>
    %1753 = vector.extract_strided_slice %1751 {offsets = [0, 0], sizes = [1, 128], strides = [1, 1]} : vector<16x128xf32> to vector<1x128xf32>
    %1754 = vector.broadcast %1752 : vector<8x1xf32> to vector<8x128xf32>
    %1755 = vector.broadcast %1753 : vector<1x128xf32> to vector<8x128xf32>
    %1756 = arith.mulf %1754, %1755 : vector<8x128xf32>
    %1757 = vector.extract_strided_slice %7 {offsets = [0, 1], sizes = [8, 1], strides = [1, 1]} : vector<8x16xf32> to vector<8x1xf32>
    %1758 = vector.extract_strided_slice %1751 {offsets = [1, 0], sizes = [1, 128], strides = [1, 1]} : vector<16x128xf32> to vector<1x128xf32>
    %1759 = vector.broadcast %1757 : vector<8x1xf32> to vector<8x128xf32>
    %1760 = vector.broadcast %1758 : vector<1x128xf32> to vector<8x128xf32>
    %1761 = arith.mulf %1759, %1760 : vector<8x128xf32>
    %1762 = arith.addf %1756, %1761 : vector<8x128xf32>
    %1763 = vector.extract_strided_slice %7 {offsets = [0, 2], sizes = [8, 1], strides = [1, 1]} : vector<8x16xf32> to vector<8x1xf32>
    %1764 = vector.extract_strided_slice %1751 {offsets = [2, 0], sizes = [1, 128], strides = [1, 1]} : vector<16x128xf32> to vector<1x128xf32>
    %1765 = vector.broadcast %1763 : vector<8x1xf32> to vector<8x128xf32>
    %1766 = vector.broadcast %1764 : vector<1x128xf32> to vector<8x128xf32>
    %1767 = arith.mulf %1765, %1766 : vector<8x128xf32>
    %1768 = arith.addf %1762, %1767 : vector<8x128xf32>
    %1769 = vector.extract_strided_slice %7 {offsets = [0, 3], sizes = [8, 1], strides = [1, 1]} : vector<8x16xf32> to vector<8x1xf32>
    %1770 = vector.extract_strided_slice %1751 {offsets = [3, 0], sizes = [1, 128], strides = [1, 1]} : vector<16x128xf32> to vector<1x128xf32>
    %1771 = vector.broadcast %1769 : vector<8x1xf32> to vector<8x128xf32>
    %1772 = vector.broadcast %1770 : vector<1x128xf32> to vector<8x128xf32>
    %1773 = arith.mulf %1771, %1772 : vector<8x128xf32>
    %1774 = arith.addf %1768, %1773 : vector<8x128xf32>
    %1775 = vector.extract_strided_slice %7 {offsets = [0, 4], sizes = [8, 1], strides = [1, 1]} : vector<8x16xf32> to vector<8x1xf32>
    %1776 = vector.extract_strided_slice %1751 {offsets = [4, 0], sizes = [1, 128], strides = [1, 1]} : vector<16x128xf32> to vector<1x128xf32>
    %1777 = vector.broadcast %1775 : vector<8x1xf32> to vector<8x128xf32>
    %1778 = vector.broadcast %1776 : vector<1x128xf32> to vector<8x128xf32>
    %1779 = arith.mulf %1777, %1778 : vector<8x128xf32>
    %1780 = arith.addf %1774, %1779 : vector<8x128xf32>
    %1781 = vector.extract_strided_slice %7 {offsets = [0, 5], sizes = [8, 1], strides = [1, 1]} : vector<8x16xf32> to vector<8x1xf32>
    %1782 = vector.extract_strided_slice %1751 {offsets = [5, 0], sizes = [1, 128], strides = [1, 1]} : vector<16x128xf32> to vector<1x128xf32>
    %1783 = vector.broadcast %1781 : vector<8x1xf32> to vector<8x128xf32>
    %1784 = vector.broadcast %1782 : vector<1x128xf32> to vector<8x128xf32>
    %1785 = arith.mulf %1783, %1784 : vector<8x128xf32>
    %1786 = arith.addf %1780, %1785 : vector<8x128xf32>
    %1787 = vector.extract_strided_slice %7 {offsets = [0, 6], sizes = [8, 1], strides = [1, 1]} : vector<8x16xf32> to vector<8x1xf32>
    %1788 = vector.extract_strided_slice %1751 {offsets = [6, 0], sizes = [1, 128], strides = [1, 1]} : vector<16x128xf32> to vector<1x128xf32>
    %1789 = vector.broadcast %1787 : vector<8x1xf32> to vector<8x128xf32>
    %1790 = vector.broadcast %1788 : vector<1x128xf32> to vector<8x128xf32>
    %1791 = arith.mulf %1789, %1790 : vector<8x128xf32>
    %1792 = arith.addf %1786, %1791 : vector<8x128xf32>
    %1793 = vector.extract_strided_slice %7 {offsets = [0, 7], sizes = [8, 1], strides = [1, 1]} : vector<8x16xf32> to vector<8x1xf32>
    %1794 = vector.extract_strided_slice %1751 {offsets = [7, 0], sizes = [1, 128], strides = [1, 1]} : vector<16x128xf32> to vector<1x128xf32>
    %1795 = vector.broadcast %1793 : vector<8x1xf32> to vector<8x128xf32>
    %1796 = vector.broadcast %1794 : vector<1x128xf32> to vector<8x128xf32>
    %1797 = arith.mulf %1795, %1796 : vector<8x128xf32>
    %1798 = arith.addf %1792, %1797 : vector<8x128xf32>
    %1799 = vector.extract_strided_slice %7 {offsets = [0, 8], sizes = [8, 1], strides = [1, 1]} : vector<8x16xf32> to vector<8x1xf32>
    %1800 = vector.extract_strided_slice %1751 {offsets = [8, 0], sizes = [1, 128], strides = [1, 1]} : vector<16x128xf32> to vector<1x128xf32>
    %1801 = vector.broadcast %1799 : vector<8x1xf32> to vector<8x128xf32>
    %1802 = vector.broadcast %1800 : vector<1x128xf32> to vector<8x128xf32>
    %1803 = arith.mulf %1801, %1802 : vector<8x128xf32>
    %1804 = arith.addf %1798, %1803 : vector<8x128xf32>
    %1805 = vector.extract_strided_slice %7 {offsets = [0, 9], sizes = [8, 1], strides = [1, 1]} : vector<8x16xf32> to vector<8x1xf32>
    %1806 = vector.extract_strided_slice %1751 {offsets = [9, 0], sizes = [1, 128], strides = [1, 1]} : vector<16x128xf32> to vector<1x128xf32>
    %1807 = vector.broadcast %1805 : vector<8x1xf32> to vector<8x128xf32>
    %1808 = vector.broadcast %1806 : vector<1x128xf32> to vector<8x128xf32>
    %1809 = arith.mulf %1807, %1808 : vector<8x128xf32>
    %1810 = arith.addf %1804, %1809 : vector<8x128xf32>
    %1811 = vector.extract_strided_slice %7 {offsets = [0, 10], sizes = [8, 1], strides = [1, 1]} : vector<8x16xf32> to vector<8x1xf32>
    %1812 = vector.extract_strided_slice %1751 {offsets = [10, 0], sizes = [1, 128], strides = [1, 1]} : vector<16x128xf32> to vector<1x128xf32>
    %1813 = vector.broadcast %1811 : vector<8x1xf32> to vector<8x128xf32>
    %1814 = vector.broadcast %1812 : vector<1x128xf32> to vector<8x128xf32>
    %1815 = arith.mulf %1813, %1814 : vector<8x128xf32>
    %1816 = arith.addf %1810, %1815 : vector<8x128xf32>
    %1817 = vector.extract_strided_slice %7 {offsets = [0, 11], sizes = [8, 1], strides = [1, 1]} : vector<8x16xf32> to vector<8x1xf32>
    %1818 = vector.extract_strided_slice %1751 {offsets = [11, 0], sizes = [1, 128], strides = [1, 1]} : vector<16x128xf32> to vector<1x128xf32>
    %1819 = vector.broadcast %1817 : vector<8x1xf32> to vector<8x128xf32>
    %1820 = vector.broadcast %1818 : vector<1x128xf32> to vector<8x128xf32>
    %1821 = arith.mulf %1819, %1820 : vector<8x128xf32>
    %1822 = arith.addf %1816, %1821 : vector<8x128xf32>
    %1823 = vector.extract_strided_slice %7 {offsets = [0, 12], sizes = [8, 1], strides = [1, 1]} : vector<8x16xf32> to vector<8x1xf32>
    %1824 = vector.extract_strided_slice %1751 {offsets = [12, 0], sizes = [1, 128], strides = [1, 1]} : vector<16x128xf32> to vector<1x128xf32>
    %1825 = vector.broadcast %1823 : vector<8x1xf32> to vector<8x128xf32>
    %1826 = vector.broadcast %1824 : vector<1x128xf32> to vector<8x128xf32>
    %1827 = arith.mulf %1825, %1826 : vector<8x128xf32>
    %1828 = arith.addf %1822, %1827 : vector<8x128xf32>
    %1829 = vector.extract_strided_slice %7 {offsets = [0, 13], sizes = [8, 1], strides = [1, 1]} : vector<8x16xf32> to vector<8x1xf32>
    %1830 = vector.extract_strided_slice %1751 {offsets = [13, 0], sizes = [1, 128], strides = [1, 1]} : vector<16x128xf32> to vector<1x128xf32>
    %1831 = vector.broadcast %1829 : vector<8x1xf32> to vector<8x128xf32>
    %1832 = vector.broadcast %1830 : vector<1x128xf32> to vector<8x128xf32>
    %1833 = arith.mulf %1831, %1832 : vector<8x128xf32>
    %1834 = arith.addf %1828, %1833 : vector<8x128xf32>
    %1835 = vector.extract_strided_slice %7 {offsets = [0, 14], sizes = [8, 1], strides = [1, 1]} : vector<8x16xf32> to vector<8x1xf32>
    %1836 = vector.extract_strided_slice %1751 {offsets = [14, 0], sizes = [1, 128], strides = [1, 1]} : vector<16x128xf32> to vector<1x128xf32>
    %1837 = vector.broadcast %1835 : vector<8x1xf32> to vector<8x128xf32>
    %1838 = vector.broadcast %1836 : vector<1x128xf32> to vector<8x128xf32>
    %1839 = arith.mulf %1837, %1838 : vector<8x128xf32>
    %1840 = arith.addf %1834, %1839 : vector<8x128xf32>
    %1841 = vector.extract_strided_slice %7 {offsets = [0, 15], sizes = [8, 1], strides = [1, 1]} : vector<8x16xf32> to vector<8x1xf32>
    %1842 = vector.extract_strided_slice %1751 {offsets = [15, 0], sizes = [1, 128], strides = [1, 1]} : vector<16x128xf32> to vector<1x128xf32>
    %1843 = vector.broadcast %1841 : vector<8x1xf32> to vector<8x128xf32>
    %1844 = vector.broadcast %1842 : vector<1x128xf32> to vector<8x128xf32>
    %1845 = arith.mulf %1843, %1844 : vector<8x128xf32>
    %1846 = arith.addf %1840, %1845 : vector<8x128xf32>
    %1847 = tpu.concatenate %1039, %1244 in 0 : vector<8x128xf32>, vector<8x128xf32> -> vector<16x128xf32>
    %1848 = vector.extract_strided_slice %7 {offsets = [0, 0], sizes = [8, 1], strides = [1, 1]} : vector<8x16xf32> to vector<8x1xf32>
    %1849 = vector.extract_strided_slice %1847 {offsets = [0, 0], sizes = [1, 128], strides = [1, 1]} : vector<16x128xf32> to vector<1x128xf32>
    %1850 = vector.broadcast %1848 : vector<8x1xf32> to vector<8x128xf32>
    %1851 = vector.broadcast %1849 : vector<1x128xf32> to vector<8x128xf32>
    %1852 = arith.mulf %1850, %1851 : vector<8x128xf32>
    %1853 = vector.extract_strided_slice %7 {offsets = [0, 1], sizes = [8, 1], strides = [1, 1]} : vector<8x16xf32> to vector<8x1xf32>
    %1854 = vector.extract_strided_slice %1847 {offsets = [1, 0], sizes = [1, 128], strides = [1, 1]} : vector<16x128xf32> to vector<1x128xf32>
    %1855 = vector.broadcast %1853 : vector<8x1xf32> to vector<8x128xf32>
    %1856 = vector.broadcast %1854 : vector<1x128xf32> to vector<8x128xf32>
    %1857 = arith.mulf %1855, %1856 : vector<8x128xf32>
    %1858 = arith.addf %1852, %1857 : vector<8x128xf32>
    %1859 = vector.extract_strided_slice %7 {offsets = [0, 2], sizes = [8, 1], strides = [1, 1]} : vector<8x16xf32> to vector<8x1xf32>
    %1860 = vector.extract_strided_slice %1847 {offsets = [2, 0], sizes = [1, 128], strides = [1, 1]} : vector<16x128xf32> to vector<1x128xf32>
    %1861 = vector.broadcast %1859 : vector<8x1xf32> to vector<8x128xf32>
    %1862 = vector.broadcast %1860 : vector<1x128xf32> to vector<8x128xf32>
    %1863 = arith.mulf %1861, %1862 : vector<8x128xf32>
    %1864 = arith.addf %1858, %1863 : vector<8x128xf32>
    %1865 = vector.extract_strided_slice %7 {offsets = [0, 3], sizes = [8, 1], strides = [1, 1]} : vector<8x16xf32> to vector<8x1xf32>
    %1866 = vector.extract_strided_slice %1847 {offsets = [3, 0], sizes = [1, 128], strides = [1, 1]} : vector<16x128xf32> to vector<1x128xf32>
    %1867 = vector.broadcast %1865 : vector<8x1xf32> to vector<8x128xf32>
    %1868 = vector.broadcast %1866 : vector<1x128xf32> to vector<8x128xf32>
    %1869 = arith.mulf %1867, %1868 : vector<8x128xf32>
    %1870 = arith.addf %1864, %1869 : vector<8x128xf32>
    %1871 = vector.extract_strided_slice %7 {offsets = [0, 4], sizes = [8, 1], strides = [1, 1]} : vector<8x16xf32> to vector<8x1xf32>
    %1872 = vector.extract_strided_slice %1847 {offsets = [4, 0], sizes = [1, 128], strides = [1, 1]} : vector<16x128xf32> to vector<1x128xf32>
    %1873 = vector.broadcast %1871 : vector<8x1xf32> to vector<8x128xf32>
    %1874 = vector.broadcast %1872 : vector<1x128xf32> to vector<8x128xf32>
    %1875 = arith.mulf %1873, %1874 : vector<8x128xf32>
    %1876 = arith.addf %1870, %1875 : vector<8x128xf32>
    %1877 = vector.extract_strided_slice %7 {offsets = [0, 5], sizes = [8, 1], strides = [1, 1]} : vector<8x16xf32> to vector<8x1xf32>
    %1878 = vector.extract_strided_slice %1847 {offsets = [5, 0], sizes = [1, 128], strides = [1, 1]} : vector<16x128xf32> to vector<1x128xf32>
    %1879 = vector.broadcast %1877 : vector<8x1xf32> to vector<8x128xf32>
    %1880 = vector.broadcast %1878 : vector<1x128xf32> to vector<8x128xf32>
    %1881 = arith.mulf %1879, %1880 : vector<8x128xf32>
    %1882 = arith.addf %1876, %1881 : vector<8x128xf32>
    %1883 = vector.extract_strided_slice %7 {offsets = [0, 6], sizes = [8, 1], strides = [1, 1]} : vector<8x16xf32> to vector<8x1xf32>
    %1884 = vector.extract_strided_slice %1847 {offsets = [6, 0], sizes = [1, 128], strides = [1, 1]} : vector<16x128xf32> to vector<1x128xf32>
    %1885 = vector.broadcast %1883 : vector<8x1xf32> to vector<8x128xf32>
    %1886 = vector.broadcast %1884 : vector<1x128xf32> to vector<8x128xf32>
    %1887 = arith.mulf %1885, %1886 : vector<8x128xf32>
    %1888 = arith.addf %1882, %1887 : vector<8x128xf32>
    %1889 = vector.extract_strided_slice %7 {offsets = [0, 7], sizes = [8, 1], strides = [1, 1]} : vector<8x16xf32> to vector<8x1xf32>
    %1890 = vector.extract_strided_slice %1847 {offsets = [7, 0], sizes = [1, 128], strides = [1, 1]} : vector<16x128xf32> to vector<1x128xf32>
    %1891 = vector.broadcast %1889 : vector<8x1xf32> to vector<8x128xf32>
    %1892 = vector.broadcast %1890 : vector<1x128xf32> to vector<8x128xf32>
    %1893 = arith.mulf %1891, %1892 : vector<8x128xf32>
    %1894 = arith.addf %1888, %1893 : vector<8x128xf32>
    %1895 = vector.extract_strided_slice %7 {offsets = [0, 8], sizes = [8, 1], strides = [1, 1]} : vector<8x16xf32> to vector<8x1xf32>
    %1896 = vector.extract_strided_slice %1847 {offsets = [8, 0], sizes = [1, 128], strides = [1, 1]} : vector<16x128xf32> to vector<1x128xf32>
    %1897 = vector.broadcast %1895 : vector<8x1xf32> to vector<8x128xf32>
    %1898 = vector.broadcast %1896 : vector<1x128xf32> to vector<8x128xf32>
    %1899 = arith.mulf %1897, %1898 : vector<8x128xf32>
    %1900 = arith.addf %1894, %1899 : vector<8x128xf32>
    %1901 = vector.extract_strided_slice %7 {offsets = [0, 9], sizes = [8, 1], strides = [1, 1]} : vector<8x16xf32> to vector<8x1xf32>
    %1902 = vector.extract_strided_slice %1847 {offsets = [9, 0], sizes = [1, 128], strides = [1, 1]} : vector<16x128xf32> to vector<1x128xf32>
    %1903 = vector.broadcast %1901 : vector<8x1xf32> to vector<8x128xf32>
    %1904 = vector.broadcast %1902 : vector<1x128xf32> to vector<8x128xf32>
    %1905 = arith.mulf %1903, %1904 : vector<8x128xf32>
    %1906 = arith.addf %1900, %1905 : vector<8x128xf32>
    %1907 = vector.extract_strided_slice %7 {offsets = [0, 10], sizes = [8, 1], strides = [1, 1]} : vector<8x16xf32> to vector<8x1xf32>
    %1908 = vector.extract_strided_slice %1847 {offsets = [10, 0], sizes = [1, 128], strides = [1, 1]} : vector<16x128xf32> to vector<1x128xf32>
    %1909 = vector.broadcast %1907 : vector<8x1xf32> to vector<8x128xf32>
    %1910 = vector.broadcast %1908 : vector<1x128xf32> to vector<8x128xf32>
    %1911 = arith.mulf %1909, %1910 : vector<8x128xf32>
    %1912 = arith.addf %1906, %1911 : vector<8x128xf32>
    %1913 = vector.extract_strided_slice %7 {offsets = [0, 11], sizes = [8, 1], strides = [1, 1]} : vector<8x16xf32> to vector<8x1xf32>
    %1914 = vector.extract_strided_slice %1847 {offsets = [11, 0], sizes = [1, 128], strides = [1, 1]} : vector<16x128xf32> to vector<1x128xf32>
    %1915 = vector.broadcast %1913 : vector<8x1xf32> to vector<8x128xf32>
    %1916 = vector.broadcast %1914 : vector<1x128xf32> to vector<8x128xf32>
    %1917 = arith.mulf %1915, %1916 : vector<8x128xf32>
    %1918 = arith.addf %1912, %1917 : vector<8x128xf32>
    %1919 = vector.extract_strided_slice %7 {offsets = [0, 12], sizes = [8, 1], strides = [1, 1]} : vector<8x16xf32> to vector<8x1xf32>
    %1920 = vector.extract_strided_slice %1847 {offsets = [12, 0], sizes = [1, 128], strides = [1, 1]} : vector<16x128xf32> to vector<1x128xf32>
    %1921 = vector.broadcast %1919 : vector<8x1xf32> to vector<8x128xf32>
    %1922 = vector.broadcast %1920 : vector<1x128xf32> to vector<8x128xf32>
    %1923 = arith.mulf %1921, %1922 : vector<8x128xf32>
    %1924 = arith.addf %1918, %1923 : vector<8x128xf32>
    %1925 = vector.extract_strided_slice %7 {offsets = [0, 13], sizes = [8, 1], strides = [1, 1]} : vector<8x16xf32> to vector<8x1xf32>
    %1926 = vector.extract_strided_slice %1847 {offsets = [13, 0], sizes = [1, 128], strides = [1, 1]} : vector<16x128xf32> to vector<1x128xf32>
    %1927 = vector.broadcast %1925 : vector<8x1xf32> to vector<8x128xf32>
    %1928 = vector.broadcast %1926 : vector<1x128xf32> to vector<8x128xf32>
    %1929 = arith.mulf %1927, %1928 : vector<8x128xf32>
    %1930 = arith.addf %1924, %1929 : vector<8x128xf32>
    %1931 = vector.extract_strided_slice %7 {offsets = [0, 14], sizes = [8, 1], strides = [1, 1]} : vector<8x16xf32> to vector<8x1xf32>
    %1932 = vector.extract_strided_slice %1847 {offsets = [14, 0], sizes = [1, 128], strides = [1, 1]} : vector<16x128xf32> to vector<1x128xf32>
    %1933 = vector.broadcast %1931 : vector<8x1xf32> to vector<8x128xf32>
    %1934 = vector.broadcast %1932 : vector<1x128xf32> to vector<8x128xf32>
    %1935 = arith.mulf %1933, %1934 : vector<8x128xf32>
    %1936 = arith.addf %1930, %1935 : vector<8x128xf32>
    %1937 = vector.extract_strided_slice %7 {offsets = [0, 15], sizes = [8, 1], strides = [1, 1]} : vector<8x16xf32> to vector<8x1xf32>
    %1938 = vector.extract_strided_slice %1847 {offsets = [15, 0], sizes = [1, 128], strides = [1, 1]} : vector<16x128xf32> to vector<1x128xf32>
    %1939 = vector.broadcast %1937 : vector<8x1xf32> to vector<8x128xf32>
    %1940 = vector.broadcast %1938 : vector<1x128xf32> to vector<8x128xf32>
    %1941 = arith.mulf %1939, %1940 : vector<8x128xf32>
    %1942 = arith.addf %1936, %1941 : vector<8x128xf32>
    %1943 = tpu.concatenate %1449, %1654 in 0 : vector<8x128xf32>, vector<8x128xf32> -> vector<16x128xf32>
    %1944 = vector.extract_strided_slice %7 {offsets = [0, 0], sizes = [8, 1], strides = [1, 1]} : vector<8x16xf32> to vector<8x1xf32>
    %1945 = vector.extract_strided_slice %1943 {offsets = [0, 0], sizes = [1, 128], strides = [1, 1]} : vector<16x128xf32> to vector<1x128xf32>
    %1946 = vector.broadcast %1944 : vector<8x1xf32> to vector<8x128xf32>
    %1947 = vector.broadcast %1945 : vector<1x128xf32> to vector<8x128xf32>
    %1948 = arith.mulf %1946, %1947 : vector<8x128xf32>
    %1949 = vector.extract_strided_slice %7 {offsets = [0, 1], sizes = [8, 1], strides = [1, 1]} : vector<8x16xf32> to vector<8x1xf32>
    %1950 = vector.extract_strided_slice %1943 {offsets = [1, 0], sizes = [1, 128], strides = [1, 1]} : vector<16x128xf32> to vector<1x128xf32>
    %1951 = vector.broadcast %1949 : vector<8x1xf32> to vector<8x128xf32>
    %1952 = vector.broadcast %1950 : vector<1x128xf32> to vector<8x128xf32>
    %1953 = arith.mulf %1951, %1952 : vector<8x128xf32>
    %1954 = arith.addf %1948, %1953 : vector<8x128xf32>
    %1955 = vector.extract_strided_slice %7 {offsets = [0, 2], sizes = [8, 1], strides = [1, 1]} : vector<8x16xf32> to vector<8x1xf32>
    %1956 = vector.extract_strided_slice %1943 {offsets = [2, 0], sizes = [1, 128], strides = [1, 1]} : vector<16x128xf32> to vector<1x128xf32>
    %1957 = vector.broadcast %1955 : vector<8x1xf32> to vector<8x128xf32>
    %1958 = vector.broadcast %1956 : vector<1x128xf32> to vector<8x128xf32>
    %1959 = arith.mulf %1957, %1958 : vector<8x128xf32>
    %1960 = arith.addf %1954, %1959 : vector<8x128xf32>
    %1961 = vector.extract_strided_slice %7 {offsets = [0, 3], sizes = [8, 1], strides = [1, 1]} : vector<8x16xf32> to vector<8x1xf32>
    %1962 = vector.extract_strided_slice %1943 {offsets = [3, 0], sizes = [1, 128], strides = [1, 1]} : vector<16x128xf32> to vector<1x128xf32>
    %1963 = vector.broadcast %1961 : vector<8x1xf32> to vector<8x128xf32>
    %1964 = vector.broadcast %1962 : vector<1x128xf32> to vector<8x128xf32>
    %1965 = arith.mulf %1963, %1964 : vector<8x128xf32>
    %1966 = arith.addf %1960, %1965 : vector<8x128xf32>
    %1967 = vector.extract_strided_slice %7 {offsets = [0, 4], sizes = [8, 1], strides = [1, 1]} : vector<8x16xf32> to vector<8x1xf32>
    %1968 = vector.extract_strided_slice %1943 {offsets = [4, 0], sizes = [1, 128], strides = [1, 1]} : vector<16x128xf32> to vector<1x128xf32>
    %1969 = vector.broadcast %1967 : vector<8x1xf32> to vector<8x128xf32>
    %1970 = vector.broadcast %1968 : vector<1x128xf32> to vector<8x128xf32>
    %1971 = arith.mulf %1969, %1970 : vector<8x128xf32>
    %1972 = arith.addf %1966, %1971 : vector<8x128xf32>
    %1973 = vector.extract_strided_slice %7 {offsets = [0, 5], sizes = [8, 1], strides = [1, 1]} : vector<8x16xf32> to vector<8x1xf32>
    %1974 = vector.extract_strided_slice %1943 {offsets = [5, 0], sizes = [1, 128], strides = [1, 1]} : vector<16x128xf32> to vector<1x128xf32>
    %1975 = vector.broadcast %1973 : vector<8x1xf32> to vector<8x128xf32>
    %1976 = vector.broadcast %1974 : vector<1x128xf32> to vector<8x128xf32>
    %1977 = arith.mulf %1975, %1976 : vector<8x128xf32>
    %1978 = arith.addf %1972, %1977 : vector<8x128xf32>
    %1979 = vector.extract_strided_slice %7 {offsets = [0, 6], sizes = [8, 1], strides = [1, 1]} : vector<8x16xf32> to vector<8x1xf32>
    %1980 = vector.extract_strided_slice %1943 {offsets = [6, 0], sizes = [1, 128], strides = [1, 1]} : vector<16x128xf32> to vector<1x128xf32>
    %1981 = vector.broadcast %1979 : vector<8x1xf32> to vector<8x128xf32>
    %1982 = vector.broadcast %1980 : vector<1x128xf32> to vector<8x128xf32>
    %1983 = arith.mulf %1981, %1982 : vector<8x128xf32>
    %1984 = arith.addf %1978, %1983 : vector<8x128xf32>
    %1985 = vector.extract_strided_slice %7 {offsets = [0, 7], sizes = [8, 1], strides = [1, 1]} : vector<8x16xf32> to vector<8x1xf32>
    %1986 = vector.extract_strided_slice %1943 {offsets = [7, 0], sizes = [1, 128], strides = [1, 1]} : vector<16x128xf32> to vector<1x128xf32>
    %1987 = vector.broadcast %1985 : vector<8x1xf32> to vector<8x128xf32>
    %1988 = vector.broadcast %1986 : vector<1x128xf32> to vector<8x128xf32>
    %1989 = arith.mulf %1987, %1988 : vector<8x128xf32>
    %1990 = arith.addf %1984, %1989 : vector<8x128xf32>
    %1991 = vector.extract_strided_slice %7 {offsets = [0, 8], sizes = [8, 1], strides = [1, 1]} : vector<8x16xf32> to vector<8x1xf32>
    %1992 = vector.extract_strided_slice %1943 {offsets = [8, 0], sizes = [1, 128], strides = [1, 1]} : vector<16x128xf32> to vector<1x128xf32>
    %1993 = vector.broadcast %1991 : vector<8x1xf32> to vector<8x128xf32>
    %1994 = vector.broadcast %1992 : vector<1x128xf32> to vector<8x128xf32>
    %1995 = arith.mulf %1993, %1994 : vector<8x128xf32>
    %1996 = arith.addf %1990, %1995 : vector<8x128xf32>
    %1997 = vector.extract_strided_slice %7 {offsets = [0, 9], sizes = [8, 1], strides = [1, 1]} : vector<8x16xf32> to vector<8x1xf32>
    %1998 = vector.extract_strided_slice %1943 {offsets = [9, 0], sizes = [1, 128], strides = [1, 1]} : vector<16x128xf32> to vector<1x128xf32>
    %1999 = vector.broadcast %1997 : vector<8x1xf32> to vector<8x128xf32>
    %2000 = vector.broadcast %1998 : vector<1x128xf32> to vector<8x128xf32>
    %2001 = arith.mulf %1999, %2000 : vector<8x128xf32>
    %2002 = arith.addf %1996, %2001 : vector<8x128xf32>
    %2003 = vector.extract_strided_slice %7 {offsets = [0, 10], sizes = [8, 1], strides = [1, 1]} : vector<8x16xf32> to vector<8x1xf32>
    %2004 = vector.extract_strided_slice %1943 {offsets = [10, 0], sizes = [1, 128], strides = [1, 1]} : vector<16x128xf32> to vector<1x128xf32>
    %2005 = vector.broadcast %2003 : vector<8x1xf32> to vector<8x128xf32>
    %2006 = vector.broadcast %2004 : vector<1x128xf32> to vector<8x128xf32>
    %2007 = arith.mulf %2005, %2006 : vector<8x128xf32>
    %2008 = arith.addf %2002, %2007 : vector<8x128xf32>
    %2009 = vector.extract_strided_slice %7 {offsets = [0, 11], sizes = [8, 1], strides = [1, 1]} : vector<8x16xf32> to vector<8x1xf32>
    %2010 = vector.extract_strided_slice %1943 {offsets = [11, 0], sizes = [1, 128], strides = [1, 1]} : vector<16x128xf32> to vector<1x128xf32>
    %2011 = vector.broadcast %2009 : vector<8x1xf32> to vector<8x128xf32>
    %2012 = vector.broadcast %2010 : vector<1x128xf32> to vector<8x128xf32>
    %2013 = arith.mulf %2011, %2012 : vector<8x128xf32>
    %2014 = arith.addf %2008, %2013 : vector<8x128xf32>
    %2015 = vector.extract_strided_slice %7 {offsets = [0, 12], sizes = [8, 1], strides = [1, 1]} : vector<8x16xf32> to vector<8x1xf32>
    %2016 = vector.extract_strided_slice %1943 {offsets = [12, 0], sizes = [1, 128], strides = [1, 1]} : vector<16x128xf32> to vector<1x128xf32>
    %2017 = vector.broadcast %2015 : vector<8x1xf32> to vector<8x128xf32>
    %2018 = vector.broadcast %2016 : vector<1x128xf32> to vector<8x128xf32>
    %2019 = arith.mulf %2017, %2018 : vector<8x128xf32>
    %2020 = arith.addf %2014, %2019 : vector<8x128xf32>
    %2021 = vector.extract_strided_slice %7 {offsets = [0, 13], sizes = [8, 1], strides = [1, 1]} : vector<8x16xf32> to vector<8x1xf32>
    %2022 = vector.extract_strided_slice %1943 {offsets = [13, 0], sizes = [1, 128], strides = [1, 1]} : vector<16x128xf32> to vector<1x128xf32>
    %2023 = vector.broadcast %2021 : vector<8x1xf32> to vector<8x128xf32>
    %2024 = vector.broadcast %2022 : vector<1x128xf32> to vector<8x128xf32>
    %2025 = arith.mulf %2023, %2024 : vector<8x128xf32>
    %2026 = arith.addf %2020, %2025 : vector<8x128xf32>
    %2027 = vector.extract_strided_slice %7 {offsets = [0, 14], sizes = [8, 1], strides = [1, 1]} : vector<8x16xf32> to vector<8x1xf32>
    %2028 = vector.extract_strided_slice %1943 {offsets = [14, 0], sizes = [1, 128], strides = [1, 1]} : vector<16x128xf32> to vector<1x128xf32>
    %2029 = vector.broadcast %2027 : vector<8x1xf32> to vector<8x128xf32>
    %2030 = vector.broadcast %2028 : vector<1x128xf32> to vector<8x128xf32>
    %2031 = arith.mulf %2029, %2030 : vector<8x128xf32>
    %2032 = arith.addf %2026, %2031 : vector<8x128xf32>
    %2033 = vector.extract_strided_slice %7 {offsets = [0, 15], sizes = [8, 1], strides = [1, 1]} : vector<8x16xf32> to vector<8x1xf32>
    %2034 = vector.extract_strided_slice %1943 {offsets = [15, 0], sizes = [1, 128], strides = [1, 1]} : vector<16x128xf32> to vector<1x128xf32>
    %2035 = vector.broadcast %2033 : vector<8x1xf32> to vector<8x128xf32>
    %2036 = vector.broadcast %2034 : vector<1x128xf32> to vector<8x128xf32>
    %2037 = arith.mulf %2035, %2036 : vector<8x128xf32>
    %2038 = arith.addf %2032, %2037 : vector<8x128xf32>
    %2039 = tpu.concatenate %1750, %1846, %1942, %2038 in 0 : vector<8x128xf32>, vector<8x128xf32>, vector<8x128xf32>, vector<8x128xf32> -> vector<32x128xf32>
    %c0_150 = arith.constant 0 : index
    %c0_151 = arith.constant 0 : index
    %c0_152 = arith.constant 0 : index
    %2040 = vector.load %arg12[%c0_150, %c0_151, %c0_152] : memref<1x32x128xf32, #tpu.memory_space<vmem>>, vector<1x32x128xf32>
    %2041 = vector.shape_cast %2040 : vector<1x32x128xf32> to vector<32x128xf32>
    %2042 = vector.shape_cast %2039 : vector<32x128xf32> to vector<1x32x128xf32>
    tpu.vector_store %arg12[%c0_150, %c0_151, %c0_152], %2042 {strides = array<i32>} : memref<1x32x128xf32, #tpu.memory_space<vmem>>, vector<1x32x128xf32>,
    return
  }
  func.func @transform_0(%arg0: i32, %arg1: i32) -> (i32, i32, i32) {
    %c0_i32 = arith.constant 0 : i32
    %c0_i32_0 = arith.constant 0 : i32
    return %arg0, %c0_i32, %arg1 : i32, i32, i32
  }
  func.func @transform_1(%arg0: i32, %arg1: i32) -> (i32, i32) {
    %c0_i32 = arith.constant 0 : i32
    %c0_i32_0 = arith.constant 0 : i32
    %c0_i32_1 = arith.constant 0 : i32
    return %c0_i32, %c0_i32_0 : i32, i32
  }
  func.func @transform_2(%arg0: i32, %arg1: i32) -> (i32, i32) {
    %c0_i32 = arith.constant 0 : i32
    %c0_i32_0 = arith.constant 0 : i32
    %c0_i32_1 = arith.constant 0 : i32
    return %c0_i32, %c0_i32_0 : i32, i32
  }
  func.func @transform_3(%arg0: i32, %arg1: i32) -> (i32, i32) {
    %c0_i32 = arith.constant 0 : i32
    %c0_i32_0 = arith.constant 0 : i32
    %c0_i32_1 = arith.constant 0 : i32
    return %c0_i32, %c0_i32_0 : i32, i32
  }
  func.func @transform_4(%arg0: i32, %arg1: i32) -> (i32, i32) {
    %c0_i32 = arith.constant 0 : i32
    %c0_i32_0 = arith.constant 0 : i32
    %c0_i32_1 = arith.constant 0 : i32
    return %c0_i32, %c0_i32_0 : i32, i32
  }
  func.func @transform_5(%arg0: i32, %arg1: i32) -> (i32, i32) {
    %c0_i32 = arith.constant 0 : i32
    %c0_i32_0 = arith.constant 0 : i32
    %c0_i32_1 = arith.constant 0 : i32
    return %c0_i32, %c0_i32_0 : i32, i32
  }
  func.func @transform_6(%arg0: i32, %arg1: i32) -> (i32, i32) {
    %c0_i32 = arith.constant 0 : i32
    %c0_i32_0 = arith.constant 0 : i32
    %c0_i32_1 = arith.constant 0 : i32
    return %c0_i32, %c0_i32_0 : i32, i32
  }
  func.func @transform_7(%arg0: i32, %arg1: i32) -> (i32, i32) {
    %c0_i32 = arith.constant 0 : i32
    %c0_i32_0 = arith.constant 0 : i32
    %c0_i32_1 = arith.constant 0 : i32
    return %c0_i32, %c0_i32_0 : i32, i32
  }
  func.func @transform_8(%arg0: i32, %arg1: i32) -> (i32, i32) {
    %c0_i32 = arith.constant 0 : i32
    %c0_i32_0 = arith.constant 0 : i32
    %c0_i32_1 = arith.constant 0 : i32
    return %c0_i32, %c0_i32_0 : i32, i32
  }
  func.func @transform_9(%arg0: i32, %arg1: i32) -> (i32, i32) {
    %c0_i32 = arith.constant 0 : i32
    %c0_i32_0 = arith.constant 0 : i32
    %c0_i32_1 = arith.constant 0 : i32
    return %c0_i32, %c0_i32_0 : i32, i32
  }
  func.func @transform_10(%arg0: i32, %arg1: i32) -> (i32, i32, i32) {
    %c0_i32 = arith.constant 0 : i32
    %c0_i32_0 = arith.constant 0 : i32
    return %arg0, %c0_i32, %arg1 : i32, i32, i32
  }
}

</mosaic_0001>

<bundles_post_ra>
// kernel: tpu_custom_call.1
= control target key start
LH: loop header
LB: loop body
LE: loop exit
PB: predicated region body
PF: predicated region fallthrough
CT: control target
= control target key end

     0   :  { %s8203_s0 = inlined_call_operand.vmem [shape: f32[2,32,256], index: 0, kind: input, shape index: {}]   ;;  %s8204_s1 = inlined_call_operand.vmem [shape: f32[16,4], index: 1, kind: input, shape index: {}]   ;;  %s8205_s2 = inlined_call_operand.vmem [shape: f32[8,4], index: 2, kind: input, shape index: {}]   ;;  %s8206_s3 = inlined_call_operand.vmem [shape: f32[8,1], index: 3, kind: input, shape index: {}]   ;;  %s8207_s4 = inlined_call_operand.vmem [shape: f32[33,8], index: 4, kind: input, shape index: {}]   ;;  %s8208_s5 = inlined_call_operand.vmem [shape: f32[8,1], index: 5, kind: input, shape index: {}]   ;;  %s8209_s6 = inlined_call_operand.vmem [shape: f32[8,1], index: 6, kind: input, shape index: {}]   ;;  %s8210_s7 = inlined_call_operand.vmem [shape: f32[16,8], index: 7, kind: input, shape index: {}]   ;;  %s8211_s8 = inlined_call_operand.vmem [shape: f32[8,1], index: 8, kind: input, shape index: {}]   ;;  %s8212_s9 = inlined_call_operand.vmem [shape: f32[8,16], index: 9, kind: input, shape index: {}]   ;;  %s8213_s10 = inlined_call_operand.hbm [shape: f32[2,32,256], index: 10, kind: output, shape index: {}]  }
   0x1   :  { %8605 = sst [smem:[#allocation170_spill]] %s8203_s0 }
   0x2   :  { %15 = vsyncpa [#allocation4], 0 }
   0x3   :  { %17 = vsyncpa [#allocation4 + $0x1], 0  ;;  %s4240_s13 = smov 0   ;;  %s4242_s14 = smov 0  }
   0x4   :  { %s4244_s15 = smov 0   ;;  %s4246_s16 = smov 0  }
   0x5   :  { %s4248_s7 = smov 0   ;;  %s4250_s17 = smov 0  }
   0x6   :  { %s4252_s18 = smov 0   ;;  %s4254_s19 = smov 0  }
   0x7 LB: > { %s3818_s20 = sadd.s32 4294967295, %s4164_s19   ;;  %s3819_s21 = sadd.s32 4294967294, %s4164_s19   ;;  %s4164_s19 = sphi %s4254_s19, %s23_s19   ;;  %s4160_s18 = sphi %s4252_s18, %s9651_s18   ;;  %s4156_s17 = sphi %s4250_s17, %s9650_s17   ;;  %s4152_s7 = sphi %s4248_s7, %s9649_s7   ;;  %s4148_s16 = sphi %s4246_s16, %s9648_s16   ;;  %s4144_s15 = sphi %s4244_s15, %s9647_s15   ;;  %s4140_s14 = sphi %s4242_s14, %s9646_s14   ;;  %s4136_s13 = sphi %s4240_s13, %s9645_s13  }
   0x8   : > { %s32_s22 = sadd.s32 1, %s4156_s17  ;;  %s35_s23 = sadd.s32 1, %s4160_s18 }
   0x9   : > { %p33_p0 = scmp.ge.s32.totalorder %s32_s22, 2  ;;  %p51_p1 = scmp.ne.s32.totalorder %s4144_s15, %s4140_s14 }
   0xa   : > { %p52_p2 = scmp.eq.s32.totalorder %s4164_s19, 0  ;;  %p272_p5 = scmp.eq.s32.totalorder %s3818_s20, 3 }
   0xb   : > { %s9653_s22 = smov (%p33_p0, %s32_s22), 0  ;;  %s9655_s23 = smov (!%p33_p0, %s35_s23), %s4160_s18 }
   0xc   : > { %8606 = sst [smem:[#allocation6_spill]] %s9653_s22  ;;  %s40_s24 = ssub.s32 %s4156_s17, %s9653_s22 }
   0xd   : > { %p4292_p3 = por %p52_p2, %p51_p1  ;;  %p37_p4 = scmp.ge.s32.totalorder %s9655_s23, 2 }
   0xe   : > { %p277_p6 = scmp.ne.s32.totalorder %s4140_s14, %s4136_s13  ;;  %p278_p7 = scmp.eq.s32.totalorder %s3819_s21, 3 }
   0xf   : > { %s9657_s23 = smov (%p37_p4, %s9655_s23), 0  ;;  %p4300_p8 = por %p272_p5, %p51_p1 }
  0x10   : > { %8608 = sst [smem:[#allocation7_spill]] %s9657_s23  ;;  %p4304_p9 = por %p278_p7, %p277_p6 }
  0x11   : > { %s39_s28 = ssub.s32 %s4160_s18, %s9657_s23  ;;  %s44_s30 = sadd.s32 1, %s4144_s15 }
  0x12   : > { %s8610_s27 = scalar_select %p4304_p9, 1, 0 }
  0x13   : > { %s41_s29 = sor.u32 %s40_s24, %s39_s28  ;;  %p3821_p11 = scmp.ge.s32.totalorder %s4164_s19, 4 }
  0x14   : > { %8611 = sst [smem:[#allocation8_spill]] %s8610_s27  ;;  %p42_p10 = scmp.eq.s32.totalorder %s41_s29, 0 }
  0x15   : > { %321 = sbr.rel (%p3821_p11) target bundleno = 40 (0x28), region = 52 }
  0x16   : > { %s4312_s11 = scalar_select %p42_p10, %s4144_s15, %s44_s30  }
  0x1a   : > { %324 = sbr.rel (!%p4292_p3) target bundleno = 40 (0x28), region = 56  ;;  %s326_s12 = sand.u32 (%p4292_p3), 1, %s4144_s15  }
  0x1b   : > { %s3823_s20 = sshll.u32 (%p4292_p3), %s4160_s18, 3  ;;  %s3822_s21 = sshll.u32 (%p4292_p3), %s326_s12, 5 }
  0x1c   : > { %s330_s22 = sadd.s32 (%p4292_p3), %s4156_s17, %s3823_s20  ;;  %s8612_s0 = sld [smem:[#allocation170_spill]] (%p4292_p3) }
  0x1d   : > { %s3824_s27 = sshll.u32 (%p4292_p3), %s330_s22, 3  ;;  %s328_s29 = scalar_lea.vmem (%p4292_p3), [#allocation2], %s3822_s21 }
  0x22   : > { %s332_s28 = scalar_lea.vmem %s8612_s0, %s3824_s27 }
  0x23   : > { %v367_v0 = vld [vmem:[%s332_s28] sm:$0xff]  ;;  %v369_v1 = vld [vmem:[%s332_s28 + $0x10] sm:$0xff] }
  0x24   : > { %v371_v2 = vld [vmem:[%s332_s28 + $0x20] sm:$0xff]  ;;  %368 = vst [vmem:[%s328_s29] sm:$0xff] %v367_v0  ;;  %v373_v3 = vld [vmem:[%s332_s28 + $0x30] sm:$0xff] }
  0x25   : > { %370 = vst [vmem:[%s328_s29 + $0x8] sm:$0xff] %v369_v1 }
  0x26   : > { %372 = vst [vmem:[%s328_s29 + $0x10] sm:$0xff] %v371_v2 }
  0x27   : > { %374 = vst [vmem:[%s328_s29 + $0x18] sm:$0xff] %v373_v3 }
  0x28 PF: > { %p3825_p12 = scmp.ge.s32.totalorder %s4164_s19, 1  ;;  %p379_p13 = scmp.lt.s32.totalorder %s4164_s19, 5 }
  0x2a   : > { %p380_p0 = pnand %p3825_p12, %p379_p13 }
  0x2c   : > { %383 = sbr.rel (%p380_p0) target bundleno = 886 (0x376), region = 94 }
  0x31   : > { %v423_v4 = vld [vmem:[%s8204_s1] sm:$0xff]  ;;  %v8231_v5 = vmov 2   ;;  %v8217_v6 = vmov 1   ;;  %v8226_v7 = vmov 0   ;;  %v4334_v8 = vld [vmem:[%s8204_s1 + $0x8] sm:$0xff]  ;;  %v8222_v9 = vmov 3  }
  0x32   : > { %3925 = vset.pattern.permute.xlu2 %v8231_v5  ;;  %3924 = vset.pattern.permute.xlu1 %v8217_v6  ;;  %v425_v10 = vld [vmem:[%s8205_s2] sm:$0xff]  ;;  %v4358_v13 = vld [vmem:[%s8207_s4 + $0x10] sm:$0xff]  ;;  %v8218_v14 = vmov 4   ;;  %v4367_v15 = vld [vmem:[%s8207_s4 + $0x8] sm:$0xff]  ;;  %v8220_v16 = vmov 5   ;;  %v8242_v17 = vmov 6  }
  0x33   : > { %3923 = vset.pattern.permute.xlu0 %v8226_v7  ;;  %464 = vperm.xlu2 %3925, %v423_v4   ;;  %v426_v11 = vld [vmem:[%s8206_s3] sm:$0xff]  ;;  %v4385_v18 = vld [vmem:[%s8207_s4 + $0x18] sm:$0xff]  ;;  %s386_s12 = sand.u32 1, %s4140_s14   ;;  %v8224_v19 = vmov 7   ;;  %s3829_s22 = sshll.u32 %s4152_s7, 3 }
  0x34   : > { %451 = vperm.xlu1 %3924, %v423_v4   ;;  %439 = vperm.xlu0 %3923, %v423_v4   ;;  %v427_v12 = vld [vmem:[%s8207_s4] sm:$0xff]  ;;  %s4400_s24 = sshll.u32 %s386_s12, 5  ;;  %s3729_s23 = sadd.s32 %s4148_s16, %s3829_s22 }
  0x35   : > { %v4396_v20 = vld [vmem:[%s8207_s4 + $0x20] sm:$0x1]  ;;  %s388_s28 = scalar_lea.vmem [#allocation2], %s4400_s24  ;;  %s3830_s7 = sshll.u32 %s3729_s23, 3 }
  0x36   : > { %v4407_v21 = vld [vmem:[%s388_s28 + $0x4] sm:$0xf]  ;;  %v4409_v22 = vld [vmem:[%s388_s28 + $0x8] sm:$0xf]  ;;  %v4411_v23 = vld [vmem:[%s388_s28 + $0xc] sm:$0xf]  ;;  %s3731_s27 = scalar_lea.hbm %s8213_s10, %s3830_s7 }
  0x37   : > { %8613 = vst [vmem:[#allocation9_spill] sm:$0xff] %v4407_v21  ;;  %v1030_v24 = vperm.slane %v4407_v21, 2  ;;  %v1377_v25 = vperm.slane %v4409_v22, 2  ;;  %v1725_v26 = vperm.slane %v4411_v23, 2  ;;  %v4416_v27 = vld [vmem:[%s388_s28 + $0x10] sm:$0xf] }
  0x38   : > { %8614 = vst [vmem:[#allocation10_spill] sm:$0xff] %v4409_v22  ;;  %v4419_v28 = vld [vmem:[%s388_s28 + $0x14] sm:$0xf]  ;;  %v4421_v29 = vld [vmem:[%s388_s28 + $0x18] sm:$0xf]  ;;  %v2074_v31 = vperm.slane %v4416_v27, 2 }
  0x39   : > { %8615 = vst [vmem:[#allocation11_spill] sm:$0xff] %v4411_v23  ;;  %v4423_v30 = vld [vmem:[%s388_s28 + $0x1c] sm:$0xf]  ;;  %v2423_v32 = vperm.slane %v4419_v28, 2  ;;  %v2772_v33 = vperm.slane %v4421_v29, 2  ;;  %v1025_v55 = vperm.slane %v4407_v21, 1 }
  0x3a   : > { %8616 = vst [vmem:[#allocation12_spill] sm:$0xff] %v4416_v27  ;;  %v3121_v34 = vperm.slane %v4423_v30, 2  ;;  %v4449_v43 = vld [vmem:[%s388_s28] sm:$0xf]  ;;  %v1372_v56 = vperm.slane %v4409_v22, 1  ;;  %v1720_v57 = vperm.slane %v4411_v23, 1 }
  0x3b   : > { %468 = vperm.xlu2 %3925, %v4334_v8   ;;  %8617 = vst [vmem:[#allocation13_spill] sm:$0xff] %v4419_v28  ;;  %v471_v44 = vperm.slane %v4449_v43, 2  ;;  %v458_v54 = vperm.slane %v4449_v43, 1  ;;  %v8240_v58 = vperm.slane %v4416_v27, 1  ;;  %v8237_v59 = vperm.slane %v4419_v28, 1  ;;  %s422_s30 = scalar_lea.vmem [#allocation3], %s4400_s24 }
  0x3c   : > { %455 = vperm.xlu1 %3924, %v4334_v8   ;;  %3926 = vset.pattern.permute.xlu0 %v8222_v9  ;;  %8618 = vst [vmem:[#allocation14_spill] sm:$0xff] %v4421_v29  ;;  %v8235_v60 = vperm.slane %v4421_v29, 1  ;;  %v8234_v61 = vperm.slane %v4423_v30, 1  ;;  %v8228_v62 = vperm.slane %v4449_v43, 0  ;;  %v8229_v63 = vperm.slane %v4407_v21, 0  ;;  %s3732_s20 = sshll.u32 %s422_s30, 4  ;;  %s3733_s20 = int_to_ptr.vmem [resolvable:$true] %s3732_s20 }
  0x3d   : > { %477 = vperm.xlu0 %3926, %v423_v4   ;;  %8619 = vst [vmem:[#allocation15_spill] sm:$0xff] %v4423_v30  ;;  %v8230_v0 = vperm.slane %v4409_v22, 0  ;;  %v8233_v1 = vperm.slane %v4411_v23, 0  ;;  %v8236_v2 = vperm.slane %v4416_v27, 0  ;;  %v8238_v3 = vperm.slane %v4419_v28, 0  ;;  %s3734_s21 = sshll.u32 %s3731_s27, 4  ;;  %s3735_s21 = int_to_ptr.hbm [resolvable:$true] %s3734_s21 }
  0x3e   : > { %8620 = vst [vmem:[#allocation16_spill] sm:$0xff] %v4449_v43  ;;  %v8239_v4 = vperm.slane %v4421_v29, 0  ;;  %s3719_s24 = scalar_lea.sflag [#allocation4], %s386_s12  ;;  %s4084_s28 = sshra.s32 %s3735_s21, 4  ;;  %s4085_s28 = int_to_ptr.hbm [resolvable:$true] %s4084_s28 }
  0x3f   : > { %s4086_s29 = scalar_lea.hbm %s4085_s28, 32  ;;  %s4090_s7 = scalar_lea.hbm %s8213_s10, 128 }
  0x40   : > { %p4087_p1 = scmp.ne.s32.totalorder %s4085_s28, %s4086_s29  ;;  %p4091_p4 = scmp.lt.s32.totalorder %s4085_s28, %s8213_s10 }
  0x41   : > { %p4092_p5 = scmp.lt.s32.totalorder %s4090_s7, %s4086_s29 }
  0x42   : > { %p4088_p2 = pnand %p4087_p1, %p4300_p8 }
  0x43   : > { %3928 = vset.pattern.permute.xlu2 %v8222_v9  ;;  %p4093_p6 = por %p4092_p5, %p4091_p4 }
  0x44   : > { %3927 = vset.pattern.permute.xlu1 %v8222_v9  ;;  %491 = vperm.xlu2 %3928, %v425_v10   ;;  %p4089_p3 = pneg %p4088_p2 }
  0x45   : > { %481 = vperm.xlu1 %3927, %v4334_v8   ;;  %3931 = vset.pattern.permute.xlu0 %v8217_v6 }
  0x46   : > { %508 = vperm.xlu0 %3931, %v425_v10   ;;  %p4094_p7 = pnand %p4093_p6, %p4089_p3 }
  0x4c   : > { %3930 = vset.pattern.permute.xlu2 %v8226_v7 }
  0x4d   : > { %3929 = vset.pattern.permute.xlu1 %v8226_v7  ;;  %502 = vperm.xlu2 %3930, %v425_v10  }
  0x4e   : > { %497 = vperm.xlu1 %3929, %v426_v11   ;;  %3935 = vset.pattern.permute.xlu0 %v8231_v5 }
  0x4f   : > { %587 = vperm.xlu0 %3935, %v427_v12  }
  0x55   : > { %526 = vperm.xlu2 %3930, %v427_v12  }
  0x56   : > { %3932 = vset.pattern.permute.xlu1 %v8231_v5 }
  0x57   : > { %514 = vperm.xlu1 %3932, %v425_v10   ;;  %3944 = vset.pattern.permute.xlu0 %v8218_v14 }
  0x58   : > { %657 = vperm.xlu0 %3944, %v4358_v13  }
  0x5d   : > { %3934 = vset.pattern.permute.xlu2 %v8217_v6 }
  0x5e   : > { %556 = vperm.xlu2 %3934, %v427_v12  }
  0x5f   : > { %3933 = vset.pattern.permute.xlu1 %v8226_v7 }
  0x60   : > { %531 = vperm.xlu1 %3933, %v4367_v15   ;;  %3949 = vset.pattern.permute.xlu0 %v8222_v9 }
  0x61   : > { %622 = vperm.xlu0 %3949, %v4367_v15  }
  0x66   : > { %3937 = vset.pattern.permute.xlu2 %v8218_v14 }
  0x67   : > { %649 = vperm.xlu2 %3937, %v427_v12  }
  0x68   : > { %3936 = vset.pattern.permute.xlu1 %v8222_v9 }
  0x69   : > { %618 = vperm.xlu1 %3936, %v427_v12   ;;  %3950 = vset.pattern.permute.xlu0 %v8220_v16 }
  0x6a   : > { %680 = vperm.xlu0 %3950, %v427_v12  }
  0x6f   : > { %3939 = vset.pattern.permute.xlu2 %v8217_v6 }
  0x70   : > { %564 = vperm.xlu2 %3939, %v4358_v13  }
  0x71   : > { %3938 = vset.pattern.permute.xlu1 %v8226_v7 }
  0x72   : > { %536 = vperm.xlu1 %3938, %v4358_v13   ;;  %684 = vperm.xlu0 %3950, %v4367_v15  }
  0x78   : > { %3941 = vset.pattern.permute.xlu2 %v8242_v17 }
  0x79   : > { %711 = vperm.xlu2 %3941, %v427_v12  }
  0x7a   : > { %3940 = vset.pattern.permute.xlu1 %v8231_v5  ;;  %3959 = vset.pattern.permute.xlu0 %v8218_v14 }
  0x7b   : > { %595 = vperm.xlu1 %3940, %v4358_v13   ;;  %661 = vperm.xlu0 %3959, %v4385_v18  }
  0x81   : > { %3943 = vset.pattern.permute.xlu2 %v8224_v19 }
  0x82   : > { %742 = vperm.xlu2 %3943, %v427_v12  }
  0x83   : > { %3942 = vset.pattern.permute.xlu1 %v8222_v9  ;;  %3964 = vset.pattern.permute.xlu0 %v8217_v6 }
  0x84   : > { %626 = vperm.xlu1 %3942, %v4358_v13   ;;  %572 = vperm.xlu0 %3964, %v4396_v20  }
  0x8a   : > { %3946 = vset.pattern.permute.xlu2 %v8220_v16 }
  0x8b   : > { %688 = vperm.xlu2 %3946, %v4358_v13  }
  0x8c   : > { %3945 = vset.pattern.permute.xlu1 %v8217_v6  ;;  %3969 = vset.pattern.permute.xlu0 %v8242_v17 }
  0x8d   : > { %560 = vperm.xlu1 %3945, %v4367_v15   ;;  %727 = vperm.xlu0 %3969, %v4396_v20   ;;  %v465_v35 = vpop.permute.xlu2 %464 }
  0x8e   : > { %v4434_v36 = vmul.f32 %v1030_v24, %v465_v35  ;;  %v4436_v37 = vmul.f32 %v1377_v25, %v465_v35  ;;  %v4438_v38 = vmul.f32 %v1725_v26, %v465_v35  ;;  %v4440_v39 = vmul.f32 %v2074_v31, %v465_v35 }
  0x8f   : > { %v4442_v40 = vmul.f32 %v2423_v32, %v465_v35  ;;  %v4444_v41 = vmul.f32 %v2772_v33, %v465_v35  ;;  %v4446_v42 = vmul.f32 %v3121_v34, %v465_v35  ;;  %v472_v10 = vmul.f32 %v471_v44, %v465_v35 }
  0x93   : > { %3948 = vset.pattern.permute.xlu2 %v8242_v17 }
  0x94   : > { %719 = vperm.xlu2 %3948, %v4358_v13  }
  0x95   : > { %3947 = vset.pattern.permute.xlu1 %v8231_v5  ;;  %3970 = vset.pattern.permute.xlu0 %v8226_v7  ;;  %v469_v45 = vpop.permute.xlu2 %468 }
  0x96   : > { %591 = vperm.xlu1 %3947, %v4367_v15   ;;  %444 = vperm.xlu0 %3970, %v4334_v8   ;;  %v4457_v46 = vmul.f32 %v471_v44, %v469_v45  ;;  %v4459_v47 = vmul.f32 %v1030_v24, %v469_v45  ;;  %v4461_v48 = vmul.f32 %v1377_v25, %v469_v45  ;;  %v8241_v8 = vperm.slane %v4423_v30, 0 }
  0x97   : > { %v4463_v49 = vmul.f32 %v1725_v26, %v469_v45  ;;  %v4465_v50 = vmul.f32 %v2074_v31, %v469_v45  ;;  %v4467_v51 = vmul.f32 %v2423_v32, %v469_v45  ;;  %v4469_v52 = vmul.f32 %v2772_v33, %v469_v45 }
  0x98   : > { %8621 = vst [vmem:[#allocation17_spill] sm:$0xff] %v4457_v46  ;;  %v4471_v53 = vmul.f32 %v3121_v34, %v469_v45 }
  0x99   : > { %8622 = vst [vmem:[#allocation18_spill] sm:$0xff] %v4459_v47  ;;  %v8667_v47 = vmov 5  }
  0x9a   : > { %8623 = vst [vmem:[#allocation19_spill] sm:$0xff] %v4461_v48 }
  0x9b   : > { %8624 = vst [vmem:[#allocation20_spill] sm:$0xff] %v4463_v49 }
  0x9c   : > { %8625 = vst [vmem:[#allocation21_spill] sm:$0xff] %v4465_v50  ;;  %3952 = vset.pattern.permute.xlu2 %v8218_v14 }
  0x9d   : > { %8626 = vst [vmem:[#allocation22_spill] sm:$0xff] %v4467_v51  ;;  %653 = vperm.xlu2 %3952, %v4367_v15  }
  0x9e   : > { %8627 = vst [vmem:[#allocation23_spill] sm:$0xff] %v4469_v52  ;;  %3951 = vset.pattern.permute.xlu1 %v8224_v19 }
  0x9f   : > { %8628 = vst [vmem:[#allocation24_spill] sm:$0xff] %v4471_v53  ;;  %750 = vperm.xlu1 %3951, %v4358_v13   ;;  %v4536_v13 = vpop.permute.xlu2 %491 }
  0xa5   : > { %3954 = vset.pattern.permute.xlu2 %v8217_v6 }
  0xa6   : > { %v452_v24 = vpop.permute.xlu1 %451  ;;  %v440_v25 = vpop.permute.xlu0 %439  ;;  %568 = vperm.xlu2 %3954, %v4385_v18  }
  0xa7   : > { %v459_v34 = vmul.f32 %v458_v54, %v452_v24  ;;  %v1026_v35 = vmul.f32 %v1025_v55, %v452_v24  ;;  %v1373_v44 = vmul.f32 %v1372_v56, %v452_v24  ;;  %v1721_v45 = vmul.f32 %v1720_v57, %v452_v24  ;;  %3953 = vset.pattern.permute.xlu1 %v8226_v7 }
  0xa8   : > { %v2070_v6 = vmul.f32 %v8240_v58, %v452_v24  ;;  %v2419_v14 = vmul.f32 %v8237_v59, %v452_v24  ;;  %v2768_v16 = vmul.f32 %v8235_v60, %v452_v24  ;;  %v3117_v9 = vmul.f32 %v8234_v61, %v452_v24  ;;  %541 = vperm.xlu1 %3953, %v4385_v18  }
  0xa9   : > { %v448_v19 = vmul.f32 %v8228_v62, %v440_v25  ;;  %v1023_v7 = vmul.f32 %v8229_v63, %v440_v25  ;;  %v1370_v33 = vmul.f32 %v8230_v0, %v440_v25  ;;  %v1718_v32 = vmul.f32 %v8233_v1, %v440_v25 }
  0xaa   : > { %v2067_v31 = vmul.f32 %v8236_v2, %v440_v25  ;;  %v2416_v24 = vmul.f32 %v8238_v3, %v440_v25  ;;  %v2765_v26 = vmul.f32 %v8239_v4, %v440_v25  ;;  %v3114_v62 = vmul.f32 %v8241_v8, %v440_v25 }
  0xab   : > { %v461_v63 = vadd.f32 %v459_v34, %v448_v19  ;;  %v1028_v12 = vadd.f32 %v1026_v35, %v1023_v7  ;;  %v1375_v0 = vadd.f32 %v1373_v44, %v1370_v33  ;;  %v1723_v11 = vadd.f32 %v1721_v45, %v1718_v32 }
  0xac   : > { %v2072_v5 = vadd.f32 %v2070_v6, %v2067_v31  ;;  %v2421_v1 = vadd.f32 %v2419_v14, %v2416_v24  ;;  %v2770_v61 = vadd.f32 %v2768_v16, %v2765_v26  ;;  %v3119_v60 = vadd.f32 %v3117_v9, %v3114_v62 }
  0xad   : > { %v474_v2 = vadd.f32 %v472_v10, %v461_v63  ;;  %v1033_v59 = vadd.f32 %v4434_v36, %v1028_v12  ;;  %v1380_v3 = vadd.f32 %v4436_v37, %v1375_v0  ;;  %v3126_v4 = vperm.slane %v4423_v30, 3 }
  0xae   : > { %v456_v58 = vpop.permute.xlu1 %455  ;;  %3956 = vset.pattern.permute.xlu2 %v8242_v17  ;;  %v1728_v25 = vadd.f32 %v4438_v38, %v1723_v11  ;;  %v2077_v7 = vadd.f32 %v4440_v39, %v2072_v5  ;;  %v2775_v19 = vadd.f32 %v4444_v41, %v2770_v61  ;;  %v3124_v6 = vadd.f32 %v4446_v42, %v3119_v60 }
  0xaf   : > { %v4548_v9 = vmul.f32 %v458_v54, %v456_v58  ;;  %v4552_v14 = vmul.f32 %v1025_v55, %v456_v58  ;;  %v4556_v16 = vmul.f32 %v1372_v56, %v456_v58  ;;  %v4560_v36 = vmul.f32 %v1720_v57, %v456_v58  ;;  %v478_v5 = vpop.permute.xlu0 %477  ;;  %715 = vperm.xlu2 %3956, %v4367_v15  }
  0xb0   : > { %v8633_v37 = vperm.slane %v4416_v27, 1  ;;  %v8635_v39 = vperm.slane %v4419_v28, 1  ;;  %v8637_v42 = vperm.slane %v4421_v29, 1  ;;  %v8639_v55 = vperm.slane %v4423_v30, 1 }
  0xb1   : > { %8629 = vst [vmem:[#allocation25_spill] sm:$0xff] %v4548_v9  ;;  %v8641_v57 = vmov 2   ;;  %v8642_v60 = vperm.slane %v4449_v43, 3  ;;  %v8643_v62 = vperm.slane %v4407_v21, 3  ;;  %v8644_v0 = vperm.slane %v4409_v22, 3 }
  0xb2   : > { %8630 = vst [vmem:[#allocation26_spill] sm:$0xff] %v4552_v14  ;;  %v4565_v38 = vmul.f32 %v8633_v37, %v456_v58  ;;  %v4569_v41 = vmul.f32 %v8635_v39, %v456_v58  ;;  %v4573_v54 = vmul.f32 %v8637_v42, %v456_v58  ;;  %v4577_v56 = vmul.f32 %v8639_v55, %v456_v58 }
  0xb3   : > { %8631 = vst [vmem:[#allocation27_spill] sm:$0xff] %v4556_v16  ;;  %3955 = vset.pattern.permute.xlu1 %v8641_v57  ;;  %v485_v61 = vmul.f32 %v8642_v60, %v478_v5  ;;  %v1036_v63 = vmul.f32 %v8643_v62, %v478_v5  ;;  %v1383_v10 = vmul.f32 %v8644_v0, %v478_v5  ;;  %v8645_v11 = vperm.slane %v4411_v23, 3  ;;  %v503_v62 = vpop.permute.xlu2 %502 }
  0xb4   : > { %8632 = vst [vmem:[#allocation28_spill] sm:$0xff] %v4560_v36  ;;  %599 = vperm.xlu1 %3955, %v4385_v18   ;;  %v8646_v26 = vperm.slane %v4416_v27, 3  ;;  %v8647_v31 = vperm.slane %v4419_v28, 3  ;;  %v8648_v33 = vperm.slane %v4421_v29, 3  ;;  %v3127_v35 = vmul.f32 %v3126_v4, %v478_v5 }
  0xb5   : > { %8634 = vst [vmem:[#allocation29_spill] sm:$0xff] %v4565_v38  ;;  %v1731_v12 = vmul.f32 %v8645_v11, %v478_v5  ;;  %v4595_v44 = vadd.f32 %v485_v61, %v474_v2  ;;  %v4597_v45 = vadd.f32 %v1036_v63, %v1033_v59  ;;  %v4599_v24 = vadd.f32 %v1383_v10, %v1380_v3 }
  0xb6   : > { %8636 = vst [vmem:[#allocation30_spill] sm:$0xff] %v4569_v41  ;;  %v2080_v58 = vmul.f32 %v8646_v26, %v478_v5  ;;  %v2429_v32 = vmul.f32 %v8647_v31, %v478_v5  ;;  %v2778_v34 = vmul.f32 %v8648_v33, %v478_v5  ;;  %v3129_v55 = vadd.f32 %v3127_v35, %v3124_v6 }
  0xb7   : > { %8638 = vst [vmem:[#allocation31_spill] sm:$0xff] %v4573_v54  ;;  %v4601_v37 = vadd.f32 %v1731_v12, %v1728_v25  ;;  %v2426_v60 = vadd.f32 %v4442_v40, %v2421_v1  ;;  %v1040_v0 = vmul.f32 %v4597_v45, %v4536_v13  ;;  %v1387_v2 = vmul.f32 %v4599_v24, %v4536_v13  ;;  %v482_v40 = vpop.permute.xlu1 %481 }
  0xb8   : > { %8640 = vst [vmem:[#allocation32_spill] sm:$0xff] %v4577_v56  ;;  %v4603_v39 = vadd.f32 %v2080_v58, %v2077_v7  ;;  %v4605_v42 = vadd.f32 %v2778_v34, %v2775_v19  ;;  %v1737_v25 = vmul.f32 %v503_v62, %v4595_v44  ;;  %v2086_v19 = vmul.f32 %v4597_v45, %v503_v62  ;;  %v509_v34 = vpop.permute.xlu0 %508 }
  0xb9   : > { %v1735_v59 = vmul.f32 %v4601_v37, %v4536_v13  ;;  %v4614_v3 = vadd.f32 %v2429_v32, %v2426_v60  ;;  %v8649_v1 = vmov 7   ;;  %v2435_v6 = vmul.f32 %v4599_v24, %v503_v62 }
  0xba   : > { %v2084_v7 = vmul.f32 %v4603_v39, %v4536_v13  ;;  %3958 = vset.pattern.permute.xlu2 %v8649_v1  ;;  %v2782_v5 = vmul.f32 %v4605_v42, %v4536_v13  ;;  %v2784_v61 = vmul.f32 %v4601_v37, %v503_v62  ;;  %v3131_v63 = vmul.f32 %v3129_v55, %v4536_v13 }
  0xbb   : > { %v8650_v10 = vperm.slane %v4449_v43, 3  ;;  %v8652_v12 = vperm.slane %v4407_v21, 3  ;;  %v8654_v58 = vperm.slane %v4409_v22, 3  ;;  %v8656_v32 = vperm.slane %v4411_v23, 3  ;;  %746 = vperm.xlu2 %3958, %v4367_v15  }
  0xbc   : > { %v8658_v35 = vperm.slane %v4416_v27, 3  ;;  %v8660_v60 = vperm.slane %v4419_v28, 3  ;;  %v8665_v17 = vmov 3   ;;  %v1739_v15 = vmul.f32 %v4597_v45, %v509_v34 }
  0xbd   : > { %v4628_v11 = vmul.f32 %v8650_v10, %v482_v40  ;;  %v4632_v26 = vmul.f32 %v8652_v12, %v482_v40  ;;  %v4636_v31 = vmul.f32 %v8654_v58, %v482_v40  ;;  %v4640_v33 = vmul.f32 %v8656_v32, %v482_v40  ;;  %3957 = vset.pattern.permute.xlu1 %v8665_v17 }
  0xbe   : > { %v4645_v55 = vmul.f32 %v8658_v35, %v482_v40  ;;  %v4649_v10 = vmul.f32 %v8660_v60, %v482_v40  ;;  %v8662_v12 = vperm.slane %v4421_v29, 3  ;;  %v4655_v58 = vmul.f32 %v3126_v4, %v482_v40  ;;  %630 = vperm.xlu1 %3957, %v4385_v18  }
  0xbf   : > { %8651 = vst [vmem:[#allocation33_spill] sm:$0xff] %v4628_v11  ;;  %v1390_v32 = vmul.f32 %v509_v34, %v4595_v44  ;;  %v2437_v35 = vmul.f32 %v4601_v37, %v509_v34  ;;  %v2786_v60 = vmul.f32 %v4603_v39, %v509_v34  ;;  %v2433_v4 = vmul.f32 %v4614_v3, %v4536_v13 }
  0xc0   : > { %8653 = vst [vmem:[#allocation34_spill] sm:$0xff] %v4632_v26  ;;  %v4653_v8 = vmul.f32 %v8662_v12, %v482_v40  ;;  %v3133_v40 = vmul.f32 %v4603_v39, %v503_v62  ;;  %v505_v12 = vmul.f32 0.0, %v503_v62 }
  0xc1   : > { %8655 = vst [vmem:[#allocation35_spill] sm:$0xff] %v4636_v31  ;;  %v8666_v31 = vmov 6  }
  0xc2   : > { %8657 = vst [vmem:[#allocation36_spill] sm:$0xff] %v4640_v33  ;;  %v2088_v33 = vmul.f32 %v4599_v24, %v509_v34 }
  0xc3   : > { %8659 = vst [vmem:[#allocation37_spill] sm:$0xff] %v4645_v55  ;;  %v498_v55 = vpop.permute.xlu1 %497  ;;  %3961 = vset.pattern.permute.xlu2 %v8666_v31 }
  0xc4   : > { %8661 = vst [vmem:[#allocation38_spill] sm:$0xff] %v4649_v10  ;;  %v3135_v10 = vmul.f32 %v4614_v3, %v509_v34  ;;  %v1041_v11 = vadd.f32 %v1040_v0, %v498_v55  ;;  %v1388_v53 = vadd.f32 %v1387_v2, %v498_v55  ;;  %v1736_v52 = vadd.f32 %v1735_v59, %v498_v55 }
  0xc5   : > { %8663 = vst [vmem:[#allocation39_spill] sm:$0xff] %v4653_v8  ;;  %v511_v8 = vmul.f32 0.0, %v509_v34  ;;  %723 = vperm.xlu2 %3961, %v4385_v18   ;;  %v2085_v51 = vadd.f32 %v2084_v7, %v498_v55  ;;  %v2434_v50 = vadd.f32 %v2433_v4, %v498_v55  ;;  %v2783_v49 = vadd.f32 %v2782_v5, %v498_v55 }
  0xc6   : > { %8664 = vst [vmem:[#allocation40_spill] sm:$0xff] %v4655_v58  ;;  %v494_v58 = vmul.f32 %v4536_v13, %v4595_v44  ;;  %v3132_v48 = vadd.f32 %v3131_v63, %v498_v55  ;;  %3960 = vset.pattern.permute.xlu1 %v8667_v47  ;;  %v1042_v62 = vadd.f32 %v1041_v11, %v505_v12  ;;  %v4674_v63 = vpop.permute.xlu2 %526 }
  0xc7   : > { %v1389_v46 = vadd.f32 %v1388_v53, %v505_v12  ;;  %v1738_v56 = vadd.f32 %v1737_v25, %v1736_v52  ;;  %692 = vperm.xlu1 %3960, %v4385_v18   ;;  %v2087_v13 = vadd.f32 %v2086_v19, %v2085_v51  ;;  %v2436_v34 = vadd.f32 %v2435_v6, %v2434_v50 }
  0xc8   : > { %v500_v26 = vadd.f32 %v498_v55, %v494_v58  ;;  %v2785_v31 = vadd.f32 %v2784_v61, %v2783_v49  ;;  %v3134_v58 = vadd.f32 %v3133_v40, %v3132_v48  ;;  %v1043_v2 = vadd.f32 %v1042_v62, %v511_v8 }
  0xc9   : > { %v1391_v59 = vadd.f32 %v1390_v32, %v1389_v46  ;;  %v1740_v54 = vadd.f32 %v1739_v15, %v1738_v56  ;;  %v2089_v41 = vadd.f32 %v2088_v33, %v2087_v13  ;;  %v2438_v7 = vadd.f32 %v2437_v35, %v2436_v34 }
  0xca   : > { %v506_v0 = vadd.f32 %v505_v12, %v500_v26  ;;  %v2787_v4 = vadd.f32 %v2786_v60, %v2785_v31  ;;  %v3136_v5 = vadd.f32 %v3135_v10, %v3134_v58  ;;  %v8668_v53 = vmov 0  }
  0xcb   : > { %v515_v55 = vpop.permute.xlu1 %514 }
  0xcc   : > { %v512_v11 = vadd.f32 %v511_v8, %v506_v0  ;;  %v517_v52 = vmul.f32 0.0, %v515_v55  ;;  %v1044_v51 = vmul.f32 %v515_v55, %v4595_v44  ;;  %v1392_v49 = vmul.f32 %v4597_v45, %v515_v55 }
  0xcd   : > { %3963 = vset.pattern.permute.xlu2 %v8668_v53  ;;  %v1741_v48 = vmul.f32 %v4599_v24, %v515_v55  ;;  %v2090_v46 = vmul.f32 %v4601_v37, %v515_v55  ;;  %v2439_v50 = vmul.f32 %v4603_v39, %v515_v55  ;;  %v2788_v56 = vmul.f32 %v4614_v3, %v515_v55 }
  0xce   : > { %546 = vperm.xlu2 %3963, %v4396_v20   ;;  %v3137_v25 = vmul.f32 %v4605_v42, %v515_v55  ;;  %v518_v8 = vadd.f32 %v517_v52, %v512_v11  ;;  %v1045_v19 = vadd.f32 %v1044_v51, %v1043_v2  ;;  %v1393_v6 = vadd.f32 %v1392_v49, %v1391_v59  ;;  %v4688_v32 = vpop.permute.xlu2 %556 }
  0xcf   : > { %3962 = vset.pattern.permute.xlu1 %v8649_v1  ;;  %v1742_v44 = vadd.f32 %v1741_v48, %v1740_v54  ;;  %v2091_v45 = vadd.f32 %v2090_v46, %v2089_v41  ;;  %v2440_v24 = vadd.f32 %v2439_v50, %v2438_v7  ;;  %v2789_v61 = vadd.f32 %v2788_v56, %v2787_v4 }
  0xd0   : > { %754 = vperm.xlu1 %3962, %v4385_v18   ;;  %v3138_v26 = vadd.f32 %v3137_v25, %v3136_v5  ;;  %v519_v31 = vmul.f32 0.5, %v518_v8  ;;  %v1046_v37 = vmul.f32 0.5, %v1045_v19  ;;  %v1394_v33 = vmul.f32 0.5, %v1393_v6 }
  0xd1   : > { %v1743_v39 = vmul.f32 0.5, %v1742_v44  ;;  %v2092_v3 = vmul.f32 0.5, %v2091_v45  ;;  %v2441_v42 = vmul.f32 0.5, %v2440_v24  ;;  %v2790_v10 = vmul.f32 0.5, %v2789_v61 }
  0xd2   : > { %3989 = vtanh.f32 %v519_v31  ;;  %v3139_v18 = vmul.f32 0.5, %v3138_v26  ;;  %v8669_v7 = vmov 4  }
  0xd3   : > { %3991 = vtanh.f32 %v1046_v37  ;;  %v4704_v37 = vpop.permute.xlu0 %587 }
  0xd4   : > { %3993 = vtanh.f32 %v1394_v33 }
  0xd5   : > { %3995 = vtanh.f32 %v1743_v39 }
  0xd6   : > { %3966 = vset.pattern.permute.xlu2 %v8665_v17  ;;  %3997 = vtanh.f32 %v2092_v3  ;;  %v4695_v58 = vpop.permute.xlu2 %649 }
  0xd7   : > { %634 = vperm.xlu2 %3966, %v4396_v20   ;;  %3999 = vtanh.f32 %v2441_v42 }
  0xd8   : > { %3965 = vset.pattern.permute.xlu1 %v8641_v57  ;;  %v3990_v41 = vpop.eup %3989  ;;  %4001 = vtanh.f32 %v2790_v10 }
  0xd9   : > { %603 = vperm.xlu1 %3965, %v4396_v20   ;;  %v3992_v54 = vpop.eup %3991  ;;  %4003 = vtanh.f32 %v3139_v18  ;;  %v521_v62 = vmul.f32 0.5, %v3990_v41 }
  0xda   : > { %v3994_v15 = vpop.eup %3993  ;;  %v1048_v13 = vmul.f32 0.5, %v3992_v54 }
  0xdb   : > { %v3996_v35 = vpop.eup %3995  ;;  %v1396_v0 = vmul.f32 0.5, %v3994_v15  ;;  %v522_v11 = vadd.f32 0.5, %v521_v62 }
  0xdc   : > { %v3998_v60 = vpop.eup %3997  ;;  %v1745_v2 = vmul.f32 0.5, %v3996_v35  ;;  %v1049_v52 = vadd.f32 0.5, %v1048_v13 }
  0xdd   : > { %v4000_v40 = vpop.eup %3999  ;;  %v2094_v59 = vmul.f32 0.5, %v3998_v60  ;;  %v1397_v51 = vadd.f32 0.5, %v1396_v0  ;;  %v4699_v25 = vmul.f32 %v522_v11, %v518_v8 }
  0xde   : > { %v4002_v12 = vpop.eup %4001  ;;  %v2443_v4 = vmul.f32 0.5, %v4000_v40  ;;  %v1746_v49 = vadd.f32 0.5, %v1745_v2  ;;  %v4701_v31 = vmul.f32 %v1049_v52, %v1045_v19  ;;  %v4719_v19 = vpop.permute.xlu2 %564 }
  0xdf   : > { %3968 = vset.pattern.permute.xlu2 %v8667_v47  ;;  %v4004_v34 = vpop.eup %4003  ;;  %v2792_v5 = vmul.f32 0.5, %v4002_v12  ;;  %v2095_v48 = vadd.f32 0.5, %v2094_v59  ;;  %8670 = vst [vmem:[#allocation41_spill] sm:$0xff] %v4699_v25  ;;  %v4706_v33 = vmul.f32 %v1397_v51, %v1393_v6  ;;  %v4723_v18 = vperm.slane %v4699_v25, 4 }
  0xe0   : > { %696 = vperm.xlu2 %3968, %v4396_v20   ;;  %v3141_v55 = vmul.f32 0.5, %v4004_v34  ;;  %v2444_v46 = vadd.f32 0.5, %v2443_v4  ;;  %8671 = vst [vmem:[#allocation42_spill] sm:$0xff] %v4701_v31  ;;  %v4708_v39 = vmul.f32 %v1746_v49, %v1742_v44  ;;  %v4726_v6 = vperm.slane %v4701_v31, 4  ;;  %v4802_v49 = vpop.permute.xlu0 %657 }
  0xe1   : > { %3967 = vset.pattern.permute.xlu1 %v8669_v7  ;;  %v2793_v50 = vadd.f32 0.5, %v2792_v5  ;;  %8672 = vst [vmem:[#allocation43_spill] sm:$0xff] %v4706_v33  ;;  %v4710_v3 = vmul.f32 %v2095_v48, %v2091_v45  ;;  %v4729_v44 = vperm.slane %v4706_v33, 4  ;;  %v4749_v54 = vperm.slane %v4701_v31, 1 }
  0xe2   : > { %665 = vperm.xlu1 %3967, %v4396_v20   ;;  %v3142_v56 = vadd.f32 0.5, %v3141_v55  ;;  %8673 = vst [vmem:[#allocation44_spill] sm:$0xff] %v4708_v39  ;;  %v4712_v42 = vmul.f32 %v2444_v46, %v2440_v24  ;;  %v4732_v45 = vperm.slane %v4708_v39, 4  ;;  %v4752_v15 = vperm.slane %v4706_v33, 1 }
  0xe3   : > { %8674 = vst [vmem:[#allocation45_spill] sm:$0xff] %v4710_v3  ;;  %v4714_v10 = vmul.f32 %v2793_v50, %v2789_v61  ;;  %v4735_v24 = vperm.slane %v4710_v3, 4  ;;  %v4738_v61 = vperm.slane %v4699_v25, 1  ;;  %v4758_v60 = vperm.slane %v4708_v39, 1 }
  0xe4   : > { %8675 = vst [vmem:[#allocation46_spill] sm:$0xff] %v4712_v42  ;;  %v4717_v8 = vmul.f32 %v3142_v56, %v3138_v26  ;;  %v4740_v26 = vpop.permute.xlu1 %531  ;;  %v4761_v40 = vperm.slane %v4710_v3, 1  ;;  %v4764_v12 = vperm.slane %v4712_v42, 1  ;;  %v4773_v34 = vperm.slane %v4699_v25, 0 }
  0xe5   : > { %8676 = vst [vmem:[#allocation47_spill] sm:$0xff] %v4714_v10  ;;  %v4746_v41 = vperm.slane %v4714_v10, 4  ;;  %v4767_v62 = vperm.slane %v4714_v10, 1  ;;  %v4776_v0 = vperm.slane %v4701_v31, 0  ;;  %v4779_v2 = vperm.slane %v4706_v33, 0 }
  0xe6   : > { %8677 = vst [vmem:[#allocation48_spill] sm:$0xff] %v4717_v8  ;;  %v4755_v35 = vperm.slane %v4717_v8, 4  ;;  %v4770_v13 = vperm.slane %v4717_v8, 1  ;;  %v4782_v59 = vperm.slane %v4708_v39, 0  ;;  %v4785_v4 = vperm.slane %v4710_v3, 0  ;;  %v4835_v30 = vpop.permute.xlu2 %711 }
  0xe7   : > { %8678 = vst [vmem:[#allocation49_spill] sm:$0xff] %v4719_v19  ;;  %v4788_v5 = vperm.slane %v4712_v42, 0  ;;  %v4791_v55 = vperm.slane %v4714_v10, 0  ;;  %v4794_v11 = vperm.slane %v4717_v8, 0  ;;  %v4797_v52 = vperm.slane %v4699_v25, 3 }
  0xe8   : > { %3972 = vset.pattern.permute.xlu2 %v8668_v53  ;;  %8679 = vst [vmem:[#allocation50_spill] sm:$0xff] %v4723_v18  ;;  %v4800_v51 = vperm.slane %v4701_v31, 3  ;;  %v4805_v48 = vperm.slane %v4706_v33, 3  ;;  %v4808_v46 = vperm.slane %v4708_v39, 3  ;;  %v4811_v50 = vperm.slane %v4699_v25, 6 }
  0xe9   : > { %8680 = vst [vmem:[#allocation51_spill] sm:$0xff] %v4726_v6  ;;  %v4814_v56 = vperm.slane %v4701_v31, 6  ;;  %v4821_v38 = vperm.slane %v4712_v42, 3  ;;  %v4824_v36 = vperm.slane %v4706_v33, 6  ;;  %v4827_v16 = vperm.slane %v4708_v39, 6 }
  0xea   : > { %3971 = vset.pattern.permute.xlu1 %v8649_v1  ;;  %8681 = vst [vmem:[#allocation52_spill] sm:$0xff] %v4729_v44  ;;  %v4818_v1 = vperm.slane %v4710_v3, 3  ;;  %v4830_v14 = vperm.slane %v4714_v10, 3  ;;  %v4833_v9 = vperm.slane %v4717_v8, 3  ;;  %v4841_v29 = vperm.slane %v4712_v42, 6 }
  0xeb   : > { %758 = vperm.xlu1 %3971, %v4396_v20   ;;  %8682 = vst [vmem:[#allocation53_spill] sm:$0xff] %v4732_v45  ;;  %v4743_v20 = vperm.slane %v4712_v42, 4  ;;  %v4845_v28 = vmul.f32 %v4811_v50, %v4835_v30  ;;  %v4849_v27 = vmul.f32 %v4814_v56, %v4835_v30  ;;  %v4853_v7 = vmul.f32 %v4824_v36, %v4835_v30 }
  0xec   : > { %8683 = vst [vmem:[#allocation54_spill] sm:$0xff] %v4735_v24  ;;  %v4856_v23 = vperm.slane %v4714_v10, 6  ;;  %v4860_v22 = vmul.f32 %v4827_v16, %v4835_v30  ;;  %v576_v43 = vmul.f32 %v4738_v61, %v4688_v32 }
  0xed   : > { %8684 = vst [vmem:[#allocation55_spill] sm:$0xff] %v4738_v61  ;;  %v4887_v61 = vperm.slane %v4701_v31, 2 }
  0xee   : > { %8685 = vst [vmem:[#allocation56_spill] sm:$0xff] %v4740_v26  ;;  %v4876_v47 = vmul.f32 %v4856_v23, %v4835_v30  ;;  %v1058_v26 = vmul.f32 %v4749_v54, %v4688_v32 }
  0xef   : > { %8686 = vst [vmem:[#allocation57_spill] sm:$0xff] %v4743_v20 }
  0xf0   : > { %8687 = vst [vmem:[#allocation58_spill] sm:$0xff] %v4746_v41 }
  0xf1   : > { %8688 = vst [vmem:[#allocation59_spill] sm:$0xff] %v4749_v54  ;;  %v4899_v54 = vperm.slane %v4706_v33, 2 }
  0xf2   : > { %8689 = vst [vmem:[#allocation60_spill] sm:$0xff] %v4752_v15 }
  0xf3   : > { %8690 = vst [vmem:[#allocation61_spill] sm:$0xff] %v4755_v35  ;;  %3973 = vset.pattern.permute.xlu1 %v8668_v53  ;;  %v4838_v53 = vperm.slane %v4710_v3, 6 }
  0xf4   : > { %8691 = vst [vmem:[#allocation62_spill] sm:$0xff] %v4758_v60 }
  0xf5   : > { %8692 = vst [vmem:[#allocation63_spill] sm:$0xff] %v4761_v40  ;;  %v4864_v21 = vmul.f32 %v4838_v53, %v4835_v30 }
  0xf6   : > { %8693 = vst [vmem:[#allocation64_spill] sm:$0xff] %v4764_v12 }
  0xf7   : > { %8694 = vst [vmem:[#allocation65_spill] sm:$0xff] %v4767_v62 }
  0xf8   : > { %8695 = vst [vmem:[#allocation66_spill] sm:$0xff] %v4770_v13 }
  0xf9   : > { %8696 = vst [vmem:[#allocation67_spill] sm:$0xff] %v4773_v34 }
  0xfa   : > { %8697 = vst [vmem:[#allocation68_spill] sm:$0xff] %v4776_v0 }
  0xfb   : > { %8698 = vst [vmem:[#allocation69_spill] sm:$0xff] %v4779_v2 }
  0xfc   : > { %8699 = vst [vmem:[#allocation70_spill] sm:$0xff] %v4782_v59 }
  0xfd   : > { %8700 = vst [vmem:[#allocation71_spill] sm:$0xff] %v4785_v4 }
  0xfe   : > { %8701 = vst [vmem:[#allocation72_spill] sm:$0xff] %v4788_v5 }
  0xff   : > { %8702 = vst [vmem:[#allocation73_spill] sm:$0xff] %v4791_v55 }
 0x100   : > { %8703 = vst [vmem:[#allocation74_spill] sm:$0xff] %v4794_v11 }
 0x101   : > { %8704 = vst [vmem:[#allocation75_spill] sm:$0xff] %v4797_v52 }
 0x102   : > { %8705 = vst [vmem:[#allocation76_spill] sm:$0xff] %v4800_v51 }
 0x103   : > { %8706 = vst [vmem:[#allocation77_spill] sm:$0xff] %v4802_v49  ;;  %v1400_v49 = vmul.f32 %v4779_v2, %v4674_v63  ;;  %v4906_v2 = vpop.permute.xlu0 %622 }
 0x104   : > { %8707 = vst [vmem:[#allocation78_spill] sm:$0xff] %v4805_v48 }
 0x105   : > { %8708 = vst [vmem:[#allocation79_spill] sm:$0xff] %v4808_v46 }
 0x106   : > { %8709 = vst [vmem:[#allocation80_spill] sm:$0xff] %v4811_v50  ;;  %v619_v50 = vpop.permute.xlu1 %618 }
 0x107   : > { %8710 = vst [vmem:[#allocation81_spill] sm:$0xff] %v4814_v56  ;;  %v550_v56 = vmul.f32 %v4773_v34, %v4674_v63  ;;  %v1052_v34 = vmul.f32 %v4776_v0, %v4674_v63  ;;  %v1428_v19 = vmul.f32 %v4805_v48, %v619_v50 }
 0x108   : > { %8711 = vst [vmem:[#allocation82_spill] sm:$0xff] %v4818_v1 }
 0x109   : > { %8712 = vst [vmem:[#allocation83_spill] sm:$0xff] %v4821_v38  ;;  %v581_v17 = vadd.f32 %v576_v43, %v550_v56  ;;  %v1406_v43 = vmul.f32 %v4752_v15, %v4688_v32  ;;  %v1063_v56 = vadd.f32 %v1058_v26, %v1052_v34  ;;  %v1417_v26 = vmul.f32 %v4899_v54, %v4704_v37 }
 0x10a   : > { %8713 = vst [vmem:[#allocation84_spill] sm:$0xff] %v4824_v36  ;;  %v4872_v36 = vmul.f32 %v4841_v29, %v4835_v30  ;;  %v4911_v34 = vperm.slane %v4708_v39, 2 }
 0x10b   : > { %8714 = vst [vmem:[#allocation85_spill] sm:$0xff] %v4827_v16  ;;  %v4879_v16 = vperm.slane %v4699_v25, 2  ;;  %v1411_v57 = vadd.f32 %v1406_v43, %v1400_v49  ;;  %v2104_v49 = vmul.f32 %v4761_v40, %v4688_v32 }
 0x10c   : > { %8715 = vst [vmem:[#allocation86_spill] sm:$0xff] %v4830_v14 }
 0x10d   : > { %8716 = vst [vmem:[#allocation87_spill] sm:$0xff] %v4833_v9 }
 0x10e   : > { %8717 = vst [vmem:[#allocation88_spill] sm:$0xff] %v4838_v53  ;;  %v638_v53 = vmul.f32 %v4797_v52, %v619_v50  ;;  %v1069_v52 = vmul.f32 %v4887_v61, %v4704_v37 }
 0x10f   : > { %8718 = vst [vmem:[#allocation89_spill] sm:$0xff] %v4841_v29  ;;  %v607_v29 = vmul.f32 %v4879_v16, %v4704_v37 }
 0x110   : > { %8719 = vst [vmem:[#allocation90_spill] sm:$0xff] %v4856_v23  ;;  %v1080_v23 = vmul.f32 %v4800_v51, %v619_v50  ;;  %v1749_v51 = vmul.f32 %v4782_v59, %v4674_v63  ;;  %v1074_v15 = vadd.f32 %v1069_v52, %v1063_v56  ;;  %v1766_v52 = vmul.f32 %v4911_v34, %v4704_v37 }
 0x111   : > { %8720 = vst [vmem:[#allocation91_spill] sm:$0xff] %v4879_v16  ;;  %v612_v0 = vadd.f32 %v607_v29, %v581_v17  ;;  %v1755_v16 = vmul.f32 %v4758_v60, %v4688_v32  ;;  %v2098_v29 = vmul.f32 %v4785_v4, %v4674_v63  ;;  %v1422_v60 = vadd.f32 %v1417_v26, %v1411_v57 }
 0x112   : > { %8721 = vst [vmem:[#allocation92_spill] sm:$0xff] %v4887_v61  ;;  %v1777_v61 = vmul.f32 %v4808_v46, %v619_v50  ;;  %v1085_v43 = vadd.f32 %v1080_v23, %v1074_v15  ;;  %v4921_v56 = vperm.slane %v4710_v3, 2  ;;  %v4931_v57 = vperm.slane %v4712_v42, 2 }
 0x113   : > { %8722 = vst [vmem:[#allocation93_spill] sm:$0xff] %v4899_v54  ;;  %v643_v48 = vadd.f32 %v638_v53, %v612_v0  ;;  %v1760_v17 = vadd.f32 %v1755_v16, %v1749_v51  ;;  %v2126_v54 = vmul.f32 %v4818_v1, %v619_v50  ;;  %v2447_v16 = vmul.f32 %v4788_v5, %v4674_v63 }
 0x114   : > { %8723 = vst [vmem:[#allocation94_spill] sm:$0xff] %v4906_v2  ;;  %v2109_v2 = vadd.f32 %v2104_v49, %v2098_v29  ;;  %v2453_v0 = vmul.f32 %v4764_v12, %v4688_v32  ;;  %v1433_v51 = vadd.f32 %v1428_v19, %v1422_v60  ;;  %v2115_v23 = vmul.f32 %v4921_v56, %v4704_v37 }
 0x115   : > { %8724 = vst [vmem:[#allocation95_spill] sm:$0xff] %v4911_v34  ;;  %v1771_v53 = vadd.f32 %v1766_v52, %v1760_v17  ;;  %v2475_v26 = vmul.f32 %v4821_v38, %v619_v50  ;;  %v2796_v29 = vmul.f32 %v4791_v55, %v4674_v63  ;;  %v2802_v49 = vmul.f32 %v4767_v62, %v4688_v32 }
 0x116   : > { %8725 = vst [vmem:[#allocation96_spill] sm:$0xff] %v4921_v56  ;;  %v2458_v15 = vadd.f32 %v2453_v0, %v2447_v16  ;;  %v2120_v46 = vadd.f32 %v2115_v23, %v2109_v2  ;;  %v2464_v19 = vmul.f32 %v4931_v57, %v4704_v37  ;;  %v4941_v60 = vperm.slane %v4714_v10, 2 }
 0x117   : > { %8726 = vst [vmem:[#allocation97_spill] sm:$0xff] %v4931_v57  ;;  %v1782_v1 = vadd.f32 %v1777_v61, %v1771_v53  ;;  %v2807_v17 = vadd.f32 %v2802_v49, %v2796_v29  ;;  %v2824_v52 = vmul.f32 %v4830_v14, %v619_v50  ;;  %v3145_v16 = vmul.f32 %v4794_v11, %v4674_v63 }
 0x118   : > { %8727 = vst [vmem:[#allocation98_spill] sm:$0xff] %v4941_v60  ;;  %v3151_v0 = vmul.f32 %v4770_v13, %v4688_v32  ;;  %v2131_v38 = vadd.f32 %v2126_v54, %v2120_v46  ;;  %v2469_v56 = vadd.f32 %v2464_v19, %v2458_v15  ;;  %v2813_v61 = vmul.f32 %v4941_v60, %v4704_v37  ;;  %v681_v54 = vpop.permute.xlu0 %680 }
 0x119   : > { %v4951_v2 = vperm.slane %v4717_v8, 2  ;;  %v3173_v23 = vmul.f32 %v4833_v9, %v619_v50  ;;  %v669_v29 = vmul.f32 %v4723_v18, %v4695_v58  ;;  %v4957_v49 = vperm.slane %v4699_v25, 5 }
 0x11a   : > { %v3156_v53 = vadd.f32 %v3151_v0, %v3145_v16  ;;  %v2480_v63 = vadd.f32 %v2475_v26, %v2469_v56  ;;  %v2818_v14 = vadd.f32 %v2813_v61, %v2807_v17  ;;  %v1091_v46 = vmul.f32 %v4726_v6, %v4695_v58 }
 0x11b   : > { %8728 = vst [vmem:[#allocation99_spill] sm:$0xff] %v4951_v2  ;;  %v3162_v32 = vmul.f32 %v4951_v2, %v4704_v37  ;;  %v674_v15 = vadd.f32 %v669_v29, %v643_v48  ;;  %v700_v19 = vmul.f32 %v4957_v49, %v681_v54  ;;  %v4965_v50 = vperm.slane %v4701_v31, 5 }
 0x11c   : > { %8729 = vst [vmem:[#allocation100_spill] sm:$0xff] %v4957_v49  ;;  %v1439_v16 = vmul.f32 %v4729_v44, %v4695_v58  ;;  %v2829_v0 = vadd.f32 %v2824_v52, %v2818_v14  ;;  %v1096_v56 = vadd.f32 %v1091_v46, %v1085_v43  ;;  %v4970_v26 = vperm.slane %v4706_v33, 5 }
 0x11d   : > { %8730 = vst [vmem:[#allocation101_spill] sm:$0xff] %v4965_v50  ;;  %v3167_v9 = vadd.f32 %v3162_v32, %v3156_v53  ;;  %v705_v37 = vadd.f32 %v700_v19, %v674_v15  ;;  %v1102_v17 = vmul.f32 %v4965_v50, %v681_v54  ;;  %v1788_v48 = vmul.f32 %v4732_v45, %v4695_v58 }
 0x11e   : > { %8731 = vst [vmem:[#allocation102_spill] sm:$0xff] %v4970_v26  ;;  %v1444_v61 = vadd.f32 %v1439_v16, %v1433_v51  ;;  %v1450_v49 = vmul.f32 %v4970_v26, %v681_v54  ;;  %v4977_v2 = vperm.slane %v4708_v39, 5  ;;  %v2137_v14 = vmul.f32 %v4735_v24, %v4695_v58 }
 0x11f   : > { %v3178_v29 = vadd.f32 %v3173_v23, %v3167_v9  ;;  %v736_v43 = vadd.f32 %v4845_v28, %v705_v37  ;;  %v1107_v52 = vadd.f32 %v1102_v17, %v1096_v56  ;;  %v1793_v53 = vadd.f32 %v1788_v48, %v1782_v1  ;;  %v432_v23 = vld [vmem:[%s8208_s5] sm:$0xff] }
 0x120   : > { %8732 = vst [vmem:[#allocation103_spill] sm:$0xff] %v4977_v2  ;;  %v4983_v32 = vperm.slane %v4710_v3, 5  ;;  %v1455_v51 = vadd.f32 %v1450_v49, %v1444_v61  ;;  %v1799_v46 = vmul.f32 %v4977_v2, %v681_v54  ;;  %v2142_v15 = vadd.f32 %v2137_v14, %v2131_v38  ;;  %774 = vperm.xlu2 %3972, %v432_v23   ;;  %v743_v14 = vpop.permute.xlu2 %742 }
 0x121   : > { %v2486_v9 = vmul.f32 %v4743_v20, %v4695_v58  ;;  %v1118_v19 = vadd.f32 %v4849_v27, %v1107_v52  ;;  %v4994_v1 = vperm.slane %v4712_v42, 5  ;;  %v2835_v49 = vmul.f32 %v4746_v41, %v4695_v58 }
 0x122   : > { %8733 = vst [vmem:[#allocation104_spill] sm:$0xff] %v4983_v32  ;;  %v2148_v28 = vmul.f32 %v4983_v32, %v681_v54  ;;  %v1466_v38 = vadd.f32 %v4853_v7, %v1455_v51  ;;  %v1804_v16 = vadd.f32 %v1799_v46, %v1793_v53  ;;  %v5000_v37 = vperm.slane %v4714_v10, 5 }
 0x123   : > { %8734 = vst [vmem:[#allocation105_spill] sm:$0xff] %v4994_v1  ;;  %v2491_v56 = vadd.f32 %v2486_v9, %v2480_v63  ;;  %v2497_v61 = vmul.f32 %v4994_v1, %v681_v54  ;;  %v2840_v27 = vadd.f32 %v2835_v49, %v2829_v0  ;;  %v3184_v48 = vmul.f32 %v4755_v35, %v4695_v58 }
 0x124   : > { %8735 = vst [vmem:[#allocation106_spill] sm:$0xff] %v5000_v37  ;;  %v2153_v17 = vadd.f32 %v2148_v28, %v2142_v15  ;;  %v1815_v52 = vadd.f32 %v4860_v22, %v1804_v16  ;;  %v2846_v32 = vmul.f32 %v5000_v37, %v681_v54  ;;  %v5008_v23 = vperm.slane %v4717_v8, 5  ;;  %v8770_v37 = vld [vmem:[#allocation93_spill] sm:$0xff] }
 0x125   : > { %v5011_v7 = vperm.slane %v4699_v25, 7  ;;  %v2502_v53 = vadd.f32 %v2497_v61, %v2491_v56  ;;  %v3189_v51 = vadd.f32 %v3184_v48, %v3178_v29  ;;  %v5015_v0 = vperm.slane %v4701_v31, 7  ;;  %v8762_v25 = vld [vmem:[#allocation62_spill] sm:$0xff] }
 0x126   : > { %8736 = vst [vmem:[#allocation107_spill] sm:$0xff] %v5008_v23  ;;  %v2164_v63 = vadd.f32 %v4864_v21, %v2153_v17  ;;  %v2851_v46 = vadd.f32 %v2846_v32, %v2840_v27  ;;  %v3195_v58 = vmul.f32 %v5008_v23, %v681_v54  ;;  %v5020_v15 = vperm.slane %v4706_v33, 7  ;;  %v434_v54 = vld [vmem:[%s8211_s8] sm:$0xff] }
 0x127   : > { %8737 = vst [vmem:[#allocation108_spill] sm:$0xff] %v5011_v7  ;;  %v762_v22 = vmul.f32 %v5011_v7, %v743_v14  ;;  %v2513_v9 = vadd.f32 %v4872_v36, %v2502_v53  ;;  %v1124_v28 = vmul.f32 %v5015_v0, %v743_v14  ;;  %v5025_v49 = vperm.slane %v4708_v39, 7  ;;  %v5083_v39 = vpop.permute.xlu0 %684 }
 0x128   : > { %8738 = vst [vmem:[#allocation109_spill] sm:$0xff] %v5015_v0  ;;  %v2862_v21 = vadd.f32 %v4876_v47, %v2851_v46  ;;  %v3200_v29 = vadd.f32 %v3195_v58, %v3189_v51  ;;  %797 = vperm.xlu2 %3972, %v434_v54   ;;  %v1472_v36 = vmul.f32 %v5020_v15, %v743_v14  ;;  %v5038_v56 = vperm.slane %v4710_v3, 7  ;;  %v433_v47 = vld [vmem:[%s8209_s6] sm:$0xff]  ;;  %v537_v46 = vpop.permute.xlu1 %536 }
 0x129   : > { %8739 = vst [vmem:[#allocation110_spill] sm:$0xff] %v5020_v15  ;;  %v5028_v16 = vadd.f32 %v762_v22, %v736_v43  ;;  %v5033_v32 = vadd.f32 %v1124_v28, %v1118_v19  ;;  %v5044_v43 = vperm.slane %v4717_v8, 6  ;;  %v1821_v17 = vmul.f32 %v5025_v49, %v743_v14  ;;  %781 = vperm.xlu1 %3973, %v433_v47  }
 0x12a   : > { %8740 = vst [vmem:[#allocation111_spill] sm:$0xff] %v5025_v49  ;;  %v5047_v19 = vadd.f32 %v1472_v36, %v1466_v38  ;;  %v5052_v27 = vperm.slane %v4712_v42, 7  ;;  %v2170_v48 = vmul.f32 %v5038_v56, %v743_v14  ;;  %v8749_v28 = vmov 2   ;;  %v8763_v49 = vld [vmem:[#allocation77_spill] sm:$0xff] }
 0x12b   : > { %8741 = vst [vmem:[#allocation112_spill] sm:$0xff] %v5028_v16  ;;  %v5049_v61 = vadd.f32 %v1821_v17, %v1815_v52  ;;  %v3206_v53 = vmul.f32 %v5044_v43, %v4835_v30  ;;  %v8751_v52 = vld [vmem:[#allocation68_spill] sm:$0xff]  ;;  %v8752_v36 = vmov 1   ;;  %v5066_v47 = vperm.slane %v4714_v10, 7  ;;  %v8755_v30 = vld [vmem:[#allocation49_spill] sm:$0xff] }
 0x12c   : > { %8742 = vst [vmem:[#allocation113_spill] sm:$0xff] %v5033_v32  ;;  %v5057_v51 = vadd.f32 %v2170_v48, %v2164_v63  ;;  %v2519_v58 = vmul.f32 %v5052_v27, %v743_v14  ;;  %v1054_v54 = vmul.f32 %v8751_v52, %v537_v46  ;;  %v5069_v17 = vperm.slane %v4717_v8, 7  ;;  %v8756_v63 = vld [vmem:[#allocation59_spill] sm:$0xff] }
 0x12d   : > { %859 = vst [vmem:[#allocation1] sm:$0xff] %v5028_v16  ;;  %v3211_v22 = vadd.f32 %v3206_v53, %v3200_v29  ;;  %v1060_v48 = vmul.f32 %v8756_v63, %v8755_v30  ;;  %v2868_v42 = vmul.f32 %v5066_v47, %v743_v14  ;;  %v1751_v8 = vmul.f32 %v4782_v59, %v537_v46 }
 0x12e   : > { %8743 = vst [vmem:[#allocation114_spill] sm:$0xff] %v5038_v56  ;;  %v5061_v38 = vadd.f32 %v2519_v58, %v2513_v9  ;;  %v3217_v29 = vmul.f32 %v5069_v17, %v743_v14  ;;  %v8757_v9 = vld [vmem:[#allocation60_spill] sm:$0xff]  ;;  %v2100_v33 = vmul.f32 %v4785_v4, %v537_v46  ;;  %v1757_v14 = vmul.f32 %v8762_v25, %v8755_v30 }
 0x12f   : > { %8744 = vst [vmem:[#allocation115_spill] sm:$0xff] %v5044_v43  ;;  %v1408_v53 = vmul.f32 %v8757_v9, %v8755_v30  ;;  %v1065_v58 = vadd.f32 %v1060_v48, %v1054_v54  ;;  %v2798_v54 = vmul.f32 %v4791_v55, %v537_v46  ;;  %v3147_v56 = vmul.f32 %v4794_v11, %v537_v46  ;;  %v5141_v43 = vpop.permute.xlu0 %661 }
 0x130   : > { %8745 = vst [vmem:[#allocation116_spill] sm:$0xff] %v5047_v19  ;;  %3975 = vset.pattern.permute.xlu2 %v8749_v28  ;;  %v8758_v28 = vld [vmem:[#allocation69_spill] sm:$0xff]  ;;  %v5080_v10 = vadd.f32 %v3217_v29, %v3211_v22  ;;  %v2804_v22 = vmul.f32 %v4767_v62, %v8755_v30  ;;  %v1762_v48 = vadd.f32 %v1757_v14, %v1751_v8 }
 0x131   : > { %8746 = vst [vmem:[#allocation117_spill] sm:$0xff] %v5049_v61  ;;  %3974 = vset.pattern.permute.xlu1 %v8752_v36  ;;  %v1402_v3 = vmul.f32 %v8758_v28, %v537_v46  ;;  %v5078_v36 = vadd.f32 %v2868_v42, %v2862_v21  ;;  %v2106_v42 = vmul.f32 %v4761_v40, %v8755_v30 }
 0x132   : > { %8747 = vst [vmem:[#allocation118_spill] sm:$0xff] %v5052_v27  ;;  %v2455_v21 = vmul.f32 %v4764_v12, %v8755_v30  ;;  %v2809_v27 = vadd.f32 %v2804_v22, %v2798_v54  ;;  %v5101_v15 = vmul.f32 %v4723_v18, %v8763_v49  ;;  %v5105_v0 = vmul.f32 %v4726_v6, %v8763_v49  ;;  %v8766_v18 = vld [vmem:[#allocation67_spill] sm:$0xff] }
 0x133   : > { %8748 = vst [vmem:[#allocation119_spill] sm:$0xff] %v5057_v51  ;;  %v1413_v31 = vadd.f32 %v1408_v53, %v1402_v3  ;;  %v596_v3 = vpop.permute.xlu1 %595  ;;  %v2111_v29 = vadd.f32 %v2106_v42, %v2100_v33  ;;  %v3153_v53 = vmul.f32 %v4770_v13, %v8755_v30  ;;  %v5109_v8 = vmul.f32 %v4729_v44, %v8763_v49  ;;  %v8764_v42 = vld [vmem:[#allocation55_spill] sm:$0xff] }
 0x134   : > { %8750 = vst [vmem:[#allocation120_spill] sm:$0xff] %v5061_v38  ;;  %v5113_v14 = vmul.f32 %v4732_v45, %v8763_v49  ;;  %v5121_v54 = vmul.f32 %v4743_v20, %v8763_v49  ;;  %v5127_v22 = vmul.f32 %v4746_v41, %v8763_v49  ;;  %v1419_v1 = vmul.f32 %v8770_v37, %v596_v3  ;;  %v8774_v45 = vld [vmem:[#allocation91_spill] sm:$0xff] }
 0x135   : > { %8753 = vst [vmem:[#allocation121_spill] sm:$0xff] %v5066_v47  ;;  %v3158_v33 = vadd.f32 %v3153_v53, %v3147_v56  ;;  %v5131_v56 = vmul.f32 %v4755_v35, %v8763_v49  ;;  %v8765_v53 = vld [vmem:[#allocation56_spill] sm:$0xff]  ;;  %v1768_v41 = vmul.f32 %v4911_v34, %v596_v3  ;;  %v2466_v2 = vmul.f32 %v4931_v57, %v596_v3 }
 0x136   : > { %8754 = vst [vmem:[#allocation122_spill] sm:$0xff] %v5069_v17  ;;  %v2449_v17 = vmul.f32 %v4788_v5, %v537_v46  ;;  %v5135_v7 = vmul.f32 %v8766_v18, %v8765_v53  ;;  %v8772_v35 = vld [vmem:[#allocation96_spill] sm:$0xff]  ;;  %v5160_v57 = vmul.f32 %v4782_v59, %v8765_v53 }
 0x137   : > { %8759 = vst [vmem:[#allocation49_spill] sm:$0xff] %v5078_v36  ;;  %v8769_v36 = vld [vmem:[#allocation92_spill] sm:$0xff]  ;;  %v2117_v20 = vmul.f32 %v8772_v35, %v596_v3  ;;  %v5209_v35 = vpop.permute.xlu0 %572 }
 0x138   : > { %8760 = vst [vmem:[#allocation123_spill] sm:$0xff] %v5080_v10  ;;  %v2460_v47 = vadd.f32 %v2455_v21, %v2449_v17  ;;  %v5117_v17 = vmul.f32 %v4735_v24, %v8763_v49  ;;  %v578_v21 = vmul.f32 %v8764_v42, %v8755_v30  ;;  %v5139_v10 = vmul.f32 %v8751_v52, %v8765_v53  ;;  %v5147_v49 = vpop.permute.xlu2 %688  ;;  %v8773_v52 = vld [vmem:[#allocation99_spill] sm:$0xff] }
 0x139   : > { %8761 = vst [vmem:[#allocation124_spill] sm:$0xff] %v5083_v39  ;;  %v552_v30 = vmul.f32 %v8766_v18, %v537_v46  ;;  %v1071_v23 = vmul.f32 %v8769_v36, %v596_v3  ;;  %v2815_v24 = vmul.f32 %v4941_v60, %v596_v3  ;;  %v3164_v26 = vmul.f32 %v8773_v52, %v596_v3 }
 0x13a   : > { %8767 = vst [vmem:[#allocation77_spill] sm:$0xff] %v5135_v7  ;;  %v1424_v46 = vadd.f32 %v1419_v1, %v1413_v31  ;;  %v1773_v18 = vadd.f32 %v1768_v41, %v1762_v48  ;;  %v2122_v39 = vadd.f32 %v2117_v20, %v2111_v29  ;;  %v2471_v44 = vadd.f32 %v2466_v2, %v2460_v47  ;;  %v8775_v41 = vld [vmem:[#allocation94_spill] sm:$0xff]  ;;  %v8776_v2 = vld [vmem:[#allocation75_spill] sm:$0xff] }
 0x13b   : > { %8768 = vst [vmem:[#allocation56_spill] sm:$0xff] %v5141_v43  ;;  %v609_v43 = vmul.f32 %v8774_v45, %v596_v3  ;;  %v1076_v50 = vadd.f32 %v1071_v23, %v1065_v58  ;;  %v2820_v6 = vadd.f32 %v2815_v24, %v2809_v27  ;;  %v3169_v37 = vadd.f32 %v3164_v26, %v3158_v33  ;;  %v627_v34 = vpop.permute.xlu1 %626  ;;  %v8778_v23 = vld [vmem:[#allocation76_spill] sm:$0xff]  ;;  %v8780_v47 = vld [vmem:[#allocation78_spill] sm:$0xff]  ;;  %v8782_v48 = vld [vmem:[#allocation79_spill] sm:$0xff] }
 0x13c   : > { %8771 = vst [vmem:[#allocation125_spill] sm:$0xff] %v5147_v49  ;;  %v5156_v49 = vmul.f32 %v8758_v28, %v8765_v53  ;;  %v5164_v52 = vmul.f32 %v4785_v4, %v8765_v53  ;;  %v5168_v31 = vmul.f32 %v4788_v5, %v8765_v53  ;;  %v5172_v24 = vmul.f32 %v4791_v55, %v8765_v53  ;;  %v8784_v29 = vld [vmem:[#allocation82_spill] sm:$0xff] }
 0x13d   : > { %v5176_v20 = vmul.f32 %v4794_v11, %v8765_v53  ;;  %v5180_v26 = vmul.f32 %v8776_v2, %v8775_v41  ;;  %v583_v1 = vadd.f32 %v578_v21, %v552_v30  ;;  %v5184_v27 = vmul.f32 %v8778_v23, %v8775_v41 }
 0x13e   : > { %v5188_v58 = vmul.f32 %v8780_v47, %v8775_v41  ;;  %v5192_v3 = vmul.f32 %v8782_v48, %v8775_v41  ;;  %v5196_v33 = vmul.f32 %v8784_v29, %v8775_v41  ;;  %v812_v53 = vrot.slane %v5028_v16, 1 }
 0x13f   : > { %8777 = vst [vmem:[#allocation94_spill] sm:$0xff] %v5180_v26  ;;  %v813_v21 = vrot.slane %v5028_v16, 2  ;;  %v814_v30 = vrot.slane %v5028_v16, 3  ;;  %v614_v11 = vadd.f32 %v609_v43, %v583_v1  ;;  %v640_v55 = vmul.f32 %v8776_v2, %v627_v34  ;;  %v8788_v26 = vld [vmem:[#allocation87_spill] sm:$0xff] }
 0x140   : > { %8779 = vst [vmem:[#allocation126_spill] sm:$0xff] %v5184_v27  ;;  %v1082_v5 = vmul.f32 %v8778_v23, %v627_v34  ;;  %v1430_v4 = vmul.f32 %v8780_v47, %v627_v34  ;;  %v1779_v59 = vmul.f32 %v8782_v48, %v627_v34  ;;  %v2128_v28 = vmul.f32 %v8784_v29, %v627_v34  ;;  %v5211_v45 = vpop.permute.xlu2 %719 }
 0x141   : > { %8781 = vst [vmem:[#allocation127_spill] sm:$0xff] %v5188_v58  ;;  %v3175_v60 = vmul.f32 %v8788_v26, %v627_v34  ;;  %v645_v36 = vadd.f32 %v640_v55, %v614_v11  ;;  %v5247_v11 = vmul.f32 %v8788_v26, %v8775_v41 }
 0x142   : > { %8783 = vst [vmem:[#allocation128_spill] sm:$0xff] %v5192_v3  ;;  %v8786_v3 = vld [vmem:[#allocation83_spill] sm:$0xff]  ;;  %v1087_v43 = vadd.f32 %v1082_v5, %v1076_v50  ;;  %v1435_v1 = vadd.f32 %v1430_v4, %v1424_v46  ;;  %v1784_v2 = vadd.f32 %v1779_v59, %v1773_v18  ;;  %v2133_v23 = vadd.f32 %v2128_v28, %v2122_v39 }
 0x143   : > { %8785 = vst [vmem:[#allocation129_spill] sm:$0xff] %v5196_v33  ;;  %v2477_v58 = vmul.f32 %v8786_v3, %v627_v34  ;;  %v8787_v33 = vld [vmem:[#allocation86_spill] sm:$0xff]  ;;  %v3180_v48 = vadd.f32 %v3175_v60, %v3169_v37  ;;  %v5214_v29 = vadd.f32 %v5101_v15, %v645_v36  ;;  %v561_v59 = vpop.permute.xlu1 %560  ;;  %v5239_v4 = vmul.f32 %v8786_v3, %v8775_v41 }
 0x144   : > { %v2826_v27 = vmul.f32 %v8787_v33, %v627_v34  ;;  %v5217_v38 = vadd.f32 %v5105_v0, %v1087_v43  ;;  %v5220_v34 = vadd.f32 %v5109_v8, %v1435_v1  ;;  %v5223_v55 = vadd.f32 %v5113_v14, %v1784_v2 }
 0x145   : > { %v2482_v47 = vadd.f32 %v2477_v58, %v2471_v44  ;;  %v5226_v18 = vadd.f32 %v5117_v17, %v2133_v23  ;;  %v5235_v44 = vadd.f32 %v5131_v56, %v3180_v48  ;;  %v5243_v5 = vmul.f32 %v8787_v33, %v8775_v41  ;;  %v5273_v48 = vpop.permute.xlu0 %727 }
 0x146   : > { %v2831_v7 = vadd.f32 %v2826_v27, %v2820_v6  ;;  %v1159_v50 = vrot.slane %v5033_v32, 1  ;;  %v1160_v37 = vrot.slane %v5033_v32, 2  ;;  %v5254_v15 = vperm.slane %v812_v53, 0  ;;  %8792 = vst [vmem:[#allocation133_spill] sm:$0xff] %v5273_v48  ;;  %v5278_v53 = vld [vmem:[%s8212_s9] sm:$0xff]  ;;  %v8814_v26 = vld [vmem:[#allocation94_spill] sm:$0xff] }
 0x147   : > { %v5229_v39 = vadd.f32 %v5121_v54, %v2482_v47  ;;  %v5256_v28 = vperm.slane %v813_v21, 0  ;;  %v5258_v36 = vperm.slane %v814_v30, 0  ;;  %v1507_v8 = vrot.slane %v5047_v19, 1  ;;  %8793 = vst [vmem:[#allocation134_spill] sm:$0xff] %v5278_v53  ;;  %3469 = vperm.xlu1 %3974, %v5278_v53   ;;  %3463 = vperm.xlu0 %3970, %v5278_v53   ;;  %v8815_v3 = vld [vmem:[#allocation126_spill] sm:$0xff] }
 0x148   : > { %v5232_v6 = vadd.f32 %v5127_v22, %v2831_v7  ;;  %v1161_v7 = vrot.slane %v5033_v32, 3  ;;  %8789 = vst [vmem:[#allocation130_spill] sm:$0xff] %v5254_v15  ;;  %v1508_v14 = vrot.slane %v5047_v19, 2  ;;  %v1509_v17 = vrot.slane %v5047_v19, 3  ;;  %v5285_v0 = vpop.permute.xlu2 %653  ;;  %3476 = vperm.xlu2 %3975, %v5278_v53  }
 0x149   : > { %8790 = vst [vmem:[#allocation131_spill] sm:$0xff] %v5256_v28  ;;  %v1856_v54 = vrot.slane %v5049_v61, 1  ;;  %v1857_v22 = vrot.slane %v5049_v61, 2  ;;  %v1858_v56 = vrot.slane %v5049_v61, 3  ;;  %v1059_v46 = vmul.f32 %v8756_v63, %v561_v59  ;;  %v8810_v61 = vld [vmem:[#allocation97_spill] sm:$0xff] }
 0x14a   : > { %8791 = vst [vmem:[#allocation132_spill] sm:$0xff] %v5258_v36  ;;  %v1407_v41 = vmul.f32 %v8757_v9, %v561_v59  ;;  %v1756_v2 = vmul.f32 %v8762_v25, %v561_v59  ;;  %v2105_v23 = vmul.f32 %v4761_v40, %v561_v59  ;;  %v2454_v27 = vmul.f32 %v4764_v12, %v561_v59  ;;  %v8892_v40 = vld [vmem:[#allocation61_spill] sm:$0xff] }
 0x14b   : > { %v2803_v47 = vmul.f32 %v4767_v62, %v561_v59  ;;  %v3152_v58 = vmul.f32 %v4770_v13, %v561_v59  ;;  %v577_v21 = vmul.f32 %v8764_v42, %v561_v59  ;;  %v1064_v30 = vadd.f32 %v1059_v46, %v5139_v10  ;;  %v8898_v9 = vld [vmem:[#allocation89_spill] sm:$0xff] }
 0x14c   : > { %v1412_v43 = vadd.f32 %v1407_v41, %v5156_v49  ;;  %v1761_v1 = vadd.f32 %v1756_v2, %v5160_v57  ;;  %v2110_v60 = vadd.f32 %v2105_v23, %v5164_v52  ;;  %v2459_v36 = vadd.f32 %v2454_v27, %v5168_v31  ;;  %v8803_v23 = vld [vmem:[#allocation120_spill] sm:$0xff]  ;;  %v8804_v27 = vld [vmem:[#allocation77_spill] sm:$0xff] }
 0x14d   : > { %v2808_v28 = vadd.f32 %v2803_v47, %v5172_v24  ;;  %v3157_v15 = vadd.f32 %v3152_v58, %v5176_v20  ;;  %v5292_v59 = vperm.slane %v1159_v50, 0  ;;  %v5294_v10 = vperm.slane %v1160_v37, 0  ;;  %v592_v20 = vpop.permute.xlu1 %591  ;;  %v8805_v47 = vld [vmem:[#allocation91_spill] sm:$0xff]  ;;  %v8806_v24 = vld [vmem:[#allocation92_spill] sm:$0xff]  ;;  %v445_v32 = vpop.permute.xlu0 %444 }
 0x14e   : > { %v5296_v49 = vperm.slane %v1161_v7, 0  ;;  %v5300_v46 = vperm.slane %v1507_v8, 0  ;;  %v5302_v52 = vperm.slane %v1508_v14, 0  ;;  %v5304_v31 = vperm.slane %v1509_v17, 0 }
 0x14f   : > { %8794 = vst [vmem:[#allocation135_spill] sm:$0xff] %v5292_v59  ;;  %v5307_v41 = vperm.slane %v1856_v54, 0  ;;  %v5309_v50 = vperm.slane %v1857_v22, 0  ;;  %v5311_v37 = vperm.slane %v1858_v56, 0  ;;  %v582_v17 = vadd.f32 %v577_v21, %v8804_v27  ;;  %v8807_v54 = vld [vmem:[#allocation93_spill] sm:$0xff]  ;;  %v8808_v22 = vld [vmem:[#allocation95_spill] sm:$0xff] }
 0x150   : > { %8795 = vst [vmem:[#allocation136_spill] sm:$0xff] %v5294_v10  ;;  %v608_v58 = vmul.f32 %v8805_v47, %v592_v20  ;;  %v1070_v57 = vmul.f32 %v8806_v24, %v592_v20  ;;  %v8809_v56 = vld [vmem:[#allocation96_spill] sm:$0xff]  ;;  %v2465_v7 = vmul.f32 %v8810_v61, %v592_v20  ;;  %v8813_v27 = vmov 3  }
 0x151   : > { %8796 = vst [vmem:[#allocation137_spill] sm:$0xff] %v5296_v49  ;;  %3976 = vset.pattern.permute.xlu1 %v8813_v27 }
 0x152   : > { %8797 = vst [vmem:[#allocation138_spill] sm:$0xff] %v5300_v46  ;;  %v613_v46 = vadd.f32 %v608_v58, %v582_v17  ;;  %v1075_v14 = vadd.f32 %v1070_v57, %v1064_v30  ;;  %v2470_v59 = vadd.f32 %v2465_v7, %v2459_v36  ;;  %3483 = vperm.xlu1 %3976, %v5278_v53   ;;  %v8817_v30 = vld [vmem:[#allocation128_spill] sm:$0xff]  ;;  %v8834_v58 = vld [vmem:[#allocation14_spill] sm:$0xff] }
 0x153   : > { %8798 = vst [vmem:[#allocation139_spill] sm:$0xff] %v5302_v52  ;;  %v8812_v52 = vld [vmem:[#allocation99_spill] sm:$0xff] }
 0x154   : > { %8799 = vst [vmem:[#allocation140_spill] sm:$0xff] %v5304_v31  ;;  %v8811_v31 = vld [vmem:[#allocation98_spill] sm:$0xff]  ;;  %v3163_v8 = vmul.f32 %v8812_v52, %v592_v20  ;;  %v5329_v33 = vadd.f32 %v8814_v26, %v613_v46  ;;  %v1086_v47 = vadd.f32 %v8815_v3, %v1075_v14  ;;  %v5345_v36 = vadd.f32 %v5239_v4, %v2470_v59 }
 0x155   : > { %8800 = vst [vmem:[#allocation141_spill] sm:$0xff] %v5307_v41  ;;  %v1418_v41 = vmul.f32 %v8807_v54, %v592_v20  ;;  %v2814_v2 = vmul.f32 %v8811_v31, %v592_v20  ;;  %v8816_v31 = vld [vmem:[#allocation127_spill] sm:$0xff]  ;;  %v8884_v54 = vld [vmem:[#allocation84_spill] sm:$0xff] }
 0x156   : > { %8801 = vst [vmem:[#allocation142_spill] sm:$0xff] %v5309_v50  ;;  %v1767_v50 = vmul.f32 %v8808_v22, %v592_v20  ;;  %v3168_v16 = vadd.f32 %v3163_v8, %v3157_v15  ;;  %v8829_v8 = vmov 4  }
 0x157   : > { %8802 = vst [vmem:[#allocation143_spill] sm:$0xff] %v5311_v37  ;;  %v2116_v37 = vmul.f32 %v8809_v56, %v592_v20  ;;  %v1423_v49 = vadd.f32 %v1418_v41, %v1412_v43  ;;  %v2819_v19 = vadd.f32 %v2814_v2, %v2808_v28  ;;  %v8820_v28 = vld [vmem:[#allocation129_spill] sm:$0xff]  ;;  %v8827_v2 = vld [vmem:[#allocation11_spill] sm:$0xff]  ;;  %3977 = vset.pattern.permute.xlu2 %v8829_v8 }
 0x158   : > { %v1772_v21 = vadd.f32 %v1767_v50, %v1761_v1  ;;  %v8818_v1 = vmov 5   ;;  %v5351_v3 = vadd.f32 %v5247_v11, %v3168_v16  ;;  %v8828_v4 = vperm.slane %v8827_v2, 0  ;;  %v8832_v11 = vld [vmem:[#allocation13_spill] sm:$0xff]  ;;  %3490 = vperm.xlu2 %3977, %v5278_v53   ;;  %v8841_v2 = vld [vmem:[#allocation28_spill] sm:$0xff]  ;;  %v8848_v56 = vld [vmem:[#allocation19_spill] sm:$0xff] }
 0x159   : > { %v2121_v10 = vadd.f32 %v2116_v37, %v2110_v60  ;;  %v5333_v20 = vadd.f32 %v8816_v31, %v1423_v49  ;;  %3978 = vset.pattern.permute.xlu0 %v8818_v1  ;;  %v5339_v60 = vpop.permute.xlu2 %568  ;;  %v5348_v26 = vadd.f32 %v5243_v5, %v2819_v19  ;;  %v8821_v49 = vld [vmem:[#allocation16_spill] sm:$0xff]  ;;  %v8823_v31 = vld [vmem:[#allocation9_spill] sm:$0xff]  ;;  %v8825_v37 = vld [vmem:[#allocation10_spill] sm:$0xff]  ;;  %v8833_v14 = vperm.slane %v8832_v11, 0 }
 0x15a   : > { %v5336_v43 = vadd.f32 %v8817_v30, %v1772_v21  ;;  %8819 = vst [vmem:[#allocation77_spill] sm:$0xff] %v5339_v60  ;;  %3497 = vperm.xlu0 %3978, %v5278_v53   ;;  %v8822_v57 = vperm.slane %v8821_v49, 0  ;;  %v8824_v41 = vperm.slane %v8823_v31, 0  ;;  %v1719_v59 = vmul.f32 %v8828_v4, %v445_v32  ;;  %v8830_v19 = vld [vmem:[#allocation12_spill] sm:$0xff]  ;;  %v8836_v30 = vld [vmem:[#allocation15_spill] sm:$0xff]  ;;  %v8838_v49 = vld [vmem:[#allocation25_spill] sm:$0xff] }
 0x15b   : > { %v5342_v15 = vadd.f32 %v8820_v28, %v2121_v10  ;;  %v8826_v10 = vperm.slane %v8825_v37, 0  ;;  %v8831_v5 = vperm.slane %v8830_v19, 0  ;;  %v2417_v17 = vmul.f32 %v8833_v14, %v445_v32  ;;  %v8839_v31 = vld [vmem:[#allocation26_spill] sm:$0xff]  ;;  %v8840_v37 = vld [vmem:[#allocation27_spill] sm:$0xff]  ;;  %v8842_v8 = vld [vmem:[#allocation29_spill] sm:$0xff] }
 0x15c   : > { %v449_v46 = vmul.f32 %v8822_v57, %v445_v32  ;;  %v1024_v50 = vmul.f32 %v8824_v41, %v445_v32  ;;  %v8835_v21 = vperm.slane %v8834_v58, 0  ;;  %v8837_v1 = vperm.slane %v8836_v30, 0  ;;  %v8844_v14 = vld [vmem:[#allocation31_spill] sm:$0xff]  ;;  %v8846_v30 = vld [vmem:[#allocation17_spill] sm:$0xff] }
 0x15d   : > { %v1371_v7 = vmul.f32 %v8826_v10, %v445_v32  ;;  %v2068_v16 = vmul.f32 %v8831_v5, %v445_v32  ;;  %v1724_v4 = vadd.f32 %v8841_v2, %v1719_v59  ;;  %v8843_v5 = vld [vmem:[#allocation30_spill] sm:$0xff]  ;;  %v8852_v2 = vld [vmem:[#allocation23_spill] sm:$0xff] }
 0x15e   : > { %v2766_v27 = vmul.f32 %v8835_v21, %v445_v32  ;;  %v3115_v28 = vmul.f32 %v8837_v1, %v445_v32  ;;  %v462_v57 = vadd.f32 %v8838_v49, %v449_v46  ;;  %v1029_v41 = vadd.f32 %v8839_v31, %v1024_v50  ;;  %v8845_v21 = vld [vmem:[#allocation32_spill] sm:$0xff]  ;;  %v8847_v1 = vld [vmem:[#allocation18_spill] sm:$0xff]  ;;  %v8850_v31 = vld [vmem:[#allocation21_spill] sm:$0xff] }
 0x15f   : > { %v1376_v10 = vadd.f32 %v8840_v37, %v1371_v7  ;;  %v2073_v19 = vadd.f32 %v8842_v8, %v2068_v16  ;;  %v2422_v11 = vadd.f32 %v8843_v5, %v2417_v17  ;;  %v8849_v49 = vld [vmem:[#allocation20_spill] sm:$0xff]  ;;  %v8851_v37 = vld [vmem:[#allocation22_spill] sm:$0xff]  ;;  %v8854_v5 = vmov 6  }
 0x160   : > { %v2771_v58 = vadd.f32 %v8844_v14, %v2766_v27  ;;  %v3120_v52 = vadd.f32 %v8845_v21, %v3115_v28  ;;  %v475_v32 = vadd.f32 %v8846_v30, %v462_v57  ;;  %v1034_v61 = vadd.f32 %v8847_v1, %v1029_v41  ;;  %v8853_v8 = vld [vmem:[#allocation24_spill] sm:$0xff]  ;;  %3979 = vset.pattern.permute.xlu1 %v8854_v5  ;;  %v8855_v27 = vld [vmem:[#allocation33_spill] sm:$0xff]  ;;  %v8856_v57 = vld [vmem:[#allocation34_spill] sm:$0xff] }
 0x161   : > { %v1381_v46 = vadd.f32 %v8848_v56, %v1376_v10  ;;  %v1729_v50 = vadd.f32 %v8849_v49, %v1724_v4  ;;  %v2078_v7 = vadd.f32 %v8850_v31, %v2073_v19  ;;  %v2427_v59 = vadd.f32 %v8851_v37, %v2422_v11  ;;  %v8857_v41 = vld [vmem:[#allocation35_spill] sm:$0xff]  ;;  %v8858_v10 = vld [vmem:[#allocation36_spill] sm:$0xff]  ;;  %3504 = vperm.xlu1 %3979, %v5278_v53   ;;  %v8859_v19 = vld [vmem:[#allocation37_spill] sm:$0xff] }
 0x162   : > { %v2776_v16 = vadd.f32 %v8852_v2, %v2771_v58  ;;  %v3125_v17 = vadd.f32 %v8853_v8, %v3120_v52  ;;  %v5390_v28 = vadd.f32 %v8855_v27, %v475_v32  ;;  %v5393_v14 = vadd.f32 %v8856_v57, %v1034_v61  ;;  %v8860_v52 = vld [vmem:[#allocation38_spill] sm:$0xff]  ;;  %v8861_v21 = vld [vmem:[#allocation39_spill] sm:$0xff]  ;;  %v8863_v32 = vld [vmem:[#allocation40_spill] sm:$0xff]  ;;  %v5433_v27 = vpop.permute.xlu2 %715 }
 0x163   : > { %v5396_v56 = vadd.f32 %v8857_v41, %v1381_v46  ;;  %v5399_v4 = vadd.f32 %v8858_v10, %v1729_v50  ;;  %v5403_v11 = vadd.f32 %v8859_v19, %v2078_v7  ;;  %v5406_v58 = vadd.f32 %v8860_v52, %v2427_v59  ;;  %v8869_v7 = vld [vmem:[#allocation51_spill] sm:$0xff]  ;;  %v8874_v10 = vld [vmem:[#allocation124_spill] sm:$0xff]  ;;  %v8875_v19 = vld [vmem:[#allocation101_spill] sm:$0xff] }
 0x164   : > { %v5409_v30 = vadd.f32 %v8861_v21, %v2776_v16  ;;  %v5412_v61 = vadd.f32 %v8863_v32, %v3125_v17  ;;  %v8865_v46 = vrot.slane %v5057_v51, 1  ;;  %v8867_v50 = vrot.slane %v5057_v51, 2  ;;  %v8872_v17 = vld [vmem:[#allocation52_spill] sm:$0xff]  ;;  %v8876_v21 = vld [vmem:[#allocation53_spill] sm:$0xff]  ;;  %v8879_v1 = vld [vmem:[#allocation102_spill] sm:$0xff] }
 0x165   : > { %v1092_v37 = vmul.f32 %v8869_v7, %v5285_v0  ;;  %v8870_v59 = vrot.slane %v5057_v51, 3  ;;  %v2555_v16 = vrot.slane %v8803_v23, 2  ;;  %v2556_v8 = vrot.slane %v8803_v23, 3  ;;  %v8881_v51 = vld [vmem:[#allocation103_spill] sm:$0xff] }
 0x166   : > { %8862 = vst [vmem:[#allocation94_spill] sm:$0xff] %v5409_v30  ;;  %v5417_v49 = vperm.slane %v8865_v46, 0  ;;  %v5421_v31 = vperm.slane %v8867_v50, 0  ;;  %v1440_v5 = vmul.f32 %v8872_v17, %v5285_v0  ;;  %v8873_v57 = vmov 7  }
 0x167   : > { %8864 = vst [vmem:[#allocation126_spill] sm:$0xff] %v5412_v61  ;;  %v5427_v2 = vperm.slane %v8870_v59, 0  ;;  %3980 = vset.pattern.permute.xlu2 %v8873_v57  ;;  %v1103_v52 = vmul.f32 %v8875_v19, %v8874_v10  ;;  %v1789_v32 = vmul.f32 %v8876_v21, %v5285_v0  ;;  %v1097_v46 = vadd.f32 %v1092_v37, %v1086_v47  ;;  %v8880_v57 = vld [vmem:[#allocation54_spill] sm:$0xff]  ;;  %v8882_v47 = vld [vmem:[#allocation81_spill] sm:$0xff] }
 0x168   : > { %8866 = vst [vmem:[#allocation127_spill] sm:$0xff] %v5417_v49  ;;  %3511 = vperm.xlu2 %3980, %v5278_v53   ;;  %v8877_v50 = vrot.slane %v8803_v23, 1  ;;  %v1445_v41 = vadd.f32 %v1440_v5, %v5333_v20  ;;  %v1800_v49 = vmul.f32 %v8881_v51, %v8874_v10  ;;  %v1114_v37 = vmul.f32 %v8882_v47, %v5433_v27  ;;  %v8885_v20 = vld [vmem:[#allocation57_spill] sm:$0xff] }
 0x169   : > { %8868 = vst [vmem:[#allocation128_spill] sm:$0xff] %v5421_v31  ;;  %v2138_v31 = vmul.f32 %v8880_v57, %v5285_v0  ;;  %v1108_v22 = vadd.f32 %v1103_v52, %v1097_v46  ;;  %v1794_v53 = vadd.f32 %v1789_v32, %v5336_v43  ;;  %v1462_v24 = vmul.f32 %v8884_v54, %v5433_v27  ;;  %v8887_v46 = vld [vmem:[#allocation85_spill] sm:$0xff]  ;;  %v8888_v43 = vld [vmem:[#allocation58_spill] sm:$0xff] }
 0x16a   : > { %8871 = vst [vmem:[#allocation129_spill] sm:$0xff] %v5427_v2  ;;  %v5444_v59 = vperm.slane %v8877_v50, 0  ;;  %v1451_v2 = vmul.f32 %v8879_v1, %v8874_v10  ;;  %v8883_v50 = vld [vmem:[#allocation104_spill] sm:$0xff]  ;;  %v2487_v5 = vmul.f32 %v8885_v20, %v5285_v0  ;;  %v1811_v13 = vmul.f32 %v8887_v46, %v5433_v27 }
 0x16b   : > { %v2143_v60 = vadd.f32 %v2138_v31, %v5342_v15  ;;  %v5463_v48 = vadd.f32 %v1114_v37, %v1108_v22  ;;  %v1805_v52 = vadd.f32 %v1800_v49, %v1794_v53  ;;  %v2836_v32 = vmul.f32 %v8888_v43, %v5285_v0  ;;  %v8891_v15 = vld [vmem:[#allocation105_spill] sm:$0xff] }
 0x16c   : > { %8878 = vst [vmem:[#allocation16_spill] sm:$0xff] %v5444_v59  ;;  %v2149_v59 = vmul.f32 %v8883_v50, %v8874_v10  ;;  %v1456_v23 = vadd.f32 %v1451_v2, %v1445_v41  ;;  %v8890_v41 = vld [vmem:[#allocation88_spill] sm:$0xff]  ;;  %v2498_v31 = vmul.f32 %v8891_v15, %v8874_v10  ;;  %v3185_v22 = vmul.f32 %v8892_v40, %v5285_v0 }
 0x16d   : > { %8886 = vst [vmem:[#allocation9_spill] sm:$0xff] %v5463_v48  ;;  %v2160_v12 = vmul.f32 %v8890_v41, %v5433_v27  ;;  %v5477_v37 = vadd.f32 %v1811_v13, %v1805_v52  ;;  %v2492_v53 = vadd.f32 %v2487_v5, %v5345_v36  ;;  %v5480_v49 = vperm.slane %v2555_v16, 0  ;;  %v8895_v48 = vld [vmem:[#allocation106_spill] sm:$0xff]  ;;  %v8900_v36 = vld [vmem:[#allocation49_spill] sm:$0xff] }
 0x16e   : > { %v5469_v62 = vadd.f32 %v1462_v24, %v1456_v23  ;;  %v2154_v2 = vadd.f32 %v2149_v59, %v2143_v60  ;;  %v2847_v24 = vmul.f32 %v8895_v48, %v8874_v10  ;;  %v2841_v60 = vadd.f32 %v2836_v32, %v5348_v26  ;;  %v8897_v59 = vld [vmem:[#allocation107_spill] sm:$0xff] }
 0x16f   : > { %8893 = vst [vmem:[#allocation11_spill] sm:$0xff] %v5477_v37  ;;  %v2503_v25 = vadd.f32 %v2498_v31, %v2492_v53  ;;  %v2509_v61 = vmul.f32 %v8898_v9, %v5433_v27  ;;  %v3190_v13 = vadd.f32 %v3185_v22, %v5351_v3  ;;  %v5492_v52 = vperm.slane %v2556_v8, 0  ;;  %v8903_v31 = vld [vmem:[#allocation115_spill] sm:$0xff]  ;;  %v8904_v8 = vld [vmem:[#allocation125_spill] sm:$0xff]  ;;  %v8905_v22 = vld [vmem:[#allocation100_spill] sm:$0xff] }
 0x170   : > { %8889 = vst [vmem:[#allocation10_spill] sm:$0xff] %v5469_v62  ;;  %v5484_v23 = vadd.f32 %v2160_v12, %v2154_v2  ;;  %v3196_v62 = vmul.f32 %v8897_v59, %v8874_v10  ;;  %v2903_v16 = vrot.slane %v8900_v36, 1  ;;  %v2852_v5 = vadd.f32 %v2847_v24, %v2841_v60  ;;  %v5508_v24 = vpop.permute.xlu1 %750  ;;  %v8907_v60 = vld [vmem:[#allocation123_spill] sm:$0xff] }
 0x171   : > { %8894 = vst [vmem:[#allocation12_spill] sm:$0xff] %v5480_v49  ;;  %v8901_v49 = vld [vmem:[#allocation90_spill] sm:$0xff]  ;;  %v2904_v2 = vrot.slane %v8900_v36, 2  ;;  %v5498_v26 = vadd.f32 %v2509_v61, %v2503_v25  ;;  %v3207_v53 = vmul.f32 %v8903_v31, %v5433_v27  ;;  %v3252_v63 = vrot.slane %v8907_v60, 1 }
 0x172   : > { %8896 = vst [vmem:[#allocation13_spill] sm:$0xff] %v5484_v23  ;;  %v2858_v12 = vmul.f32 %v8901_v49, %v5433_v27  ;;  %v3201_v32 = vadd.f32 %v3196_v62, %v3190_v13  ;;  %v2905_v23 = vrot.slane %v8900_v36, 3  ;;  %v3253_v25 = vrot.slane %v8907_v60, 2  ;;  %v8909_v36 = vld [vmem:[#allocation80_spill] sm:$0xff] }
 0x173   : > { %8899 = vst [vmem:[#allocation14_spill] sm:$0xff] %v5492_v52  ;;  %v702_v52 = vmul.f32 %v8905_v22, %v8904_v8  ;;  %v3254_v62 = vrot.slane %v8907_v60, 3  ;;  %v1104_v3 = vmul.f32 %v8875_v19, %v8904_v8  ;;  %v1452_v42 = vmul.f32 %v8879_v1, %v8904_v8  ;;  %v5553_v1 = vld [vmem:[#allocation1 + $0x7] ss:$9 sm:$0xff] }
 0x174   : > { %8902 = vst [vmem:[#allocation15_spill] sm:$0xff] %v5498_v26  ;;  %v5506_v37 = vadd.f32 %v2858_v12, %v2852_v5  ;;  %v5513_v61 = vadd.f32 %v3207_v53, %v3201_v32  ;;  %v733_v26 = vmul.f32 %v8909_v36, %v5211_v45  ;;  %v5521_v12 = vperm.slane %v2903_v16, 0  ;;  %v8912_v32 = vld [vmem:[#allocation108_spill] sm:$0xff]  ;;  %v8914_v16 = vld [vmem:[#allocation109_spill] sm:$0xff] }
 0x175   : > { %v707_v5 = vadd.f32 %v702_v52, %v5214_v29  ;;  %v764_v53 = vmul.f32 %v8912_v32, %v5508_v24  ;;  %v1115_v13 = vmul.f32 %v8882_v47, %v5211_v45  ;;  %v1109_v19 = vadd.f32 %v1104_v3, %v5217_v38  ;;  %v8918_v38 = vld [vmem:[#allocation110_spill] sm:$0xff]  ;;  %8921 = vst [vmem:[#allocation19_spill] sm:$0xff] %v5553_v1 }
 0x176   : > { %8906 = vst [vmem:[#allocation25_spill] sm:$0xff] %v5506_v37  ;;  %v5523_v37 = vperm.slane %v2904_v2, 0  ;;  %v1801_v29 = vmul.f32 %v8881_v51, %v8904_v8  ;;  %v1463_v52 = vmul.f32 %v8884_v54, %v5211_v45  ;;  %v1126_v2 = vmul.f32 %v8914_v16, %v5508_v24  ;;  %v5551_v51 = vld [vmem:[#allocation1 + $0x6] ss:$9 sm:$0xff] }
 0x177   : > { %8908 = vst [vmem:[#allocation26_spill] sm:$0xff] %v5513_v61  ;;  %v5529_v61 = vperm.slane %v2905_v23, 0  ;;  %v738_v60 = vadd.f32 %v733_v26, %v707_v5  ;;  %v5543_v23 = vperm.slane %v3252_v63, 0  ;;  %v1120_v26 = vadd.f32 %v1115_v13, %v1109_v19  ;;  %v5549_v5 = vld [vmem:[#allocation1 + $0x5] ss:$9 sm:$0xff] }
 0x178   : > { %8910 = vst [vmem:[#allocation27_spill] sm:$0xff] %v5521_v12  ;;  %v5541_v12 = vld [vmem:[#allocation1 + $0x4] ss:$9 sm:$0xff]  ;;  %v1474_v3 = vmul.f32 %v8918_v38, %v5508_v24  ;;  %v2150_v54 = vmul.f32 %v8883_v50, %v8904_v8  ;;  %v5562_v19 = vperm.slane %v3254_v62, 0  ;;  %v1015_v13 = vmul.f32 0.5, %v5390_v28 }
 0x179   : > { %8911 = vst [vmem:[#allocation28_spill] sm:$0xff] %v5523_v37  ;;  %v1457_v37 = vadd.f32 %v1452_v42, %v5220_v34  ;;  %v1812_v42 = vmul.f32 %v8887_v46, %v5211_v45  ;;  %v1806_v34 = vadd.f32 %v1801_v29, %v5223_v55  ;;  %v5568_v1 = vadd.f32 %v1126_v2, %v1120_v26  ;;  %v8927_v62 = vld [vmem:[#allocation50_spill] sm:$0xff] }
 0x17a   : > { %8913 = vst [vmem:[#allocation29_spill] sm:$0xff] %v5529_v61  ;;  %v5545_v61 = vadd.f32 %v764_v53, %v738_v60  ;;  %v5560_v60 = vperm.slane %v3253_v25, 0  ;;  %v8924_v53 = vld [vmem:[#allocation111_spill] sm:$0xff]  ;;  %v701_v55 = vmul.f32 %v8905_v22, %v8874_v10  ;;  %v2499_v25 = vmul.f32 %v8891_v15, %v8904_v8 }
 0x17b   : > { %8915 = vst [vmem:[#allocation30_spill] sm:$0xff] %v5541_v12  ;;  %v1468_v63 = vadd.f32 %v1463_v52, %v1457_v37  ;;  %v2155_v37 = vadd.f32 %v2150_v54, %v5226_v18  ;;  %v670_v29 = vmul.f32 %v8927_v62, %v5285_v0  ;;  %v1362_v52 = vmul.f32 0.5, %v5393_v14 }
 0x17c   : > { %8916 = vst [vmem:[#allocation31_spill] sm:$0xff] %v5543_v23  ;;  %v1823_v23 = vmul.f32 %v8924_v53, %v5508_v24  ;;  %v2848_v2 = vmul.f32 %v8895_v48, %v8904_v8  ;;  %v3197_v26 = vmul.f32 %v8897_v59, %v8904_v8  ;;  %v1710_v54 = vmul.f32 0.5, %v5396_v56  ;;  %v8933_v48 = vld [vmem:[#allocation121_spill] sm:$0xff] }
 0x17d   : > { %8917 = vst [vmem:[#allocation32_spill] sm:$0xff] %v5545_v61  ;;  %v2161_v0 = vmul.f32 %v8890_v41, %v5211_v45  ;;  %v2510_v8 = vmul.f32 %v8898_v9, %v5211_v45  ;;  %4005 = vtanh.f32 %v1015_v13  ;;  %v2859_v12 = vmul.f32 %v8901_v49, %v5211_v45 }
 0x17e   : > { %8919 = vst [vmem:[#allocation17_spill] sm:$0xff] %v5549_v5  ;;  %v1817_v5 = vadd.f32 %v1812_v42, %v1806_v34  ;;  %v2059_v42 = vmul.f32 0.5, %v5399_v4  ;;  %4007 = vtanh.f32 %v1362_v52  ;;  %v2757_v59 = vmul.f32 0.5, %v5406_v58 }
 0x17f   : > { %8920 = vst [vmem:[#allocation18_spill] sm:$0xff] %v5551_v51  ;;  %v5570_v51 = vadd.f32 %v1474_v3, %v1468_v63  ;;  %v8928_v3 = vld [vmem:[#allocation56_spill] sm:$0xff]  ;;  %v675_v63 = vadd.f32 %v670_v29, %v5329_v33  ;;  %4009 = vtanh.f32 %v1710_v54  ;;  %v2504_v33 = vadd.f32 %v2499_v25, %v5229_v39 }
 0x180   : > { %8922 = vst [vmem:[#allocation20_spill] sm:$0xff] %v5560_v60  ;;  %v5586_v18 = vmul.f32 %v8927_v62, %v8928_v3  ;;  %v5591_v10 = vmul.f32 %v8869_v7, %v8928_v3  ;;  %v5599_v34 = vadd.f32 %v1823_v23, %v1817_v5  ;;  %v2408_v7 = vmul.f32 0.5, %v5403_v11  ;;  %v8932_v5 = vld [vmem:[#allocation118_spill] sm:$0xff] }
 0x181   : > { %8923 = vst [vmem:[#allocation21_spill] sm:$0xff] %v5562_v19  ;;  %v8931_v19 = vld [vmem:[#allocation114_spill] sm:$0xff]  ;;  %v2166_v62 = vadd.f32 %v2161_v0, %v2155_v37  ;;  %v2853_v29 = vadd.f32 %v2848_v2, %v5232_v6  ;;  %4011 = vtanh.f32 %v2059_v42  ;;  %v706_v23 = vadd.f32 %v701_v55, %v675_v63  ;;  %v5626_v55 = vpop.permute.xlu2 %746 }
 0x182   : > { %884 = vst [vmem:[#allocation1] sm:$0xff] %v5545_v61  ;;  %v2172_v60 = vmul.f32 %v8931_v19, %v5508_v24  ;;  %v2521_v13 = vmul.f32 %v8932_v5, %v5508_v24  ;;  %v2870_v15 = vmul.f32 %v8933_v48, %v5508_v24  ;;  %v2515_v52 = vadd.f32 %v2510_v8, %v2504_v33 }
 0x183   : > { %8925 = vst [vmem:[#allocation22_spill] sm:$0xff] %v5568_v1  ;;  %v3202_v37 = vadd.f32 %v3197_v26, %v5235_v44  ;;  %v5618_v54 = vmul.f32 %v8872_v17, %v8928_v3  ;;  %v5622_v39 = vmul.f32 %v8876_v21, %v8928_v3  ;;  %v3208_v6 = vmul.f32 %v8903_v31, %v5211_v45 }
 0x184   : > { %8926 = vst [vmem:[#allocation23_spill] sm:$0xff] %v5570_v51  ;;  %v5613_v50 = vadd.f32 %v2172_v60, %v2166_v62  ;;  %4013 = vtanh.f32 %v2408_v7  ;;  %v4006_v60 = vpop.eup %4005  ;;  %v3106_v44 = vmul.f32 0.5, %v5409_v30  ;;  %v732_v25 = vmul.f32 %v8909_v36, %v5433_v27  ;;  %v8937_v7 = vld [vmem:[#allocation122_spill] sm:$0xff] }
 0x185   : > { %8929 = vst [vmem:[#allocation24_spill] sm:$0xff] %v5591_v10  ;;  %v2864_v10 = vadd.f32 %v2859_v12, %v2853_v29  ;;  %v5630_v12 = vmul.f32 %v8880_v57, %v8928_v3  ;;  %4015 = vtanh.f32 %v2757_v59  ;;  %v4008_v62 = vpop.eup %4007  ;;  %v5635_v2 = vadd.f32 %v2521_v13, %v2515_v52  ;;  %v8941_v29 = vld [vmem:[#allocation59_spill] sm:$0xff]  ;;  %v8943_v52 = vld [vmem:[#allocation126_spill] sm:$0xff] }
 0x186   : > { %8930 = vst [vmem:[#allocation33_spill] sm:$0xff] %v5599_v34  ;;  %v3213_v45 = vadd.f32 %v3208_v6, %v3202_v37  ;;  %v3219_v0 = vmul.f32 %v8937_v7, %v5508_v24  ;;  %v4010_v42 = vpop.eup %4009  ;;  %v5643_v63 = vmul.f32 %v8885_v20, %v8928_v3  ;;  %v5647_v59 = vmul.f32 %v8888_v43, %v8928_v3  ;;  %v8939_v24 = vld [vmem:[#allocation55_spill] sm:$0xff]  ;;  %v8950_v43 = vld [vmem:[#allocation64_spill] sm:$0xff] }
 0x187   : > { %8934 = vst [vmem:[#allocation34_spill] sm:$0xff] %v5613_v50  ;;  %v5637_v26 = vadd.f32 %v2870_v15, %v2864_v10  ;;  %v737_v8 = vadd.f32 %v732_v25, %v706_v23  ;;  %v763_v27 = vmul.f32 %v8912_v32, %v5626_v55  ;;  %v4012_v33 = vpop.eup %4011  ;;  %v5653_v15 = vmul.f32 %v8892_v40, %v8928_v3  ;;  %v8944_v23 = vld [vmem:[#allocation60_spill] sm:$0xff]  ;;  %v8946_v25 = vld [vmem:[#allocation62_spill] sm:$0xff]  ;;  %v8948_v3 = vld [vmem:[#allocation63_spill] sm:$0xff] }
 0x188   : > { %8935 = vst [vmem:[#allocation35_spill] sm:$0xff] %v5635_v2  ;;  %v5657_v10 = vmul.f32 %v8939_v24, %v5209_v35  ;;  %v5661_v13 = vmul.f32 %v8941_v29, %v5209_v35  ;;  %v3455_v37 = vmul.f32 0.5, %v8943_v52  ;;  %v5666_v6 = vmul.f32 %v8944_v23, %v5209_v35  ;;  %v8953_v52 = vld [vmem:[#allocation65_spill] sm:$0xff] }
 0x189   : > { %8936 = vst [vmem:[#allocation36_spill] sm:$0xff] %v5637_v26  ;;  %v5670_v30 = vmul.f32 %v8946_v25, %v5209_v35  ;;  %v5674_v40 = vmul.f32 %v8948_v3, %v5209_v35  ;;  %v5678_v20 = vmul.f32 %v8950_v43, %v5209_v35  ;;  %v5680_v57 = vld [vmem:[#allocation1 + $0x4] ss:$9 sm:$0xff]  ;;  %v5684_v17 = vmul.f32 %v8953_v52, %v5209_v35 }
 0x18a   : > { %8938 = vst [vmem:[#allocation37_spill] sm:$0xff] %v5653_v15  ;;  %v4014_v21 = vpop.eup %4013  ;;  %4017 = vtanh.f32 %v3106_v44  ;;  %v8961_v15 = vld [vmem:[#allocation133_spill] sm:$0xff] }
 0x18b   : > { %8940 = vst [vmem:[#allocation38_spill] sm:$0xff] %v5657_v10  ;;  %v5692_v10 = vadd.f32 %v3219_v0, %v3213_v45  ;;  %v5706_v44 = vmul.f32 %v8882_v47, %v8961_v15  ;;  %v8964_v45 = vld [vmem:[#allocation84_spill] sm:$0xff]  ;;  %4019 = vtanh.f32 %v3455_v37  ;;  %v1364_v37 = vmul.f32 0.5, %v4008_v62 }
 0x18c   : > { %8942 = vst [vmem:[#allocation39_spill] sm:$0xff] %v5661_v13  ;;  %v5688_v13 = vld [vmem:[#allocation1 + $0x6] ss:$9 sm:$0xff]  ;;  %v5712_v0 = vmul.f32 %v8964_v45, %v8961_v15  ;;  %v2171_v62 = vmul.f32 %v8931_v19, %v5626_v55 }
 0x18d   : > { %8945 = vst [vmem:[#allocation40_spill] sm:$0xff] %v5666_v6  ;;  %v5686_v6 = vld [vmem:[#allocation1 + $0x5] ss:$9 sm:$0xff] }
 0x18e   : > { %8947 = vst [vmem:[#allocation124_spill] sm:$0xff] %v5670_v30  ;;  %v5690_v30 = vld [vmem:[#allocation1 + $0x7] ss:$9 sm:$0xff] }
 0x18f   : > { %8949 = vst [vmem:[#allocation81_spill] sm:$0xff] %v5674_v40  ;;  %v1125_v40 = vmul.f32 %v8914_v16, %v5626_v55  ;;  %v2410_v16 = vmul.f32 0.5, %v4014_v21  ;;  %v8978_v19 = vld [vmem:[#allocation13_spill] sm:$0xff] }
 0x190   : > { %8951 = vst [vmem:[#allocation125_spill] sm:$0xff] %v5678_v20  ;;  %v4016_v20 = vpop.eup %4015  ;;  %v8982_v45 = vld [vmem:[#allocation25_spill] sm:$0xff] }
 0x191   : > { %8952 = vst [vmem:[#allocation100_spill] sm:$0xff] %v5680_v57  ;;  %v8959_v57 = vld [vmem:[#allocation66_spill] sm:$0xff] }
 0x192   : > { %8954 = vst [vmem:[#allocation80_spill] sm:$0xff] %v5684_v17  ;;  %v5698_v32 = vmul.f32 %v8959_v57, %v5209_v35  ;;  %v5702_v17 = vmul.f32 %v8909_v36, %v8961_v15  ;;  %v5720_v35 = vmul.f32 %v8890_v41, %v8961_v15  ;;  %v5777_v41 = vadd.f32 %v2171_v62, %v8978_v19 }
 0x193   : > { %8955 = vst [vmem:[#allocation56_spill] sm:$0xff] %v5686_v6  ;;  %v5724_v6 = vmul.f32 %v8898_v9, %v8961_v15 }
 0x194   : > { %8956 = vst [vmem:[#allocation121_spill] sm:$0xff] %v5688_v13  ;;  %v5708_v13 = vadd.f32 %v763_v27, %v737_v8  ;;  %v5728_v8 = vmul.f32 %v8901_v49, %v8961_v15  ;;  %v5732_v27 = vmul.f32 %v8903_v31, %v8961_v15  ;;  %v2759_v49 = vmul.f32 0.5, %v4016_v20 }
 0x195   : > { %8957 = vst [vmem:[#allocation55_spill] sm:$0xff] %v5690_v30  ;;  %v5716_v30 = vmul.f32 %v8887_v46, %v8961_v15  ;;  %v4018_v15 = vpop.eup %4017  ;;  %v1822_v20 = vmul.f32 %v8924_v53, %v5626_v55  ;;  %v8976_v53 = vld [vmem:[#allocation11_spill] sm:$0xff] }
 0x196   : > { %8958 = vst [vmem:[#allocation59_spill] sm:$0xff] %v5692_v10 }
 0x197   : > { %8960 = vst [vmem:[#allocation60_spill] sm:$0xff] %v5698_v32  ;;  %v5774_v9 = vadd.f32 %v1822_v20, %v8976_v53 }
 0x198   : > { %8962 = vst [vmem:[#allocation62_spill] sm:$0xff] %v5702_v17  ;;  %v8972_v17 = vld [vmem:[#allocation9_spill] sm:$0xff] }
 0x199   : > { %8963 = vst [vmem:[#allocation63_spill] sm:$0xff] %v5706_v44  ;;  %v1712_v44 = vmul.f32 0.5, %v4010_v42  ;;  %v5740_v32 = vadd.f32 %v1125_v40, %v8972_v17  ;;  %v8974_v17 = vld [vmem:[#allocation10_spill] sm:$0xff]  ;;  %v2520_v42 = vmul.f32 %v8932_v5, %v5626_v55  ;;  %v8980_v5 = vld [vmem:[#allocation15_spill] sm:$0xff] }
 0x19a   : > { %8965 = vst [vmem:[#allocation64_spill] sm:$0xff] %v5712_v0  ;;  %v8971_v0 = vld [vmem:[#allocation77_spill] sm:$0xff] }
 0x19b   : > { %8966 = vst [vmem:[#allocation65_spill] sm:$0xff] %v5716_v30  ;;  %v5736_v30 = vmul.f32 %v8939_v24, %v8971_v0  ;;  %v5750_v24 = vmul.f32 %v8944_v23, %v8971_v0  ;;  %v5758_v40 = vmul.f32 %v8948_v3, %v8971_v0  ;;  %v1713_v31 = vadd.f32 0.5, %v1712_v44 }
 0x19c   : > { %8967 = vst [vmem:[#allocation66_spill] sm:$0xff] %v5720_v35  ;;  %v1017_v35 = vmul.f32 0.5, %v4006_v60  ;;  %v5754_v60 = vmul.f32 %v8946_v25, %v8971_v0  ;;  %v1365_v25 = vadd.f32 0.5, %v1364_v37  ;;  %v2869_v3 = vmul.f32 %v8933_v48, %v5626_v55 }
 0x19d   : > { %8968 = vst [vmem:[#allocation133_spill] sm:$0xff] %v5724_v6  ;;  %v2061_v6 = vmul.f32 0.5, %v4012_v33  ;;  %v5769_v33 = vpop.permute.xlu1 %541  ;;  %v5780_v46 = vadd.f32 %v2520_v42, %v8980_v5  ;;  %v2456_v44 = vmul.f32 %v8950_v43, %v8971_v0  ;;  %v5798_v5 = vmul.f32 %v1713_v31, %v5396_v56 }
 0x19e   : > { %8969 = vst [vmem:[#allocation144_spill] sm:$0xff] %v5728_v8  ;;  %v1473_v8 = vmul.f32 %v8918_v38, %v5626_v55  ;;  %v1018_v23 = vadd.f32 0.5, %v1017_v35  ;;  %v2760_v38 = vadd.f32 0.5, %v2759_v49  ;;  %v5783_v35 = vadd.f32 %v2869_v3, %v8982_v45 }
 0x19f   : > { %8970 = vst [vmem:[#allocation145_spill] sm:$0xff] %v5732_v27  ;;  %v5746_v27 = vmul.f32 %v8941_v29, %v8971_v0  ;;  %v4020_v29 = vpop.eup %4019  ;;  %v3154_v49 = vmul.f32 %v8959_v57, %v8971_v0  ;;  %v5795_v19 = vmul.f32 %v1365_v25, %v5393_v14  ;;  %v832_v45 = vrot.slane %v5545_v61, 1 }
 0x1a0   : > { %965 = vst [vmem:[#allocation1] sm:$0xff] %v5708_v13  ;;  %v5761_v21 = vadd.f32 %v1473_v8, %v8974_v17  ;;  %v2062_v8 = vadd.f32 0.5, %v2061_v6  ;;  %v2411_v17 = vadd.f32 0.5, %v2410_v16  ;;  %v2805_v16 = vmul.f32 %v8953_v52, %v8971_v0 }
 0x1a1   : > { %8973 = vst [vmem:[#allocation77_spill] sm:$0xff] %v5740_v32  ;;  %v3457_v53 = vmul.f32 0.5, %v4020_v29  ;;  %v5792_v6 = vmul.f32 %v1018_v23, %v5390_v28  ;;  %v833_v57 = vrot.slane %v5545_v61, 2  ;;  %v834_v0 = vrot.slane %v5545_v61, 3 }
 0x1a2   : > { %8975 = vst [vmem:[#allocation9_spill] sm:$0xff] %v5761_v21  ;;  %v3108_v21 = vmul.f32 0.5, %v4018_v15  ;;  %v5802_v43 = vmul.f32 %v2062_v8, %v5399_v4  ;;  %v5805_v52 = vmul.f32 %v2411_v17, %v5403_v11  ;;  %v5810_v28 = vmul.f32 %v2760_v38, %v5406_v58  ;;  %v8996_v17 = vld [vmem:[#allocation26_spill] sm:$0xff] }
 0x1a3   : > { %8977 = vst [vmem:[#allocation10_spill] sm:$0xff] %v5774_v9  ;;  %v1179_v56 = vrot.slane %v5568_v1, 1  ;;  %v3218_v31 = vmul.f32 %v8937_v7, %v5626_v55  ;;  %v5817_v37 = vadd.f32 0.5, %v3457_v53  ;;  %v1180_v11 = vrot.slane %v5568_v1, 2  ;;  %v9001_v55 = vld [vmem:[#allocation69_spill] sm:$0xff] }
 0x1a4   : > { %8979 = vst [vmem:[#allocation11_spill] sm:$0xff] %v5777_v41  ;;  %v5812_v14 = vadd.f32 0.5, %v3108_v21  ;;  %v1181_v15 = vrot.slane %v5568_v1, 3  ;;  %v5822_v20 = vperm.slane %v832_v45, 0  ;;  %v1527_v58 = vrot.slane %v5570_v51, 1 }
 0x1a5   : > { %8981 = vst [vmem:[#allocation13_spill] sm:$0xff] %v5780_v46  ;;  %v1528_v38 = vrot.slane %v5570_v51, 2  ;;  %v1529_v21 = vrot.slane %v5570_v51, 3  ;;  %v5827_v62 = vperm.slane %v833_v57, 0  ;;  %v5829_v42 = vperm.slane %v834_v0, 0  ;;  %v600_v23 = vpop.permute.xlu1 %599  ;;  %v9000_v0 = vld [vmem:[#allocation68_spill] sm:$0xff] }
 0x1a6   : > { %8983 = vst [vmem:[#allocation15_spill] sm:$0xff] %v5783_v35  ;;  %v5833_v25 = vperm.slane %v1179_v56, 0  ;;  %v1876_v3 = vrot.slane %v5599_v34, 1  ;;  %v1877_v8 = vrot.slane %v5599_v34, 2  ;;  %v5838_v53 = vadd.f32 %v3218_v31, %v8996_v17  ;;  %v9005_v17 = vld [vmem:[#allocation70_spill] sm:$0xff]  ;;  %v9009_v31 = vld [vmem:[#allocation72_spill] sm:$0xff] }
 0x1a7   : > { %8984 = vst [vmem:[#allocation25_spill] sm:$0xff] %v5792_v6  ;;  %v5840_v45 = vperm.slane %v1180_v11, 0  ;;  %v5842_v57 = vperm.slane %v1181_v15, 0  ;;  %v1055_v4 = vmul.f32 %v9000_v0, %v5769_v33  ;;  %v1403_v29 = vmul.f32 %v9001_v55, %v5769_v33  ;;  %v9012_v51 = vld [vmem:[#allocation67_spill] sm:$0xff] }
 0x1a8   : > { %8985 = vst [vmem:[#allocation146_spill] sm:$0xff] %v5795_v19  ;;  %v5850_v56 = vperm.slane %v1528_v38, 0  ;;  %v1878_v19 = vrot.slane %v5599_v34, 3  ;;  %v9008_v38 = vld [vmem:[#allocation71_spill] sm:$0xff]  ;;  %v2576_v34 = vrot.slane %v5635_v2, 3  ;;  %v553_v6 = vmul.f32 %v9012_v51, %v5769_v33 }
 0x1a9   : > { %8986 = vst [vmem:[#allocation147_spill] sm:$0xff] %v5798_v5  ;;  %v1066_v11 = vadd.f32 %v5746_v27, %v1055_v4  ;;  %v1414_v15 = vadd.f32 %v5750_v24, %v1403_v29  ;;  %v2450_v5 = vmul.f32 %v9009_v31, %v5769_v33  ;;  %v9010_v27 = vld [vmem:[#allocation73_spill] sm:$0xff]  ;;  %v9011_v4 = vld [vmem:[#allocation74_spill] sm:$0xff]  ;;  %v9019_v35 = vld [vmem:[#allocation99_spill] sm:$0xff] }
 0x1aa   : > { %8987 = vst [vmem:[#allocation148_spill] sm:$0xff] %v5802_v43  ;;  %v5852_v43 = vperm.slane %v1529_v21, 0  ;;  %v2101_v21 = vmul.f32 %v9008_v38, %v5769_v33  ;;  %v2799_v24 = vmul.f32 %v9010_v27, %v5769_v33  ;;  %v3148_v29 = vmul.f32 %v9011_v4, %v5769_v33  ;;  %v9020_v4 = vld [vmem:[#allocation91_spill] sm:$0xff] }
 0x1ab   : > { %8988 = vst [vmem:[#allocation149_spill] sm:$0xff] %v5805_v52  ;;  %v3165_v1 = vmul.f32 %v9019_v35, %v600_v23  ;;  %v610_v27 = vmul.f32 %v9020_v4, %v600_v23  ;;  %v9039_v35 = vld [vmem:[#allocation87_spill] sm:$0xff] }
 0x1ac   : > { %8989 = vst [vmem:[#allocation150_spill] sm:$0xff] %v5810_v28  ;;  %v5848_v28 = vperm.slane %v1527_v58, 0  ;;  %v2225_v58 = vrot.slane %v5613_v50, 1 }
 0x1ad   : > { %8990 = vst [vmem:[#allocation151_spill] sm:$0xff] %v5812_v14  ;;  %v3159_v14 = vadd.f32 %v3154_v49, %v3148_v29  ;;  %v9018_v29 = vld [vmem:[#allocation98_spill] sm:$0xff] }
 0x1ae   : > { %8991 = vst [vmem:[#allocation152_spill] sm:$0xff] %v5817_v37  ;;  %v2575_v37 = vrot.slane %v5635_v2, 2 }
 0x1af   : > { %8992 = vst [vmem:[#allocation153_spill] sm:$0xff] %v5822_v20  ;;  %v9014_v20 = vld [vmem:[#allocation93_spill] sm:$0xff] }
 0x1b0   : > { %8993 = vst [vmem:[#allocation154_spill] sm:$0xff] %v5827_v62 }
 0x1b1   : > { %8994 = vst [vmem:[#allocation155_spill] sm:$0xff] %v5829_v42  ;;  %v9013_v42 = vld [vmem:[#allocation92_spill] sm:$0xff] }
 0x1b2   : > { %8995 = vst [vmem:[#allocation156_spill] sm:$0xff] %v5833_v25  ;;  %v5862_v25 = vperm.slane %v1877_v8, 0  ;;  %v2227_v8 = vrot.slane %v5613_v50, 3  ;;  %v1072_v62 = vmul.f32 %v9013_v42, %v600_v23 }
 0x1b3   : > { %8997 = vst [vmem:[#allocation26_spill] sm:$0xff] %v5838_v53  ;;  %v2816_v53 = vmul.f32 %v9018_v29, %v600_v23 }
 0x1b4   : > { %8998 = vst [vmem:[#allocation157_spill] sm:$0xff] %v5840_v45  ;;  %v5860_v45 = vperm.slane %v1876_v3, 0  ;;  %v2226_v3 = vrot.slane %v5613_v50, 2  ;;  %v1077_v31 = vadd.f32 %v1072_v62, %v1066_v11  ;;  %v5900_v29 = vperm.slane %v2227_v8, 0 }
 0x1b5   : > { %8999 = vst [vmem:[#allocation158_spill] sm:$0xff] %v5842_v57  ;;  %v1752_v57 = vmul.f32 %v9005_v17, %v5769_v33  ;;  %v5893_v17 = vperm.slane %v1878_v19, 0 }
 0x1b6   : > { %9002 = vst [vmem:[#allocation68_spill] sm:$0xff] %v5848_v28  ;;  %v2925_v28 = vrot.slane %v5637_v26, 3 }
 0x1b7   : > { %9003 = vst [vmem:[#allocation69_spill] sm:$0xff] %v5850_v56  ;;  %v1763_v52 = vadd.f32 %v5754_v60, %v1752_v57  ;;  %v2461_v60 = vadd.f32 %v2456_v44, %v2450_v5  ;;  %v2810_v57 = vadd.f32 %v2805_v16, %v2799_v24  ;;  %v2924_v56 = vrot.slane %v5637_v26, 2  ;;  %v631_v44 = vpop.permute.xlu1 %630  ;;  %v9016_v16 = vld [vmem:[#allocation96_spill] sm:$0xff]  ;;  %v9017_v5 = vld [vmem:[#allocation97_spill] sm:$0xff] }
 0x1b8   : > { %9004 = vst [vmem:[#allocation159_spill] sm:$0xff] %v5852_v43  ;;  %v2923_v43 = vrot.slane %v5637_v26, 1  ;;  %v2118_v49 = vmul.f32 %v9016_v16, %v600_v23  ;;  %v2467_v24 = vmul.f32 %v9017_v5, %v600_v23  ;;  %v5896_v16 = vperm.slane %v2225_v58, 0 }
 0x1b9   : > { %9006 = vst [vmem:[#allocation160_spill] sm:$0xff] %v5860_v45  ;;  %v2112_v45 = vadd.f32 %v5758_v40, %v2101_v21  ;;  %v1420_v40 = vmul.f32 %v9014_v20, %v600_v23  ;;  %v9015_v21 = vld [vmem:[#allocation95_spill] sm:$0xff]  ;;  %v2821_v38 = vadd.f32 %v2816_v53, %v2810_v57  ;;  %v3170_v20 = vadd.f32 %v3165_v1, %v3159_v14 }
 0x1ba   : > { %9007 = vst [vmem:[#allocation161_spill] sm:$0xff] %v5862_v25  ;;  %v2574_v25 = vrot.slane %v5635_v2, 1  ;;  %v1769_v61 = vmul.f32 %v9015_v21, %v600_v23  ;;  %v2472_v42 = vadd.f32 %v2467_v24, %v2461_v60  ;;  %v5898_v5 = vperm.slane %v2226_v3, 0  ;;  %v9032_v3 = vld [vmem:[#allocation76_spill] sm:$0xff]  ;;  %v9035_v60 = vld [vmem:[#allocation82_spill] sm:$0xff]  ;;  %v9036_v57 = vld [vmem:[#allocation83_spill] sm:$0xff] }
 0x1bb   : > { %v1425_v46 = vadd.f32 %v1420_v40, %v1414_v15  ;;  %v2123_v7 = vadd.f32 %v2118_v49, %v2112_v45  ;;  %9021 = vst [vmem:[#allocation67_spill] sm:$0xff] %v5893_v17  ;;  %v5907_v23 = vperm.slane %v2575_v37, 0  ;;  %v5909_v1 = vperm.slane %v2576_v34, 0  ;;  %v9031_v15 = vld [vmem:[#allocation75_spill] sm:$0xff]  ;;  %v9037_v40 = vld [vmem:[#allocation86_spill] sm:$0xff] }
 0x1bc   : > { %v1774_v33 = vadd.f32 %v1769_v61, %v1763_v52  ;;  %9022 = vst [vmem:[#allocation91_spill] sm:$0xff] %v5896_v16  ;;  %v584_v61 = vadd.f32 %v5736_v30, %v553_v6  ;;  %v5905_v52 = vperm.slane %v2574_v25, 0  ;;  %v5911_v19 = vperm.slane %v2923_v43, 0  ;;  %v9033_v30 = vld [vmem:[#allocation78_spill] sm:$0xff]  ;;  %v9034_v37 = vld [vmem:[#allocation79_spill] sm:$0xff] }
 0x1bd   : > { %9023 = vst [vmem:[#allocation162_spill] sm:$0xff] %v5898_v5  ;;  %v5913_v14 = vperm.slane %v2924_v56, 0  ;;  %v5915_v53 = vperm.slane %v2925_v28, 0  ;;  %v3272_v45 = vrot.slane %v5692_v10, 1  ;;  %v641_v58 = vmul.f32 %v9031_v15, %v631_v44  ;;  %v9038_v49 = vld [vmem:[#allocation134_spill] sm:$0xff] }
 0x1be   : > { %9024 = vst [vmem:[#allocation163_spill] sm:$0xff] %v5900_v29  ;;  %v615_v11 = vadd.f32 %v610_v27, %v584_v61  ;;  %v1083_v8 = vmul.f32 %v9032_v3, %v631_v44  ;;  %v1431_v6 = vmul.f32 %v9033_v30, %v631_v44  ;;  %v4174_v25 = vmov 8  }
 0x1bf   : > { %9025 = vst [vmem:[#allocation164_spill] sm:$0xff] %v5905_v52  ;;  %3981 = vset.pattern.permute.xlu1 %v4174_v25  ;;  %v1780_v34 = vmul.f32 %v9034_v37, %v631_v44  ;;  %v2129_v43 = vmul.f32 %v9035_v60, %v631_v44  ;;  %v2478_v56 = vmul.f32 %v9036_v57, %v631_v44  ;;  %v693_v21 = vpop.permute.xlu1 %692  ;;  %v9068_v16 = vrot.slane %v5708_v13, 1 }
 0x1c0   : > { %9026 = vst [vmem:[#allocation165_spill] sm:$0xff] %v5907_v23  ;;  %v2827_v28 = vmul.f32 %v9037_v40, %v631_v44  ;;  %3518 = vperm.xlu1 %3981, %v9038_v49   ;;  %v646_v24 = vadd.f32 %v641_v58, %v615_v11  ;;  %v1088_v27 = vadd.f32 %v1083_v8, %v1077_v31  ;;  %v9041_v58 = vld [vmem:[#allocation24_spill] sm:$0xff] }
 0x1c1   : > { %9027 = vst [vmem:[#allocation166_spill] sm:$0xff] %v5909_v1  ;;  %v1436_v61 = vadd.f32 %v1431_v6, %v1425_v46  ;;  %v3176_v62 = vmul.f32 %v9039_v35, %v631_v44  ;;  %v1785_v1 = vadd.f32 %v1780_v34, %v1774_v33  ;;  %v2134_v23 = vadd.f32 %v2129_v43, %v2123_v7  ;;  %v5934_v44 = vpop.permute.xlu2 %723  ;;  %v9043_v34 = vld [vmem:[#allocation102_spill] sm:$0xff] }
 0x1c2   : > { %9028 = vst [vmem:[#allocation167_spill] sm:$0xff] %v5911_v19  ;;  %v2483_v52 = vadd.f32 %v2478_v56, %v2472_v42  ;;  %v2832_v25 = vadd.f32 %v2827_v28, %v2821_v38  ;;  %v5936_v7 = vperm.slane %v3272_v45, 0  ;;  %v677_v42 = vadd.f32 %v5586_v18, %v646_v24  ;;  %v9044_v45 = vld [vmem:[#allocation103_spill] sm:$0xff] }
 0x1c3   : > { %9029 = vst [vmem:[#allocation168_spill] sm:$0xff] %v5913_v14  ;;  %v3181_v14 = vadd.f32 %v3176_v62, %v3170_v20  ;;  %v4175_v38 = vmov 10   ;;  %v703_v33 = vmul.f32 %v8905_v22, %v693_v21  ;;  %v1099_v20 = vadd.f32 %v9041_v58, %v1088_v27  ;;  %v9042_v62 = vld [vmem:[#allocation101_spill] sm:$0xff] }
 0x1c4   : > { %9030 = vst [vmem:[#allocation169_spill] sm:$0xff] %v5915_v53  ;;  %3983 = vset.pattern.permute.xlu0 %v4175_v38  ;;  %v1105_v8 = vmul.f32 %v9042_v62, %v693_v21  ;;  %v1447_v6 = vadd.f32 %v5618_v54, %v1436_v61  ;;  %v1453_v43 = vmul.f32 %v9043_v34, %v693_v21  ;;  %v9045_v53 = vld [vmem:[#allocation104_spill] sm:$0xff]  ;;  %v4176_v58 = vmov 11   ;;  %v9046_v61 = vld [vmem:[#allocation105_spill] sm:$0xff] }
 0x1c5   : > { %9040 = vst [vmem:[#allocation75_spill] sm:$0xff] %v5936_v7  ;;  %3532 = vperm.xlu0 %3983, %v9038_v49   ;;  %v1796_v56 = vadd.f32 %v5622_v39, %v1785_v1  ;;  %v1802_v28 = vmul.f32 %v9044_v45, %v693_v21  ;;  %v2145_v18 = vadd.f32 %v5630_v12, %v2134_v23  ;;  %v9047_v1 = vld [vmem:[#allocation106_spill] sm:$0xff]  ;;  %v9048_v12 = vld [vmem:[#allocation37_spill] sm:$0xff] }
 0x1c6   : > { %v708_v24 = vadd.f32 %v703_v33, %v677_v42  ;;  %v1110_v38 = vadd.f32 %v1105_v8, %v1099_v20  ;;  %v2151_v31 = vmul.f32 %v9045_v53, %v693_v21  ;;  %v2494_v27 = vadd.f32 %v5643_v63, %v2483_v52  ;;  %v9049_v42 = vld [vmem:[#allocation107_spill] sm:$0xff] }
 0x1c7   : > { %v1458_v46 = vadd.f32 %v1453_v43, %v1447_v6  ;;  %v1807_v54 = vadd.f32 %v1802_v28, %v1796_v56  ;;  %v2500_v11 = vmul.f32 %v9046_v61, %v693_v21  ;;  %v2843_v19 = vadd.f32 %v5647_v59, %v2832_v25  ;;  %v5959_v6 = vpop.permute.xlu1 %754  ;;  %v9051_v56 = vld [vmem:[#allocation85_spill] sm:$0xff] }
 0x1c8   : > { %3984 = vset.pattern.permute.xlu1 %v4176_v58  ;;  %v2156_v39 = vadd.f32 %v2151_v31, %v2145_v18  ;;  %v2849_v2 = vmul.f32 %v9047_v1, %v693_v21  ;;  %v3192_v23 = vadd.f32 %v9048_v12, %v3181_v14  ;;  %v3198_v33 = vmul.f32 %v9049_v42, %v693_v21  ;;  %v9050_v21 = vld [vmem:[#allocation84_spill] sm:$0xff] }
 0x1c9   : > { %3539 = vperm.xlu1 %3984, %v9038_v49   ;;  %v1265_v20 = vrot.slane %v5740_v32, 1  ;;  %v1266_v63 = vrot.slane %v5740_v32, 2  ;;  %v1267_v52 = vrot.slane %v5740_v32, 3  ;;  %v2505_v8 = vadd.f32 %v2500_v11, %v2494_v27  ;;  %v9052_v11 = vld [vmem:[#allocation88_spill] sm:$0xff]  ;;  %v9053_v27 = vld [vmem:[#allocation89_spill] sm:$0xff] }
 0x1ca   : > { %v734_v59 = vmul.f32 %v8909_v36, %v5934_v44  ;;  %v1116_v25 = vmul.f32 %v8882_v47, %v5934_v44  ;;  %v5965_v31 = vadd.f32 %v2849_v2, %v2843_v19  ;;  %v5967_v14 = vadd.f32 %v3198_v33, %v3192_v23  ;;  %v5977_v36 = vpop.permute.xlu2 %546  ;;  %v9054_v47 = vld [vmem:[#allocation108_spill] sm:$0xff] }
 0x1cb   : > { %v1464_v43 = vmul.f32 %v9050_v21, %v5934_v44  ;;  %v1813_v28 = vmul.f32 %v9051_v56, %v5934_v44  ;;  %v2162_v18 = vmul.f32 %v9052_v11, %v5934_v44  ;;  %v2511_v58 = vmul.f32 %v9053_v27, %v5934_v44  ;;  %v9055_v21 = vld [vmem:[#allocation109_spill] sm:$0xff]  ;;  %v9107_v32 = vld [vmem:[#allocation40_spill] sm:$0xff] }
 0x1cc   : > { %v739_v12 = vadd.f32 %v734_v59, %v708_v24  ;;  %v765_v2 = vmul.f32 %v9054_v47, %v5959_v6  ;;  %v4177_v19 = vmov 15   ;;  %v4178_v23 = vmov 9   ;;  %v5983_v7 = vld [vmem:[#allocation1 + $0x4] ss:$9 sm:$0xff] }
 0x1cd   : > { %3988 = vset.pattern.permute.xlu0 %v4177_v19  ;;  %3982 = vset.pattern.permute.xlu2 %v4178_v23  ;;  %v1121_v33 = vadd.f32 %v1116_v25, %v1110_v38  ;;  %v1127_v56 = vmul.f32 %v9055_v21, %v5959_v6  ;;  %v1469_v17 = vadd.f32 %v1464_v43, %v1458_v46  ;;  %v9057_v11 = vld [vmem:[#allocation9_spill] sm:$0xff]  ;;  %v9058_v24 = vld [vmem:[#allocation110_spill] sm:$0xff]  ;;  %v9063_v46 = vld [vmem:[#allocation111_spill] sm:$0xff] }
 0x1ce   : > { %9056 = vst [vmem:[#allocation76_spill] sm:$0xff] %v5983_v7  ;;  %v1613_v26 = vrot.slane %v9057_v11, 1  ;;  %3567 = vperm.xlu0 %3988, %v9038_v49   ;;  %v5987_v27 = vadd.f32 %v765_v2, %v739_v12  ;;  %v1475_v59 = vmul.f32 %v9058_v24, %v5959_v6  ;;  %v1818_v29 = vadd.f32 %v1813_v28, %v1807_v54  ;;  %v5991_v19 = vld [vmem:[#allocation1 + $0x5] ss:$9 sm:$0xff]  ;;  %v5995_v38 = vld [vmem:[#allocation1 + $0x7] ss:$9 sm:$0xff] }
 0x1cf   : > { %9059 = vst [vmem:[#allocation78_spill] sm:$0xff] %v5991_v19  ;;  %v5993_v23 = vld [vmem:[#allocation1 + $0x6] ss:$9 sm:$0xff]  ;;  %v5997_v25 = vadd.f32 %v1127_v56, %v1121_v33  ;;  %v1824_v43 = vmul.f32 %v9063_v46, %v5959_v6  ;;  %v2167_v5 = vadd.f32 %v2162_v18, %v2156_v39  ;;  %v2516_v50 = vadd.f32 %v2511_v58, %v2505_v8 }
 0x1d0   : > { %9060 = vst [vmem:[#allocation79_spill] sm:$0xff] %v5993_v23  ;;  %3525 = vperm.xlu2 %3982, %v9038_v49   ;;  %v9064_v12 = vrot.slane %v5692_v10, 2  ;;  %v9066_v54 = vrot.slane %v5692_v10, 3  ;;  %v1614_v33 = vrot.slane %v9057_v11, 2  ;;  %v4179_v56 = vmov 13   ;;  %v9105_v7 = vld [vmem:[#allocation38_spill] sm:$0xff] }
 0x1d1   : > { %9061 = vst [vmem:[#allocation82_spill] sm:$0xff] %v5995_v38  ;;  %v6012_v38 = vperm.slane %v9068_v16, 0  ;;  %3986 = vset.pattern.permute.xlu1 %v4179_v56  ;;  %v9069_v49 = vrot.slane %v5708_v13, 2  ;;  %v9071_v8 = vrot.slane %v5708_v13, 3  ;;  %v6029_v16 = vld [vmem:[%s8212_s9] sm:$0xff]  ;;  %v6034_v56 = vperm.slane %v1266_v63, 0 }
 0x1d2   : > { %9062 = vst [vmem:[#allocation83_spill] sm:$0xff] %v5997_v25  ;;  %v6004_v2 = vperm.slane %v9064_v12, 0  ;;  %v6008_v28 = vperm.slane %v9066_v54, 0  ;;  %v1615_v12 = vrot.slane %v9057_v11, 3  ;;  %3553 = vperm.xlu1 %3986, %v6029_v16   ;;  %v6032_v54 = vperm.slane %v1265_v20, 0 }
 0x1d3   : > { %990 = vst [vmem:[#allocation1] sm:$0xff] %v5987_v27  ;;  %v6018_v39 = vperm.slane %v9069_v49, 0  ;;  %v6022_v18 = vperm.slane %v9071_v8, 0  ;;  %v6036_v49 = vadd.f32 %v1475_v59, %v1469_v17  ;;  %v9075_v8 = vld [vmem:[#allocation114_spill] sm:$0xff]  ;;  %v6043_v10 = vperm.slane %v1613_v26, 0 }
 0x1d4   : > { %9065 = vst [vmem:[#allocation86_spill] sm:$0xff] %v6004_v2  ;;  %v6040_v2 = vperm.slane %v1267_v52, 0  ;;  %v6045_v23 = vadd.f32 %v1824_v43, %v1818_v29  ;;  %v6047_v19 = vperm.slane %v1614_v33, 0  ;;  %v1962_v20 = vrot.slane %v5774_v9, 1  ;;  %v9081_v59 = vld [vmem:[#allocation90_spill] sm:$0xff]  ;;  %v6061_v33 = vpop.permute.xlu2 %634 }
 0x1d5   : > { %9067 = vst [vmem:[#allocation134_spill] sm:$0xff] %v6008_v28  ;;  %v2173_v28 = vmul.f32 %v9075_v8, %v5959_v6  ;;  %v1963_v63 = vrot.slane %v5774_v9, 2  ;;  %v1964_v17 = vrot.slane %v5774_v9, 3  ;;  %v2860_v52 = vmul.f32 %v9081_v59, %v5934_v44 }
 0x1d6   : > { %9070 = vst [vmem:[#allocation87_spill] sm:$0xff] %v6018_v39  ;;  %v2311_v29 = vrot.slane %v5777_v41, 1  ;;  %v2312_v43 = vrot.slane %v5777_v41, 2  ;;  %v2871_v9 = vmul.f32 %v8933_v48, %v5959_v6  ;;  %v9112_v39 = vld [vmem:[#allocation80_spill] sm:$0xff] }
 0x1d7   : > { %9072 = vst [vmem:[#allocation24_spill] sm:$0xff] %v6022_v18  ;;  %v2865_v26 = vadd.f32 %v2860_v52, %v5965_v31  ;;  %v554_v31 = vmul.f32 %v9012_v51, %v5977_v36  ;;  %v9093_v52 = vld [vmem:[#allocation70_spill] sm:$0xff] }
 0x1d8   : > { %9073 = vst [vmem:[#allocation101_spill] sm:$0xff] %v6032_v54  ;;  %v6081_v54 = vperm.slane %v1963_v63, 0  ;;  %v9096_v51 = vld [vmem:[#allocation122_spill] sm:$0xff] }
 0x1d9   : > { %9074 = vst [vmem:[#allocation102_spill] sm:$0xff] %v6034_v56  ;;  %v6051_v56 = vperm.slane %v1615_v12, 0  ;;  %v6065_v12 = vpop.permute.xlu1 %603 }
 0x1da   : > { %9076 = vst [vmem:[#allocation103_spill] sm:$0xff] %v6040_v2  ;;  %v9082_v2 = vld [vmem:[#allocation115_spill] sm:$0xff] }
 0x1db   : > { %9077 = vst [vmem:[#allocation104_spill] sm:$0xff] %v6043_v10  ;;  %v3209_v58 = vmul.f32 %v9082_v2, %v5934_v44  ;;  %v6069_v10 = vld [vmem:[#allocation1 + $0x5] ss:$9 sm:$0xff] }
 0x1dc   : > { %9078 = vst [vmem:[#allocation105_spill] sm:$0xff] %v6045_v23  ;;  %v6071_v59 = vld [vmem:[#allocation1 + $0x6] ss:$9 sm:$0xff] }
 0x1dd   : > { %9079 = vst [vmem:[#allocation106_spill] sm:$0xff] %v6047_v19  ;;  %v6063_v19 = vadd.f32 %v2173_v28, %v2167_v5  ;;  %v9087_v44 = vld [vmem:[#allocation118_spill] sm:$0xff]  ;;  %v3214_v11 = vadd.f32 %v3209_v58, %v5967_v14  ;;  %v4180_v5 = vmov 12   ;;  %v6079_v28 = vperm.slane %v1962_v20, 0  ;;  %v9091_v20 = vld [vmem:[#allocation113_spill] sm:$0xff] }
 0x1de   : > { %9080 = vst [vmem:[#allocation37_spill] sm:$0xff] %v6051_v56  ;;  %v6067_v56 = vld [vmem:[#allocation1 + $0x4] ss:$9 sm:$0xff]  ;;  %v2522_v2 = vmul.f32 %v9087_v44, %v5959_v6  ;;  %3985 = vset.pattern.permute.xlu2 %v4180_v5  ;;  %v1056_v14 = vmul.f32 %v9000_v0, %v5977_v36  ;;  %v1404_v58 = vmul.f32 %v9001_v55, %v5977_v36 }
 0x1df   : > { %9083 = vst [vmem:[#allocation107_spill] sm:$0xff] %v6063_v19  ;;  %3546 = vperm.xlu2 %3985, %v6029_v16   ;;  %v1753_v5 = vmul.f32 %v9093_v52, %v5977_v36  ;;  %v9098_v0 = vld [vmem:[#allocation13_spill] sm:$0xff]  ;;  %v9099_v55 = vld [vmem:[#allocation72_spill] sm:$0xff]  ;;  %v6114_v52 = vperm.slane %v2312_v43, 0 }
 0x1e0   : > { %9084 = vst [vmem:[#allocation84_spill] sm:$0xff] %v6067_v56  ;;  %v6085_v56 = vld [vmem:[#allocation1 + $0x7] ss:$9 sm:$0xff]  ;;  %v6095_v63 = vadd.f32 %v2522_v2, %v2516_v50  ;;  %v1415_v18 = vadd.f32 %v9107_v32, %v1404_v58  ;;  %v642_v32 = vmul.f32 %v9031_v15, %v6061_v33  ;;  %v1432_v15 = vmul.f32 %v9033_v30, %v6061_v33 }
 0x1e1   : > { %9085 = vst [vmem:[#allocation85_spill] sm:$0xff] %v6069_v10  ;;  %v2313_v10 = vrot.slane %v5777_v41, 3  ;;  %v9100_v50 = vld [vmem:[#allocation73_spill] sm:$0xff]  ;;  %v9118_v58 = vld [vmem:[#allocation95_spill] sm:$0xff]  ;;  %v9123_v30 = vld [vmem:[#allocation98_spill] sm:$0xff] }
 0x1e2   : > { %9086 = vst [vmem:[#allocation88_spill] sm:$0xff] %v6071_v59  ;;  %v9094_v59 = vld [vmem:[#allocation71_spill] sm:$0xff]  ;;  %v2800_v2 = vmul.f32 %v9100_v50, %v5977_v36  ;;  %v9108_v50 = vld [vmem:[#allocation124_spill] sm:$0xff] }
 0x1e3   : > { %9088 = vst [vmem:[#allocation89_spill] sm:$0xff] %v6079_v28  ;;  %v2102_v41 = vmul.f32 %v9094_v59, %v5977_v36  ;;  %v3220_v28 = vmul.f32 %v9096_v51, %v5959_v6  ;;  %v6116_v59 = vperm.slane %v2313_v10, 0  ;;  %v9111_v10 = vld [vmem:[#allocation125_spill] sm:$0xff]  ;;  %v2817_v6 = vmul.f32 %v9123_v30, %v6065_v12 }
 0x1e4   : > { %9089 = vst [vmem:[#allocation108_spill] sm:$0xff] %v6081_v54  ;;  %v6101_v54 = vadd.f32 %v2871_v9, %v2865_v26  ;;  %v9104_v9 = vld [vmem:[#allocation74_spill] sm:$0xff] }
 0x1e5   : > { %9090 = vst [vmem:[#allocation109_spill] sm:$0xff] %v6085_v56  ;;  %v6105_v56 = vperm.slane %v1964_v17, 0  ;;  %v3149_v26 = vmul.f32 %v9104_v9, %v5977_v36  ;;  %v611_v9 = vmul.f32 %v9020_v4, %v6065_v12  ;;  %v9113_v17 = vld [vmem:[#allocation92_spill] sm:$0xff] }
 0x1e6   : > { %1206 = vst [vmem:[#allocation1] sm:$0xff] %v9091_v20  ;;  %v2451_v20 = vmul.f32 %v9099_v55, %v5977_v36  ;;  %v2811_v36 = vadd.f32 %v9112_v39, %v2800_v2  ;;  %v9117_v39 = vld [vmem:[#allocation93_spill] sm:$0xff]  ;;  %v1781_v2 = vmul.f32 %v9034_v37, %v6061_v33  ;;  %v2828_v37 = vmul.f32 %v9037_v40, %v6061_v33 }
 0x1e7   : > { %9092 = vst [vmem:[#allocation110_spill] sm:$0xff] %v6095_v63  ;;  %v6112_v63 = vperm.slane %v2311_v29, 0  ;;  %v1764_v29 = vadd.f32 %v9108_v50, %v1753_v5  ;;  %v1421_v4 = vmul.f32 %v9117_v39, %v6065_v12  ;;  %v1084_v5 = vmul.f32 %v9032_v3, %v6061_v33  ;;  %v9121_v39 = vld [vmem:[#allocation22_spill] sm:$0xff]  ;;  %v9122_v3 = vld [vmem:[#allocation97_spill] sm:$0xff] }
 0x1e8   : > { %9095 = vst [vmem:[#allocation111_spill] sm:$0xff] %v6101_v54  ;;  %v9106_v54 = vld [vmem:[#allocation39_spill] sm:$0xff] }
 0x1e9   : > { %9097 = vst [vmem:[#allocation114_spill] sm:$0xff] %v6105_v56  ;;  %v585_v56 = vadd.f32 %v9105_v7, %v554_v31  ;;  %v1067_v55 = vadd.f32 %v9106_v54, %v1056_v14  ;;  %v1073_v7 = vmul.f32 %v9113_v17, %v6065_v12  ;;  %v9114_v31 = vld [vmem:[#allocation60_spill] sm:$0xff]  ;;  %v6140_v14 = vpop.permute.xlu2 %696 }
 0x1ea   : > { %9101 = vst [vmem:[#allocation90_spill] sm:$0xff] %v6112_v63  ;;  %v9109_v63 = vld [vmem:[#allocation81_spill] sm:$0xff]  ;;  %v6136_v54 = vadd.f32 %v9114_v31, %v3149_v26  ;;  %v9120_v17 = vld [vmem:[#allocation96_spill] sm:$0xff]  ;;  %v2479_v31 = vmul.f32 %v9036_v57, %v6061_v33  ;;  %v1454_v57 = vmul.f32 %v9043_v34, %v6140_v14  ;;  %v2152_v30 = vmul.f32 %v9045_v53, %v6140_v14 }
 0x1eb   : > { %9102 = vst [vmem:[#allocation115_spill] sm:$0xff] %v6114_v52  ;;  %v2113_v43 = vadd.f32 %v9109_v63, %v2102_v41  ;;  %v6127_v52 = vadd.f32 %v3220_v28, %v3214_v11  ;;  %v6152_v63 = vpop.permute.xlu1 %665  ;;  %v2119_v50 = vmul.f32 %v9120_v17, %v6065_v12  ;;  %v704_v17 = vmul.f32 %v8905_v22, %v6140_v14 }
 0x1ec   : > { %9103 = vst [vmem:[#allocation118_spill] sm:$0xff] %v6116_v59  ;;  %v2462_v59 = vadd.f32 %v9111_v10, %v2451_v20  ;;  %v1770_v20 = vmul.f32 %v9118_v58, %v6065_v12  ;;  %v2130_v10 = vmul.f32 %v9035_v60, %v6061_v33  ;;  %v2468_v58 = vmul.f32 %v9122_v3, %v6065_v12 }
 0x1ed   : > { %9110 = vst [vmem:[#allocation70_spill] sm:$0xff] %v6127_v52  ;;  %v6142_v41 = vld [vmem:[#allocation1 + $0x4] ss:$9 sm:$0xff]  ;;  %v6146_v28 = vld [vmem:[#allocation1 + $0x6] ss:$9 sm:$0xff]  ;;  %v616_v52 = vadd.f32 %v611_v9, %v585_v56  ;;  %v1106_v60 = vmul.f32 %v9042_v62, %v6140_v14  ;;  %v1803_v3 = vmul.f32 %v9044_v45, %v6140_v14  ;;  %v2501_v40 = vmul.f32 %v9046_v61, %v6140_v14 }
 0x1ee   : > { %v6144_v11 = vld [vmem:[#allocation1 + $0x5] ss:$9 sm:$0xff]  ;;  %9116 = vst [vmem:[#allocation122_spill] sm:$0xff] %v6146_v28  ;;  %v6160_v26 = vld [vmem:[#allocation1 + $0x7] ss:$9 sm:$0xff]  ;;  %v1775_v28 = vadd.f32 %v1770_v20, %v1764_v29  ;;  %v2124_v22 = vadd.f32 %v2119_v50, %v2113_v43  ;;  %v2473_v56 = vadd.f32 %v2468_v58, %v2462_v59 }
 0x1ef   : > { %9115 = vst [vmem:[#allocation71_spill] sm:$0xff] %v6144_v11  ;;  %v9124_v9 = vld [vmem:[#allocation99_spill] sm:$0xff]  ;;  %v647_v34 = vadd.f32 %v642_v32, %v616_v52  ;;  %v9127_v11 = vld [vmem:[#allocation52_spill] sm:$0xff]  ;;  %v9128_v59 = vld [vmem:[#allocation53_spill] sm:$0xff] }
 0x1f0   : > { %9119 = vst [vmem:[#allocation72_spill] sm:$0xff] %v6160_v26  ;;  %v1078_v26 = vadd.f32 %v1073_v7, %v1067_v55  ;;  %v2822_v55 = vadd.f32 %v2817_v6, %v2811_v36  ;;  %v3166_v62 = vmul.f32 %v9124_v9, %v6065_v12  ;;  %v4181_v7 = vmov 14   ;;  %v9126_v45 = vld [vmem:[#allocation51_spill] sm:$0xff]  ;;  %v9129_v32 = vld [vmem:[#allocation54_spill] sm:$0xff] }
 0x1f1   : > { %1231 = vst [vmem:[#allocation1] sm:$0xff] %v9121_v39  ;;  %v1426_v39 = vadd.f32 %v1421_v4, %v1415_v18  ;;  %3987 = vset.pattern.permute.xlu2 %v4181_v7  ;;  %v9125_v18 = vld [vmem:[#allocation50_spill] sm:$0xff]  ;;  %v1095_v20 = vmul.f32 %v9126_v45, %v6152_v63  ;;  %v1443_v61 = vmul.f32 %v9127_v11, %v6152_v63 }
 0x1f2   : > { %v673_v29 = vmul.f32 %v9125_v18, %v6152_v63  ;;  %v1089_v4 = vadd.f32 %v1084_v5, %v1078_v26  ;;  %v1786_v43 = vadd.f32 %v1781_v2, %v1775_v28  ;;  %v1792_v6 = vmul.f32 %v9128_v59, %v6152_v63  ;;  %3560 = vperm.xlu2 %3987, %v6029_v16  }
 0x1f3   : > { %v1437_v53 = vadd.f32 %v1432_v15, %v1426_v39  ;;  %v2135_v52 = vadd.f32 %v2130_v10, %v2124_v22  ;;  %v2141_v50 = vmul.f32 %v9129_v32, %v6152_v63  ;;  %v2484_v58 = vadd.f32 %v2479_v31, %v2473_v56  ;;  %v9130_v15 = vld [vmem:[#allocation57_spill] sm:$0xff]  ;;  %v6202_v9 = vpop.permute.xlu1 %758  ;;  %v9131_v10 = vld [vmem:[#allocation58_spill] sm:$0xff] }
 0x1f4   : > { %v678_v12 = vadd.f32 %v673_v29, %v647_v34  ;;  %v1100_v36 = vadd.f32 %v1095_v20, %v1089_v4  ;;  %v1797_v26 = vadd.f32 %v1792_v6, %v1786_v43  ;;  %v2490_v39 = vmul.f32 %v9130_v15, %v6152_v63 }
 0x1f5   : > { %v1448_v5 = vadd.f32 %v1443_v61, %v1437_v53  ;;  %v2146_v2 = vadd.f32 %v2141_v50, %v2135_v52  ;;  %v2833_v7 = vadd.f32 %v2828_v37, %v2822_v55  ;;  %v2839_v22 = vmul.f32 %v9131_v10, %v6152_v63  ;;  %v9134_v53 = vld [vmem:[#allocation64_spill] sm:$0xff] }
 0x1f6   : > { %v709_v11 = vadd.f32 %v704_v17, %v678_v12  ;;  %v1111_v28 = vadd.f32 %v1106_v60, %v1100_v36  ;;  %v1808_v16 = vadd.f32 %v1803_v3, %v1797_v26  ;;  %v2495_v34 = vadd.f32 %v2490_v39, %v2484_v58  ;;  %v9132_v60 = vld [vmem:[#allocation62_spill] sm:$0xff]  ;;  %v6231_v58 = vpop.permute.xlu2 %774  ;;  %v9139_v39 = vld [vmem:[#allocation144_spill] sm:$0xff] }
 0x1f7   : > { %v1459_v18 = vadd.f32 %v1454_v57, %v1448_v5  ;;  %v3177_v29 = vmul.f32 %v9039_v35, %v6061_v33  ;;  %v2850_v31 = vmul.f32 %v9047_v1, %v6140_v14  ;;  %v3171_v56 = vadd.f32 %v3166_v62, %v6136_v54  ;;  %v9133_v57 = vld [vmem:[#allocation63_spill] sm:$0xff]  ;;  %v9137_v36 = vld [vmem:[#allocation66_spill] sm:$0xff]  ;;  %v9138_v5 = vld [vmem:[#allocation133_spill] sm:$0xff] }
 0x1f8   : > { %v2157_v4 = vadd.f32 %v2152_v30, %v2146_v2  ;;  %v2506_v45 = vadd.f32 %v2501_v40, %v2495_v34  ;;  %v2844_v17 = vadd.f32 %v2839_v22, %v2833_v7  ;;  %v740_v20 = vadd.f32 %v9132_v60, %v709_v11  ;;  %v9135_v30 = vld [vmem:[#allocation65_spill] sm:$0xff] }
 0x1f9   : > { %v766_v37 = vmul.f32 %v9054_v47, %v6202_v9  ;;  %v1122_v3 = vadd.f32 %v9133_v57, %v1111_v28  ;;  %v1128_v55 = vmul.f32 %v9055_v21, %v6202_v9  ;;  %v1470_v35 = vadd.f32 %v9134_v53, %v1459_v18  ;;  %v9136_v47 = vld [vmem:[#allocation61_spill] sm:$0xff]  ;;  %v9144_v53 = vld [vmem:[#allocation15_spill] sm:$0xff] }
 0x1fa   : > { %v1476_v1 = vmul.f32 %v9058_v24, %v6202_v9  ;;  %v2855_v33 = vadd.f32 %v2850_v31, %v2844_v17  ;;  %v1819_v40 = vadd.f32 %v9135_v30, %v1808_v16  ;;  %v1825_v62 = vmul.f32 %v9063_v46, %v6202_v9 }
 0x1fb   : > { %v771_v54 = vadd.f32 %v766_v37, %v740_v20  ;;  %v3182_v61 = vadd.f32 %v3177_v29, %v3171_v56  ;;  %v3188_v43 = vmul.f32 %v9136_v47, %v6152_v63  ;;  %v1133_v59 = vadd.f32 %v1128_v55, %v1122_v3  ;;  %v6236_v2 = vpop.permute.xlu1 %781 }
 0x1fc   : > { %v1481_v6 = vadd.f32 %v1476_v1, %v1470_v35  ;;  %v1830_v21 = vadd.f32 %v1825_v62, %v1819_v40  ;;  %v2168_v52 = vadd.f32 %v9137_v36, %v2157_v4  ;;  %v2174_v24 = vmul.f32 %v9075_v8, %v6202_v9 }
 0x1fd   : > { %v777_v12 = vperm.slane %v771_v54, 0  ;;  %v1134_v32 = vperm.slane %v1133_v59, 0  ;;  %v2517_v26 = vadd.f32 %v9138_v5, %v2506_v45  ;;  %v2523_v46 = vmul.f32 %v9087_v44, %v6202_v9 }
 0x1fe   : > { %v1482_v50 = vperm.slane %v1481_v6, 0  ;;  %v1831_v15 = vperm.slane %v1830_v21, 0  ;;  %v2179_v63 = vadd.f32 %v2174_v24, %v2168_v52  ;;  %v2866_v11 = vadd.f32 %v9139_v39, %v2855_v33  ;;  %v9145_v6 = vld [vmem:[#allocation145_spill] sm:$0xff]  ;;  %v9148_v39 = vld [vmem:[#allocation26_spill] sm:$0xff] }
 0x1ff   : > { %v2872_v28 = vmul.f32 %v8933_v48, %v6202_v9  ;;  %v3193_v7 = vadd.f32 %v3188_v43, %v3182_v61  ;;  %v2528_v8 = vadd.f32 %v2523_v46, %v2517_v26  ;;  %v778_v18 = vmul.f32 %v777_v12, %v6231_v58 }
 0x200   : > { %v1135_v16 = vmul.f32 %v1134_v32, %v6231_v58  ;;  %v2180_v34 = vperm.slane %v2179_v63, 0  ;;  %v1483_v44 = vmul.f32 %v1482_v50, %v6231_v58  ;;  %v1832_v22 = vmul.f32 %v1831_v15, %v6231_v58 }
 0x201   : > { %v2877_v10 = vadd.f32 %v2872_v28, %v2866_v11  ;;  %v3199_v29 = vmul.f32 %v9049_v42, %v6140_v14  ;;  %v2529_v31 = vperm.slane %v2528_v8, 0  ;;  %v6245_v48 = vadd.f32 %v6236_v2, %v778_v18 }
 0x202   : > { %v6248_v56 = vadd.f32 %v1135_v16, %v6236_v2  ;;  %v6251_v45 = vadd.f32 %v1483_v44, %v6236_v2  ;;  %v6254_v17 = vadd.f32 %v1832_v22, %v6236_v2  ;;  %v2181_v60 = vmul.f32 %v2180_v34, %v6231_v58  ;;  %v6356_v16 = vpop.permute.xlu2 %797 }
 0x203   : > { %v2878_v4 = vperm.slane %v2877_v10, 0  ;;  %v9140_v42 = vrot.slane %v9098_v0, 1  ;;  %v3204_v37 = vadd.f32 %v3199_v29, %v3193_v7  ;;  %v786_v57 = vand.u32 2147483647, %v6245_v48  ;;  %9162 = vst [vmem:[#allocation99_spill] sm:$0xff] %v6356_v16 }
 0x204   : > { %v9142_v3 = vrot.slane %v9098_v0, 2  ;;  %v3009_v35 = vrot.slane %v9144_v53, 1  ;;  %v1138_v1 = vand.u32 2147483647, %v6248_v56  ;;  %v1486_v33 = vand.u32 2147483647, %v6251_v45 }
 0x205   : > { %v6260_v14 = vperm.slane %v9140_v42, 0  ;;  %v787_v54 = vsub.f32 0.0, %v786_v57  ;;  %v1835_v30 = vand.u32 2147483647, %v6254_v17  ;;  %v6272_v40 = vadd.f32 %v2181_v60, %v6236_v2 }
 0x206   : > { %v6265_v55 = vperm.slane %v9142_v3, 0  ;;  %v2530_v62 = vmul.f32 %v2529_v31, %v6231_v58  ;;  %v3221_v61 = vmul.f32 %v9096_v51, %v6202_v9  ;;  %v1139_v47 = vsub.f32 0.0, %v1138_v1 }
 0x207   : > { %9141 = vst [vmem:[#allocation73_spill] sm:$0xff] %v6260_v14  ;;  %v1487_v43 = vsub.f32 0.0, %v1486_v33  ;;  %v2879_v59 = vmul.f32 %v2878_v4, %v6231_v58  ;;  %v3215_v12 = vadd.f32 %v9145_v6, %v3204_v37  ;;  %v788_v21 = vmul.f32 1.442695, %v787_v54 }
 0x208   : > { %9143 = vst [vmem:[#allocation74_spill] sm:$0xff] %v6265_v55  ;;  %v1836_v36 = vsub.f32 0.0, %v1835_v30  ;;  %v2184_v52 = vand.u32 2147483647, %v6272_v40  ;;  %v1140_v24 = vmul.f32 1.442695, %v1139_v47  ;;  %v6281_v50 = vadd.f32 %v2530_v62, %v6236_v2 }
 0x209   : > { %v1488_v32 = vmul.f32 1.442695, %v1487_v43  ;;  %v6284_v5 = vadd.f32 %v2879_v59, %v6236_v2  ;;  %v3010_v51 = vrot.slane %v9144_v53, 2  ;;  %4021 = vpow2.f32 %v788_v21 }
 0x20a   : > { %9146 = vst [vmem:[#allocation38_spill] sm:$0xff] %v6281_v50  ;;  %v1837_v9 = vmul.f32 1.442695, %v1836_v36  ;;  %v2185_v26 = vsub.f32 0.0, %v2184_v52  ;;  %v3011_v46 = vrot.slane %v9144_v53, 3  ;;  %v3226_v15 = vadd.f32 %v3221_v61, %v3215_v12 }
 0x20b   : > { %9147 = vst [vmem:[#allocation39_spill] sm:$0xff] %v6284_v5  ;;  %4023 = vpow2.f32 %v1140_v24  ;;  %v2533_v63 = vand.u32 2147483647, %v6281_v50  ;;  %v3358_v11 = vrot.slane %v9148_v39, 1  ;;  %v2882_v7 = vand.u32 2147483647, %v6284_v5 }
 0x20c   : > { %4025 = vpow2.f32 %v1488_v32  ;;  %v2186_v28 = vmul.f32 1.442695, %v2185_v26  ;;  %v9149_v8 = vrot.slane %v9098_v0, 3  ;;  %v6296_v10 = vperm.slane %v3009_v35, 0 }
 0x20d   : > { %4027 = vpow2.f32 %v1837_v9  ;;  %v2534_v34 = vsub.f32 0.0, %v2533_v63  ;;  %v6298_v44 = vperm.slane %v3010_v51, 0  ;;  %v2883_v22 = vsub.f32 0.0, %v2882_v7 }
 0x20e   : > { %v6293_v18 = vperm.slane %v9149_v8, 0  ;;  %9151 = vst [vmem:[#allocation124_spill] sm:$0xff] %v6296_v10  ;;  %4029 = vpow2.f32 %v2186_v28  ;;  %v6300_v29 = vperm.slane %v3011_v46, 0  ;;  %v3359_v31 = vrot.slane %v9148_v39, 2  ;;  %v9191_v10 = vld [vmem:[#allocation87_spill] sm:$0xff] }
 0x20f   : > { %9152 = vst [vmem:[#allocation81_spill] sm:$0xff] %v6298_v44  ;;  %v3227_v4 = vperm.slane %v3226_v15, 0  ;;  %v2535_v60 = vmul.f32 1.442695, %v2534_v34  ;;  %v4022_v42 = vpop.eup %4021  ;;  %v3360_v37 = vrot.slane %v9148_v39, 3  ;;  %v6305_v3 = vperm.slane %v3358_v11, 0 }
 0x210   : > { %9150 = vst [vmem:[#allocation40_spill] sm:$0xff] %v6293_v18  ;;  %v2884_v1 = vmul.f32 1.442695, %v2883_v22  ;;  %v938_v33 = vrot.slane %v5987_v27, 1  ;;  %v939_v54 = vrot.slane %v5987_v27, 2  ;;  %v790_v30 = vadd.f32 1.0, %v4022_v42 }
 0x211   : > { %9153 = vst [vmem:[#allocation125_spill] sm:$0xff] %v6300_v29  ;;  %v4024_v35 = vpop.eup %4023  ;;  %4031 = vpow2.f32 %v2535_v60  ;;  %v940_v61 = vrot.slane %v5987_v27, 3  ;;  %v1285_v47 = vrot.slane %v5997_v25, 1  ;;  %v1286_v6 = vrot.slane %v5997_v25, 2  ;;  %v6434_v29 = vld [vmem:[#allocation1 + $0x4] ss:$9 sm:$0xff] }
 0x212   : > { %9154 = vst [vmem:[#allocation80_spill] sm:$0xff] %v6305_v3  ;;  %v4026_v62 = vpop.eup %4025  ;;  %v1142_v43 = vadd.f32 1.0, %v4024_v35  ;;  %4033 = vpow2.f32 %v2884_v1  ;;  %v3228_v21 = vmul.f32 %v3227_v4, %v6231_v58  ;;  %v6313_v52 = vperm.slane %v3359_v31, 0  ;;  %v6436_v44 = vld [vmem:[#allocation1 + $0x5] ss:$9 sm:$0xff] }
 0x213   : > { %v4028_v59 = vpop.eup %4027  ;;  %4035 = vlog2.f32 %v790_v30  ;;  %v1490_v12 = vadd.f32 1.0, %v4026_v62  ;;  %v1287_v24 = vrot.slane %v5997_v25, 3  ;;  %v6316_v51 = vperm.slane %v3360_v37, 0  ;;  %9188 = vst [vmem:[#allocation62_spill] sm:$0xff] %v6434_v29  ;;  %v6447_v18 = vld [vmem:[#allocation1 + $0x6] ss:$9 sm:$0xff] }
 0x214   : > { %v4030_v36 = vpop.eup %4029  ;;  %9155 = vst [vmem:[#allocation92_spill] sm:$0xff] %v6313_v52  ;;  %4037 = vlog2.f32 %v1142_v43  ;;  %v1839_v32 = vadd.f32 1.0, %v4028_v59  ;;  %v6320_v46 = vperm.slane %v938_v33, 0  ;;  %v6322_v15 = vperm.slane %v939_v54, 0 }
 0x215   : > { %9156 = vst [vmem:[#allocation60_spill] sm:$0xff] %v6316_v51  ;;  %4039 = vlog2.f32 %v1490_v12  ;;  %v6324_v63 = vperm.slane %v940_v61, 0  ;;  %v6326_v11 = vperm.slane %v1285_v47, 0  ;;  %v6328_v28 = vperm.slane %v1286_v6, 0 }
 0x216   : > { %4041 = vlog2.f32 %v1839_v32  ;;  %v2188_v7 = vadd.f32 1.0, %v4030_v36  ;;  %v6331_v8 = vadd.f32 %v3228_v21, %v6236_v2  ;;  %v6333_v22 = vperm.slane %v1287_v24, 0  ;;  %9189 = vst [vmem:[#allocation63_spill] sm:$0xff] %v6436_v44  ;;  %v9194_v44 = vld [vmem:[#allocation153_spill] sm:$0xff] }
 0x217   : > { %v4032_v58 = vpop.eup %4031  ;;  %9157 = vst [vmem:[#allocation93_spill] sm:$0xff] %v6326_v11  ;;  %v1633_v31 = vrot.slane %v6036_v49, 1  ;;  %v1634_v4 = vrot.slane %v6036_v49, 2  ;;  %v1635_v60 = vrot.slane %v6036_v49, 3  ;;  %v1982_v1 = vrot.slane %v6045_v23, 1 }
 0x218   : > { %9158 = vst [vmem:[#allocation95_spill] sm:$0xff] %v6328_v28  ;;  %v4034_v34 = vpop.eup %4033  ;;  %v1983_v35 = vrot.slane %v6045_v23, 2  ;;  %v1984_v33 = vrot.slane %v6045_v23, 3  ;;  %v785_v30 = vmax.f32 %v6245_v48, 0.0  ;;  %v1137_v61 = vmax.f32 %v6248_v56, 0.0 }
 0x219   : > { %9159 = vst [vmem:[#allocation96_spill] sm:$0xff] %v6331_v8  ;;  %v4036_v42 = vpop.eup %4035  ;;  %4043 = vlog2.f32 %v2188_v7  ;;  %v2537_v59 = vadd.f32 1.0, %v4032_v58  ;;  %v3231_v6 = vand.u32 2147483647, %v6331_v8  ;;  %v1485_v36 = vmax.f32 %v6251_v45, 0.0  ;;  %v9198_v8 = vld [vmem:[#allocation76_spill] sm:$0xff] }
 0x21a   : > { %9160 = vst [vmem:[#allocation97_spill] sm:$0xff] %v6333_v22  ;;  %v4038_v2 = vpop.eup %4037  ;;  %v792_v62 = vmul.f32 0.6931472, %v4036_v42  ;;  %v2886_v32 = vadd.f32 1.0, %v4034_v34  ;;  %v6347_v26 = vperm.slane %v1633_v31, 0  ;;  %v6349_v54 = vperm.slane %v1634_v4, 0 }
 0x21b   : > { %v4040_v47 = vpop.eup %4039  ;;  %v1144_v43 = vmul.f32 0.6931472, %v4038_v2  ;;  %v6351_v57 = vperm.slane %v1635_v60, 0  ;;  %v1834_v58 = vmax.f32 %v6254_v17, 0.0  ;;  %v6354_v7 = vperm.slane %v1982_v1, 0  ;;  %v9176_v22 = vld [vmem:[#allocation55_spill] sm:$0xff] }
 0x21c   : > { %v4042_v12 = vpop.eup %4041  ;;  %v793_v21 = vadd.f32 %v792_v62, %v785_v30  ;;  %v1492_v24 = vmul.f32 0.6931472, %v4040_v47  ;;  %4045 = vlog2.f32 %v2537_v59  ;;  %v3232_v45 = vsub.f32 0.0, %v3231_v6  ;;  %v9167_v6 = vld [vmem:[#allocation43_spill] sm:$0xff]  ;;  %v9169_v47 = vld [vmem:[#allocation17_spill] sm:$0xff]  ;;  %9193 = vst [vmem:[#allocation64_spill] sm:$0xff] %v6447_v18 }
 0x21d   : > { %v1145_v48 = vadd.f32 %v1144_v43, %v1137_v61  ;;  %v1841_v42 = vmul.f32 0.6931472, %v4042_v12  ;;  %9161 = vst [vmem:[#allocation98_spill] sm:$0xff] %v6354_v7  ;;  %v6358_v34 = vperm.slane %v1983_v35, 0  ;;  %4047 = vlog2.f32 %v2886_v32  ;;  %v9166_v43 = vld [vmem:[#allocation41_spill] sm:$0xff]  ;;  %v9170_v61 = vld [vmem:[#allocation18_spill] sm:$0xff] }
 0x21e   : > { %v801_v56 = vsub.f32 0.0, %v793_v21  ;;  %v1493_v2 = vadd.f32 %v1492_v24, %v1485_v36  ;;  %v6362_v60 = vperm.slane %v1984_v33, 0  ;;  %v6369_v59 = vmul.f32 %v6356_v16, %v9166_v43  ;;  %v9174_v7 = vld [vmem:[#allocation42_spill] sm:$0xff] }
 0x21f   : > { %v1148_v30 = vsub.f32 0.0, %v1145_v48  ;;  %9163 = vst [vmem:[#allocation50_spill] sm:$0xff] %v6358_v34  ;;  %v6360_v4 = vadd.f32 %v1841_v42, %v1834_v58  ;;  %v4044_v62 = vpop.eup %4043  ;;  %v6373_v12 = vmul.f32 %v9167_v6, %v6356_v16  ;;  %v2183_v33 = vmax.f32 %v6272_v40, 0.0  ;;  %v9173_v34 = vld [vmem:[#allocation56_spill] sm:$0xff] }
 0x220   : > { %v802_v31 = vmul.f32 1.442695, %v801_v56  ;;  %9165 = vst [vmem:[#allocation52_spill] sm:$0xff] %v6362_v60  ;;  %v1496_v35 = vsub.f32 0.0, %v1493_v2  ;;  %v3233_v36 = vmul.f32 1.442695, %v3232_v45  ;;  %v6389_v56 = vmul.f32 %v1145_v48, %v9174_v7 }
 0x221   : > { %9164 = vst [vmem:[#allocation51_spill] sm:$0xff] %v6360_v4  ;;  %v1149_v1 = vmul.f32 1.442695, %v1148_v30  ;;  %v1845_v24 = vsub.f32 0.0, %v6360_v4  ;;  %v2190_v32 = vmul.f32 0.6931472, %v4044_v62  ;;  %v6380_v30 = vmul.f32 %v793_v21, %v9166_v43 }
 0x222   : > { %4049 = vpow2.f32 %v802_v31  ;;  %v4046_v58 = vpop.eup %4045  ;;  %v9168_v31 = vld [vmem:[#allocation30_spill] sm:$0xff]  ;;  %v869_v17 = vperm.slane %v9169_v47, 0  ;;  %v1497_v40 = vmul.f32 1.442695, %v1496_v35  ;;  %v9171_v45 = vld [vmem:[#allocation19_spill] sm:$0xff]  ;;  %v9172_v60 = vld [vmem:[#allocation100_spill] sm:$0xff]  ;;  %v6394_v47 = vmul.f32 %v1493_v2, %v9167_v6 }
 0x223   : > { %4051 = vpow2.f32 %v1149_v1  ;;  %v868_v20 = vperm.slane %v9168_v31, 0  ;;  %v870_v1 = vperm.slane %v9170_v61, 0  ;;  %v4048_v37 = vpop.eup %4047  ;;  %v871_v9 = vperm.slane %v9171_v45, 0  ;;  %v9175_v21 = vld [vmem:[#allocation121_spill] sm:$0xff]  ;;  %v9180_v43 = vld [vmem:[#allocation112_spill] sm:$0xff]  ;;  %v9182_v2 = vld [vmem:[#allocation130_spill] sm:$0xff] }
 0x224   : > { %4053 = vpow2.f32 %v3233_v36  ;;  %v6396_v61 = vmul.f32 1.442695, %v1845_v24  ;;  %v6398_v35 = vadd.f32 %v2190_v32, %v2183_v33  ;;  %v6400_v45 = vmul.f32 0.6931472, %v4046_v58  ;;  %v9183_v24 = vld [vmem:[#allocation131_spill] sm:$0xff]  ;;  %v9184_v32 = vld [vmem:[#allocation132_spill] sm:$0xff] }
 0x225   : > { %v6404_v48 = vmul.f32 0.6931472, %v4048_v37  ;;  %v9181_v11 = vperm.slane %v9180_v43, 0  ;;  %4055 = vpow2.f32 %v1497_v40  ;;  %v824_v6 = vmul.f32 %v9182_v2, %v6380_v30  ;;  %v9199_v4 = vld [vmem:[#allocation78_spill] sm:$0xff] }
 0x226   : > { %9177 = vst [vmem:[#allocation53_spill] sm:$0xff] %v6398_v35  ;;  %v825_v33 = vmul.f32 %v9183_v24, %v6380_v30  ;;  %v826_v58 = vmul.f32 %v9184_v32, %v6380_v30  ;;  %v876_v37 = vmul.f32 %v868_v20, %v6380_v30  ;;  %v878_v40 = vmul.f32 %v870_v1, %v6380_v30 }
 0x227   : > { %9178 = vst [vmem:[#allocation54_spill] sm:$0xff] %v6400_v45  ;;  %v823_v31 = vmul.f32 %v9181_v11, %v6380_v30  ;;  %v877_v11 = vmul.f32 %v869_v17, %v6380_v30  ;;  %v879_v2 = vmul.f32 %v871_v9, %v6380_v30  ;;  %v9190_v17 = vperm.slane %v5708_v13, 0 }
 0x228   : > { %v4050_v28 = vpop.eup %4049  ;;  %9179 = vst [vmem:[#allocation57_spill] sm:$0xff] %v6404_v48  ;;  %v930_v9 = vmul.f32 %v6012_v38, %v6380_v30  ;;  %v931_v53 = vmul.f32 %v9191_v10, %v6380_v30  ;;  %v974_v16 = vperm.slane %v9198_v8, 0  ;;  %v9202_v8 = vperm.slane %v9172_v60, 0 }
 0x229   : > { %v6402_v62 = vpop.eup %4051  ;;  %v804_v42 = vmul.f32 %v4050_v28, %v4050_v28  ;;  %v807_v36 = vmul.f32 0.0, %v4050_v28  ;;  %v929_v1 = vmul.f32 %v9190_v17, %v6380_v30  ;;  %v6455_v17 = vld [vmem:[#allocation1 + $0x7] ss:$9 sm:$0xff]  ;;  %v9206_v60 = vperm.slane %v9176_v22, 0 }
 0x22a   : > { %v6420_v43 = vmul.f32 %v6402_v62, %v6402_v62  ;;  %v6425_v24 = vpop.eup %4053  ;;  %9195 = vst [vmem:[#allocation65_spill] sm:$0xff] %v6455_v17  ;;  %4057 = vpow2.f32 %v6396_v61 }
 0x22b   : > { %v805_v51 = vmul.f32 %v4050_v28, %v804_v42  ;;  %v808_v52 = vmul.f32 0.0, %v804_v42  ;;  %v6415_v3 = vadd.f32 %v823_v31, %v807_v36  ;;  %9185 = vst [vmem:[#allocation58_spill] sm:$0xff] %v6425_v24  ;;  %v9186_v31 = vld [vmem:[#allocation32_spill] sm:$0xff]  ;;  %v6457_v38 = vpop.eup %4055 }
 0x22c   : > { %v9187_v20 = vperm.slane %v9186_v31, 0  ;;  %v6461_v10 = vmul.f32 %v6402_v62, %v6420_v43 }
 0x22d   : > { %v6427_v39 = vmul.f32 %v4050_v28, %v805_v51  ;;  %v809_v32 = vmul.f32 0.0, %v805_v51  ;;  %v6429_v7 = vadd.f32 %v824_v6, %v808_v52  ;;  %v9192_v52 = vld [vmem:[#allocation24_spill] sm:$0xff] }
 0x22e   : > { %v843_v36 = vmul.f32 %v9187_v20, %v6415_v3  ;;  %v932_v6 = vmul.f32 %v9192_v52, %v6380_v30 }
 0x22f   : > { %v810_v31 = vmul.f32 0.0, %v6427_v39  ;;  %v6450_v20 = vadd.f32 %v825_v33, %v809_v32  ;;  %v844_v29 = vmul.f32 %v9194_v44, %v6429_v7  ;;  %v851_v13 = vmul.f32 %v4050_v28, %v6427_v39  ;;  %v9196_v32 = vld [vmem:[#allocation77_spill] sm:$0xff]  ;;  %v9197_v28 = vld [vmem:[#allocation154_spill] sm:$0xff] }
 0x230   : > { %v852_v52 = vmul.f32 %v6427_v39, %v804_v42  ;;  %v853_v18 = vmul.f32 %v6427_v39, %v805_v51  ;;  %v854_v33 = vmul.f32 %v6427_v39, %v6427_v39  ;;  %1312 = vst [vmem:[#allocation1] sm:$0xff] %v9196_v32  ;;  %v975_v42 = vperm.slane %v9199_v4, 0  ;;  %v9200_v51 = vld [vmem:[#allocation155_spill] sm:$0xff] }
 0x231   : > { %v6468_v44 = vadd.f32 %v826_v58, %v810_v31  ;;  %v845_v17 = vmul.f32 %v9197_v28, %v6450_v20  ;;  %v847_v55 = vadd.f32 %v844_v29, %v843_v36  ;;  %v855_v14 = vmul.f32 0.0, %v851_v13  ;;  %v9201_v36 = vld [vmem:[#allocation79_spill] sm:$0xff] }
 0x232   : > { %v856_v0 = vmul.f32 0.0, %v852_v52  ;;  %v857_v23 = vmul.f32 0.0, %v853_v18  ;;  %v858_v48 = vmul.f32 0.0, %v854_v33  ;;  %v909_v29 = vmul.f32 %v851_v13, %v6427_v39 }
 0x233   : > { %v846_v24 = vmul.f32 %v9200_v51, %v6468_v44  ;;  %v848_v19 = vadd.f32 %v847_v55, %v845_v17  ;;  %v6476_v5 = vadd.f32 %v876_v37, %v855_v14  ;;  %v976_v28 = vperm.slane %v9201_v36, 0  ;;  %v9204_v37 = vld [vmem:[#allocation82_spill] sm:$0xff] }
 0x234   : > { %v6478_v58 = vadd.f32 %v877_v11, %v856_v0  ;;  %v6480_v31 = vadd.f32 %v878_v40, %v857_v23  ;;  %v6484_v45 = vadd.f32 %v879_v2, %v858_v48  ;;  %v910_v55 = vmul.f32 %v852_v52, %v6427_v39 }
 0x235   : > { %v849_v35 = vadd.f32 %v848_v19, %v846_v24  ;;  %v901_v4 = vmul.f32 %v9202_v8, %v6476_v5  ;;  %v9203_v14 = vperm.slane %v9173_v34, 0  ;;  %v911_v23 = vmul.f32 %v853_v18, %v6427_v39 }
 0x236   : > { %v977_v11 = vperm.slane %v9204_v37, 0  ;;  %v982_v40 = vmul.f32 %v974_v16, %v6380_v30  ;;  %v9205_v19 = vperm.slane %v9175_v21, 0  ;;  %v904_v2 = vmul.f32 %v9206_v60, %v6484_v45 }
 0x237   : > { %v902_v0 = vmul.f32 %v9203_v14, %v6478_v58  ;;  %v912_v24 = vmul.f32 %v854_v33, %v6427_v39  ;;  %v913_v13 = vmul.f32 0.0, %v909_v29  ;;  %v6503_v17 = vld [vmem:[#allocation1 + $0x4] ss:$9 sm:$0xff]  ;;  %v914_v52 = vmul.f32 0.0, %v910_v55  ;;  %v6508_v36 = vld [vmem:[#allocation1 + $0x6] ss:$9 sm:$0xff] }
 0x238   : > { %v903_v48 = vmul.f32 %v9205_v19, %v6480_v31  ;;  %v6505_v34 = vld [vmem:[#allocation1 + $0x5] ss:$9 sm:$0xff]  ;;  %v915_v51 = vmul.f32 0.0, %v911_v23  ;;  %v957_v16 = vmul.f32 %v909_v29, %v6427_v39  ;;  %v6510_v21 = vld [vmem:[#allocation1 + $0x7] ss:$9 sm:$0xff]  ;;  %v958_v22 = vmul.f32 %v910_v55, %v6427_v39 }
 0x239   : > { %v905_v18 = vadd.f32 %v902_v0, %v901_v4  ;;  %v916_v8 = vmul.f32 0.0, %v912_v24  ;;  %v6512_v14 = vadd.f32 %v929_v1, %v913_v13  ;;  %v959_v33 = vmul.f32 %v911_v23, %v6427_v39  ;;  %1337 = vst [vmem:[#allocation1] sm:$0xff] %v5997_v25 }
 0x23a   : > { %v6517_v19 = vadd.f32 %v930_v9, %v914_v52  ;;  %v6519_v4 = vadd.f32 %v931_v53, %v915_v51  ;;  %v960_v29 = vmul.f32 %v912_v24, %v6427_v39  ;;  %v9207_v60 = vperm.slane %v5987_v27, 0 }
 0x23b   : > { %v906_v37 = vadd.f32 %v905_v18, %v903_v48  ;;  %v6522_v0 = vadd.f32 %v932_v6, %v916_v8  ;;  %v961_v13 = vmul.f32 0.0, %v957_v16  ;;  %v962_v50 = vmul.f32 0.0, %v958_v22  ;;  %v9209_v8 = vld [vmem:[#allocation85_spill] sm:$0xff] }
 0x23c   : > { %v949_v1 = vmul.f32 %v9207_v60, %v6512_v14  ;;  %v950_v23 = vmul.f32 %v6320_v46, %v6517_v19  ;;  %v951_v9 = vmul.f32 %v6322_v15, %v6519_v4  ;;  %v963_v48 = vmul.f32 0.0, %v959_v33  ;;  %v9208_v15 = vld [vmem:[#allocation84_spill] sm:$0xff]  ;;  %v9215_v60 = vld [vmem:[#allocation109_spill] sm:$0xff] }
 0x23d   : > { %v907_v55 = vadd.f32 %v906_v37, %v904_v2  ;;  %v952_v53 = vmul.f32 %v6324_v63, %v6522_v0  ;;  %v964_v39 = vmul.f32 0.0, %v960_v29  ;;  %v983_v6 = vmul.f32 %v975_v42, %v6380_v30 }
 0x23e   : > { %v984_v24 = vmul.f32 %v976_v28, %v6380_v30  ;;  %v850_v27 = vadd.f32 %v849_v35, %v6369_v59  ;;  %v953_v18 = vadd.f32 %v950_v23, %v949_v1  ;;  %v985_v2 = vmul.f32 %v977_v11, %v6380_v30  ;;  %v9212_v30 = vld [vmem:[#allocation88_spill] sm:$0xff] }
 0x23f   : > { %v6537_v52 = vadd.f32 %v982_v40, %v961_v13  ;;  %v6539_v46 = vadd.f32 %v983_v6, %v962_v50  ;;  %v999_v16 = vperm.slane %v9208_v15, 0  ;;  %v1000_v63 = vperm.slane %v9209_v8, 0  ;;  %v9216_v23 = vld [vmem:[#allocation116_spill] sm:$0xff] }
 0x240   : > { %v6541_v51 = vadd.f32 %v984_v24, %v963_v48  ;;  %v908_v42 = vadd.f32 %v907_v55, %v850_v27  ;;  %v954_v22 = vadd.f32 %v953_v18, %v951_v9  ;;  %v6546_v28 = vadd.f32 %v985_v2, %v964_v39  ;;  %v6548_v59 = vld [vmem:[#allocation1 + $0x4] ss:$9 sm:$0xff]  ;;  %v6559_v37 = vld [vmem:[#allocation1 + $0x6] ss:$9 sm:$0xff] }
 0x241   : > { %9210 = vst [vmem:[#allocation61_spill] sm:$0xff] %v6548_v59  ;;  %v6550_v35 = vld [vmem:[#allocation1 + $0x5] ss:$9 sm:$0xff]  ;;  %v6554_v50 = vmul.f32 %v6402_v62, %v6461_v10  ;;  %v1001_v11 = vperm.slane %v9212_v30, 0  ;;  %v1007_v40 = vmul.f32 %v999_v16, %v6537_v52  ;;  %v1008_v33 = vmul.f32 %v1000_v63, %v6539_v46  ;;  %v6561_v61 = vld [vmem:[#allocation1 + $0x7] ss:$9 sm:$0xff] }
 0x242   : > { %9211 = vst [vmem:[#allocation66_spill] sm:$0xff] %v6550_v35  ;;  %v955_v29 = vadd.f32 %v954_v22, %v952_v53  ;;  %v1002_v1 = vperm.slane %v9215_v60, 0  ;;  %v1154_v13 = vmul.f32 %v6402_v62, %v6415_v3  ;;  %v1155_v55 = vmul.f32 %v6420_v43, %v6429_v7  ;;  %v9217_v27 = vld [vmem:[#allocation113_spill] sm:$0xff]  ;;  %v9219_v7 = vld [vmem:[#allocation135_spill] sm:$0xff]  ;;  %v9220_v16 = vld [vmem:[#allocation136_spill] sm:$0xff] }
 0x243   : > { %9213 = vst [vmem:[#allocation133_spill] sm:$0xff] %v6559_v37  ;;  %v1009_v9 = vmul.f32 %v1001_v11, %v6541_v51  ;;  %v1011_v48 = vadd.f32 %v1008_v33, %v1007_v40  ;;  %v1156_v39 = vmul.f32 %v6461_v10, %v6450_v20  ;;  %v1157_v6 = vmul.f32 %v6554_v50, %v6468_v44  ;;  %v9221_v63 = vld [vmem:[#allocation137_spill] sm:$0xff] }
 0x244   : > { %9214 = vst [vmem:[#allocation144_spill] sm:$0xff] %v6561_v61  ;;  %v956_v53 = vadd.f32 %v955_v29, %v908_v42  ;;  %v1010_v24 = vmul.f32 %v1002_v1, %v6546_v28  ;;  %v9218_v3 = vperm.slane %v9217_v27, 0  ;;  %v1171_v2 = vmul.f32 %v9219_v7, %v6389_v56  ;;  %v6586_v42 = vpop.eup %4057 }
 0x245   : > { %1554 = vst [vmem:[#allocation1] sm:$0xff] %v9216_v23  ;;  %v1012_v15 = vadd.f32 %v1011_v48, %v1009_v9  ;;  %v1172_v8 = vmul.f32 %v9220_v16, %v6389_v56  ;;  %v1173_v20 = vmul.f32 %v9221_v63, %v6389_v56  ;;  %v1198_v44 = vmul.f32 %v6402_v62, %v6554_v50  ;;  %v9231_v63 = vld [vmem:[#allocation23_spill] sm:$0xff] }
 0x246   : > { %v1170_v18 = vmul.f32 %v9218_v3, %v6389_v56  ;;  %v6590_v30 = vadd.f32 %v1171_v2, %v1155_v55  ;;  %v1199_v11 = vmul.f32 %v6554_v50, %v6420_v43  ;;  %v1200_v40 = vmul.f32 %v6554_v50, %v6461_v10  ;;  %v9226_v10 = vld [vmem:[#allocation71_spill] sm:$0xff] }
 0x247   : > { %v1013_v33 = vadd.f32 %v1012_v15, %v1010_v24  ;;  %v6596_v29 = vadd.f32 %v1172_v8, %v1156_v39  ;;  %v6598_v60 = vadd.f32 %v1173_v20, %v1157_v6  ;;  %v1201_v62 = vmul.f32 %v6554_v50, %v6554_v50  ;;  %v9227_v39 = vld [vmem:[#allocation122_spill] sm:$0xff] }
 0x248   : > { %v6588_v22 = vadd.f32 %v1170_v18, %v1154_v13  ;;  %9223 = vst [vmem:[#allocation41_spill] sm:$0xff] %v6590_v30  ;;  %v1202_v1 = vmul.f32 %v1198_v44, %v6476_v5  ;;  %v1203_v13 = vmul.f32 %v1199_v11, %v6478_v58  ;;  %v1204_v55 = vmul.f32 %v1200_v40, %v6480_v31  ;;  %v9228_v18 = vld [vmem:[#allocation72_spill] sm:$0xff] }
 0x249   : > { %9224 = vst [vmem:[#allocation43_spill] sm:$0xff] %v6596_v29  ;;  %v1215_v9 = vperm.slane %v6142_v41, 0  ;;  %v1014_v43 = vadd.f32 %v1013_v33, %v956_v53  ;;  %v1205_v48 = vmul.f32 %v1201_v62, %v6484_v45  ;;  %v1216_v24 = vperm.slane %v9226_v10, 0  ;;  %v9229_v45 = vld [vmem:[#allocation25_spill] sm:$0xff] }
 0x24a   : > { %9222 = vst [vmem:[#allocation145_spill] sm:$0xff] %v6588_v22  ;;  %v1217_v27 = vperm.slane %v9227_v39, 0  ;;  %v1218_v7 = vperm.slane %v9228_v18, 0  ;;  %v1256_v58 = vmul.f32 %v1198_v44, %v6554_v50  ;;  %v1257_v31 = vmul.f32 %v1199_v11, %v6554_v50 }
 0x24b   : > { %9225 = vst [vmem:[#allocation30_spill] sm:$0xff] %v6598_v60  ;;  %v1223_v5 = vmul.f32 %v1215_v9, %v6389_v56  ;;  %v6622_v2 = vmul.f32 %v9229_v45, %v1014_v43  ;;  %v1224_v15 = vmul.f32 %v1216_v24, %v6389_v56  ;;  %v1258_v16 = vmul.f32 %v1200_v40, %v6554_v50 }
 0x24c   : > { %v6609_v6 = vld [vmem:[#allocation1 + $0x4] ss:$9 sm:$0xff]  ;;  %v6617_v41 = vld [vmem:[#allocation1 + $0x6] ss:$9 sm:$0xff]  ;;  %v1259_v8 = vmul.f32 %v1201_v62, %v6554_v50  ;;  %v1225_v20 = vmul.f32 %v1217_v27, %v6389_v56  ;;  %v1226_v44 = vmul.f32 %v1218_v7, %v6389_v56  ;;  %v1260_v11 = vmul.f32 %v1256_v58, %v6512_v14 }
 0x24d   : > { %v6611_v3 = vld [vmem:[#allocation1 + $0x5] ss:$9 sm:$0xff]  ;;  %v6619_v53 = vld [vmem:[#allocation1 + $0x7] ss:$9 sm:$0xff]  ;;  %9230 = vst [vmem:[#allocation17_spill] sm:$0xff] %v6622_v2  ;;  %v1261_v33 = vmul.f32 %v1257_v31, %v6517_v19  ;;  %v6632_v9 = vadd.f32 %v1223_v5, %v1202_v1  ;;  %v1262_v43 = vmul.f32 %v1258_v16, %v6519_v4  ;;  %v9233_v40 = vperm.slane %v9196_v32, 0 }
 0x24e   : > { %1579 = vst [vmem:[#allocation1] sm:$0xff] %v9231_v63  ;;  %v1263_v10 = vmul.f32 %v1259_v8, %v6522_v0  ;;  %v6639_v24 = vadd.f32 %v1224_v15, %v1203_v13  ;;  %v6641_v39 = vadd.f32 %v1225_v20, %v1204_v55  ;;  %v6643_v27 = vadd.f32 %v1226_v44, %v1205_v48  ;;  %v9237_v14 = vld [vmem:[#allocation101_spill] sm:$0xff]  ;;  %v9238_v19 = vld [vmem:[#allocation102_spill] sm:$0xff]  ;;  %v9239_v4 = vld [vmem:[#allocation103_spill] sm:$0xff] }
 0x24f   : > { %9232 = vst [vmem:[#allocation18_spill] sm:$0xff] %v6632_v9  ;;  %v1276_v62 = vmul.f32 %v9233_v40, %v6389_v56  ;;  %v1277_v18 = vmul.f32 %v9237_v14, %v6389_v56  ;;  %v1278_v1 = vmul.f32 %v9238_v19, %v6389_v56  ;;  %v1279_v7 = vmul.f32 %v9239_v4, %v6389_v56 }
 0x250   : > { %9234 = vst [vmem:[#allocation19_spill] sm:$0xff] %v6639_v24  ;;  %v1304_v32 = vmul.f32 %v1256_v58, %v6554_v50  ;;  %v1305_v13 = vmul.f32 %v1257_v31, %v6554_v50  ;;  %v1306_v55 = vmul.f32 %v1258_v16, %v6554_v50  ;;  %v1307_v48 = vmul.f32 %v1259_v8, %v6554_v50 }
 0x251   : > { %9235 = vst [vmem:[#allocation100_spill] sm:$0xff] %v6641_v39  ;;  %v6651_v0 = vadd.f32 %v1276_v62, %v1260_v11  ;;  %v6654_v5 = vadd.f32 %v1277_v18, %v1261_v33  ;;  %v6659_v45 = vadd.f32 %v1278_v1, %v1262_v43  ;;  %v6661_v15 = vadd.f32 %v1279_v7, %v1263_v10  ;;  %v9246_v62 = vld [vmem:[#allocation9_spill] sm:$0xff] }
 0x252   : > { %9236 = vst [vmem:[#allocation56_spill] sm:$0xff] %v6643_v27  ;;  %v1308_v20 = vmul.f32 %v1304_v32, %v6537_v52  ;;  %v1321_v44 = vperm.slane %v6503_v17, 0  ;;  %v1322_v11 = vperm.slane %v6505_v34, 0  ;;  %v1323_v58 = vperm.slane %v6508_v36, 0 }
 0x253   : > { %9240 = vst [vmem:[#allocation121_spill] sm:$0xff] %v6651_v0  ;;  %v1324_v33 = vperm.slane %v6510_v21, 0  ;;  %v1499_v31 = vmul.f32 %v6457_v38, %v6457_v38  ;;  %v1309_v50 = vmul.f32 %v1305_v13, %v6539_v46  ;;  %v1310_v8 = vmul.f32 %v1306_v55, %v6541_v51  ;;  %v9249_v13 = vld [vmem:[#allocation140_spill] sm:$0xff] }
 0x254   : > { %9241 = vst [vmem:[#allocation55_spill] sm:$0xff] %v6654_v5  ;;  %v6675_v43 = vmul.f32 %v1307_v48, %v6546_v28  ;;  %v1502_v17 = vmul.f32 %v6457_v38, %v6588_v22  ;;  %v1329_v52 = vmul.f32 %v1321_v44, %v6389_v56  ;;  %v9244_v46 = vperm.slane %v9216_v23, 0  ;;  %v9245_v28 = vld [vmem:[#allocation138_spill] sm:$0xff]  ;;  %v9248_v23 = vld [vmem:[#allocation139_spill] sm:$0xff] }
 0x255   : > { %9242 = vst [vmem:[#allocation112_spill] sm:$0xff] %v6659_v45  ;;  %v6670_v16 = vld [vmem:[#allocation1 + $0x4] ss:$9 sm:$0xff]  ;;  %v6681_v36 = vld [vmem:[#allocation1 + $0x6] ss:$9 sm:$0xff]  ;;  %v1500_v10 = vmul.f32 %v6457_v38, %v1499_v31  ;;  %v1519_v40 = vmul.f32 %v9245_v28, %v6394_v47  ;;  %v1330_v14 = vmul.f32 %v1322_v11, %v6389_v56  ;;  %v1331_v18 = vmul.f32 %v1323_v58, %v6389_v56 }
 0x256   : > { %9243 = vst [vmem:[#allocation130_spill] sm:$0xff] %v6661_v15  ;;  %v6679_v34 = vld [vmem:[#allocation1 + $0x5] ss:$9 sm:$0xff]  ;;  %v6683_v21 = vld [vmem:[#allocation1 + $0x7] ss:$9 sm:$0xff]  ;;  %v1518_v51 = vmul.f32 %v9244_v46, %v6394_v47  ;;  %v6696_v19 = vmul.f32 %v1324_v33, %v6389_v56  ;;  %v1503_v1 = vmul.f32 %v1499_v31, %v6590_v30  ;;  %v6699_v4 = vadd.f32 %v1329_v52, %v1308_v20 }
 0x257   : > { %1660 = vst [vmem:[#allocation1] sm:$0xff] %v9246_v62  ;;  %v6702_v7 = vmul.f32 %v6457_v38, %v1500_v10  ;;  %v1520_v32 = vmul.f32 %v9248_v23, %v6394_v47  ;;  %v1521_v55 = vmul.f32 %v9249_v13, %v6394_v47  ;;  %v6708_v48 = vadd.f32 %v1330_v14, %v1309_v50  ;;  %v9308_v30 = vld [vmem:[#allocation105_spill] sm:$0xff] }
 0x258   : > { %9247 = vst [vmem:[#allocation131_spill] sm:$0xff] %v6699_v4  ;;  %v1504_v44 = vmul.f32 %v1500_v10, %v6596_v29  ;;  %v6711_v11 = vadd.f32 %v1518_v51, %v1502_v17  ;;  %v6713_v56 = vadd.f32 %v1519_v40, %v1503_v1  ;;  %v6715_v58 = vadd.f32 %v1331_v18, %v1310_v8  ;;  %v9253_v17 = vld [vmem:[#allocation68_spill] sm:$0xff]  ;;  %v9254_v18 = vld [vmem:[#allocation69_spill] sm:$0xff] }
 0x259   : > { %9250 = vst [vmem:[#allocation132_spill] sm:$0xff] %v6708_v48  ;;  %v1505_v20 = vmul.f32 %v6702_v7, %v6598_v60  ;;  %v1546_v33 = vmul.f32 %v6457_v38, %v6702_v7  ;;  %v1563_v52 = vperm.slane %v6609_v6, 0  ;;  %v9252_v50 = vperm.slane %v9231_v63, 0 }
 0x25a   : > { %9251 = vst [vmem:[#allocation32_spill] sm:$0xff] %v6715_v58  ;;  %v6722_v46 = vadd.f32 %v1520_v32, %v1504_v44  ;;  %v1539_v51 = vmul.f32 %v9253_v17, %v6713_v56  ;;  %v1547_v8 = vmul.f32 %v6702_v7, %v1499_v31  ;;  %v1548_v14 = vmul.f32 %v6702_v7, %v1500_v10 }
 0x25b   : > { %v1538_v28 = vmul.f32 %v9252_v50, %v6711_v11  ;;  %v6730_v40 = vadd.f32 %v1521_v55, %v1505_v20  ;;  %v1549_v38 = vmul.f32 %v6702_v7, %v6702_v7  ;;  %v1550_v6 = vmul.f32 %v1546_v33, %v6632_v9  ;;  %v9255_v55 = vld [vmem:[#allocation159_spill] sm:$0xff] }
 0x25c   : > { %v1540_v1 = vmul.f32 %v9254_v18, %v6722_v46  ;;  %v1551_v63 = vmul.f32 %v1547_v8, %v6639_v24  ;;  %v1564_v32 = vperm.slane %v6611_v3, 0  ;;  %v1552_v44 = vmul.f32 %v1548_v14, %v6641_v39 }
 0x25d   : > { %v1542_v23 = vadd.f32 %v1539_v51, %v1538_v28  ;;  %v1541_v10 = vmul.f32 %v9255_v55, %v6730_v40  ;;  %v1565_v20 = vperm.slane %v6617_v41, 0  ;;  %v1571_v50 = vmul.f32 %v1563_v52, %v6394_v47 }
 0x25e   : > { %v6740_v13 = vld [vmem:[#allocation1 + $0x4] ss:$9 sm:$0xff]  ;;  %v6749_v17 = vld [vmem:[#allocation1 + $0x6] ss:$9 sm:$0xff]  ;;  %v1553_v3 = vmul.f32 %v1549_v38, %v6643_v27  ;;  %v1566_v18 = vperm.slane %v6619_v53, 0  ;;  %v1572_v25 = vmul.f32 %v1564_v32, %v6394_v47  ;;  %v1588_v41 = vperm.slane %v6670_v16, 0 }
 0x25f   : > { %v6742_v31 = vld [vmem:[#allocation1 + $0x5] ss:$9 sm:$0xff]  ;;  %v6751_v28 = vld [vmem:[#allocation1 + $0x7] ss:$9 sm:$0xff]  ;;  %v1543_v51 = vadd.f32 %v1542_v23, %v1540_v1  ;;  %v1573_v55 = vmul.f32 %v1565_v20, %v6394_v47  ;;  %v6758_v39 = vadd.f32 %v1571_v50, %v1550_v6  ;;  %v1589_v52 = vperm.slane %v6679_v34, 0 }
 0x260   : > { %1685 = vst [vmem:[#allocation1] sm:$0xff] %v6036_v49  ;;  %v1574_v9 = vmul.f32 %v1566_v18, %v6394_v47  ;;  %v6763_v1 = vadd.f32 %v1572_v25, %v1551_v63  ;;  %v1590_v23 = vperm.slane %v6681_v36, 0  ;;  %v1604_v27 = vmul.f32 %v1546_v33, %v6702_v7 }
 0x261   : > { %v1544_v24 = vadd.f32 %v1543_v51, %v1541_v10  ;;  %v6766_v53 = vadd.f32 %v1573_v55, %v1552_v44  ;;  %v1596_v32 = vmul.f32 %v1588_v41, %v6758_v39  ;;  %v1605_v6 = vmul.f32 %v1547_v8, %v6702_v7  ;;  %v9260_v55 = vld [vmem:[#allocation37_spill] sm:$0xff] }
 0x262   : > { %v6771_v20 = vadd.f32 %v1574_v9, %v1553_v3  ;;  %v1597_v16 = vmul.f32 %v1589_v52, %v6763_v1  ;;  %v1606_v34 = vmul.f32 %v1548_v14, %v6702_v7  ;;  %v1607_v10 = vmul.f32 %v1549_v38, %v6702_v7  ;;  %v9259_v3 = vld [vmem:[#allocation106_spill] sm:$0xff] }
 0x263   : > { %v1591_v25 = vperm.slane %v6683_v21, 0  ;;  %v1598_v36 = vmul.f32 %v1590_v23, %v6766_v53  ;;  %v1608_v63 = vmul.f32 %v1604_v27, %v6651_v0  ;;  %v1609_v44 = vmul.f32 %v1605_v6, %v6654_v5  ;;  %v9258_v21 = vld [vmem:[#allocation104_spill] sm:$0xff] }
 0x264   : > { %v1600_v50 = vadd.f32 %v1597_v16, %v1596_v32  ;;  %v1610_v33 = vmul.f32 %v1606_v34, %v6659_v45  ;;  %v1611_v9 = vmul.f32 %v1607_v10, %v6661_v15  ;;  %v9256_v8 = vperm.slane %v9246_v62, 0 }
 0x265   : > { %v6787_v14 = vadd.f32 %v6696_v19, %v6675_v43  ;;  %v1625_v38 = vmul.f32 %v9258_v21, %v6394_v47  ;;  %v1626_v18 = vmul.f32 %v9259_v3, %v6394_v47  ;;  %v1627_v41 = vmul.f32 %v9260_v55, %v6394_v47  ;;  %v9261_v55 = vld [vmem:[#allocation117_spill] sm:$0xff] }
 0x266   : > { %v1624_v51 = vmul.f32 %v9256_v8, %v6394_v47  ;;  %v1599_v16 = vmul.f32 %v1591_v25, %v6771_v20  ;;  %v1601_v62 = vadd.f32 %v1600_v50, %v1598_v36  ;;  %v1652_v43 = vmul.f32 %v1604_v27, %v6702_v7 }
 0x267   : > { %9257 = vst [vmem:[#allocation87_spill] sm:$0xff] %v6787_v14  ;;  %v1687_v52 = vld [vmem:[#allocation1 + $0x4] ss:$9 sm:$0xff]  ;;  %v1691_v32 = vld [vmem:[#allocation1 + $0x6] ss:$9 sm:$0xff]  ;;  %v6799_v15 = vadd.f32 %v1625_v38, %v1609_v44  ;;  %v6801_v21 = vadd.f32 %v1626_v18, %v1610_v33  ;;  %v6803_v45 = vadd.f32 %v1627_v41, %v1611_v9  ;;  %v1653_v3 = vmul.f32 %v1605_v6, %v6702_v7 }
 0x268   : > { %v1689_v23 = vld [vmem:[#allocation1 + $0x5] ss:$9 sm:$0xff]  ;;  %v6796_v8 = vadd.f32 %v1624_v51, %v1608_v63  ;;  %v1693_v19 = vld [vmem:[#allocation1 + $0x7] ss:$9 sm:$0xff]  ;;  %v1545_v5 = vadd.f32 %v1544_v24, %v6373_v12  ;;  %v1602_v0 = vadd.f32 %v1601_v62, %v1599_v16  ;;  %v9262_v25 = vperm.slane %v6036_v49, 0 }
 0x269   : > { %1903 = vst [vmem:[#allocation1] sm:$0xff] %v9261_v55  ;;  %v1654_v27 = vmul.f32 %v1606_v34, %v6702_v7  ;;  %v1645_v63 = vmul.f32 %v6347_v26, %v6799_v15  ;;  %v1655_v44 = vmul.f32 %v1607_v10, %v6702_v7  ;;  %v1656_v50 = vmul.f32 %v1652_v43, %v6699_v4  ;;  %v9265_v62 = vld [vmem:[#allocation54_spill] sm:$0xff] }
 0x26a   : > { %v1644_v36 = vmul.f32 %v9262_v25, %v6796_v8  ;;  %v1657_v6 = vmul.f32 %v1653_v3, %v6708_v48  ;;  %v1646_v33 = vmul.f32 %v6349_v54, %v6801_v21  ;;  %v1647_v12 = vmul.f32 %v6351_v57, %v6803_v45  ;;  %v9279_v48 = vld [vmem:[#allocation151_spill] sm:$0xff] }
 0x26b   : > { %v1669_v49 = vperm.slane %v6740_v13, 0  ;;  %v1670_v24 = vperm.slane %v6742_v31, 0  ;;  %v1658_v9 = vmul.f32 %v1654_v27, %v6715_v58  ;;  %v1671_v26 = vperm.slane %v6749_v17, 0  ;;  %v9263_v31 = vld [vmem:[#allocation38_spill] sm:$0xff] }
 0x26c   : > { %v1648_v34 = vadd.f32 %v1645_v63, %v1644_v36  ;;  %v1672_v7 = vperm.slane %v6751_v28, 0  ;;  %v1603_v10 = vadd.f32 %v1602_v0, %v1545_v5  ;;  %v1659_v51 = vmul.f32 %v1655_v44, %v6787_v14  ;;  %v9266_v36 = vld [vmem:[#allocation53_spill] sm:$0xff]  ;;  %v9278_v58 = vld [vmem:[#allocation94_spill] sm:$0xff] }
 0x26d   : > { %v1677_v38 = vmul.f32 %v1669_v49, %v6394_v47  ;;  %v1678_v54 = vmul.f32 %v1670_v24, %v6394_v47  ;;  %v1679_v57 = vmul.f32 %v1671_v26, %v6394_v47  ;;  %v1694_v13 = vperm.slane %v1687_v52, 0  ;;  %v9267_v52 = vld [vmem:[#allocation39_spill] sm:$0xff]  ;;  %v9269_v63 = vld [vmem:[#allocation57_spill] sm:$0xff] }
 0x26e   : > { %v1649_v18 = vadd.f32 %v1648_v34, %v1646_v33  ;;  %v1695_v41 = vperm.slane %v1689_v23, 0  ;;  %v9264_v16 = vmax.f32 %v9263_v31, 0.0  ;;  %v1680_v17 = vmul.f32 %v1672_v7, %v6394_v47  ;;  %v9270_v26 = vld [vmem:[#allocation33_spill] sm:$0xff]  ;;  %v9271_v7 = vld [vmem:[#allocation107_spill] sm:$0xff] }
 0x26f   : > { %v6834_v3 = vadd.f32 %v1677_v38, %v1656_v50  ;;  %v6836_v0 = vadd.f32 %v1678_v54, %v1657_v6  ;;  %v2194_v27 = vsub.f32 0.0, %v9266_v36  ;;  %v9268_v23 = vmax.f32 %v9267_v52, 0.0  ;;  %v9277_v38 = vld [vmem:[#allocation111_spill] sm:$0xff] }
 0x270   : > { %v2540_v43 = vadd.f32 %v9265_v62, %v9264_v16  ;;  %v6838_v5 = vld [vmem:[#allocation1 + $0x4] ss:$9 sm:$0xff]  ;;  %v6842_v25 = vld [vmem:[#allocation1 + $0x6] ss:$9 sm:$0xff]  ;;  %v1650_v33 = vadd.f32 %v1649_v18, %v1647_v12  ;;  %v6848_v49 = vadd.f32 %v1679_v57, %v1658_v9  ;;  %v6852_v50 = vadd.f32 %v1680_v17, %v1659_v51 }
 0x271   : > { %v6840_v28 = vld [vmem:[#allocation1 + $0x5] ss:$9 sm:$0xff]  ;;  %v2889_v44 = vadd.f32 %v9269_v63, %v9268_v23  ;;  %v6850_v47 = vld [vmem:[#allocation1 + $0x7] ss:$9 sm:$0xff]  ;;  %v1696_v6 = vperm.slane %v1691_v32, 0  ;;  %v1702_v24 = vmul.f32 %v1694_v13, %v6834_v3  ;;  %v1703_v34 = vmul.f32 %v1695_v41, %v6836_v0 }
 0x272   : > { %1928 = vst [vmem:[#allocation1] sm:$0xff] %v9270_v26  ;;  %v9272_v54 = vrot.slane %v9271_v7, 1  ;;  %v1651_v12 = vadd.f32 %v1650_v33, %v1603_v10  ;;  %v1848_v9 = vmul.f32 %v6586_v42, %v6586_v42  ;;  %v2543_v18 = vsub.f32 0.0, %v2540_v43  ;;  %v9275_v23 = vld [vmem:[#allocation110_spill] sm:$0xff] }
 0x273   : > { %v1697_v51 = vperm.slane %v1693_v19, 0  ;;  %v1704_v32 = vmul.f32 %v1696_v6, %v6848_v49  ;;  %v1706_v57 = vadd.f32 %v1703_v34, %v1702_v24  ;;  %v9273_v13 = vrot.slane %v9271_v7, 2  ;;  %v9276_v34 = vld [vmem:[#allocation58_spill] sm:$0xff] }
 0x274   : > { %v6860_v31 = vperm.slane %v9272_v54, 0  ;;  %v9274_v16 = vrot.slane %v9271_v7, 3  ;;  %v2195_v17 = vmul.f32 1.442695, %v2194_v27  ;;  %v2892_v52 = vsub.f32 0.0, %v2889_v44 }
 0x275   : > { %v6867_v41 = vperm.slane %v9273_v13, 0  ;;  %v2680_v10 = vrot.slane %v9275_v23, 1  ;;  %v2681_v63 = vrot.slane %v9275_v23, 2  ;;  %v1705_v33 = vmul.f32 %v1697_v51, %v6852_v50  ;;  %v9281_v51 = vld [vmem:[#allocation126_spill] sm:$0xff] }
 0x276   : > { %v6871_v62 = vperm.slane %v9274_v16, 0  ;;  %v1707_v19 = vadd.f32 %v1706_v57, %v1704_v32  ;;  %v3235_v54 = vadd.f32 1.0, %v9276_v34  ;;  %v1849_v13 = vmul.f32 %v6586_v42, %v1848_v9  ;;  %v9282_v32 = vld [vmem:[#allocation152_spill] sm:$0xff] }
 0x277   : > { %v2544_v26 = vmul.f32 1.442695, %v2543_v18  ;;  %v6884_v4 = vmul.f32 %v9279_v48, %v9278_v58  ;;  %v6888_v57 = vmul.f32 %v9282_v32, %v9281_v51  ;;  %4059 = vpow2.f32 %v2195_v17  ;;  %v9288_v18 = vld [vmem:[#allocation44_spill] sm:$0xff]  ;;  %v9293_v51 = vld [vmem:[#allocation45_spill] sm:$0xff]  ;;  %v9298_v17 = vld [vmem:[#allocation46_spill] sm:$0xff] }
 0x278   : > { %v1708_v14 = vadd.f32 %v1707_v19, %v1705_v33  ;;  %v2893_v24 = vmul.f32 1.442695, %v2892_v52  ;;  %v6894_v61 = vperm.slane %v2680_v10, 0  ;;  %v6896_v16 = vperm.slane %v2681_v63, 0  ;;  %v9289_v33 = vld [vmem:[#allocation51_spill] sm:$0xff]  ;;  %v9294_v63 = vld [vmem:[#allocation10_spill] sm:$0xff] }
 0x279   : > { %9280 = vst [vmem:[#allocation24_spill] sm:$0xff] %v6884_v4  ;;  %v6890_v6 = vld [vmem:[#allocation1 + $0x4] ss:$9 sm:$0xff]  ;;  %v6900_v19 = vmul.f32 %v9289_v33, %v9288_v18  ;;  %v6902_v58 = vld [vmem:[#allocation1 + $0x6] ss:$9 sm:$0xff]  ;;  %4061 = vlog2.f32 %v3235_v54  ;;  %v6912_v10 = vmul.f32 %v6586_v42, %v1849_v13  ;;  %v6917_v33 = vmul.f32 %v9266_v36, %v9293_v51 }
 0x27a   : > { %9283 = vst [vmem:[#allocation153_spill] sm:$0xff] %v6888_v57  ;;  %v6892_v34 = vld [vmem:[#allocation1 + $0x5] ss:$9 sm:$0xff]  ;;  %v1709_v48 = vadd.f32 %v1708_v14, %v1651_v12  ;;  %v6904_v27 = vld [vmem:[#allocation1 + $0x7] ss:$9 sm:$0xff]  ;;  %4063 = vpow2.f32 %v2544_v26  ;;  %v1853_v36 = vmul.f32 %v1849_v13, %v6722_v46  ;;  %v9300_v26 = vperm.slane %v9261_v55, 0 }
 0x27b   : > { %9284 = vst [vmem:[#allocation77_spill] sm:$0xff] %v6890_v6  ;;  %v9292_v52 = vld [vmem:[#allocation99_spill] sm:$0xff]  ;;  %v9295_v14 = vld [vmem:[#allocation96_spill] sm:$0xff]  ;;  %4065 = vpow2.f32 %v2893_v24  ;;  %v1898_v46 = vmul.f32 %v6912_v10, %v6912_v10  ;;  %v1913_v55 = vperm.slane %v6840_v28, 0  ;;  %v1914_v24 = vperm.slane %v6842_v25, 0 }
 0x27c   : > { %9285 = vst [vmem:[#allocation154_spill] sm:$0xff] %v6892_v34  ;;  %v6909_v32 = vmul.f32 %v9293_v51, %v9292_v52  ;;  %v9296_v57 = vld [vmem:[#allocation147_spill] sm:$0xff]  ;;  %v1867_v51 = vmul.f32 %v9300_v26, %v6900_v19 }
 0x27d   : > { %9286 = vst [vmem:[#allocation76_spill] sm:$0xff] %v6894_v61  ;;  %v6924_v61 = vmul.f32 %v2540_v43, %v9298_v17  ;;  %v9299_v4 = vld [vmem:[#allocation47_spill] sm:$0xff]  ;;  %v1854_v43 = vmul.f32 %v6912_v10, %v6730_v40  ;;  %v9301_v40 = vld [vmem:[#allocation141_spill] sm:$0xff]  ;;  %v1921_v29 = vmul.f32 %v1913_v55, %v6900_v19  ;;  %v1922_v22 = vmul.f32 %v1914_v24, %v6900_v19 }
 0x27e   : > { %9287 = vst [vmem:[#allocation78_spill] sm:$0xff] %v6896_v16  ;;  %v6921_v16 = vmul.f32 %v9296_v57, %v1709_v48  ;;  %v6927_v54 = vmul.f32 %v2889_v44, %v9299_v4  ;;  %v1912_v57 = vperm.slane %v6838_v5, 0  ;;  %v6937_v48 = vpop.eup %4059  ;;  %v1895_v44 = vmul.f32 %v6586_v42, %v6912_v10 }
 0x27f   : > { %9290 = vst [vmem:[#allocation155_spill] sm:$0xff] %v6902_v58  ;;  %v1852_v58 = vmul.f32 %v1848_v9, %v6713_v56  ;;  %v1897_v56 = vmul.f32 %v6912_v10, %v1849_v13  ;;  %v1915_v5 = vperm.slane %v6850_v47, 0  ;;  %v6950_v26 = vpop.eup %4061  ;;  %v1868_v12 = vmul.f32 %v9301_v40, %v6900_v19 }
 0x280   : > { %9291 = vst [vmem:[#allocation79_spill] sm:$0xff] %v6904_v27  ;;  %v1851_v27 = vmul.f32 %v6586_v42, %v6711_v11  ;;  %v1896_v11 = vmul.f32 %v6912_v10, %v1848_v9  ;;  %v9302_v42 = vld [vmem:[#allocation142_spill] sm:$0xff]  ;;  %v9303_v9 = vld [vmem:[#allocation143_spill] sm:$0xff]  ;;  %v1899_v6 = vmul.f32 %v1895_v44, %v6758_v39  ;;  %v6959_v37 = vpop.eup %4063  ;;  %v1902_v47 = vmul.f32 %v1898_v46, %v6771_v20 }
 0x281   : > { %2009 = vst [vmem:[#allocation1] sm:$0xff] %v9294_v63  ;;  %v1869_v34 = vmul.f32 %v9302_v42, %v6900_v19  ;;  %v1870_v13 = vmul.f32 %v9303_v9, %v6900_v19  ;;  %v1901_v25 = vmul.f32 %v1897_v56, %v6766_v53  ;;  %v2197_v42 = vmul.f32 %v6937_v48, %v6937_v48  ;;  %v6972_v9 = vpop.eup %4065 }
 0x282   : > { %9297 = vst [vmem:[#allocation82_spill] sm:$0xff] %v6921_v16  ;;  %v1900_v28 = vmul.f32 %v1896_v11, %v6763_v1  ;;  %v6974_v39 = vadd.f32 %v1867_v51, %v1851_v27  ;;  %v6976_v16 = vadd.f32 %v1868_v12, %v1852_v58  ;;  %v1920_v60 = vmul.f32 %v1912_v57, %v6900_v19 }
 0x283   : > { %v6978_v1 = vadd.f32 %v1869_v34, %v1853_v36  ;;  %v6980_v53 = vadd.f32 %v1870_v13, %v1854_v43  ;;  %v1923_v2 = vmul.f32 %v1915_v5, %v6900_v19  ;;  %v1953_v27 = vmul.f32 %v1895_v44, %v6912_v10 }
 0x284   : > { %9304 = vst [vmem:[#allocation84_spill] sm:$0xff] %v6974_v39  ;;  %v1954_v58 = vmul.f32 %v1896_v11, %v6912_v10  ;;  %v1955_v34 = vmul.f32 %v1897_v56, %v6912_v10  ;;  %v2198_v12 = vmul.f32 %v6937_v48, %v2197_v42  ;;  %v6993_v36 = vadd.f32 %v1920_v60, %v1899_v6  ;;  %v9314_v60 = vld [vmem:[#allocation89_spill] sm:$0xff] }
 0x285   : > { %9305 = vst [vmem:[#allocation85_spill] sm:$0xff] %v6976_v16  ;;  %v6995_v51 = vadd.f32 %v1921_v29, %v1900_v28  ;;  %v6997_v57 = vadd.f32 %v1922_v22, %v1901_v25  ;;  %v6999_v43 = vadd.f32 %v1923_v2, %v1902_v47  ;;  %v1956_v55 = vmul.f32 %v1898_v46, %v6912_v10  ;;  %v9315_v22 = vld [vmem:[#allocation108_spill] sm:$0xff]  ;;  %v9317_v47 = vld [vmem:[#allocation127_spill] sm:$0xff] }
 0x286   : > { %9306 = vst [vmem:[#allocation88_spill] sm:$0xff] %v6978_v1  ;;  %v1957_v24 = vmul.f32 %v1953_v27, %v6796_v8  ;;  %v1958_v44 = vmul.f32 %v1954_v58, %v6799_v15  ;;  %v1959_v11 = vmul.f32 %v1955_v34, %v6801_v21  ;;  %v9313_v56 = vperm.slane %v9294_v63, 0  ;;  %v9316_v8 = vld [vmem:[#allocation114_spill] sm:$0xff] }
 0x287   : > { %9307 = vst [vmem:[#allocation109_spill] sm:$0xff] %v6980_v53  ;;  %v1974_v29 = vmul.f32 %v9314_v60, %v6900_v19  ;;  %v1975_v6 = vmul.f32 %v9315_v22, %v6900_v19  ;;  %v2201_v2 = vmul.f32 %v2197_v42, %v6976_v16  ;;  %v1960_v46 = vmul.f32 %v1956_v55, %v6803_v45 }
 0x288   : > { %v6964_v35 = vld [vmem:[#allocation1 + $0x4] ss:$9 sm:$0xff]  ;;  %v6968_v40 = vld [vmem:[#allocation1 + $0x6] ss:$9 sm:$0xff]  ;;  %9309 = vst [vmem:[#allocation116_spill] sm:$0xff] %v6993_v36  ;;  %v1973_v5 = vmul.f32 %v9313_v56, %v6900_v19  ;;  %v1976_v13 = vmul.f32 %v9316_v8, %v6900_v19  ;;  %v2001_v15 = vmul.f32 %v1953_v27, %v6912_v10  ;;  %v7018_v21 = vmul.f32 %v6937_v48, %v2198_v12 }
 0x289   : > { %v6966_v59 = vld [vmem:[#allocation1 + $0x5] ss:$9 sm:$0xff]  ;;  %v6982_v20 = vld [vmem:[#allocation1 + $0x7] ss:$9 sm:$0xff]  ;;  %9310 = vst [vmem:[#allocation113_spill] sm:$0xff] %v6995_v51  ;;  %v2018_v63 = vperm.slane %v6964_v35, 0  ;;  %v2200_v25 = vmul.f32 %v6937_v48, %v6974_v39  ;;  %v2217_v56 = vmul.f32 %v9317_v47, %v6917_v33  ;;  %v7028_v45 = vadd.f32 %v1974_v29, %v1958_v44 }
 0x28a   : > { %2034 = vst [vmem:[#allocation1] sm:$0xff] %v9308_v30  ;;  %v2019_v28 = vperm.slane %v6966_v59, 0  ;;  %v7026_v60 = vadd.f32 %v1973_v5, %v1957_v24  ;;  %v7030_v22 = vadd.f32 %v1975_v6, %v1959_v11  ;;  %v2002_v27 = vmul.f32 %v1954_v58, %v6912_v10  ;;  %v9325_v24 = vld [vmem:[#allocation119_spill] sm:$0xff] }
 0x28b   : > { %9311 = vst [vmem:[#allocation135_spill] sm:$0xff] %v6997_v57  ;;  %v2003_v59 = vmul.f32 %v1955_v34, %v6912_v10  ;;  %v2202_v47 = vmul.f32 %v2198_v12, %v6978_v1  ;;  %v9326_v44 = vperm.slane %v9325_v24, 0  ;;  %v7046_v11 = vadd.f32 %v2217_v56, %v2201_v2  ;;  %v9331_v56 = vld [vmem:[#allocation34_spill] sm:$0xff] }
 0x28c   : > { %9312 = vst [vmem:[#allocation136_spill] sm:$0xff] %v6999_v43  ;;  %v7048_v29 = vadd.f32 %v1976_v13, %v1960_v46  ;;  %v2020_v58 = vperm.slane %v6968_v40, 0  ;;  %v2244_v6 = vmul.f32 %v6937_v48, %v7018_v21  ;;  %v2004_v34 = vmul.f32 %v1956_v55, %v6912_v10 }
 0x28d   : > { %9318 = vst [vmem:[#allocation137_spill] sm:$0xff] %v7026_v60  ;;  %v2216_v5 = vmul.f32 %v9326_v44, %v6917_v33  ;;  %v2005_v46 = vmul.f32 %v2001_v15, %v6834_v3  ;;  %v2006_v40 = vmul.f32 %v2002_v27, %v6836_v0  ;;  %v2026_v13 = vmul.f32 %v2018_v63, %v6900_v19 }
 0x28e   : > { %9319 = vst [vmem:[#allocation71_spill] sm:$0xff] %v7028_v45  ;;  %v2027_v48 = vmul.f32 %v2019_v28, %v6900_v19  ;;  %v2203_v10 = vmul.f32 %v7018_v21, %v6980_v53  ;;  %v2028_v3 = vmul.f32 %v2020_v58, %v6900_v19  ;;  %v2302_v0 = vmul.f32 %v2244_v6, %v7018_v21 }
 0x28f   : > { %9320 = vst [vmem:[#allocation122_spill] sm:$0xff] %v7030_v22  ;;  %v7059_v2 = vadd.f32 %v2216_v5, %v2200_v25  ;;  %v2008_v25 = vmul.f32 %v2004_v34, %v6852_v50  ;;  %v9332_v27 = vperm.slane %v9331_v56, 0 }
 0x290   : > { %9327 = vst [vmem:[#allocation102_spill] sm:$0xff] %v7048_v29  ;;  %v7085_v50 = vadd.f32 %v2027_v48, %v2006_v40  ;;  %v2306_v5 = vmul.f32 %v2302_v0, %v7026_v60  ;;  %v9336_v48 = vld [vmem:[#allocation11_spill] sm:$0xff] }
 0x291   : > { %v7033_v8 = vld [vmem:[#allocation1 + $0x4] ss:$9 sm:$0xff]  ;;  %v7037_v35 = vld [vmem:[#allocation1 + $0x6] ss:$9 sm:$0xff] }
 0x292   : > { %9321 = vst [vmem:[#allocation72_spill] sm:$0xff] %v7033_v8  ;;  %v7035_v30 = vld [vmem:[#allocation1 + $0x5] ss:$9 sm:$0xff]  ;;  %v7040_v16 = vld [vmem:[#allocation1 + $0x7] ss:$9 sm:$0xff]  ;;  %v9337_v8 = vperm.slane %v9336_v48, 0 }
 0x293   : > { %9322 = vst [vmem:[#allocation25_spill] sm:$0xff] %v7035_v30  ;;  %v9328_v30 = vld [vmem:[#allocation128_spill] sm:$0xff] }
 0x294   : > { %9323 = vst [vmem:[#allocation23_spill] sm:$0xff] %v7037_v35  ;;  %v2245_v35 = vmul.f32 %v7018_v21, %v2197_v42  ;;  %v2218_v44 = vmul.f32 %v9328_v30, %v6917_v33  ;;  %v2007_v42 = vmul.f32 %v2003_v59, %v6848_v49  ;;  %v9330_v49 = vld [vmem:[#allocation129_spill] sm:$0xff]  ;;  %v2236_v59 = vmul.f32 %v9332_v27, %v7059_v2 }
 0x295   : > { %9324 = vst [vmem:[#allocation101_spill] sm:$0xff] %v7040_v16  ;;  %v2021_v16 = vperm.slane %v6982_v20, 0  ;;  %v9329_v20 = vld [vmem:[#allocation91_spill] sm:$0xff]  ;;  %v2219_v28 = vmul.f32 %v9330_v49, %v6917_v33  ;;  %v2322_v60 = vmul.f32 %v9337_v8, %v6917_v33 }
 0x296   : > { %2252 = vst [vmem:[#allocation1] sm:$0xff] %v9325_v24  ;;  %v7068_v55 = vadd.f32 %v2218_v44, %v2202_v47  ;;  %v2237_v30 = vmul.f32 %v9329_v20, %v7046_v11  ;;  %v2303_v15 = vmul.f32 %v2245_v35, %v7018_v21  ;;  %v2246_v47 = vmul.f32 %v7018_v21, %v2198_v12  ;;  %v9341_v8 = vld [vmem:[#allocation163_spill] sm:$0xff] }
 0x297   : > { %v2029_v63 = vmul.f32 %v2021_v16, %v6900_v19  ;;  %v7083_v24 = vadd.f32 %v2026_v13, %v2005_v46  ;;  %9334 = vst [vmem:[#allocation138_spill] sm:$0xff] %v7085_v50  ;;  %v7089_v34 = vadd.f32 %v2219_v28, %v2203_v10  ;;  %v9335_v16 = vld [vmem:[#allocation162_spill] sm:$0xff]  ;;  %v2247_v20 = vmul.f32 %v7018_v21, %v7018_v21 }
 0x298   : > { %v2307_v58 = vmul.f32 %v2303_v15, %v7028_v45  ;;  %v2238_v19 = vmul.f32 %v9335_v16, %v7068_v55  ;;  %v2240_v44 = vadd.f32 %v2237_v30, %v2236_v59  ;;  %v9338_v10 = vld [vmem:[#allocation90_spill] sm:$0xff]  ;;  %v7100_v45 = vadd.f32 %v2028_v3, %v2007_v42 }
 0x299   : > { %9333 = vst [vmem:[#allocation103_spill] sm:$0xff] %v7083_v24  ;;  %v2323_v28 = vmul.f32 %v9338_v10, %v6917_v33  ;;  %v7102_v16 = vadd.f32 %v2029_v63, %v2008_v25  ;;  %v2248_v30 = vmul.f32 %v2244_v6, %v6993_v36  ;;  %v2304_v59 = vmul.f32 %v2246_v47, %v7018_v21 }
 0x29a   : > { %9339 = vst [vmem:[#allocation9_spill] sm:$0xff] %v7100_v45  ;;  %v7108_v53 = vadd.f32 %v2322_v60, %v2306_v5  ;;  %v2239_v10 = vmul.f32 %v9341_v8, %v7089_v34  ;;  %v2241_v42 = vadd.f32 %v2240_v44, %v2238_v19  ;;  %v2305_v25 = vmul.f32 %v2247_v20, %v7018_v21  ;;  %v9342_v19 = vld [vmem:[#allocation115_spill] sm:$0xff] }
 0x29b   : > { %9340 = vst [vmem:[#allocation139_spill] sm:$0xff] %v7102_v16  ;;  %v7110_v1 = vadd.f32 %v2323_v28, %v2307_v58  ;;  %v2308_v3 = vmul.f32 %v2304_v59, %v7030_v22  ;;  %v2250_v60 = vmul.f32 %v2246_v47, %v6997_v57  ;;  %v2251_v5 = vmul.f32 %v2247_v20, %v6999_v43 }
 0x29c   : > { %v2309_v58 = vmul.f32 %v2305_v25, %v7048_v29  ;;  %v2324_v44 = vmul.f32 %v9342_v19, %v6917_v33  ;;  %v2242_v47 = vadd.f32 %v2241_v42, %v2239_v10  ;;  %v2350_v20 = vmul.f32 %v2302_v0, %v7018_v21 }
 0x29d   : > { %v2254_v49 = vld [vmem:[#allocation1 + $0x4] ss:$9 sm:$0xff]  ;;  %v2258_v12 = vld [vmem:[#allocation1 + $0x6] ss:$9 sm:$0xff]  ;;  %v2343_v8 = vmul.f32 %v6860_v31, %v7110_v1  ;;  %v2351_v29 = vmul.f32 %v2303_v15, %v7018_v21  ;;  %v2549_v0 = vmul.f32 %v6959_v37, %v7059_v2 }
 0x29e   : > { %v2256_v27 = vld [vmem:[#allocation1 + $0x5] ss:$9 sm:$0xff]  ;;  %v2260_v46 = vld [vmem:[#allocation1 + $0x7] ss:$9 sm:$0xff]  ;;  %v2261_v13 = vperm.slane %v2254_v49, 0  ;;  %v2249_v49 = vmul.f32 %v2245_v35, %v6995_v51  ;;  %v7120_v35 = vmul.f32 %v6959_v37, %v6959_v37  ;;  %v7135_v22 = vadd.f32 %v2324_v44, %v2308_v3 }
 0x29f   : > { %v2262_v40 = vperm.slane %v2256_v27, 0  ;;  %2277 = vst [vmem:[#allocation1] sm:$0xff] %v9331_v56  ;;  %v2263_v27 = vperm.slane %v2258_v12, 0  ;;  %v2264_v6 = vperm.slane %v2260_v46, 0  ;;  %v9343_v46 = vld [vmem:[#allocation118_spill] sm:$0xff] }
 0x2a0   : > { %v2269_v63 = vmul.f32 %v2261_v13, %v6917_v33  ;;  %v2325_v13 = vmul.f32 %v9343_v46, %v6917_v33 }
 0x2a1   : > { %v2270_v56 = vmul.f32 %v2262_v40, %v6917_v33  ;;  %v2271_v12 = vmul.f32 %v2263_v27, %v6917_v33  ;;  %v9344_v40 = vperm.slane %v9271_v7, 0  ;;  %v2272_v19 = vmul.f32 %v2264_v6, %v6917_v33  ;;  %v9345_v6 = vld [vmem:[#allocation120_spill] sm:$0xff] }
 0x2a2   : > { %v7140_v27 = vadd.f32 %v2269_v63, %v2248_v30  ;;  %v7152_v30 = vadd.f32 %v2325_v13, %v2309_v58  ;;  %v9346_v63 = vperm.slane %v9345_v6, 0  ;;  %v9347_v58 = vld [vmem:[#allocation16_spill] sm:$0xff] }
 0x2a3   : > { %v2342_v28 = vmul.f32 %v9344_v40, %v7108_v53  ;;  %v7142_v43 = vadd.f32 %v2270_v56, %v2249_v49  ;;  %v7146_v40 = vmul.f32 %v6959_v37, %v7120_v35  ;;  %v7150_v15 = vadd.f32 %v2271_v12, %v2250_v60 }
 0x2a4   : > { %v2565_v56 = vmul.f32 %v9346_v63, %v6924_v61  ;;  %v7162_v2 = vadd.f32 %v2272_v19, %v2251_v5  ;;  %v2344_v60 = vmul.f32 %v6867_v41, %v7135_v22  ;;  %v2566_v12 = vmul.f32 %v9347_v58, %v6924_v61 }
 0x2a5   : > { %v2346_v49 = vadd.f32 %v2343_v8, %v2342_v28  ;;  %v2551_v8 = vmul.f32 %v7146_v40, %v7068_v55  ;;  %v2352_v41 = vmul.f32 %v2304_v59, %v7018_v21  ;;  %v2353_v55 = vmul.f32 %v2305_v25, %v7018_v21 }
 0x2a6   : > { %v2279_v46 = vld [vmem:[#allocation1 + $0x4] ss:$9 sm:$0xff]  ;;  %v2283_v51 = vld [vmem:[#allocation1 + $0x6] ss:$9 sm:$0xff]  ;;  %v7192_v59 = vmul.f32 %v6972_v9, %v6972_v9 }
 0x2a7   : > { %v2281_v57 = vld [vmem:[#allocation1 + $0x5] ss:$9 sm:$0xff]  ;;  %v2285_v31 = vld [vmem:[#allocation1 + $0x7] ss:$9 sm:$0xff]  ;;  %v2286_v10 = vperm.slane %v2279_v46, 0  ;;  %v2288_v3 = vperm.slane %v2283_v51, 0  ;;  %v2550_v51 = vmul.f32 %v7120_v35, %v7046_v11  ;;  %v7175_v46 = vadd.f32 %v2565_v56, %v2549_v0 }
 0x2a8   : > { %v2287_v42 = vperm.slane %v2281_v57, 0  ;;  %2358 = vst [vmem:[#allocation1] sm:$0xff] %v9336_v48  ;;  %v2289_v44 = vperm.slane %v2285_v31, 0  ;;  %v7168_v48 = vmul.f32 %v6959_v37, %v7146_v40  ;;  %v2243_v11 = vadd.f32 %v2242_v47, %v6909_v32  ;;  %v9351_v32 = vld [vmem:[#allocation14_spill] sm:$0xff] }
 0x2a9   : > { %v2294_v36 = vmul.f32 %v2286_v10, %v7140_v27  ;;  %v2296_v13 = vmul.f32 %v2288_v3, %v7150_v15  ;;  %9348 = vst [vmem:[#allocation140_spill] sm:$0xff] %v7175_v46  ;;  %v2347_v5 = vadd.f32 %v2346_v49, %v2344_v60  ;;  %v2354_v0 = vmul.f32 %v2350_v20, %v7083_v24 }
 0x2aa   : > { %v2295_v57 = vmul.f32 %v2287_v42, %v7142_v43  ;;  %v2552_v19 = vmul.f32 %v7168_v48, %v7089_v34  ;;  %v2297_v31 = vmul.f32 %v2289_v44, %v7162_v2  ;;  %v9349_v42 = vld [vmem:[#allocation12_spill] sm:$0xff]  ;;  %v2568_v47 = vmul.f32 %v9351_v32, %v6924_v61 }
 0x2ab   : > { %v2567_v3 = vmul.f32 %v9349_v42, %v6924_v61  ;;  %v2345_v49 = vmul.f32 %v6871_v62, %v7152_v30  ;;  %v2898_v21 = vmul.f32 %v6972_v9, %v7175_v46  ;;  %v7204_v58 = vmul.f32 %v6972_v9, %v7192_v59 }
 0x2ac   : > { %v2298_v28 = vadd.f32 %v2295_v57, %v2294_v36  ;;  %v7184_v36 = vadd.f32 %v2566_v12, %v2550_v51  ;;  %v7200_v60 = vadd.f32 %v2568_v47, %v2552_v19 }
 0x2ad   : > { %v7196_v57 = vadd.f32 %v2567_v3, %v2551_v8  ;;  %v7215_v19 = vmul.f32 %v6972_v9, %v7204_v58  ;;  %v9356_v3 = vld [vmem:[#allocation27_spill] sm:$0xff] }
 0x2ae   : > { %v2299_v10 = vadd.f32 %v2298_v28, %v2296_v13  ;;  %9350 = vst [vmem:[#allocation68_spill] sm:$0xff] %v7184_v36  ;;  %v2348_v13 = vadd.f32 %v2347_v5, %v2345_v49  ;;  %v2899_v62 = vmul.f32 %v7192_v59, %v7184_v36  ;;  %v9354_v28 = vld [vmem:[#allocation49_spill] sm:$0xff] }
 0x2af   : > { %v2360_v63 = vld [vmem:[#allocation1 + $0x4] ss:$9 sm:$0xff]  ;;  %v2364_v44 = vld [vmem:[#allocation1 + $0x6] ss:$9 sm:$0xff]  ;;  %9352 = vst [vmem:[#allocation69_spill] sm:$0xff] %v7196_v57  ;;  %v9355_v8 = vperm.slane %v9354_v28, 0  ;;  %v2900_v32 = vmul.f32 %v7204_v58, %v7196_v57  ;;  %v2901_v49 = vmul.f32 %v7215_v19, %v7200_v60 }
 0x2b0   : > { %v2300_v34 = vadd.f32 %v2299_v10, %v2297_v31  ;;  %v2362_v56 = vld [vmem:[#allocation1 + $0x5] ss:$9 sm:$0xff]  ;;  %v2366_v25 = vld [vmem:[#allocation1 + $0x7] ss:$9 sm:$0xff]  ;;  %v2367_v20 = vperm.slane %v2360_v63, 0  ;;  %9353 = vst [vmem:[#allocation159_spill] sm:$0xff] %v7200_v60  ;;  %v2355_v10 = vmul.f32 %v2351_v29, %v7085_v50 }
 0x2b1   : > { %v2368_v51 = vperm.slane %v2362_v56, 0  ;;  %2383 = vst [vmem:[#allocation1] sm:$0xff] %v9271_v7  ;;  %v2914_v31 = vmul.f32 %v9355_v8, %v6927_v54  ;;  %v2369_v42 = vperm.slane %v2364_v44, 0  ;;  %v2370_v7 = vperm.slane %v2366_v25, 0  ;;  %v9358_v63 = vld [vmem:[#allocation28_spill] sm:$0xff] }
 0x2b2   : > { %v2301_v12 = vadd.f32 %v2300_v34, %v2243_v11  ;;  %v2915_v11 = vmul.f32 %v9356_v3, %v6927_v54  ;;  %v2375_v34 = vmul.f32 %v2367_v20, %v6917_v33  ;;  %v2916_v56 = vmul.f32 %v9358_v63, %v6927_v54  ;;  %v9394_v28 = vld [vmem:[#allocation124_spill] sm:$0xff] }
 0x2b3   : > { %v7223_v47 = vadd.f32 %v2914_v31, %v2898_v21  ;;  %v2376_v29 = vmul.f32 %v2368_v51, %v6917_v33  ;;  %v2356_v44 = vmul.f32 %v2352_v41, %v7100_v45  ;;  %v7234_v25 = vmul.f32 %v6959_v37, %v7168_v48  ;;  %v9360_v21 = vld [vmem:[#allocation36_spill] sm:$0xff]  ;;  %v9362_v31 = vld [vmem:[#allocation29_spill] sm:$0xff] }
 0x2b4   : > { %v7219_v5 = vadd.f32 %v2348_v13, %v2301_v12  ;;  %v7236_v12 = vadd.f32 %v2915_v11, %v2899_v62  ;;  %v9361_v13 = vperm.slane %v9360_v21, 0  ;;  %v2377_v51 = vmul.f32 %v2369_v42, %v6917_v33  ;;  %v9364_v42 = vld [vmem:[#allocation167_spill] sm:$0xff] }
 0x2b5   : > { %9357 = vst [vmem:[#allocation104_spill] sm:$0xff] %v7223_v47  ;;  %v7244_v8 = vmul.f32 %v7168_v48, %v7120_v35  ;;  %v2917_v3 = vmul.f32 %v9362_v31, %v6927_v54  ;;  %v7248_v41 = vadd.f32 %v2916_v56, %v2900_v32  ;;  %v2378_v37 = vmul.f32 %v2370_v7, %v6917_v33  ;;  %v9366_v33 = vld [vmem:[#allocation168_spill] sm:$0xff] }
 0x2b6   : > { %9359 = vst [vmem:[#allocation106_spill] sm:$0xff] %v7236_v12  ;;  %v2934_v20 = vmul.f32 %v9361_v13, %v7223_v47  ;;  %v7253_v62 = vmul.f32 %v7168_v48, %v7146_v40  ;;  %v7257_v11 = vmul.f32 %v7168_v48, %v7168_v48  ;;  %v2935_v63 = vmul.f32 %v9364_v42, %v7236_v12 }
 0x2b7   : > { %9363 = vst [vmem:[#allocation37_spill] sm:$0xff] %v7248_v41  ;;  %v7261_v35 = vadd.f32 %v2375_v34, %v2354_v0  ;;  %v7263_v13 = vadd.f32 %v2376_v29, %v2355_v10  ;;  %v7265_v47 = vadd.f32 %v2917_v3, %v2901_v49  ;;  %v2936_v40 = vmul.f32 %v9366_v33, %v7248_v41  ;;  %v9367_v10 = vld [vmem:[#allocation169_spill] sm:$0xff] }
 0x2b8   : > { %v2385_v31 = vld [vmem:[#allocation1 + $0x4] ss:$9 sm:$0xff]  ;;  %v2389_v56 = vld [vmem:[#allocation1 + $0x6] ss:$9 sm:$0xff]  ;;  %v2938_v45 = vadd.f32 %v2935_v63, %v2934_v20  ;;  %v3237_v50 = vmul.f32 0.6931472, %v6950_v26  ;;  %v2357_v0 = vmul.f32 %v2353_v55, %v7102_v16  ;;  %v7271_v34 = vadd.f32 %v2377_v51, %v2356_v44 }
 0x2b9   : > { %v2387_v32 = vld [vmem:[#allocation1 + $0x5] ss:$9 sm:$0xff]  ;;  %9365 = vst [vmem:[#allocation117_spill] sm:$0xff] %v7265_v47  ;;  %v2391_v7 = vld [vmem:[#allocation1 + $0x7] ss:$9 sm:$0xff]  ;;  %v2392_v60 = vperm.slane %v2385_v31, 0  ;;  %v2937_v29 = vmul.f32 %v9367_v10, %v7265_v47  ;;  %v7280_v20 = vmul.f32 %v7234_v25, %v7168_v48  ;;  %v7284_v26 = vmul.f32 %v7244_v8, %v7168_v48 }
 0x2ba   : > { %v2393_v57 = vperm.slane %v2387_v32, 0  ;;  %v2394_v36 = vperm.slane %v2389_v56, 0  ;;  %2601 = vst [vmem:[#allocation1] sm:$0xff] %v9345_v6  ;;  %v2395_v49 = vperm.slane %v2391_v7, 0  ;;  %v2939_v31 = vadd.f32 %v2938_v45, %v2936_v40  ;;  %v9369_v33 = vld [vmem:[#allocation13_spill] sm:$0xff] }
 0x2bb   : > { %v2400_v3 = vmul.f32 %v2392_v60, %v7261_v35  ;;  %v7288_v6 = vmul.f32 %v7253_v62, %v7168_v48  ;;  %v7292_v55 = vmul.f32 %v7257_v11, %v7168_v48  ;;  %v7294_v60 = vadd.f32 %v2378_v37, %v2357_v0 }
 0x2bc   : > { %v2401_v42 = vmul.f32 %v2393_v57, %v7263_v13  ;;  %v2402_v45 = vmul.f32 %v2394_v36, %v7271_v34  ;;  %v7297_v44 = vadd.f32 %v2939_v31, %v2937_v29  ;;  %v9368_v51 = vmax.f32 %v9295_v14, 0.0 }
 0x2bd   : > { %v2655_v32 = vmul.f32 %v7280_v20, %v7108_v53  ;;  %v2656_v56 = vmul.f32 %v7284_v26, %v7110_v1  ;;  %v9370_v40 = vperm.slane %v9369_v33, 0  ;;  %v2403_v7 = vmul.f32 %v2395_v49, %v7294_v60  ;;  %v9372_v53 = vld [vmem:[#allocation74_spill] sm:$0xff]  ;;  %v9373_v1 = vld [vmem:[#allocation40_spill] sm:$0xff] }
 0x2be   : > { %v2404_v57 = vadd.f32 %v2401_v42, %v2400_v3  ;;  %v7301_v63 = vadd.f32 %v3237_v50, %v9368_v51  ;;  %v2657_v0 = vmul.f32 %v7288_v6, %v7135_v22  ;;  %v2658_v14 = vmul.f32 %v7292_v55, %v7152_v30  ;;  %v9371_v50 = vld [vmem:[#allocation73_spill] sm:$0xff] }
 0x2bf   : > { %v2671_v37 = vmul.f32 %v9370_v40, %v6924_v61  ;;  %v2672_v10 = vmul.f32 %v9371_v50, %v6924_v61  ;;  %v2673_v29 = vmul.f32 %v9372_v53, %v6924_v61  ;;  %v2674_v3 = vmul.f32 %v9373_v1, %v6924_v61 }
 0x2c0   : > { %v2405_v36 = vadd.f32 %v2404_v57, %v2402_v45  ;;  %v7323_v42 = vmul.f32 %v6972_v9, %v7215_v19  ;;  %v7333_v30 = vmul.f32 %v7215_v19, %v7192_v59  ;;  %v7337_v57 = vmul.f32 %v7215_v19, %v7204_v58  ;;  %v9380_v58 = vld [vmem:[#allocation35_spill] sm:$0xff] }
 0x2c1   : > { %v7325_v31 = vld [vmem:[#allocation1 + $0x4] ss:$9 sm:$0xff]  ;;  %v7329_v45 = vld [vmem:[#allocation1 + $0x6] ss:$9 sm:$0xff]  ;;  %v7341_v51 = vmul.f32 %v7215_v19, %v7215_v19  ;;  %v9376_v9 = vrot.slane %v9275_v23, 3  ;;  %v7351_v59 = vadd.f32 %v2671_v37, %v2655_v32  ;;  %v7355_v47 = vadd.f32 %v2672_v10, %v2656_v56 }
 0x2c2   : > { %v2406_v49 = vadd.f32 %v2405_v36, %v2403_v7  ;;  %v7327_v22 = vld [vmem:[#allocation1 + $0x5] ss:$9 sm:$0xff]  ;;  %9374 = vst [vmem:[#allocation38_spill] sm:$0xff] %v7337_v57  ;;  %v3032_v7 = vperm.slane %v9277_v38, 0  ;;  %v7349_v53 = vld [vmem:[#allocation1 + $0x7] ss:$9 sm:$0xff]  ;;  %v7357_v41 = vadd.f32 %v2673_v29, %v2657_v0  ;;  %v7359_v12 = vadd.f32 %v2674_v3, %v2658_v14 }
 0x2c3   : > { %9375 = vst [vmem:[#allocation54_spill] sm:$0xff] %v7341_v51  ;;  %v7345_v40 = vperm.slane %v9376_v9, 0  ;;  %v9378_v36 = vld [vmem:[#allocation70_spill] sm:$0xff]  ;;  %v3241_v16 = vsub.f32 0.0, %v7301_v63  ;;  %v7366_v32 = vmul.f32 %v7323_v42, %v7215_v19  ;;  %v9384_v37 = vld [vmem:[#allocation149_spill] sm:$0xff]  ;;  %v7373_v56 = vmul.f32 %v7333_v30, %v7215_v19 }
 0x2c4   : > { %v3378_v50 = vrot.slane %v9378_v36, 1  ;;  %9379 = vst [vmem:[#allocation39_spill] sm:$0xff] %v7351_v59  ;;  %v2407_v1 = vadd.f32 %v2406_v49, %v7219_v5  ;;  %v3379_v9 = vrot.slane %v9378_v36, 2  ;;  %v7377_v0 = vmul.f32 %v7337_v57, %v7215_v19  ;;  %v9396_v57 = vld [vmem:[#allocation125_spill] sm:$0xff] }
 0x2c5   : > { %9377 = vst [vmem:[#allocation53_spill] sm:$0xff] %v7345_v40  ;;  %v3380_v40 = vrot.slane %v9378_v36, 3  ;;  %v7381_v14 = vmul.f32 %v7341_v51, %v7215_v19  ;;  %v9386_v10 = vrot.slane %v9277_v38, 1  ;;  %v9387_v3 = vrot.slane %v9277_v38, 2  ;;  %v9392_v36 = vld [vmem:[#allocation15_spill] sm:$0xff]  ;;  %v9395_v51 = vld [vmem:[#allocation81_spill] sm:$0xff] }
 0x2c6   : > { %2626 = vst [vmem:[#allocation1] sm:$0xff] %v9380_v58  ;;  %v7369_v5 = vmul.f32 %v9384_v37, %v2407_v1  ;;  %v9388_v1 = vrot.slane %v9277_v38, 3  ;;  %v7390_v58 = vpop.permute.xlu2 %3476  ;;  %v3004_v46 = vmul.f32 %v7366_v32, %v7351_v59  ;;  %v3005_v39 = vmul.f32 %v7373_v56, %v7355_v47 }
 0x2c7   : > { %9381 = vst [vmem:[#allocation57_spill] sm:$0xff] %v7355_v47  ;;  %v3033_v29 = vperm.slane %v9386_v10, 0  ;;  %v3034_v49 = vperm.slane %v9387_v3, 0  ;;  %v3007_v10 = vmul.f32 %v7381_v14, %v7359_v12  ;;  %v7400_v3 = vperm.slane %v3378_v50, 0  ;;  %v9397_v50 = vld [vmem:[#allocation42_spill] sm:$0xff] }
 0x2c8   : > { %9382 = vst [vmem:[#allocation107_spill] sm:$0xff] %v7357_v41  ;;  %v3035_v37 = vperm.slane %v9388_v1, 0  ;;  %v7402_v38 = vperm.slane %v3379_v9, 0  ;;  %v7404_v1 = vperm.slane %v3380_v40, 0  ;;  %v3242_v24 = vmul.f32 1.442695, %v3241_v16 }
 0x2c9   : > { %9383 = vst [vmem:[#allocation110_spill] sm:$0xff] %v7359_v12  ;;  %v9393_v21 = vperm.slane %v9392_v36, 0  ;;  %v3021_v47 = vmul.f32 %v9394_v28, %v6927_v54  ;;  %v3023_v12 = vmul.f32 %v9396_v57, %v6927_v54  ;;  %v7417_v9 = vmul.f32 %v9397_v50, %v9292_v52 }
 0x2ca   : > { %9385 = vst [vmem:[#allocation58_spill] sm:$0xff] %v7369_v5  ;;  %v3006_v5 = vmul.f32 %v7377_v0, %v7357_v41  ;;  %v3022_v41 = vmul.f32 %v9395_v51, %v6927_v54  ;;  %v7421_v16 = vmul.f32 %v9288_v18, %v9292_v52  ;;  %v2891_v28 = vmul.f32 %v9299_v4, %v9292_v52  ;;  %v9405_v4 = vld [vmem:[#allocation48_spill] sm:$0xff] }
 0x2cb   : > { %9389 = vst [vmem:[#allocation94_spill] sm:$0xff] %v7400_v3  ;;  %v3020_v59 = vmul.f32 %v9393_v21, %v6927_v54  ;;  %v7425_v21 = vmul.f32 %v9298_v17, %v9292_v52  ;;  %v7441_v18 = vadd.f32 %v3021_v47, %v3005_v39  ;;  %v7445_v17 = vadd.f32 %v3023_v12, %v3007_v10 }
 0x2cc   : > { %9390 = vst [vmem:[#allocation151_spill] sm:$0xff] %v7402_v38  ;;  %v7443_v3 = vadd.f32 %v3022_v41, %v3006_v5  ;;  %4067 = vpow2.f32 %v3242_v24  ;;  %v2599_v41 = vmul.f32 %v7253_v62, %v7150_v15  ;;  %v2610_v24 = vperm.slane %v7325_v31, 0  ;;  %v9409_v31 = vld [vmem:[#allocation156_spill] sm:$0xff]  ;;  %v9410_v5 = vld [vmem:[#allocation17_spill] sm:$0xff] }
 0x2cd   : > { %9391 = vst [vmem:[#allocation126_spill] sm:$0xff] %v7404_v1  ;;  %v7429_v40 = vld [vmem:[#allocation1 + $0x4] ss:$9 sm:$0xff]  ;;  %v7433_v57 = vld [vmem:[#allocation1 + $0x6] ss:$9 sm:$0xff]  ;;  %v7435_v1 = vpop.permute.xlu1 %3469  ;;  %v7439_v38 = vadd.f32 %v3020_v59, %v3004_v46  ;;  %v3041_v46 = vmul.f32 %v3033_v29, %v7441_v18  ;;  %v3043_v12 = vmul.f32 %v3035_v37, %v7445_v17  ;;  %v2612_v59 = vperm.slane %v7329_v45, 0 }
 0x2ce   : > { %9398 = vst [vmem:[#allocation152_spill] sm:$0xff] %v7425_v21  ;;  %v7431_v51 = vld [vmem:[#allocation1 + $0x5] ss:$9 sm:$0xff]  ;;  %v7437_v50 = vld [vmem:[#allocation1 + $0x7] ss:$9 sm:$0xff]  ;;  %v7449_v21 = vmul.f32 %v9405_v4, %v9292_v52  ;;  %v3042_v47 = vmul.f32 %v3034_v49, %v7443_v3  ;;  %v2598_v52 = vmul.f32 %v7244_v8, %v7142_v43  ;;  %v2613_v43 = vperm.slane %v7349_v53, 0 }
 0x2cf   : > { %9399 = vst [vmem:[#allocation44_spill] sm:$0xff] %v7431_v51  ;;  %v7453_v51 = vmul.f32 %v7301_v63, %v9405_v4  ;;  %v3040_v39 = vmul.f32 %v3032_v7, %v7439_v38  ;;  %v2699_v63 = vmul.f32 %v7280_v20, %v7168_v48  ;;  %v2701_v15 = vmul.f32 %v7288_v6, %v7168_v48  ;;  %v7486_v20 = vpop.permute.xlu2 %3490 }
 0x2d0   : > { %9400 = vst [vmem:[#allocation51_spill] sm:$0xff] %v7437_v50  ;;  %v2597_v50 = vmul.f32 %v7234_v25, %v7140_v27  ;;  %v2611_v27 = vperm.slane %v7327_v22, 0  ;;  %v2600_v25 = vmul.f32 %v7257_v11, %v7162_v2  ;;  %v2702_v8 = vmul.f32 %v7292_v55, %v7168_v48 }
 0x2d1   : > { %9401 = vst [vmem:[#allocation99_spill] sm:$0xff] %v7439_v38  ;;  %v3044_v7 = vadd.f32 %v3041_v46, %v3040_v39  ;;  %v7481_v62 = vmul.f32 %v2699_v63, %v7261_v35  ;;  %v2618_v53 = vmul.f32 %v2610_v24, %v6924_v61  ;;  %v3472_v35 = vperm.slane %v9410_v5, 1  ;;  %v9411_v24 = vld [vmem:[#allocation145_spill] sm:$0xff] }
 0x2d2   : > { %9402 = vst [vmem:[#allocation45_spill] sm:$0xff] %v7441_v18  ;;  %v7490_v45 = vpop.eup %4067  ;;  %v2619_v6 = vmul.f32 %v2611_v27, %v6924_v61  ;;  %v7497_v55 = vmul.f32 %v2701_v15, %v7271_v34  ;;  %v7512_v4 = vmul.f32 %v7366_v32, %v7215_v19  ;;  %v2620_v39 = vmul.f32 %v2612_v59, %v6924_v61  ;;  %v9412_v27 = vld [vmem:[#allocation22_spill] sm:$0xff] }
 0x2d3   : > { %9403 = vst [vmem:[#allocation10_spill] sm:$0xff] %v7443_v3  ;;  %v3045_v11 = vadd.f32 %v3044_v7, %v3042_v47  ;;  %v2621_v34 = vmul.f32 %v2613_v43, %v6924_v61  ;;  %v9413_v63 = vperm.slane %v9412_v27, 0  ;;  %v7529_v32 = vmul.f32 %v7373_v56, %v7215_v19 }
 0x2d4   : > { %9404 = vst [vmem:[#allocation96_spill] sm:$0xff] %v7445_v17  ;;  %v3493_v7 = vperm.slane %v9410_v5, 4  ;;  %v7538_v43 = vadd.f32 %v2618_v53, %v2597_v50  ;;  %v7540_v15 = vadd.f32 %v2619_v6, %v2598_v52  ;;  %v7545_v56 = vmul.f32 %v7381_v14, %v7215_v19 }
 0x2d5   : > { %9406 = vst [vmem:[#allocation147_spill] sm:$0xff] %v7449_v21  ;;  %v7508_v10 = vadd.f32 %v3045_v11, %v3043_v12  ;;  %v7521_v47 = vpop.permute.xlu1 %3483  ;;  %v1190_v12 = vmul.f32 %v9413_v63, %v9411_v24  ;;  %v9417_v24 = vld [vmem:[#allocation158_spill] sm:$0xff]  ;;  %v7551_v63 = vadd.f32 %v2620_v39, %v2599_v41  ;;  %v7553_v50 = vadd.f32 %v2621_v34, %v2600_v25 }
 0x2d6   : > { %9407 = vst [vmem:[#allocation46_spill] sm:$0xff] %v7453_v51  ;;  %v3486_v52 = vperm.slane %v9410_v5, 3  ;;  %v3514_v53 = vperm.slane %v9410_v5, 7  ;;  %v3507_v14 = vperm.slane %v9410_v5, 6  ;;  %v7567_v41 = vmul.f32 %v7323_v42, %v7538_v43 }
 0x2d7   : > { %2707 = vst [vmem:[#allocation1] sm:$0xff] %v9369_v33  ;;  %v2700_v33 = vmul.f32 %v7284_v26, %v7168_v48  ;;  %v9408_v26 = vld [vmem:[#allocation41_spill] sm:$0xff]  ;;  %v3479_v48 = vperm.slane %v9410_v5, 2  ;;  %v7571_v25 = vmul.f32 %v7333_v30, %v7540_v15  ;;  %v9422_v30 = vld [vmem:[#allocation38_spill] sm:$0xff] }
 0x2d8   : > { %v1191_v22 = vmul.f32 %v9409_v31, %v9408_v26  ;;  %v9416_v31 = vld [vmem:[#allocation30_spill] sm:$0xff] }
 0x2d9   : > { %v7484_v2 = vmul.f32 %v2700_v33, %v7263_v13  ;;  %v7500_v13 = vmul.f32 %v2702_v8, %v7294_v60  ;;  %v7519_v60 = vadd.f32 %v7297_v44, %v2891_v28  ;;  %v7533_v33 = vmul.f32 %v7377_v0, %v7215_v19  ;;  %v9414_v44 = vld [vmem:[#allocation43_spill] sm:$0xff]  ;;  %v9415_v28 = vld [vmem:[#allocation157_spill] sm:$0xff] }
 0x2da   : > { %v1192_v59 = vmul.f32 %v9415_v28, %v9414_v44  ;;  %v3466_v8 = vperm.slane %v9410_v5, 0  ;;  %v1194_v11 = vadd.f32 %v1191_v22, %v1190_v12  ;;  %v3480_v26 = vmul.f32 %v3479_v48, %v7390_v58  ;;  %v9418_v22 = vld [vmem:[#allocation82_spill] sm:$0xff]  ;;  %v7562_v48 = vpop.permute.xlu0 %3463  ;;  %v7577_v28 = vpop.permute.xlu2 %3511 }
 0x2db   : > { %v3473_v0 = vmul.f32 %v3472_v35, %v7435_v1  ;;  %v1193_v27 = vmul.f32 %v9417_v24, %v9416_v31  ;;  %v3575_v6 = vperm.slane %v9418_v22, 1  ;;  %v7559_v19 = vmul.f32 %v3493_v7, %v7486_v20 }
 0x2dc   : > { %v3573_v35 = vperm.slane %v9418_v22, 0  ;;  %v3467_v39 = vmul.f32 %v3466_v8, %v7562_v48  ;;  %v1195_v34 = vadd.f32 %v1194_v11, %v1192_v59  ;;  %v3578_v12 = vperm.slane %v9418_v22, 2  ;;  %v9423_v59 = vld [vmem:[#allocation54_spill] sm:$0xff] }
 0x2dd   : > { %9419 = vst [vmem:[#allocation47_spill] sm:$0xff] %v7559_v19  ;;  %v3584_v7 = vperm.slane %v9418_v22, 4  ;;  %v3581_v44 = vperm.slane %v9418_v22, 3  ;;  %v3593_v31 = vperm.slane %v9418_v22, 7  ;;  %v7588_v8 = vmul.f32 %v9422_v30, %v7551_v63 }
 0x2de   : > { %v7502_v29 = vld [vmem:[#allocation1 + $0x4] ss:$9 sm:$0xff]  ;;  %v7506_v37 = vld [vmem:[#allocation1 + $0x6] ss:$9 sm:$0xff]  ;;  %v7592_v11 = vmul.f32 %v9423_v59, %v7553_v50  ;;  %v7595_v5 = vmul.f32 %v3486_v52, %v7521_v47  ;;  %v7598_v17 = vmul.f32 %v3514_v53, %v7577_v28  ;;  %v3576_v38 = vmul.f32 %v3575_v6, %v7435_v1 }
 0x2df   : > { %v7504_v49 = vld [vmem:[#allocation1 + $0x5] ss:$9 sm:$0xff]  ;;  %v7516_v46 = vld [vmem:[#allocation1 + $0x7] ss:$9 sm:$0xff]  ;;  %v2716_v3 = vperm.slane %v7502_v29, 0  ;;  %v3574_v30 = vmul.f32 %v3573_v35, %v7562_v48  ;;  %v3590_v52 = vperm.slane %v9418_v22, 6  ;;  %v3474_v53 = vadd.f32 %v3473_v0, %v3467_v39 }
 0x2e0   : > { %2732 = vst [vmem:[#allocation1] sm:$0xff] %v9275_v23  ;;  %v2717_v21 = vperm.slane %v7504_v49, 0  ;;  %v9427_v59 = vld [vmem:[#allocation49_spill] sm:$0xff]  ;;  %v3579_v29 = vmul.f32 %v3578_v12, %v7390_v58  ;;  %v7613_v49 = vmul.f32 %v3584_v7, %v7486_v20  ;;  %v7623_v35 = vmul.f32 %v3593_v31, %v7577_v28  ;;  %v9433_v0 = vld [vmem:[#allocation63_spill] sm:$0xff] }
 0x2e1   : > { %9424 = vst [vmem:[#allocation143_spill] sm:$0xff] %v7595_v5  ;;  %v7616_v5 = vmul.f32 %v3581_v44, %v7521_v47  ;;  %v2724_v39 = vmul.f32 %v2716_v3, %v6924_v61  ;;  %v3577_v12 = vadd.f32 %v3576_v38, %v3574_v30  ;;  %v7631_v7 = vmul.f32 %v7490_v45, %v7490_v45  ;;  %v9438_v3 = vld [vmem:[#allocation65_spill] sm:$0xff] }
 0x2e2   : > { %9425 = vst [vmem:[#allocation89_spill] sm:$0xff] %v7598_v17  ;;  %v1196_v17 = vadd.f32 %v1195_v34, %v1193_v27  ;;  %v2725_v34 = vmul.f32 %v2717_v21, %v6924_v61  ;;  %v7637_v44 = vadd.f32 %v3480_v26, %v3474_v53  ;;  %v9437_v27 = vld [vmem:[#allocation64_spill] sm:$0xff]  ;;  %v9439_v21 = vld [vmem:[#allocation61_spill] sm:$0xff] }
 0x2e3   : > { %9428 = vst [vmem:[#allocation114_spill] sm:$0xff] %v7613_v49  ;;  %v7647_v30 = vmul.f32 %v7490_v45, %v7631_v7  ;;  %v9443_v53 = vld [vmem:[#allocation144_spill] sm:$0xff] }
 0x2e4   : > { %9429 = vst [vmem:[#allocation127_spill] sm:$0xff] %v7616_v5  ;;  %v7640_v31 = vadd.f32 %v1196_v17, %v7417_v9  ;;  %v7654_v9 = vadd.f32 %v2724_v39, %v7481_v62  ;;  %v7657_v17 = vadd.f32 %v2725_v34, %v7484_v2  ;;  %v7659_v5 = vadd.f32 %v3579_v29, %v3577_v12  ;;  %v9448_v2 = vld [vmem:[#allocation123_spill] sm:$0xff] }
 0x2e5   : > { %9431 = vst [vmem:[#allocation128_spill] sm:$0xff] %v7623_v35  ;;  %v9449_v34 = vperm.slane %v9448_v2, 0 }
 0x2e6   : > { %9434 = vst [vmem:[#allocation91_spill] sm:$0xff] %v7631_v7 }
 0x2e7   : > { %v7580_v24 = vld [vmem:[#allocation1 + $0x4] ss:$9 sm:$0xff]  ;;  %v7584_v19 = vld [vmem:[#allocation1 + $0x6] ss:$9 sm:$0xff]  ;;  %9436 = vst [vmem:[#allocation34_spill] sm:$0xff] %v7637_v44 }
 0x2e8   : > { %v7582_v42 = vld [vmem:[#allocation1 + $0x5] ss:$9 sm:$0xff]  ;;  %9421 = vst [vmem:[#allocation142_spill] sm:$0xff] %v7584_v19  ;;  %v7602_v18 = vld [vmem:[#allocation1 + $0x7] ss:$9 sm:$0xff]  ;;  %v2718_v19 = vperm.slane %v7506_v37, 0 }
 0x2e9   : > { %9420 = vst [vmem:[#allocation141_spill] sm:$0xff] %v7582_v42  ;;  %v7608_v42 = vpop.permute.xlu1 %3504  ;;  %v2719_v37 = vperm.slane %v7516_v46, 0  ;;  %v9447_v44 = vld [vmem:[#allocation36_spill] sm:$0xff] }
 0x2ea   : > { %9426 = vst [vmem:[#allocation108_spill] sm:$0xff] %v7602_v18  ;;  %v7619_v6 = vmul.f32 %v3507_v14, %v7608_v42  ;;  %v2726_v14 = vmul.f32 %v2718_v19, %v6924_v61  ;;  %v7635_v46 = vmul.f32 %v3590_v52, %v7608_v42  ;;  %v7672_v18 = vmul.f32 %v9449_v34, %v7453_v51 }
 0x2eb   : > { %2950 = vst [vmem:[#allocation1] sm:$0xff] %v9427_v59  ;;  %v9432_v59 = vld [vmem:[#allocation62_spill] sm:$0xff]  ;;  %v2727_v19 = vmul.f32 %v2719_v37, %v6924_v61  ;;  %v7663_v61 = vmul.f32 %v7490_v45, %v7647_v30 }
 0x2ec   : > { %9430 = vst [vmem:[#allocation119_spill] sm:$0xff] %v7619_v6  ;;  %v9441_v6 = vld [vmem:[#allocation66_spill] sm:$0xff]  ;;  %v7666_v37 = vadd.f32 %v2726_v14, %v7497_v55 }
 0x2ed   : > { %9435 = vst [vmem:[#allocation129_spill] sm:$0xff] %v7635_v46  ;;  %v9442_v46 = vld [vmem:[#allocation133_spill] sm:$0xff]  ;;  %v7676_v29 = vmul.f32 %v7490_v45, %v7663_v61  ;;  %v7680_v55 = vmul.f32 %v7663_v61, %v7631_v7  ;;  %v7691_v14 = vmul.f32 %v7663_v61, %v7647_v30 }
 0x2ee   : > { %9440 = vst [vmem:[#allocation162_spill] sm:$0xff] %v7647_v30 }
 0x2ef   : > { %9444 = vst [vmem:[#allocation11_spill] sm:$0xff] %v7659_v5 }
 0x2f0   : > { %9445 = vst [vmem:[#allocation90_spill] sm:$0xff] %v7663_v61 }
 0x2f1   : > { %9446 = vst [vmem:[#allocation163_spill] sm:$0xff] %v7666_v37 }
 0x2f2   : > { %v2952_v35 = vld [vmem:[#allocation1 + $0x4] ss:$9 sm:$0xff]  ;;  %v2956_v22 = vld [vmem:[#allocation1 + $0x6] ss:$9 sm:$0xff]  ;;  %9450 = vst [vmem:[#allocation115_spill] sm:$0xff] %v7672_v18 }
 0x2f3   : > { %v2954_v38 = vld [vmem:[#allocation1 + $0x5] ss:$9 sm:$0xff]  ;;  %v2958_v26 = vld [vmem:[#allocation1 + $0x7] ss:$9 sm:$0xff]  ;;  %v2959_v49 = vperm.slane %v2952_v35, 0  ;;  %v2961_v62 = vperm.slane %v2956_v22, 0  ;;  %v7683_v35 = vadd.f32 %v2727_v19, %v7500_v13 }
 0x2f4   : > { %v2960_v52 = vperm.slane %v2954_v38, 0  ;;  %v2962_v39 = vperm.slane %v2958_v26, 0  ;;  %2975 = vst [vmem:[#allocation1] sm:$0xff] %v9447_v44  ;;  %v9454_v22 = vld [vmem:[#allocation31_spill] sm:$0xff]  ;;  %v7695_v44 = vmul.f32 %v7663_v61, %v7663_v61  ;;  %v9458_v26 = vld [vmem:[#allocation20_spill] sm:$0xff]  ;;  %v9460_v13 = vld [vmem:[#allocation21_spill] sm:$0xff] }
 0x2f5   : > { %9451 = vst [vmem:[#allocation118_spill] sm:$0xff] %v7676_v29  ;;  %v7687_v12 = vmul.f32 %v9454_v22, %v7453_v51  ;;  %v2967_v38 = vmul.f32 %v2959_v49, %v6927_v54  ;;  %v7700_v34 = vmul.f32 %v9458_v26, %v7453_v51  ;;  %v7704_v19 = vmul.f32 %v9460_v13, %v7453_v51  ;;  %v9462_v22 = vld [vmem:[#allocation26_spill] sm:$0xff]  ;;  %v9467_v13 = vld [vmem:[#allocation80_spill] sm:$0xff] }
 0x2f6   : > { %9452 = vst [vmem:[#allocation120_spill] sm:$0xff] %v7680_v55  ;;  %v9463_v5 = vperm.slane %v9462_v22, 0  ;;  %v2968_v18 = vmul.f32 %v2960_v52, %v6927_v54  ;;  %v2969_v30 = vmul.f32 %v2961_v62, %v6927_v54  ;;  %v2970_v7 = vmul.f32 %v2962_v39, %v6927_v54  ;;  %v9471_v52 = vld [vmem:[#allocation60_spill] sm:$0xff] }
 0x2f7   : > { %9453 = vst [vmem:[#allocation16_spill] sm:$0xff] %v7683_v35  ;;  %v7716_v49 = vmul.f32 %v7676_v29, %v7663_v61  ;;  %v7720_v26 = vmul.f32 %v7680_v55, %v7663_v61  ;;  %v7732_v62 = vmul.f32 %v9471_v52, %v7453_v51  ;;  %v7736_v39 = vmul.f32 %v7512_v4, %v7654_v9 }
 0x2f8   : > { %9455 = vst [vmem:[#allocation12_spill] sm:$0xff] %v7687_v12  ;;  %v7709_v12 = vmul.f32 %v9463_v5, %v7453_v51  ;;  %v9469_v5 = vld [vmem:[#allocation92_spill] sm:$0xff]  ;;  %v7740_v55 = vmul.f32 %v7529_v32, %v7657_v17  ;;  %v7755_v52 = vmul.f32 %v7533_v33, %v7666_v37  ;;  %v7759_v4 = vmul.f32 %v7545_v56, %v7683_v35  ;;  %v9476_v32 = vld [vmem:[#allocation58_spill] sm:$0xff]  ;;  %v9504_v37 = vld [vmem:[#allocation97_spill] sm:$0xff] }
 0x2f9   : > { %9456 = vst [vmem:[#allocation14_spill] sm:$0xff] %v7691_v14  ;;  %v7773_v33 = vmul.f32 %v7716_v49, %v7663_v61 }
 0x2fa   : > { %9457 = vst [vmem:[#allocation27_spill] sm:$0xff] %v7695_v44 }
 0x2fb   : > { %9459 = vst [vmem:[#allocation28_spill] sm:$0xff] %v7700_v34  ;;  %v2983_v56 = vld [vmem:[#allocation1 + $0x7] ss:$9 sm:$0xff] }
 0x2fc   : > { %9461 = vst [vmem:[#allocation29_spill] sm:$0xff] %v7704_v19  ;;  %v7724_v19 = vmul.f32 %v9467_v13, %v7453_v51  ;;  %v7744_v13 = vmul.f32 %v7691_v14, %v7663_v61  ;;  %v2981_v14 = vld [vmem:[#allocation1 + $0x6] ss:$9 sm:$0xff] }
 0x2fd   : > { %9464 = vst [vmem:[#allocation167_spill] sm:$0xff] %v7709_v12  ;;  %v7728_v12 = vmul.f32 %v9469_v5, %v7453_v51  ;;  %v7748_v5 = vmul.f32 %v7695_v44, %v7663_v61  ;;  %v7766_v51 = vadd.f32 %v2969_v30, %v7588_v8  ;;  %v7769_v44 = vadd.f32 %v2970_v7, %v7592_v11 }
 0x2fe   : > { %9465 = vst [vmem:[#allocation168_spill] sm:$0xff] %v7716_v49  ;;  %v2986_v35 = vperm.slane %v2981_v14, 0  ;;  %v7783_v11 = vmul.f32 %v7744_v13, %v7663_v61  ;;  %v9492_v49 = vld [vmem:[#allocation100_spill] sm:$0xff] }
 0x2ff   : > { %9466 = vst [vmem:[#allocation169_spill] sm:$0xff] %v7720_v26  ;;  %v7787_v7 = vmul.f32 %v7748_v5, %v7663_v61 }
 0x300   : > { %9468 = vst [vmem:[#allocation13_spill] sm:$0xff] %v7724_v19  ;;  %v7763_v19 = vadd.f32 %v2968_v18, %v7571_v25  ;;  %v7777_v18 = vmul.f32 %v7720_v26, %v7663_v61  ;;  %v2987_v25 = vperm.slane %v2983_v56, 0  ;;  %v3628_v56 = vperm.slane %v9476_v32, 3 }
 0x301   : > { %9470 = vst [vmem:[#allocation73_spill] sm:$0xff] %v7728_v12  ;;  %v7751_v12 = vadd.f32 %v2967_v38, %v7567_v41  ;;  %v2977_v41 = vld [vmem:[#allocation1 + $0x4] ss:$9 sm:$0xff] }
 0x302   : > { %9472 = vst [vmem:[#allocation74_spill] sm:$0xff] %v7732_v62  ;;  %v3625_v62 = vperm.slane %v9476_v32, 2  ;;  %v2979_v38 = vld [vmem:[#allocation1 + $0x5] ss:$9 sm:$0xff]  ;;  %v2984_v29 = vperm.slane %v2977_v41, 0  ;;  %v2994_v41 = vmul.f32 %v2986_v35, %v7766_v51  ;;  %v7804_v35 = vmul.f32 %v3628_v56, %v7521_v47 }
 0x303   : > { %9473 = vst [vmem:[#allocation40_spill] sm:$0xff] %v7744_v13  ;;  %v2985_v34 = vperm.slane %v2979_v38, 0  ;;  %v3622_v38 = vperm.slane %v9476_v32, 1  ;;  %v9488_v13 = vperm.slane %v9432_v59, 0  ;;  %v9493_v56 = vperm.slane %v9437_v27, 0  ;;  %v9496_v59 = vld [vmem:[#allocation121_spill] sm:$0xff] }
 0x304   : > { %9474 = vst [vmem:[#allocation149_spill] sm:$0xff] %v7748_v5  ;;  %v3626_v8 = vmul.f32 %v3625_v62, %v7390_v58  ;;  %v2992_v30 = vmul.f32 %v2984_v29, %v7751_v12  ;;  %v3631_v62 = vperm.slane %v9476_v32, 4  ;;  %v3620_v29 = vperm.slane %v9476_v32, 0  ;;  %v9487_v5 = vld [vmem:[#allocation18_spill] sm:$0xff]  ;;  %v9502_v27 = vld [vmem:[#allocation95_spill] sm:$0xff] }
 0x305   : > { %9475 = vst [vmem:[#allocation15_spill] sm:$0xff] %v7751_v12  ;;  %v2993_v14 = vmul.f32 %v2985_v34, %v7763_v19  ;;  %v1248_v26 = vmul.f32 %v9488_v13, %v9487_v5  ;;  %v9497_v13 = vld [vmem:[#allocation83_spill] sm:$0xff]  ;;  %v9501_v12 = vld [vmem:[#allocation112_spill] sm:$0xff] }
 0x306   : > { %9477 = vst [vmem:[#allocation124_spill] sm:$0xff] %v7763_v19  ;;  %v7801_v34 = vmul.f32 %v3631_v62, %v7486_v20  ;;  %v9491_v62 = vperm.slane %v9433_v0, 0  ;;  %v9498_v5 = vperm.slane %v9497_v13, 0 }
 0x307   : > { %9478 = vst [vmem:[#allocation81_spill] sm:$0xff] %v7766_v51 }
 0x308   : > { %9479 = vst [vmem:[#allocation125_spill] sm:$0xff] %v7769_v44 }
 0x309   : > { %9480 = vst [vmem:[#allocation42_spill] sm:$0xff] %v7773_v33  ;;  %v3623_v33 = vmul.f32 %v3622_v38, %v7435_v1  ;;  %v3621_v38 = vmul.f32 %v3620_v29, %v7562_v48 }
 0x30a   : > { %9481 = vst [vmem:[#allocation48_spill] sm:$0xff] %v7777_v18  ;;  %v2996_v18 = vadd.f32 %v2993_v14, %v2992_v30 }
 0x30b   : > { %3056 = vst [vmem:[#allocation1] sm:$0xff] %v9392_v36  ;;  %v2995_v36 = vmul.f32 %v2987_v25, %v7769_v44 }
 0x30c   : > { %9482 = vst [vmem:[#allocation41_spill] sm:$0xff] %v7783_v11  ;;  %v3640_v11 = vperm.slane %v9476_v32, 7  ;;  %v2997_v30 = vadd.f32 %v2996_v18, %v2994_v41  ;;  %v1296_v18 = vmul.f32 %v9498_v5, %v9496_v59  ;;  %v9500_v41 = vld [vmem:[#allocation93_spill] sm:$0xff] }
 0x30d   : > { %9483 = vst [vmem:[#allocation156_spill] sm:$0xff] %v7787_v7  ;;  %v3637_v7 = vperm.slane %v9476_v32, 6  ;;  %v9490_v32 = vld [vmem:[#allocation19_spill] sm:$0xff] }
 0x30e   : > { %9484 = vst [vmem:[#allocation145_spill] sm:$0xff] %v7801_v34  ;;  %v7807_v25 = vmul.f32 %v3640_v11, %v7577_v28  ;;  %v1249_v34 = vmul.f32 %v9491_v62, %v9490_v32  ;;  %v9494_v11 = vld [vmem:[#allocation56_spill] sm:$0xff]  ;;  %v2998_v29 = vadd.f32 %v2997_v30, %v2995_v36  ;;  %v3624_v32 = vadd.f32 %v3623_v33, %v3621_v38 }
 0x30f   : > { %9485 = vst [vmem:[#allocation22_spill] sm:$0xff] %v7804_v35  ;;  %v7813_v14 = vmul.f32 %v3637_v7, %v7608_v42  ;;  %v1250_v35 = vmul.f32 %v9493_v56, %v9492_v49  ;;  %v9499_v7 = vld [vmem:[#allocation55_spill] sm:$0xff]  ;;  %v1298_v49 = vmul.f32 %v9502_v27, %v9501_v12  ;;  %v9507_v38 = vperm.slane %v9439_v21, 0  ;;  %v9514_v27 = vld [vmem:[#allocation84_spill] sm:$0xff] }
 0x310   : > { %9486 = vst [vmem:[#allocation43_spill] sm:$0xff] %v7807_v25  ;;  %v9495_v25 = vperm.slane %v9438_v3, 0  ;;  %v1252_v62 = vadd.f32 %v1249_v34, %v1248_v26  ;;  %v2999_v59 = vadd.f32 %v2998_v29, %v7519_v60  ;;  %v7836_v36 = vadd.f32 %v3626_v8, %v3624_v32  ;;  %v9506_v60 = vld [vmem:[#allocation131_spill] sm:$0xff]  ;;  %v9510_v29 = vld [vmem:[#allocation32_spill] sm:$0xff] }
 0x311   : > { %9489 = vst [vmem:[#allocation157_spill] sm:$0xff] %v7813_v14  ;;  %v1297_v14 = vmul.f32 %v9500_v41, %v9499_v7  ;;  %v9505_v7 = vld [vmem:[#allocation111_spill] sm:$0xff]  ;;  %v1354_v41 = vmul.f32 %v9507_v38, %v9506_v60  ;;  %v9525_v60 = vld [vmem:[#allocation105_spill] sm:$0xff] }
 0x312   : > { %v1251_v44 = vmul.f32 %v9495_v25, %v9494_v11  ;;  %v3058_v51 = vld [vmem:[#allocation1 + $0x4] ss:$9 sm:$0xff]  ;;  %v3062_v0 = vld [vmem:[#allocation1 + $0x6] ss:$9 sm:$0xff]  ;;  %v1253_v30 = vadd.f32 %v1252_v62, %v1250_v35  ;;  %v9513_v62 = vperm.slane %v9443_v53, 0  ;;  %v9526_v38 = vperm.slane %v9525_v60, 0 }
 0x313   : > { %v3060_v19 = vld [vmem:[#allocation1 + $0x5] ss:$9 sm:$0xff]  ;;  %v3064_v56 = vld [vmem:[#allocation1 + $0x7] ss:$9 sm:$0xff]  ;;  %v3065_v61 = vperm.slane %v3058_v51, 0  ;;  %v3067_v25 = vperm.slane %v3062_v0, 0  ;;  %v1300_v51 = vadd.f32 %v1297_v14, %v1296_v18 }
 0x314   : > { %v3066_v3 = vperm.slane %v3060_v19, 0  ;;  %v9503_v11 = vld [vmem:[#allocation130_spill] sm:$0xff]  ;;  %v3068_v5 = vperm.slane %v3064_v56, 0  ;;  %3081 = vst [vmem:[#allocation1] sm:$0xff] %v9505_v7  ;;  %v7842_v19 = vadd.f32 %v7508_v10, %v2999_v59  ;;  %v1254_v34 = vadd.f32 %v1253_v30, %v1251_v44  ;;  %v9508_v44 = vld [vmem:[#allocation132_spill] sm:$0xff]  ;;  %v9521_v7 = vld [vmem:[#allocation109_spill] sm:$0xff] }
 0x315   : > { %v1299_v13 = vmul.f32 %v9504_v37, %v9503_v11  ;;  %v3073_v26 = vmul.f32 %v3065_v61, %v6927_v54  ;;  %v3075_v12 = vmul.f32 %v3067_v25, %v6927_v54  ;;  %v1301_v14 = vadd.f32 %v1300_v51, %v1298_v49  ;;  %v9515_v49 = vld [vmem:[#allocation33_spill] sm:$0xff]  ;;  %v9518_v25 = vld [vmem:[#allocation160_spill] sm:$0xff]  ;;  %v9522_v30 = vld [vmem:[#allocation67_spill] sm:$0xff] }
 0x316   : > { %v3074_v33 = vmul.f32 %v3066_v3, %v6927_v54  ;;  %v3076_v37 = vmul.f32 %v3068_v5, %v6927_v54  ;;  %v1255_v54 = vadd.f32 %v1254_v34, %v7640_v31  ;;  %v9509_v18 = vperm.slane %v9441_v6, 0  ;;  %v9517_v3 = vld [vmem:[#allocation85_spill] sm:$0xff]  ;;  %v9519_v59 = vld [vmem:[#allocation88_spill] sm:$0xff] }
 0x317   : > { %v7849_v8 = vadd.f32 %v3073_v26, %v7736_v39  ;;  %v7855_v35 = vadd.f32 %v3075_v12, %v7755_v52  ;;  %v9511_v39 = vperm.slane %v9442_v46, 0  ;;  %v1302_v32 = vadd.f32 %v1301_v14, %v1299_v13  ;;  %v9520_v6 = vld [vmem:[#allocation161_spill] sm:$0xff]  ;;  %v9535_v60 = vld [vmem:[#allocation136_spill] sm:$0xff] }
 0x318   : > { %v7852_v61 = vadd.f32 %v3074_v33, %v7740_v55  ;;  %v7858_v10 = vadd.f32 %v3076_v37, %v7759_v4  ;;  %v1355_v21 = vmul.f32 %v9509_v18, %v9508_v44  ;;  %v9512_v55 = vld [vmem:[#allocation87_spill] sm:$0xff]  ;;  %v9516_v56 = vperm.slane %v9515_v49, 0  ;;  %v9523_v26 = vld [vmem:[#allocation77_spill] sm:$0xff]  ;;  %v9528_v18 = vld [vmem:[#allocation98_spill] sm:$0xff] }
 0x319   : > { %v1356_v0 = vmul.f32 %v9511_v39, %v9510_v29  ;;  %v1357_v52 = vmul.f32 %v9513_v62, %v9512_v55  ;;  %v1888_v31 = vmul.f32 %v9518_v25, %v9517_v3  ;;  %v1889_v5 = vmul.f32 %v9520_v6, %v9519_v59  ;;  %v9524_v34 = vld [vmem:[#allocation137_spill] sm:$0xff]  ;;  %v9527_v44 = vld [vmem:[#allocation71_spill] sm:$0xff] }
 0x31a   : > { %v1887_v4 = vmul.f32 %v9516_v56, %v9514_v27  ;;  %v1358_v11 = vadd.f32 %v1355_v21, %v1354_v41  ;;  %v1890_v46 = vmul.f32 %v9522_v30, %v9521_v7  ;;  %v1937_v13 = vperm.slane %v9523_v26, 0  ;;  %v9529_v56 = vld [vmem:[#allocation154_spill] sm:$0xff]  ;;  %v9531_v30 = vld [vmem:[#allocation79_spill] sm:$0xff] }
 0x31b   : > { %v3083_v33 = vld [vmem:[#allocation1 + $0x4] ss:$9 sm:$0xff]  ;;  %v3087_v53 = vld [vmem:[#allocation1 + $0x6] ss:$9 sm:$0xff]  ;;  %v1303_v51 = vadd.f32 %v1302_v32, %v1255_v54  ;;  %v1993_v14 = vmul.f32 %v9526_v38, %v9524_v34  ;;  %v1994_v41 = vmul.f32 %v9528_v18, %v9527_v44  ;;  %v1938_v3 = vperm.slane %v9529_v56, 0 }
 0x31c   : > { %v3085_v12 = vld [vmem:[#allocation1 + $0x5] ss:$9 sm:$0xff]  ;;  %v1891_v37 = vadd.f32 %v1888_v31, %v1887_v4  ;;  %v3089_v21 = vld [vmem:[#allocation1 + $0x7] ss:$9 sm:$0xff]  ;;  %v3090_v29 = vperm.slane %v3083_v33, 0  ;;  %v3092_v55 = vperm.slane %v3087_v53, 0  ;;  %v1359_v62 = vadd.f32 %v1358_v11, %v1356_v0 }
 0x31d   : > { %v3091_v39 = vperm.slane %v3085_v12, 0  ;;  %v3093_v27 = vperm.slane %v3089_v21, 0  ;;  %3299 = vst [vmem:[#allocation1] sm:$0xff] %v9448_v2  ;;  %v9530_v54 = vld [vmem:[#allocation155_spill] sm:$0xff]  ;;  %v1940_v0 = vperm.slane %v9531_v30, 0  ;;  %v9532_v11 = vld [vmem:[#allocation116_spill] sm:$0xff] }
 0x31e   : > { %v1892_v49 = vadd.f32 %v1891_v37, %v1889_v5  ;;  %v1939_v32 = vperm.slane %v9530_v54, 0  ;;  %v3098_v4 = vmul.f32 %v3090_v29, %v7849_v8  ;;  %v3100_v31 = vmul.f32 %v3092_v55, %v7855_v35  ;;  %v9533_v33 = vld [vmem:[#allocation113_spill] sm:$0xff]  ;;  %v9534_v53 = vld [vmem:[#allocation135_spill] sm:$0xff]  ;;  %v9536_v44 = vld [vmem:[#allocation122_spill] sm:$0xff] }
 0x31f   : > { %v3099_v25 = vmul.f32 %v3091_v39, %v7852_v61  ;;  %v1360_v59 = vadd.f32 %v1359_v62, %v1357_v52  ;;  %v3101_v6 = vmul.f32 %v3093_v27, %v7858_v10  ;;  %v1945_v26 = vmul.f32 %v1937_v13, %v9532_v11  ;;  %v9537_v18 = vld [vmem:[#allocation50_spill] sm:$0xff]  ;;  %v9539_v29 = vld [vmem:[#allocation52_spill] sm:$0xff]  ;;  %v9542_v56 = vld [vmem:[#allocation25_spill] sm:$0xff] }
 0x320   : > { %v1893_v7 = vadd.f32 %v1892_v49, %v1890_v46  ;;  %v1946_v12 = vmul.f32 %v1938_v3, %v9533_v33  ;;  %v1947_v37 = vmul.f32 %v1939_v32, %v9534_v53  ;;  %v1948_v38 = vmul.f32 %v1940_v0, %v9535_v60  ;;  %v9538_v21 = vld [vmem:[#allocation102_spill] sm:$0xff]  ;;  %v9541_v27 = vld [vmem:[#allocation72_spill] sm:$0xff]  ;;  %v9543_v54 = vld [vmem:[#allocation23_spill] sm:$0xff] }
 0x321   : > { %v3102_v2 = vadd.f32 %v3099_v25, %v3098_v4  ;;  %v1361_v5 = vadd.f32 %v1360_v59, %v1303_v51  ;;  %v1995_v52 = vmul.f32 %v9537_v18, %v9536_v44  ;;  %v1996_v46 = vmul.f32 %v9539_v29, %v9538_v21  ;;  %v9540_v55 = vld [vmem:[#allocation146_spill] sm:$0xff]  ;;  %v9544_v32 = vld [vmem:[#allocation101_spill] sm:$0xff]  ;;  %v9545_v30 = vld [vmem:[#allocation140_spill] sm:$0xff] }
 0x322   : > { %v1894_v34 = vadd.f32 %v1893_v7, %v7421_v16  ;;  %v1949_v13 = vadd.f32 %v1946_v12, %v1945_v26  ;;  %v1997_v51 = vadd.f32 %v1994_v41, %v1993_v14  ;;  %v2043_v49 = vperm.slane %v9541_v27, 0  ;;  %v9546_v0 = vld [vmem:[#allocation35_spill] sm:$0xff]  ;;  %v9549_v33 = vld [vmem:[#allocation138_spill] sm:$0xff]  ;;  %v9550_v53 = vld [vmem:[#allocation9_spill] sm:$0xff] }
 0x323   : > { %v3103_v39 = vadd.f32 %v3102_v2, %v3100_v31  ;;  %v7903_v62 = vmul.f32 %v9540_v55, %v1361_v5  ;;  %v2044_v3 = vperm.slane %v9542_v56, 0  ;;  %v2045_v16 = vperm.slane %v9543_v54, 0  ;;  %v9548_v41 = vld [vmem:[#allocation103_spill] sm:$0xff]  ;;  %v9552_v29 = vld [vmem:[#allocation68_spill] sm:$0xff]  ;;  %v9555_v27 = vld [vmem:[#allocation69_spill] sm:$0xff] }
 0x324   : > { %v2046_v4 = vperm.slane %v9544_v32, 0  ;;  %v1950_v59 = vadd.f32 %v1949_v13, %v1947_v37  ;;  %v1998_v7 = vadd.f32 %v1997_v51, %v1995_v52  ;;  %v9547_v11 = vperm.slane %v9546_v0, 0  ;;  %v7912_v2 = vld [vmem:[#allocation1 + $0x4] ss:$9 sm:$0xff]  ;;  %v7916_v14 = vld [vmem:[#allocation1 + $0x6] ss:$9 sm:$0xff] }
 0x325   : > { %v3104_v25 = vadd.f32 %v3103_v39, %v3101_v6  ;;  %v7914_v5 = vld [vmem:[#allocation1 + $0x5] ss:$9 sm:$0xff]  ;;  %v2051_v26 = vmul.f32 %v2043_v49, %v9548_v41  ;;  %v2052_v12 = vmul.f32 %v2044_v3, %v9549_v33  ;;  %v2053_v60 = vmul.f32 %v2045_v16, %v9550_v53  ;;  %v7922_v37 = vld [vmem:[#allocation1 + $0x7] ss:$9 sm:$0xff] }
 0x326   : > { %v2585_v31 = vmul.f32 %v9547_v11, %v9545_v30  ;;  %v9551_v44 = vld [vmem:[#allocation139_spill] sm:$0xff]  ;;  %v1951_v52 = vadd.f32 %v1950_v59, %v1948_v38  ;;  %v1999_v21 = vadd.f32 %v1998_v7, %v1996_v46  ;;  %v9553_v39 = vld [vmem:[#allocation164_spill] sm:$0xff]  ;;  %v9556_v49 = vld [vmem:[#allocation165_spill] sm:$0xff]  ;;  %v2635_v32 = vperm.slane %v7429_v40, 0 }
 0x327   : > { %v2054_v6 = vmul.f32 %v2046_v4, %v9551_v44  ;;  %v3105_v18 = vadd.f32 %v3104_v25, %v7842_v19  ;;  %v2586_v55 = vmul.f32 %v9553_v39, %v9552_v29  ;;  %v9554_v13 = vld [vmem:[#allocation59_spill] sm:$0xff]  ;;  %v2055_v51 = vadd.f32 %v2052_v12, %v2051_v26  ;;  %v9558_v54 = vld [vmem:[#allocation166_spill] sm:$0xff]  ;;  %v9559_v4 = vld [vmem:[#allocation24_spill] sm:$0xff] }
 0x328   : > { %3324 = vst [vmem:[#allocation1] sm:$0xff] %v9554_v13  ;;  %v2587_v56 = vmul.f32 %v9556_v49, %v9555_v27  ;;  %v9557_v3 = vld [vmem:[#allocation159_spill] sm:$0xff]  ;;  %v1952_v19 = vadd.f32 %v1951_v52, %v1894_v34  ;;  %v9560_v46 = vld [vmem:[#allocation44_spill] sm:$0xff]  ;;  %v2637_v7 = vperm.slane %v7433_v57, 0  ;;  %v2643_v41 = vmul.f32 %v2635_v32, %v7538_v43 }
 0x329   : > { %v2588_v16 = vmul.f32 %v9558_v54, %v9557_v3  ;;  %v7934_v30 = vmul.f32 %v9559_v4, %v3105_v18  ;;  %v2589_v38 = vadd.f32 %v2586_v55, %v2585_v31  ;;  %v2636_v25 = vperm.slane %v9560_v46, 0  ;;  %v9561_v0 = vld [vmem:[#allocation51_spill] sm:$0xff]  ;;  %v9564_v54 = vld [vmem:[#allocation57_spill] sm:$0xff]  ;;  %v9565_v32 = vld [vmem:[#allocation76_spill] sm:$0xff] }
 0x32a   : > { %v2056_v59 = vadd.f32 %v2055_v51, %v2053_v60  ;;  %v2638_v11 = vperm.slane %v9561_v0, 0  ;;  %v2000_v60 = vadd.f32 %v1999_v21, %v1952_v19  ;;  %v9562_v3 = vld [vmem:[#allocation39_spill] sm:$0xff]  ;;  %v2692_v4 = vmul.f32 %v9565_v32, %v9564_v54  ;;  %v9568_v46 = vld [vmem:[#allocation110_spill] sm:$0xff] }
 0x32b   : > { %v3672_v26 = vperm.slane %v7934_v30, 2  ;;  %v3669_v33 = vperm.slane %v7934_v30, 1  ;;  %v3678_v40 = vperm.slane %v7934_v30, 4  ;;  %v3675_v12 = vperm.slane %v7934_v30, 3  ;;  %v9581_v54 = vld [vmem:[#allocation162_spill] sm:$0xff] }
 0x32c   : > { %v3687_v34 = vperm.slane %v7934_v30, 7  ;;  %v3684_v31 = vperm.slane %v7934_v30, 6  ;;  %v3667_v53 = vperm.slane %v7934_v30, 0  ;;  %v2057_v55 = vadd.f32 %v2056_v59, %v2054_v6 }
 0x32d   : > { %v3673_v57 = vmul.f32 %v3672_v26, %v7390_v58  ;;  %v3670_v44 = vmul.f32 %v3669_v33, %v7435_v1  ;;  %v7950_v43 = vmul.f32 %v3678_v40, %v7486_v20  ;;  %v7953_v18 = vmul.f32 %v3675_v12, %v7521_v47  ;;  %v9571_v26 = vld [vmem:[#allocation152_spill] sm:$0xff] }
 0x32e   : > { %v7956_v52 = vmul.f32 %v3687_v34, %v7577_v28  ;;  %v7959_v29 = vmul.f32 %v3684_v31, %v7608_v42  ;;  %v3668_v39 = vmul.f32 %v3667_v53, %v7562_v48  ;;  %v2590_v20 = vadd.f32 %v2589_v38, %v2587_v56  ;;  %v9567_v38 = vld [vmem:[#allocation78_spill] sm:$0xff]  ;;  %v9574_v31 = vld [vmem:[#allocation108_spill] sm:$0xff] }
 0x32f   : > { %v7962_v21 = vld [vmem:[#allocation1 + $0x4] ss:$9 sm:$0xff]  ;;  %v7966_v1 = vld [vmem:[#allocation1 + $0x6] ss:$9 sm:$0xff]  ;;  %v2644_v51 = vmul.f32 %v2636_v25, %v7540_v15  ;;  %v2645_v47 = vmul.f32 %v2637_v7, %v7551_v63  ;;  %v2646_v28 = vmul.f32 %v2638_v11, %v7553_v50  ;;  %v2058_v49 = vadd.f32 %v2057_v55, %v2000_v60 }
 0x330   : > { %v7964_v58 = vld [vmem:[#allocation1 + $0x5] ss:$9 sm:$0xff]  ;;  %v7971_v27 = vld [vmem:[#allocation1 + $0x7] ss:$9 sm:$0xff]  ;;  %v3671_v42 = vadd.f32 %v3670_v44, %v3668_v39  ;;  %v9563_v48 = vperm.slane %v9275_v23, 0  ;;  %v2591_v56 = vadd.f32 %v2590_v20, %v2588_v16  ;;  %v2741_v11 = vperm.slane %v7580_v24, 0 }
 0x331   : > { %3405 = vst [vmem:[#allocation1] sm:$0xff] %v9462_v22  ;;  %v2647_v19 = vadd.f32 %v2644_v51, %v2643_v41  ;;  %v9566_v15 = vld [vmem:[#allocation107_spill] sm:$0xff]  ;;  %v9569_v50 = vld [vmem:[#allocation53_spill] sm:$0xff]  ;;  %v9570_v7 = vld [vmem:[#allocation148_spill] sm:$0xff]  ;;  %v2744_v53 = vperm.slane %v9574_v31, 0 }
 0x332   : > { %v2691_v6 = vmul.f32 %v9563_v48, %v9562_v3  ;;  %v2693_v63 = vmul.f32 %v9567_v38, %v9566_v15  ;;  %v2694_v25 = vmul.f32 %v9569_v50, %v9568_v46  ;;  %v7983_v59 = vadd.f32 %v3673_v57, %v3671_v42  ;;  %v9572_v22 = vld [vmem:[#allocation141_spill] sm:$0xff]  ;;  %v9573_v41 = vld [vmem:[#allocation142_spill] sm:$0xff]  ;;  %v9575_v57 = vld [vmem:[#allocation104_spill] sm:$0xff] }
 0x333   : > { %v7986_v0 = vmul.f32 %v9570_v7, %v2058_v49  ;;  %v2592_v33 = vadd.f32 %v2591_v56, %v9571_v26  ;;  %v2648_v40 = vadd.f32 %v2647_v19, %v2645_v47  ;;  %v2742_v16 = vperm.slane %v9572_v22, 0  ;;  %v9576_v20 = vld [vmem:[#allocation163_spill] sm:$0xff]  ;;  %v9577_v51 = vld [vmem:[#allocation106_spill] sm:$0xff]  ;;  %v9579_v3 = vld [vmem:[#allocation16_spill] sm:$0xff] }
 0x334   : > { %v2695_v23 = vadd.f32 %v2692_v4, %v2691_v6  ;;  %v2743_v12 = vperm.slane %v9573_v41, 0  ;;  %v2749_v60 = vmul.f32 %v2741_v11, %v7654_v9  ;;  %v3247_v44 = vmul.f32 %v7490_v45, %v9575_v57  ;;  %v9578_v42 = vld [vmem:[#allocation91_spill] sm:$0xff]  ;;  %v9580_v6 = vld [vmem:[#allocation37_spill] sm:$0xff]  ;;  %v9583_v56 = vld [vmem:[#allocation90_spill] sm:$0xff] }
 0x335   : > { %v2649_v39 = vadd.f32 %v2648_v40, %v2646_v28  ;;  %v2750_v55 = vmul.f32 %v2742_v16, %v7657_v17  ;;  %v3248_v47 = vmul.f32 %v9578_v42, %v9577_v51  ;;  %v2752_v48 = vmul.f32 %v2744_v53, %v9579_v3  ;;  %v9582_v4 = vld [vmem:[#allocation117_spill] sm:$0xff]  ;;  %v9584_v45 = vld [vmem:[#allocation115_spill] sm:$0xff]  ;;  %v9585_v38 = vld [vmem:[#allocation12_spill] sm:$0xff] }
 0x336   : > { %v2696_v34 = vadd.f32 %v2695_v23, %v2693_v63  ;;  %v2751_v24 = vmul.f32 %v2743_v12, %v9576_v20  ;;  %v3249_v32 = vmul.f32 %v9581_v54, %v9580_v6  ;;  %v3250_v9 = vmul.f32 %v9583_v56, %v9582_v4  ;;  %v9587_v23 = vld [vmem:[#allocation29_spill] sm:$0xff]  ;;  %v9588_v26 = vld [vmem:[#allocation15_spill] sm:$0xff]  ;;  %v9589_v40 = vld [vmem:[#allocation118_spill] sm:$0xff] }
 0x337   : > { %v2650_v19 = vadd.f32 %v2649_v39, %v2592_v33  ;;  %v2753_v15 = vadd.f32 %v2750_v55, %v2749_v60  ;;  %v3267_v28 = vadd.f32 %v9584_v45, %v3247_v44  ;;  %v3268_v17 = vadd.f32 %v9585_v38, %v3248_v47  ;;  %v9590_v16 = vld [vmem:[#allocation124_spill] sm:$0xff]  ;;  %v9593_v57 = vld [vmem:[#allocation75_spill] sm:$0xff]  ;;  %v9594_v39 = vld [vmem:[#allocation70_spill] sm:$0xff] }
 0x338   : > { %v2697_v49 = vadd.f32 %v2696_v34, %v2694_v25  ;;  %v8007_v63 = vld [vmem:[#allocation1 + $0x4] ss:$9 sm:$0xff]  ;;  %v8011_v50 = vld [vmem:[#allocation1 + $0x6] ss:$9 sm:$0xff]  ;;  %v3270_v11 = vadd.f32 %v9587_v23, %v3250_v9  ;;  %v3295_v22 = vmul.f32 %v9589_v40, %v9588_v26  ;;  %v9592_v53 = vperm.slane %v9554_v13, 0 }
 0x339   : > { %v8009_v46 = vld [vmem:[#allocation1 + $0x5] ss:$9 sm:$0xff]  ;;  %v8019_v12 = vld [vmem:[#allocation1 + $0x7] ss:$9 sm:$0xff]  ;;  %v2754_v31 = vadd.f32 %v2753_v15, %v2751_v24  ;;  %v3284_v44 = vmul.f32 %v9593_v57, %v3268_v17  ;;  %v3308_v24 = vperm.slane %v7912_v2, 0  ;;  %v3309_v13 = vperm.slane %v7914_v5, 0 }
 0x33a   : > { %v9586_v25 = vld [vmem:[#allocation28_spill] sm:$0xff]  ;;  %v2698_v34 = vadd.f32 %v2697_v49, %v2650_v19  ;;  %v3283_v60 = vmul.f32 %v9592_v53, %v3267_v28  ;;  %3430 = vst [vmem:[#allocation1] sm:$0xff] %v9594_v39  ;;  %v9595_v55 = vld [vmem:[#allocation86_spill] sm:$0xff]  ;;  %v9597_v47 = vld [vmem:[#allocation81_spill] sm:$0xff]  ;;  %v3310_v9 = vperm.slane %v7916_v14, 0  ;;  %v3311_v19 = vperm.slane %v7922_v37, 0 }
 0x33b   : > { %v3269_v7 = vadd.f32 %v9586_v25, %v3249_v32  ;;  %v9591_v33 = vld [vmem:[#allocation120_spill] sm:$0xff]  ;;  %v9596_v51 = vld [vmem:[#allocation134_spill] sm:$0xff]  ;;  %v9599_v54 = vld [vmem:[#allocation125_spill] sm:$0xff]  ;;  %v2755_v56 = vadd.f32 %v2754_v31, %v2752_v48  ;;  %v3333_v15 = vperm.slane %v7962_v21, 0  ;;  %v3334_v45 = vperm.slane %v7964_v58, 0 }
 0x33c   : > { %v3296_v41 = vmul.f32 %v9591_v33, %v9590_v16  ;;  %v3286_v42 = vmul.f32 %v9596_v51, %v3270_v11  ;;  %v9598_v3 = vld [vmem:[#allocation14_spill] sm:$0xff]  ;;  %v9600_v32 = vld [vmem:[#allocation27_spill] sm:$0xff]  ;;  %v3287_v49 = vadd.f32 %v3284_v44, %v3283_v60  ;;  %v3335_v5 = vperm.slane %v7966_v1, 0  ;;  %v9604_v33 = vld [vmem:[#allocation168_spill] sm:$0xff] }
 0x33d   : > { %v3285_v20 = vmul.f32 %v9595_v55, %v3269_v7  ;;  %v3297_v6 = vmul.f32 %v9598_v3, %v9597_v47  ;;  %v3298_v4 = vmul.f32 %v9600_v32, %v9599_v54  ;;  %v2756_v28 = vadd.f32 %v2755_v56, %v2698_v34  ;;  %v9601_v17 = vld [vmem:[#allocation46_spill] sm:$0xff]  ;;  %v9603_v16 = vld [vmem:[#allocation99_spill] sm:$0xff]  ;;  %v9605_v31 = vld [vmem:[#allocation45_spill] sm:$0xff] }
 0x33e   : > { %v3316_v25 = vmul.f32 %v3308_v24, %v9601_v17  ;;  %v3317_v7 = vmul.f32 %v3309_v13, %v9601_v17  ;;  %v3318_v48 = vmul.f32 %v3310_v9, %v9601_v17  ;;  %v3319_v2 = vmul.f32 %v3311_v19, %v9601_v17  ;;  %v9602_v23 = vld [vmem:[#allocation150_spill] sm:$0xff]  ;;  %v9606_v53 = vld [vmem:[#allocation169_spill] sm:$0xff]  ;;  %v9607_v57 = vld [vmem:[#allocation147_spill] sm:$0xff] }
 0x33f   : > { %v3288_v38 = vadd.f32 %v3287_v49, %v3285_v20  ;;  %v3336_v14 = vperm.slane %v7971_v27, 0  ;;  %v8044_v37 = vmul.f32 %v9602_v23, %v2756_v28  ;;  %v3353_v34 = vmul.f32 %v9604_v33, %v9603_v16  ;;  %v9608_v20 = vld [vmem:[#allocation10_spill] sm:$0xff]  ;;  %v9609_v27 = vld [vmem:[#allocation40_spill] sm:$0xff]  ;;  %v9614_v49 = vld [vmem:[#allocation73_spill] sm:$0xff] }
 0x340   : > { %v3320_v11 = vadd.f32 %v3316_v25, %v3295_v22  ;;  %v3321_v58 = vadd.f32 %v3317_v7, %v3296_v41  ;;  %v3322_v26 = vadd.f32 %v3318_v48, %v3297_v6  ;;  %v3323_v40 = vadd.f32 %v3319_v2, %v3298_v4  ;;  %v9611_v22 = vld [vmem:[#allocation149_spill] sm:$0xff]  ;;  %v9612_v6 = vld [vmem:[#allocation167_spill] sm:$0xff]  ;;  %v9615_v13 = vld [vmem:[#allocation42_spill] sm:$0xff] }
 0x341   : > { %v3289_v21 = vadd.f32 %v3288_v38, %v3286_v42  ;;  %v3354_v60 = vmul.f32 %v9606_v53, %v9605_v31  ;;  %v3355_v51 = vmul.f32 %v9609_v27, %v9608_v20  ;;  %v9610_v42 = vld [vmem:[#allocation96_spill] sm:$0xff]  ;;  %v3373_v54 = vadd.f32 %v9612_v6, %v3353_v34  ;;  %v9613_v4 = vld [vmem:[#allocation13_spill] sm:$0xff]  ;;  %v9616_v19 = vld [vmem:[#allocation74_spill] sm:$0xff] }
 0x342   : > { %v3341_v55 = vmul.f32 %v3333_v15, %v3320_v11  ;;  %v3342_v1 = vmul.f32 %v3334_v45, %v3321_v58  ;;  %v3343_v47 = vmul.f32 %v3335_v5, %v3322_v26  ;;  %v3344_v3 = vmul.f32 %v3336_v14, %v3323_v40  ;;  %v9618_v38 = vld [vmem:[#allocation48_spill] sm:$0xff]  ;;  %v9619_v7 = vld [vmem:[#allocation41_spill] sm:$0xff]  ;;  %v9620_v14 = vld [vmem:[#allocation94_spill] sm:$0xff] }
 0x343   : > { %v3290_v44 = vadd.f32 %v3289_v21, %v9607_v57  ;;  %v3356_v41 = vmul.f32 %v9611_v22, %v9610_v42  ;;  %v3374_v56 = vadd.f32 %v9613_v4, %v3354_v60  ;;  %v3375_v24 = vadd.f32 %v9614_v49, %v3355_v51  ;;  %v3432_v2 = vld [vmem:[#allocation1 + $0x4] ss:$9 sm:$0xff]  ;;  %v3436_v34 = vld [vmem:[#allocation1 + $0x6] ss:$9 sm:$0xff] }
 0x344   : > { %v3345_v32 = vadd.f32 %v3342_v1, %v3341_v55  ;;  %v3401_v9 = vmul.f32 %v9615_v13, %v7849_v8  ;;  %v9617_v45 = vperm.slane %v9594_v39, 0  ;;  %v3402_v25 = vmul.f32 %v9618_v38, %v7852_v61  ;;  %v9621_v21 = vld [vmem:[#allocation151_spill] sm:$0xff]  ;;  %v9622_v58 = vld [vmem:[#allocation156_spill] sm:$0xff]  ;;  %v9623_v40 = vld [vmem:[#allocation126_spill] sm:$0xff] }
 0x345   : > { %v3376_v15 = vadd.f32 %v9616_v19, %v3356_v41  ;;  %v3403_v48 = vmul.f32 %v9619_v7, %v7855_v35  ;;  %v3390_v23 = vmul.f32 %v9620_v14, %v3374_v56  ;;  %v3391_v11 = vmul.f32 %v9621_v21, %v3375_v24  ;;  %v3434_v26 = vld [vmem:[#allocation1 + $0x5] ss:$9 sm:$0xff]  ;;  %v3438_v60 = vld [vmem:[#allocation1 + $0x7] ss:$9 sm:$0xff] }
 0x346   : > { %v3389_v28 = vmul.f32 %v9617_v45, %v3373_v54  ;;  %v3346_v5 = vadd.f32 %v3345_v32, %v3343_v47  ;;  %v3404_v8 = vmul.f32 %v9622_v58, %v7858_v10  ;;  %v3414_v39 = vperm.slane %v8007_v63, 0  ;;  %v9625_v7 = vld [vmem:[#allocation143_spill] sm:$0xff] }
 0x347   : > { %v3392_v16 = vmul.f32 %v9623_v40, %v3376_v15  ;;  %v3415_v33 = vperm.slane %v8009_v46, 0  ;;  %v3416_v61 = vperm.slane %v8011_v50, 0  ;;  %v3417_v53 = vperm.slane %v8019_v12, 0  ;;  %v8080_v50 = vpop.permute.xlu2 %3525  ;;  %v3519_v15 = vpop.permute.xlu1 %3518  ;;  %v9627_v14 = vld [vmem:[#allocation11_spill] sm:$0xff]  ;;  %v9629_v40 = vld [vmem:[#allocation82_spill] sm:$0xff] }
 0x348   : > { %v3347_v35 = vadd.f32 %v3346_v5, %v3344_v3  ;;  %v3393_v31 = vadd.f32 %v3390_v23, %v3389_v28  ;;  %v3439_v57 = vperm.slane %v3432_v2, 0  ;;  %v3422_v55 = vmul.f32 %v3414_v39, %v9601_v17  ;;  %v9626_v2 = vld [vmem:[#allocation17_spill] sm:$0xff]  ;;  %v9628_v23 = vld [vmem:[#allocation127_spill] sm:$0xff] }
 0x349   : > { %v3423_v10 = vmul.f32 %v3415_v33, %v9601_v17  ;;  %v3424_v1 = vmul.f32 %v3416_v61, %v9601_v17  ;;  %v3440_v20 = vperm.slane %v3434_v26, 0  ;;  %v3425_v46 = vmul.f32 %v3417_v53, %v9601_v17  ;;  %v3498_v26 = vpop.permute.xlu0 %3497  ;;  %v9630_v33 = vld [vmem:[#allocation47_spill] sm:$0xff] }
 0x34a   : > { %v3348_v27 = vadd.f32 %v3347_v35, %v3290_v44  ;;  %v3394_v63 = vadd.f32 %v3393_v31, %v3391_v11  ;;  %v3441_v51 = vperm.slane %v3436_v34, 0  ;;  %v3426_v47 = vadd.f32 %v3422_v55, %v3401_v9  ;;  %v9631_v35 = vld [vmem:[#allocation114_spill] sm:$0xff] }
 0x34b   : > { %v3427_v3 = vadd.f32 %v3423_v10, %v3402_v25  ;;  %v3428_v42 = vadd.f32 %v3424_v1, %v3403_v48  ;;  %v3442_v12 = vperm.slane %v3438_v60, 0  ;;  %v3429_v41 = vadd.f32 %v3425_v46, %v3404_v8  ;;  %v9624_v25 = vld [vmem:[#allocation34_spill] sm:$0xff] }
 0x34c   : > { %v3395_v22 = vadd.f32 %v3394_v63, %v3392_v16  ;;  %v3528_v6 = vperm.slane %v7903_v62, 1  ;;  %v3599_v54 = vperm.slane %v7986_v0, 1  ;;  %v3447_v32 = vmul.f32 %v3439_v57, %v3426_v47  ;;  %v9632_v57 = vld [vmem:[#allocation22_spill] sm:$0xff] }
 0x34d   : > { %v3448_v4 = vmul.f32 %v3440_v20, %v3427_v3  ;;  %v3449_v56 = vmul.f32 %v3441_v51, %v3428_v42  ;;  %v3646_v44 = vperm.slane %v8044_v37, 1  ;;  %v3450_v17 = vmul.f32 %v3442_v12, %v3429_v41  ;;  %v9633_v10 = vld [vmem:[#allocation58_spill] sm:$0xff]  ;;  %v9634_v3 = vld [vmem:[#allocation145_spill] sm:$0xff]  ;;  %v9635_v41 = vld [vmem:[#allocation119_spill] sm:$0xff] }
 0x34e   : > { %v3396_v49 = vadd.f32 %v3395_v22, %v3348_v27  ;;  %v8086_v24 = vmul.f32 %v3528_v6, %v8080_v50  ;;  %v8089_v13 = vmul.f32 %v3599_v54, %v8080_v50  ;;  %v3521_v45 = vperm.slane %v7903_v62, 0 }
 0x34f   : > { %v3451_v9 = vadd.f32 %v3448_v4, %v3447_v32  ;;  %v8092_v19 = vmul.f32 %v3646_v44, %v8080_v50  ;;  %v3596_v28 = vperm.slane %v7986_v0, 0  ;;  %v3643_v38 = vperm.slane %v8044_v37, 0  ;;  %v3547_v22 = vpop.permute.xlu2 %3546  ;;  %v9636_v4 = vld [vmem:[#allocation153_spill] sm:$0xff] }
 0x350   : > { %v3488_v48 = vadd.f32 %v9625_v7, %v9624_v25  ;;  %v3500_v5 = vperm.slane %v9626_v2, 5  ;;  %v3583_v21 = vadd.f32 %v9628_v23, %v9627_v14  ;;  %v3522_v58 = vmul.f32 %v3521_v45, %v3519_v15  ;;  %v9639_v25 = vld [vmem:[#allocation128_spill] sm:$0xff] }
 0x351   : > { %v3452_v11 = vadd.f32 %v3451_v9, %v3449_v56  ;;  %v3597_v8 = vmul.f32 %v3596_v28, %v3519_v15  ;;  %v3587_v16 = vperm.slane %v9629_v40, 5  ;;  %v3644_v39 = vmul.f32 %v3643_v38, %v3519_v15 }
 0x352   : > { %v3495_v61 = vadd.f32 %v9630_v33, %v3488_v48  ;;  %v3501_v34 = vmul.f32 %v3500_v5, %v3498_v26  ;;  %v3586_v31 = vadd.f32 %v9631_v35, %v3583_v21  ;;  %v3630_v55 = vadd.f32 %v9632_v57, %v7836_v36  ;;  %v9640_v48 = vld [vmem:[#allocation157_spill] sm:$0xff]  ;;  %v3540_v5 = vpop.permute.xlu1 %3539 }
 0x353   : > { %v3453_v53 = vadd.f32 %v3452_v11, %v3450_v17  ;;  %v3588_v60 = vmul.f32 %v3587_v16, %v3498_v26  ;;  %v3634_v1 = vperm.slane %v9633_v10, 5  ;;  %v3677_v27 = vadd.f32 %v7953_v18, %v7983_v59  ;;  %v9637_v18 = vld [vmem:[#allocation129_spill] sm:$0xff]  ;;  %v9641_v16 = vld [vmem:[#allocation43_spill] sm:$0xff] }
 0x354   : > { %v3502_v20 = vadd.f32 %v3501_v34, %v3495_v61  ;;  %v3681_v63 = vperm.slane %v7934_v30, 5  ;;  %v3549_v46 = vperm.slane %v7903_v62, 4  ;;  %v3633_v42 = vadd.f32 %v9634_v3, %v3630_v55 }
 0x355   : > { %v3454_v51 = vadd.f32 %v3453_v53, %v3396_v49  ;;  %v3589_v47 = vadd.f32 %v3588_v60, %v3586_v31  ;;  %v3635_v12 = vmul.f32 %v3634_v1, %v3498_v26  ;;  %v3680_v36 = vadd.f32 %v7950_v43, %v3677_v27  ;;  %v9638_v49 = vld [vmem:[#allocation89_spill] sm:$0xff] }
 0x356   : > { %v3509_v6 = vadd.f32 %v9635_v41, %v3502_v20  ;;  %v3682_v54 = vmul.f32 %v3681_v63, %v3498_v26  ;;  %v8115_v32 = vmul.f32 %v3549_v46, %v3547_v22  ;;  %v3608_v44 = vperm.slane %v7986_v0, 4 }
 0x357   : > { %v8118_v56 = vmul.f32 %v9636_v4, %v3454_v51  ;;  %v3592_v30 = vadd.f32 %v9637_v18, %v3589_v47  ;;  %v3636_v59 = vadd.f32 %v3635_v12, %v3633_v42  ;;  %v3655_v45 = vperm.slane %v8044_v37, 4  ;;  %v3561_v42 = vpop.permute.xlu2 %3560 }
 0x358   : > { %v3516_v17 = vadd.f32 %v9638_v49, %v3509_v6  ;;  %v3683_v9 = vadd.f32 %v3682_v54, %v3680_v36  ;;  %v3542_v28 = vperm.slane %v7903_v62, 3  ;;  %v3609_v23 = vmul.f32 %v3608_v44, %v3547_v22 }
 0x359   : > { %v3693_v43 = vperm.slane %v8118_v56, 1  ;;  %v3690_v38 = vperm.slane %v8118_v56, 0  ;;  %v3595_v7 = vadd.f32 %v9639_v25, %v3592_v30  ;;  %v3639_v2 = vadd.f32 %v9640_v48, %v3636_v59 }
 0x35a   : > { %v3686_v14 = vadd.f32 %v7959_v29, %v3683_v9  ;;  %v3656_v21 = vmul.f32 %v3655_v45, %v3547_v22  ;;  %v3702_v11 = vperm.slane %v8118_v56, 4  ;;  %v3543_v61 = vmul.f32 %v3542_v28, %v3540_v5  ;;  %v3533_v29 = vpop.permute.xlu0 %3532  ;;  %v3554_v18 = vpop.permute.xlu1 %3553 }
 0x35b   : > { %v3694_v26 = vmul.f32 %v3693_v43, %v8080_v50  ;;  %v3691_v40 = vmul.f32 %v3690_v38, %v3519_v15  ;;  %v3642_v33 = vadd.f32 %v9641_v16, %v3639_v2  ;;  %v3605_v31 = vperm.slane %v7986_v0, 3 }
 0x35c   : > { %v3689_v34 = vadd.f32 %v7956_v52, %v3686_v14  ;;  %v3703_v35 = vmul.f32 %v3702_v11, %v3547_v22  ;;  %v3652_v53 = vperm.slane %v8044_v37, 3  ;;  %v3699_v60 = vperm.slane %v8118_v56, 3 }
 0x35d   : > { %v3523_v57 = vadd.f32 %v3522_v58, %v3516_v17  ;;  %v3535_v55 = vperm.slane %v7903_v62, 2  ;;  %v3598_v10 = vadd.f32 %v3597_v8, %v3595_v7  ;;  %v3606_v50 = vmul.f32 %v3605_v31, %v3540_v5 }
 0x35e   : > { %v3653_v15 = vmul.f32 %v3652_v53, %v3540_v5  ;;  %v3602_v1 = vperm.slane %v7986_v0, 2  ;;  %v3645_v20 = vadd.f32 %v3644_v39, %v3642_v33  ;;  %v3700_v27 = vmul.f32 %v3699_v60, %v3540_v5 }
 0x35f   : > { %v3530_v52 = vadd.f32 %v8086_v24, %v3523_v57  ;;  %v3536_v63 = vmul.f32 %v3535_v55, %v3533_v29  ;;  %v3601_v46 = vadd.f32 %v8089_v13, %v3598_v10  ;;  %v3649_v58 = vperm.slane %v8044_v37, 2 }
 0x360   : > { %v3603_v51 = vmul.f32 %v3602_v1, %v3533_v29  ;;  %v3648_v47 = vadd.f32 %v8092_v19, %v3645_v20  ;;  %v3692_v3 = vadd.f32 %v3691_v40, %v3689_v34  ;;  %v3696_v12 = vperm.slane %v8118_v56, 2 }
 0x361   : > { %v3537_v8 = vadd.f32 %v3536_v63, %v3530_v52  ;;  %v3563_v39 = vperm.slane %v7903_v62, 6  ;;  %v3614_v22 = vperm.slane %v7986_v0, 6  ;;  %v3650_v41 = vmul.f32 %v3649_v58, %v3533_v29 }
 0x362   : > { %v3604_v24 = vadd.f32 %v3603_v51, %v3601_v46  ;;  %v3695_v6 = vadd.f32 %v3694_v26, %v3692_v3  ;;  %v3661_v13 = vperm.slane %v8044_v37, 6  ;;  %v3697_v36 = vmul.f32 %v3696_v12, %v3533_v29  ;;  %v3568_v11 = vpop.permute.xlu0 %3567 }
 0x363   : > { %v3564_v19 = vmul.f32 %v3563_v39, %v3561_v42  ;;  %v3615_v54 = vmul.f32 %v3614_v22, %v3561_v42  ;;  %v3708_v4 = vperm.slane %v8118_v56, 6  ;;  %v3651_v30 = vadd.f32 %v3650_v41, %v3648_v47 }
 0x364   : > { %v3662_v59 = vmul.f32 %v3661_v13, %v3561_v42  ;;  %v3544_v44 = vadd.f32 %v3543_v61, %v3537_v8  ;;  %v3556_v49 = vperm.slane %v7903_v62, 5  ;;  %v3698_v17 = vadd.f32 %v3697_v36, %v3695_v6 }
 0x365   : > { %v3709_v9 = vmul.f32 %v3708_v4, %v3561_v42  ;;  %v3607_v45 = vadd.f32 %v3606_v50, %v3604_v24  ;;  %v3611_v28 = vperm.slane %v7986_v0, 5  ;;  %v3654_v25 = vadd.f32 %v3653_v15, %v3651_v30 }
 0x366   : > { %v3551_v43 = vadd.f32 %v8115_v32, %v3544_v44  ;;  %v3557_v38 = vmul.f32 %v3556_v49, %v3554_v18  ;;  %v3658_v7 = vperm.slane %v8044_v37, 5  ;;  %v3701_v5 = vadd.f32 %v3700_v27, %v3698_v17 }
 0x367   : > { %v3610_v48 = vadd.f32 %v3609_v23, %v3607_v45  ;;  %v3612_v2 = vmul.f32 %v3611_v28, %v3554_v18  ;;  %v3705_v14 = vperm.slane %v8118_v56, 5  ;;  %v3657_v40 = vadd.f32 %v3656_v21, %v3654_v25 }
 0x368   : > { %v3558_v26 = vadd.f32 %v3557_v38, %v3551_v43  ;;  %v3659_v16 = vmul.f32 %v3658_v7, %v3554_v18  ;;  %v3570_v33 = vperm.slane %v7903_v62, 7  ;;  %v3704_v34 = vadd.f32 %v3703_v35, %v3701_v5 }
 0x369   : > { %v3613_v61 = vadd.f32 %v3612_v2, %v3610_v48  ;;  %v3706_v32 = vmul.f32 %v3705_v14, %v3554_v18  ;;  %v3617_v31 = vperm.slane %v7986_v0, 7  ;;  %v3664_v29 = vperm.slane %v8044_v37, 7 }
 0x36a   : > { %v3660_v23 = vadd.f32 %v3659_v16, %v3657_v40  ;;  %v3565_v53 = vadd.f32 %v3564_v19, %v3558_v26  ;;  %v3571_v60 = vmul.f32 %v3570_v33, %v3568_v11  ;;  %v3711_v62 = vperm.slane %v8118_v56, 7 }
 0x36b   : > { %v3707_v21 = vadd.f32 %v3706_v32, %v3704_v34  ;;  %v3616_v57 = vadd.f32 %v3615_v54, %v3613_v61  ;;  %v3618_v55 = vmul.f32 %v3617_v31, %v3568_v11  ;;  %v3665_v0 = vmul.f32 %v3664_v29, %v3568_v11 }
 0x36c   : > { %v3572_v35 = vadd.f32 %v3571_v60, %v3565_v53  ;;  %v3663_v10 = vadd.f32 %v3662_v59, %v3660_v23  ;;  %v3712_v1 = vmul.f32 %v3711_v62, %v3568_v11 }
 0x36d   : > { %v3619_v50 = vadd.f32 %v3618_v55, %v3616_v57  ;;  %v3710_v15 = vadd.f32 %v3709_v9, %v3707_v21 }
 0x36e   : > { %v3666_v20 = vadd.f32 %v3665_v0, %v3663_v10  ;;  %3714 = vst [vmem:[%s422_s30] sm:$0xff] %v3572_v35 }
 0x36f   : > { %v3713_v37 = vadd.f32 %v3712_v1, %v3710_v15  ;;  %3715 = vst [vmem:[%s422_s30 + $0x8] sm:$0xff] %v3619_v50 }
 0x370   : > { %3716 = vst [vmem:[%s422_s30 + $0x10] sm:$0xff] %v3666_v20 }
 0x371   : > { %3717 = vst [vmem:[%s422_s30 + $0x18] sm:$0xff] %v3713_v37 }
 0x372   : > { %4097 = shalt.err (!%p4094_p7)
}
 0x373   : > { %s4182_s12 = smov 128   ;;  %s4183_s27 = smov 256  }
 0x374   : > { %s4184_s30 = smov 8  }
 0x375   : > { %3833 = dma.vmem_to_hbm [thread:$0]  (%p4300_p8), %s3733_s20, 512, %s3735_s21, %s3719_s24, %s4182_s12, %s4183_s27, %s4184_s30  }
 0x376 PF: > { %p3839_p10 = scmp.ge.s32.totalorder %s4164_s19, 2  ;;  %s3749_s22 = sand.u32 1, %s4136_s13  }
 0x377   : > { %s3750_s28 = scalar_lea.sflag [#allocation4], %s3749_s22 }
 0x378   : > { %p3836_p11 = pnand %p3839_p10, %p4304_p9 }
 0x37a   : > { %p3837_p12 = pneg %p3836_p11 }
 0x37c   : > { %4131 = dma.done.wait (%p3837_p12), %s3750_s28, 512  }
 0x37d   : > { %4133 = vsyncadd (%p3837_p12), %s3750_s28, 4294966784  ;;  %s23_s19 = sadd.s32 1, %s4164_s19   ;;  %s9643_s26 = sld [smem:[#allocation6_spill]] }
 0x37e   : > { %p20_p13 = scmp.ge.s32.totalorder %s23_s19, 6   ;;  %s9644_s20 = sld [smem:[#allocation7_spill]] }
 0x37f   : > { %s9645_s13 = smov %s4140_s14  ;;  %s9646_s14 = smov %s4144_s15 }
 0x380   : > { %s9647_s15 = smov %s4312_s11  ;;  %s9648_s16 = smov %s4156_s17 }
 0x381   : > { %s9649_s7 = smov %s4160_s18  ;;  %22 = sbr.rel (!%p20_p13) target bundleno = 7 (0x7), region = 266 }
 0x383   : > { %s9650_s17 = smov %s9643_s26 }
 0x384   : > { %s9651_s18 = smov %s9644_s20 }
 0x386   :  { %3756 = vsyncpa [#allocation4], 1 }
 0x387   :  { %3758 = vsyncpa [#allocation4 + $0x1], 1 }

</bundles_post_ra>
